<compile_context>
chip_gen: v6e
topology: v6e:2x2x1
jax: 0.10.0
libtpu: 0.0.40
codegen_flags: <defaults>
</compile_context>

<pallas_src>
import jax
import jax.numpy as jnp
from jax import lax
from jax.experimental import pallas as pl
from jax.experimental.pallas import tpu as pltpu

KH = KW = 7
PAD = 3


def _add_dwconv_kernel(x1_ref, x2_ref, w_ref, b_ref, o_ref, pad_ref, xs_ref):
    # x1_ref, x2_ref: (1, H, W, CB)    unpadded NHWC residual inputs
    # w_ref:          (KH*KW, 1, CB)   depthwise filter taps
    # b_ref:          (1, CB)          bias
    # o_ref:          (1, H, W, CB)    output block
    # pad_ref:        (Hp, Wp, CB)     f32 scratch: zero-padded residual sum
    # xs_ref:         (KW, Hp, W, CB)  f32 scratch: 7 W-shifted copies of pad
    _, H, W, CB = o_ref.shape

    # Phase 1: fused residual add + zero padding (single f32 cast here).
    pad_ref[...] = jnp.zeros(pad_ref.shape, pad_ref.dtype)
    pad_ref[PAD:PAD + H, PAD:PAD + W, :] = (
        x1_ref[0] + x2_ref[0]).astype(jnp.float32)

    # Phase 2: hoist the sublane (W-axis) shifts out of the tap loop:
    # 7 shifted copies instead of 49*H unaligned slices.
    for kw in range(KW):
        xs_ref[kw] = pad_ref[:, kw:kw + W, :]

    bias = b_ref[...].astype(jnp.float32)               # (1, CB)

    # Phase 3: per-output-row accumulation; acc = (W, CB) stays in vregs.
    def row_body(h, carry):
        acc = jnp.broadcast_to(bias, (W, CB))
        for kh in range(KH):
            for kw in range(KW):
                tap = xs_ref[kw, h + kh]                         # (W, CB) aligned
                wv = w_ref[kh * KW + kw].astype(jnp.float32)     # (1, CB)
                acc = acc + tap * wv
        o_ref[0, h] = acc.astype(o_ref.dtype)
        return carry

    lax.fori_loop(0, H, row_body, 0)


def add_depthwise_conv(x248, x238, weight, bias):
    """x248, x238: NCHW; weight: (C, 1, KH, KW) (groups=C); bias: (C,)."""
    N, C, H, W = x248.shape
    assert weight.shape == (C, 1, KH, KW)
    Hp, Wp = H + 2 * PAD, W + 2 * PAD

    # Channel block: 2 blocks of 256 for C=512 (small grid step count; shards
    # across the 2 TensorCores on v7x, minimal overhead on v5e/v6e).
    if C % 256 == 0:
        cb = 256
    elif C % 128 == 0:
        cb = 128
    else:
        cb = C

    # TODO(synk): the NCHW<->NHWC transposes are only needed because the
    # PyTorch module interface is NCHW; drop them if the surrounding graph
    # can stay NHWC (the kernel itself never writes NCHW).
    x1 = jnp.transpose(x248, (0, 2, 3, 1))               # NHWC
    x2 = jnp.transpose(x238, (0, 2, 3, 1))
    w = jnp.transpose(weight[:, 0, :, :], (1, 2, 0)).reshape(KH * KW, 1, C)
    b = bias.reshape(1, C)

    out_nhwc = pl.pallas_call(
        _add_dwconv_kernel,
        out_shape=jax.ShapeDtypeStruct((N, H, W, C), x248.dtype),
        grid=(N, C // cb),
        in_specs=[
            pl.BlockSpec((1, H, W, cb), lambda n, c: (n, 0, 0, c)),
            pl.BlockSpec((1, H, W, cb), lambda n, c: (n, 0, 0, c)),
            pl.BlockSpec((KH * KW, 1, cb), lambda n, c: (0, 0, c)),
            pl.BlockSpec((1, cb), lambda n, c: (0, c)),
        ],
        out_specs=pl.BlockSpec((1, H, W, cb), lambda n, c: (n, 0, 0, c)),
        scratch_shapes=[
            pltpu.VMEM((Hp, Wp, cb), jnp.float32),
            pltpu.VMEM((KW, Hp, W, cb), jnp.float32),
        ],
        compiler_params=pltpu.CompilerParams(
            dimension_semantics=("parallel", "parallel"),
            vmem_limit_bytes=16 << 20),
    )(x1, x2, w, b)

    return jnp.transpose(out_nhwc, (0, 3, 1, 2))         # back to NCHW


if __name__ == "__main__":
    key = jax.random.PRNGKey(0)
    k1, k2, k3, k4 = jax.random.split(key, 4)

    N, C, H, W = 1, 512, 14, 14
    x248 = jax.random.normal(k1, (N, C, H, W), jnp.float32)
    x238 = jax.random.normal(k2, (N, C, H, W), jnp.float32)

    # Deterministic parameter init (matches PyTorch Conv2d shapes;
    # uniform(-1/sqrt(fan_in), 1/sqrt(fan_in)), fan_in = 1*7*7 for depthwise).
    fan_in = KH * KW
    bound = 1.0 / (fan_in ** 0.5)
    weight = jax.random.uniform(k3, (C, 1, KH, KW), jnp.float32, -bound, bound)
    bias = jax.random.uniform(k4, (C,), jnp.float32, -bound, bound)

    out = add_depthwise_conv(x248, x238, weight, bias)
    out = jax.block_until_ready(out)

    # Correctness check against XLA's grouped conv.
    ref = jax.lax.conv_general_dilated(
        x248 + x238, weight, window_strides=(1, 1),
        padding=((PAD, PAD), (PAD, PAD)),
        dimension_numbers=("NCHW", "OIHW", "NCHW"),
        feature_group_count=C,
    ) + bias.reshape(1, C, 1, 1)
    assert out.shape == (N, C, H, W)
    assert jnp.allclose(out, ref, atol=1e-4, rtol=1e-4)

    print("KERNEL_OK")
</pallas_src>

<mosaic_0001>
module attributes {stable_mosaic.version = 11 : i64} {
  func.func @_add_dwconv_kernel(%arg0: i32, %arg1: i32, %arg2: memref<1x14x14x256xf32, #tpu.memory_space<vmem>>, %arg3: memref<1x14x14x256xf32, #tpu.memory_space<vmem>>, %arg4: memref<49x1x256xf32, #tpu.memory_space<vmem>>, %arg5: memref<1x256xf32, #tpu.memory_space<vmem>>, %arg6: memref<1x14x14x256xf32, #tpu.memory_space<vmem>>, %arg7: memref<20x20x256xf32, #tpu.memory_space<vmem>>, %arg8: memref<7x20x14x256xf32, #tpu.memory_space<vmem>>) attributes {dimension_semantics = [#tpu.dimension_semantics<parallel>, #tpu.dimension_semantics<parallel>], iteration_bounds = array<i64: 1, 2>, scalar_prefetch = 0 : i64, scratch_operands = 2 : i64, tpu.core_type = #tpu.core_type<tc>, window_params = [{transform_indices = @transform_0, window_bounds = array<i64: 1, 14, 14, 256>}, {transform_indices = @transform_1, window_bounds = array<i64: 1, 14, 14, 256>}, {transform_indices = @transform_2, window_bounds = array<i64: 49, 1, 256>}, {transform_indices = @transform_3, window_bounds = array<i64: 1, 256>}, {transform_indices = @transform_4, window_bounds = array<i64: 1, 14, 14, 256>}]} {
    %cst = arith.constant 0.000000e+00 : f32
    %0 = vector.broadcast %cst : f32 to vector<20x20x256xf32>
    %c0 = arith.constant 0 : index
    %c0_0 = arith.constant 0 : index
    %c0_1 = arith.constant 0 : index
    %1 = vector.load %arg7[%c0, %c0_0, %c0_1] : memref<20x20x256xf32, #tpu.memory_space<vmem>>, vector<20x20x256xf32>
    tpu.vector_store %arg7[%c0, %c0_0, %c0_1], %0 {strides = array<i32>} : memref<20x20x256xf32, #tpu.memory_space<vmem>>, vector<20x20x256xf32>,
    %c0_2 = arith.constant 0 : index
    %c0_3 = arith.constant 0 : index
    %c0_4 = arith.constant 0 : index
    %c0_5 = arith.constant 0 : index
    %2 = vector.load %arg2[%c0_2, %c0_3, %c0_4, %c0_5] : memref<1x14x14x256xf32, #tpu.memory_space<vmem>>, vector<1x14x14x256xf32>
    %3 = vector.shape_cast %2 : vector<1x14x14x256xf32> to vector<14x14x256xf32>
    %c0_6 = arith.constant 0 : index
    %c0_7 = arith.constant 0 : index
    %c0_8 = arith.constant 0 : index
    %c0_9 = arith.constant 0 : index
    %4 = vector.load %arg3[%c0_6, %c0_7, %c0_8, %c0_9] : memref<1x14x14x256xf32, #tpu.memory_space<vmem>>, vector<1x14x14x256xf32>
    %5 = vector.shape_cast %4 : vector<1x14x14x256xf32> to vector<14x14x256xf32>
    %6 = arith.addf %3, %5 : vector<14x14x256xf32>
    %c3 = arith.constant 3 : index
    %c3_10 = arith.constant 3 : index
    %c0_11 = arith.constant 0 : index
    %7 = vector.load %arg7[%c3, %c3_10, %c0_11] : memref<20x20x256xf32, #tpu.memory_space<vmem>>, vector<14x14x256xf32>
    tpu.vector_store %arg7[%c3, %c3_10, %c0_11], %6 {strides = array<i32>} : memref<20x20x256xf32, #tpu.memory_space<vmem>>, vector<14x14x256xf32>,
    %c0_12 = arith.constant 0 : index
    %c0_13 = arith.constant 0 : index
    %c0_14 = arith.constant 0 : index
    %8 = vector.load %arg7[%c0_12, %c0_13, %c0_14] : memref<20x20x256xf32, #tpu.memory_space<vmem>>, vector<20x14x256xf32>
    %c0_15 = arith.constant 0 : index
    %c0_16 = arith.constant 0 : index
    %c0_17 = arith.constant 0 : index
    %c0_18 = arith.constant 0 : index
    %9 = vector.load %arg8[%c0_15, %c0_16, %c0_17, %c0_18] : memref<7x20x14x256xf32, #tpu.memory_space<vmem>>, vector<1x20x14x256xf32>
    %10 = vector.shape_cast %9 : vector<1x20x14x256xf32> to vector<20x14x256xf32>
    %11 = vector.shape_cast %8 : vector<20x14x256xf32> to vector<1x20x14x256xf32>
    tpu.vector_store %arg8[%c0_15, %c0_16, %c0_17, %c0_18], %11 {strides = array<i32>} : memref<7x20x14x256xf32, #tpu.memory_space<vmem>>, vector<1x20x14x256xf32>,
    %c0_19 = arith.constant 0 : index
    %c1 = arith.constant 1 : index
    %c0_20 = arith.constant 0 : index
    %12 = vector.load %arg7[%c0_19, %c1, %c0_20] : memref<20x20x256xf32, #tpu.memory_space<vmem>>, vector<20x14x256xf32>
    %c1_21 = arith.constant 1 : index
    %c0_22 = arith.constant 0 : index
    %c0_23 = arith.constant 0 : index
    %c0_24 = arith.constant 0 : index
    %13 = vector.load %arg8[%c1_21, %c0_22, %c0_23, %c0_24] : memref<7x20x14x256xf32, #tpu.memory_space<vmem>>, vector<1x20x14x256xf32>
    %14 = vector.shape_cast %13 : vector<1x20x14x256xf32> to vector<20x14x256xf32>
    %15 = vector.shape_cast %12 : vector<20x14x256xf32> to vector<1x20x14x256xf32>
    tpu.vector_store %arg8[%c1_21, %c0_22, %c0_23, %c0_24], %15 {strides = array<i32>} : memref<7x20x14x256xf32, #tpu.memory_space<vmem>>, vector<1x20x14x256xf32>,
    %c0_25 = arith.constant 0 : index
    %c2 = arith.constant 2 : index
    %c0_26 = arith.constant 0 : index
    %16 = vector.load %arg7[%c0_25, %c2, %c0_26] : memref<20x20x256xf32, #tpu.memory_space<vmem>>, vector<20x14x256xf32>
    %c2_27 = arith.constant 2 : index
    %c0_28 = arith.constant 0 : index
    %c0_29 = arith.constant 0 : index
    %c0_30 = arith.constant 0 : index
    %17 = vector.load %arg8[%c2_27, %c0_28, %c0_29, %c0_30] : memref<7x20x14x256xf32, #tpu.memory_space<vmem>>, vector<1x20x14x256xf32>
    %18 = vector.shape_cast %17 : vector<1x20x14x256xf32> to vector<20x14x256xf32>
    %19 = vector.shape_cast %16 : vector<20x14x256xf32> to vector<1x20x14x256xf32>
    tpu.vector_store %arg8[%c2_27, %c0_28, %c0_29, %c0_30], %19 {strides = array<i32>} : memref<7x20x14x256xf32, #tpu.memory_space<vmem>>, vector<1x20x14x256xf32>,
    %c0_31 = arith.constant 0 : index
    %c3_32 = arith.constant 3 : index
    %c0_33 = arith.constant 0 : index
    %20 = vector.load %arg7[%c0_31, %c3_32, %c0_33] : memref<20x20x256xf32, #tpu.memory_space<vmem>>, vector<20x14x256xf32>
    %c3_34 = arith.constant 3 : index
    %c0_35 = arith.constant 0 : index
    %c0_36 = arith.constant 0 : index
    %c0_37 = arith.constant 0 : index
    %21 = vector.load %arg8[%c3_34, %c0_35, %c0_36, %c0_37] : memref<7x20x14x256xf32, #tpu.memory_space<vmem>>, vector<1x20x14x256xf32>
    %22 = vector.shape_cast %21 : vector<1x20x14x256xf32> to vector<20x14x256xf32>
    %23 = vector.shape_cast %20 : vector<20x14x256xf32> to vector<1x20x14x256xf32>
    tpu.vector_store %arg8[%c3_34, %c0_35, %c0_36, %c0_37], %23 {strides = array<i32>} : memref<7x20x14x256xf32, #tpu.memory_space<vmem>>, vector<1x20x14x256xf32>,
    %c0_38 = arith.constant 0 : index
    %c4 = arith.constant 4 : index
    %c0_39 = arith.constant 0 : index
    %24 = vector.load %arg7[%c0_38, %c4, %c0_39] : memref<20x20x256xf32, #tpu.memory_space<vmem>>, vector<20x14x256xf32>
    %c4_40 = arith.constant 4 : index
    %c0_41 = arith.constant 0 : index
    %c0_42 = arith.constant 0 : index
    %c0_43 = arith.constant 0 : index
    %25 = vector.load %arg8[%c4_40, %c0_41, %c0_42, %c0_43] : memref<7x20x14x256xf32, #tpu.memory_space<vmem>>, vector<1x20x14x256xf32>
    %26 = vector.shape_cast %25 : vector<1x20x14x256xf32> to vector<20x14x256xf32>
    %27 = vector.shape_cast %24 : vector<20x14x256xf32> to vector<1x20x14x256xf32>
    tpu.vector_store %arg8[%c4_40, %c0_41, %c0_42, %c0_43], %27 {strides = array<i32>} : memref<7x20x14x256xf32, #tpu.memory_space<vmem>>, vector<1x20x14x256xf32>,
    %c0_44 = arith.constant 0 : index
    %c5 = arith.constant 5 : index
    %c0_45 = arith.constant 0 : index
    %28 = vector.load %arg7[%c0_44, %c5, %c0_45] : memref<20x20x256xf32, #tpu.memory_space<vmem>>, vector<20x14x256xf32>
    %c5_46 = arith.constant 5 : index
    %c0_47 = arith.constant 0 : index
    %c0_48 = arith.constant 0 : index
    %c0_49 = arith.constant 0 : index
    %29 = vector.load %arg8[%c5_46, %c0_47, %c0_48, %c0_49] : memref<7x20x14x256xf32, #tpu.memory_space<vmem>>, vector<1x20x14x256xf32>
    %30 = vector.shape_cast %29 : vector<1x20x14x256xf32> to vector<20x14x256xf32>
    %31 = vector.shape_cast %28 : vector<20x14x256xf32> to vector<1x20x14x256xf32>
    tpu.vector_store %arg8[%c5_46, %c0_47, %c0_48, %c0_49], %31 {strides = array<i32>} : memref<7x20x14x256xf32, #tpu.memory_space<vmem>>, vector<1x20x14x256xf32>,
    %c0_50 = arith.constant 0 : index
    %c6 = arith.constant 6 : index
    %c0_51 = arith.constant 0 : index
    %32 = vector.load %arg7[%c0_50, %c6, %c0_51] : memref<20x20x256xf32, #tpu.memory_space<vmem>>, vector<20x14x256xf32>
    %c6_52 = arith.constant 6 : index
    %c0_53 = arith.constant 0 : index
    %c0_54 = arith.constant 0 : index
    %c0_55 = arith.constant 0 : index
    %33 = vector.load %arg8[%c6_52, %c0_53, %c0_54, %c0_55] : memref<7x20x14x256xf32, #tpu.memory_space<vmem>>, vector<1x20x14x256xf32>
    %34 = vector.shape_cast %33 : vector<1x20x14x256xf32> to vector<20x14x256xf32>
    %35 = vector.shape_cast %32 : vector<20x14x256xf32> to vector<1x20x14x256xf32>
    tpu.vector_store %arg8[%c6_52, %c0_53, %c0_54, %c0_55], %35 {strides = array<i32>} : memref<7x20x14x256xf32, #tpu.memory_space<vmem>>, vector<1x20x14x256xf32>,
    %c0_56 = arith.constant 0 : index
    %c0_57 = arith.constant 0 : index
    %36 = vector.load %arg5[%c0_56, %c0_57] : memref<1x256xf32, #tpu.memory_space<vmem>>, vector<1x256xf32>
    %c0_i32 = arith.constant 0 : i32
    %c14_i32 = arith.constant 14 : i32
    %37 = arith.addi %c0_i32, %c14_i32 : i32
    %c1_i32 = arith.constant 1 : i32
    scf.for %arg9 = %c0_i32 to %37 step %c1_i32  : i32 {
      %38 = vector.shape_cast %36 : vector<1x256xf32> to vector<1x256xf32>
      %39 = vector.broadcast %38 : vector<1x256xf32> to vector<14x256xf32>
      %c0_i32_59 = arith.constant 0 : i32
      %40 = arith.addi %arg9, %c0_i32_59 : i32
      %c0_60 = arith.constant 0 : index
      %41 = arith.index_cast %40 : i32 to index
      %c0_61 = arith.constant 0 : index
      %c0_62 = arith.constant 0 : index
      %42 = vector.load %arg8[%c0_60, %41, %c0_61, %c0_62] : memref<7x20x14x256xf32, #tpu.memory_space<vmem>>, vector<1x1x14x256xf32>
      %43 = vector.shape_cast %42 : vector<1x1x14x256xf32> to vector<14x256xf32>
      %c0_63 = arith.constant 0 : index
      %c0_64 = arith.constant 0 : index
      %c0_65 = arith.constant 0 : index
      %44 = vector.load %arg4[%c0_63, %c0_64, %c0_65] : memref<49x1x256xf32, #tpu.memory_space<vmem>>, vector<1x1x256xf32>
      %45 = vector.shape_cast %44 : vector<1x1x256xf32> to vector<1x256xf32>
      %46 = vector.broadcast %45 : vector<1x256xf32> to vector<14x256xf32>
      %47 = arith.mulf %43, %46 : vector<14x256xf32>
      %48 = arith.addf %39, %47 : vector<14x256xf32>
      %c0_i32_66 = arith.constant 0 : i32
      %49 = arith.addi %arg9, %c0_i32_66 : i32
      %c1_67 = arith.constant 1 : index
      %50 = arith.index_cast %49 : i32 to index
      %c0_68 = arith.constant 0 : index
      %c0_69 = arith.constant 0 : index
      %51 = vector.load %arg8[%c1_67, %50, %c0_68, %c0_69] : memref<7x20x14x256xf32, #tpu.memory_space<vmem>>, vector<1x1x14x256xf32>
      %52 = vector.shape_cast %51 : vector<1x1x14x256xf32> to vector<14x256xf32>
      %c1_70 = arith.constant 1 : index
      %c0_71 = arith.constant 0 : index
      %c0_72 = arith.constant 0 : index
      %53 = vector.load %arg4[%c1_70, %c0_71, %c0_72] : memref<49x1x256xf32, #tpu.memory_space<vmem>>, vector<1x1x256xf32>
      %54 = vector.shape_cast %53 : vector<1x1x256xf32> to vector<1x256xf32>
      %55 = vector.broadcast %54 : vector<1x256xf32> to vector<14x256xf32>
      %56 = arith.mulf %52, %55 : vector<14x256xf32>
      %57 = arith.addf %48, %56 : vector<14x256xf32>
      %c0_i32_73 = arith.constant 0 : i32
      %58 = arith.addi %arg9, %c0_i32_73 : i32
      %c2_74 = arith.constant 2 : index
      %59 = arith.index_cast %58 : i32 to index
      %c0_75 = arith.constant 0 : index
      %c0_76 = arith.constant 0 : index
      %60 = vector.load %arg8[%c2_74, %59, %c0_75, %c0_76] : memref<7x20x14x256xf32, #tpu.memory_space<vmem>>, vector<1x1x14x256xf32>
      %61 = vector.shape_cast %60 : vector<1x1x14x256xf32> to vector<14x256xf32>
      %c2_77 = arith.constant 2 : index
      %c0_78 = arith.constant 0 : index
      %c0_79 = arith.constant 0 : index
      %62 = vector.load %arg4[%c2_77, %c0_78, %c0_79] : memref<49x1x256xf32, #tpu.memory_space<vmem>>, vector<1x1x256xf32>
      %63 = vector.shape_cast %62 : vector<1x1x256xf32> to vector<1x256xf32>
      %64 = vector.broadcast %63 : vector<1x256xf32> to vector<14x256xf32>
      %65 = arith.mulf %61, %64 : vector<14x256xf32>
      %66 = arith.addf %57, %65 : vector<14x256xf32>
      %c0_i32_80 = arith.constant 0 : i32
      %67 = arith.addi %arg9, %c0_i32_80 : i32
      %c3_81 = arith.constant 3 : index
      %68 = arith.index_cast %67 : i32 to index
      %c0_82 = arith.constant 0 : index
      %c0_83 = arith.constant 0 : index
      %69 = vector.load %arg8[%c3_81, %68, %c0_82, %c0_83] : memref<7x20x14x256xf32, #tpu.memory_space<vmem>>, vector<1x1x14x256xf32>
      %70 = vector.shape_cast %69 : vector<1x1x14x256xf32> to vector<14x256xf32>
      %c3_84 = arith.constant 3 : index
      %c0_85 = arith.constant 0 : index
      %c0_86 = arith.constant 0 : index
      %71 = vector.load %arg4[%c3_84, %c0_85, %c0_86] : memref<49x1x256xf32, #tpu.memory_space<vmem>>, vector<1x1x256xf32>
      %72 = vector.shape_cast %71 : vector<1x1x256xf32> to vector<1x256xf32>
      %73 = vector.broadcast %72 : vector<1x256xf32> to vector<14x256xf32>
      %74 = arith.mulf %70, %73 : vector<14x256xf32>
      %75 = arith.addf %66, %74 : vector<14x256xf32>
      %c0_i32_87 = arith.constant 0 : i32
      %76 = arith.addi %arg9, %c0_i32_87 : i32
      %c4_88 = arith.constant 4 : index
      %77 = arith.index_cast %76 : i32 to index
      %c0_89 = arith.constant 0 : index
      %c0_90 = arith.constant 0 : index
      %78 = vector.load %arg8[%c4_88, %77, %c0_89, %c0_90] : memref<7x20x14x256xf32, #tpu.memory_space<vmem>>, vector<1x1x14x256xf32>
      %79 = vector.shape_cast %78 : vector<1x1x14x256xf32> to vector<14x256xf32>
      %c4_91 = arith.constant 4 : index
      %c0_92 = arith.constant 0 : index
      %c0_93 = arith.constant 0 : index
      %80 = vector.load %arg4[%c4_91, %c0_92, %c0_93] : memref<49x1x256xf32, #tpu.memory_space<vmem>>, vector<1x1x256xf32>
      %81 = vector.shape_cast %80 : vector<1x1x256xf32> to vector<1x256xf32>
      %82 = vector.broadcast %81 : vector<1x256xf32> to vector<14x256xf32>
      %83 = arith.mulf %79, %82 : vector<14x256xf32>
      %84 = arith.addf %75, %83 : vector<14x256xf32>
      %c0_i32_94 = arith.constant 0 : i32
      %85 = arith.addi %arg9, %c0_i32_94 : i32
      %c5_95 = arith.constant 5 : index
      %86 = arith.index_cast %85 : i32 to index
      %c0_96 = arith.constant 0 : index
      %c0_97 = arith.constant 0 : index
      %87 = vector.load %arg8[%c5_95, %86, %c0_96, %c0_97] : memref<7x20x14x256xf32, #tpu.memory_space<vmem>>, vector<1x1x14x256xf32>
      %88 = vector.shape_cast %87 : vector<1x1x14x256xf32> to vector<14x256xf32>
      %c5_98 = arith.constant 5 : index
      %c0_99 = arith.constant 0 : index
      %c0_100 = arith.constant 0 : index
      %89 = vector.load %arg4[%c5_98, %c0_99, %c0_100] : memref<49x1x256xf32, #tpu.memory_space<vmem>>, vector<1x1x256xf32>
      %90 = vector.shape_cast %89 : vector<1x1x256xf32> to vector<1x256xf32>
      %91 = vector.broadcast %90 : vector<1x256xf32> to vector<14x256xf32>
      %92 = arith.mulf %88, %91 : vector<14x256xf32>
      %93 = arith.addf %84, %92 : vector<14x256xf32>
      %c0_i32_101 = arith.constant 0 : i32
      %94 = arith.addi %arg9, %c0_i32_101 : i32
      %c6_102 = arith.constant 6 : index
      %95 = arith.index_cast %94 : i32 to index
      %c0_103 = arith.constant 0 : index
      %c0_104 = arith.constant 0 : index
      %96 = vector.load %arg8[%c6_102, %95, %c0_103, %c0_104] : memref<7x20x14x256xf32, #tpu.memory_space<vmem>>, vector<1x1x14x256xf32>
      %97 = vector.shape_cast %96 : vector<1x1x14x256xf32> to vector<14x256xf32>
      %c6_105 = arith.constant 6 : index
      %c0_106 = arith.constant 0 : index
      %c0_107 = arith.constant 0 : index
      %98 = vector.load %arg4[%c6_105, %c0_106, %c0_107] : memref<49x1x256xf32, #tpu.memory_space<vmem>>, vector<1x1x256xf32>
      %99 = vector.shape_cast %98 : vector<1x1x256xf32> to vector<1x256xf32>
      %100 = vector.broadcast %99 : vector<1x256xf32> to vector<14x256xf32>
      %101 = arith.mulf %97, %100 : vector<14x256xf32>
      %102 = arith.addf %93, %101 : vector<14x256xf32>
      %c1_i32_108 = arith.constant 1 : i32
      %103 = arith.addi %arg9, %c1_i32_108 : i32
      %c0_109 = arith.constant 0 : index
      %104 = arith.index_cast %103 : i32 to index
      %c0_110 = arith.constant 0 : index
      %c0_111 = arith.constant 0 : index
      %105 = vector.load %arg8[%c0_109, %104, %c0_110, %c0_111] : memref<7x20x14x256xf32, #tpu.memory_space<vmem>>, vector<1x1x14x256xf32>
      %106 = vector.shape_cast %105 : vector<1x1x14x256xf32> to vector<14x256xf32>
      %c7 = arith.constant 7 : index
      %c0_112 = arith.constant 0 : index
      %c0_113 = arith.constant 0 : index
      %107 = vector.load %arg4[%c7, %c0_112, %c0_113] : memref<49x1x256xf32, #tpu.memory_space<vmem>>, vector<1x1x256xf32>
      %108 = vector.shape_cast %107 : vector<1x1x256xf32> to vector<1x256xf32>
      %109 = vector.broadcast %108 : vector<1x256xf32> to vector<14x256xf32>
      %110 = arith.mulf %106, %109 : vector<14x256xf32>
      %111 = arith.addf %102, %110 : vector<14x256xf32>
      %c1_i32_114 = arith.constant 1 : i32
      %112 = arith.addi %arg9, %c1_i32_114 : i32
      %c1_115 = arith.constant 1 : index
      %113 = arith.index_cast %112 : i32 to index
      %c0_116 = arith.constant 0 : index
      %c0_117 = arith.constant 0 : index
      %114 = vector.load %arg8[%c1_115, %113, %c0_116, %c0_117] : memref<7x20x14x256xf32, #tpu.memory_space<vmem>>, vector<1x1x14x256xf32>
      %115 = vector.shape_cast %114 : vector<1x1x14x256xf32> to vector<14x256xf32>
      %c8 = arith.constant 8 : index
      %c0_118 = arith.constant 0 : index
      %c0_119 = arith.constant 0 : index
      %116 = vector.load %arg4[%c8, %c0_118, %c0_119] : memref<49x1x256xf32, #tpu.memory_space<vmem>>, vector<1x1x256xf32>
      %117 = vector.shape_cast %116 : vector<1x1x256xf32> to vector<1x256xf32>
      %118 = vector.broadcast %117 : vector<1x256xf32> to vector<14x256xf32>
      %119 = arith.mulf %115, %118 : vector<14x256xf32>
      %120 = arith.addf %111, %119 : vector<14x256xf32>
      %c1_i32_120 = arith.constant 1 : i32
      %121 = arith.addi %arg9, %c1_i32_120 : i32
      %c2_121 = arith.constant 2 : index
      %122 = arith.index_cast %121 : i32 to index
      %c0_122 = arith.constant 0 : index
      %c0_123 = arith.constant 0 : index
      %123 = vector.load %arg8[%c2_121, %122, %c0_122, %c0_123] : memref<7x20x14x256xf32, #tpu.memory_space<vmem>>, vector<1x1x14x256xf32>
      %124 = vector.shape_cast %123 : vector<1x1x14x256xf32> to vector<14x256xf32>
      %c9 = arith.constant 9 : index
      %c0_124 = arith.constant 0 : index
      %c0_125 = arith.constant 0 : index
      %125 = vector.load %arg4[%c9, %c0_124, %c0_125] : memref<49x1x256xf32, #tpu.memory_space<vmem>>, vector<1x1x256xf32>
      %126 = vector.shape_cast %125 : vector<1x1x256xf32> to vector<1x256xf32>
      %127 = vector.broadcast %126 : vector<1x256xf32> to vector<14x256xf32>
      %128 = arith.mulf %124, %127 : vector<14x256xf32>
      %129 = arith.addf %120, %128 : vector<14x256xf32>
      %c1_i32_126 = arith.constant 1 : i32
      %130 = arith.addi %arg9, %c1_i32_126 : i32
      %c3_127 = arith.constant 3 : index
      %131 = arith.index_cast %130 : i32 to index
      %c0_128 = arith.constant 0 : index
      %c0_129 = arith.constant 0 : index
      %132 = vector.load %arg8[%c3_127, %131, %c0_128, %c0_129] : memref<7x20x14x256xf32, #tpu.memory_space<vmem>>, vector<1x1x14x256xf32>
      %133 = vector.shape_cast %132 : vector<1x1x14x256xf32> to vector<14x256xf32>
      %c10 = arith.constant 10 : index
      %c0_130 = arith.constant 0 : index
      %c0_131 = arith.constant 0 : index
      %134 = vector.load %arg4[%c10, %c0_130, %c0_131] : memref<49x1x256xf32, #tpu.memory_space<vmem>>, vector<1x1x256xf32>
      %135 = vector.shape_cast %134 : vector<1x1x256xf32> to vector<1x256xf32>
      %136 = vector.broadcast %135 : vector<1x256xf32> to vector<14x256xf32>
      %137 = arith.mulf %133, %136 : vector<14x256xf32>
      %138 = arith.addf %129, %137 : vector<14x256xf32>
      %c1_i32_132 = arith.constant 1 : i32
      %139 = arith.addi %arg9, %c1_i32_132 : i32
      %c4_133 = arith.constant 4 : index
      %140 = arith.index_cast %139 : i32 to index
      %c0_134 = arith.constant 0 : index
      %c0_135 = arith.constant 0 : index
      %141 = vector.load %arg8[%c4_133, %140, %c0_134, %c0_135] : memref<7x20x14x256xf32, #tpu.memory_space<vmem>>, vector<1x1x14x256xf32>
      %142 = vector.shape_cast %141 : vector<1x1x14x256xf32> to vector<14x256xf32>
      %c11 = arith.constant 11 : index
      %c0_136 = arith.constant 0 : index
      %c0_137 = arith.constant 0 : index
      %143 = vector.load %arg4[%c11, %c0_136, %c0_137] : memref<49x1x256xf32, #tpu.memory_space<vmem>>, vector<1x1x256xf32>
      %144 = vector.shape_cast %143 : vector<1x1x256xf32> to vector<1x256xf32>
      %145 = vector.broadcast %144 : vector<1x256xf32> to vector<14x256xf32>
      %146 = arith.mulf %142, %145 : vector<14x256xf32>
      %147 = arith.addf %138, %146 : vector<14x256xf32>
      %c1_i32_138 = arith.constant 1 : i32
      %148 = arith.addi %arg9, %c1_i32_138 : i32
      %c5_139 = arith.constant 5 : index
      %149 = arith.index_cast %148 : i32 to index
      %c0_140 = arith.constant 0 : index
      %c0_141 = arith.constant 0 : index
      %150 = vector.load %arg8[%c5_139, %149, %c0_140, %c0_141] : memref<7x20x14x256xf32, #tpu.memory_space<vmem>>, vector<1x1x14x256xf32>
      %151 = vector.shape_cast %150 : vector<1x1x14x256xf32> to vector<14x256xf32>
      %c12 = arith.constant 12 : index
      %c0_142 = arith.constant 0 : index
      %c0_143 = arith.constant 0 : index
      %152 = vector.load %arg4[%c12, %c0_142, %c0_143] : memref<49x1x256xf32, #tpu.memory_space<vmem>>, vector<1x1x256xf32>
      %153 = vector.shape_cast %152 : vector<1x1x256xf32> to vector<1x256xf32>
      %154 = vector.broadcast %153 : vector<1x256xf32> to vector<14x256xf32>
      %155 = arith.mulf %151, %154 : vector<14x256xf32>
      %156 = arith.addf %147, %155 : vector<14x256xf32>
      %c1_i32_144 = arith.constant 1 : i32
      %157 = arith.addi %arg9, %c1_i32_144 : i32
      %c6_145 = arith.constant 6 : index
      %158 = arith.index_cast %157 : i32 to index
      %c0_146 = arith.constant 0 : index
      %c0_147 = arith.constant 0 : index
      %159 = vector.load %arg8[%c6_145, %158, %c0_146, %c0_147] : memref<7x20x14x256xf32, #tpu.memory_space<vmem>>, vector<1x1x14x256xf32>
      %160 = vector.shape_cast %159 : vector<1x1x14x256xf32> to vector<14x256xf32>
      %c13 = arith.constant 13 : index
      %c0_148 = arith.constant 0 : index
      %c0_149 = arith.constant 0 : index
      %161 = vector.load %arg4[%c13, %c0_148, %c0_149] : memref<49x1x256xf32, #tpu.memory_space<vmem>>, vector<1x1x256xf32>
      %162 = vector.shape_cast %161 : vector<1x1x256xf32> to vector<1x256xf32>
      %163 = vector.broadcast %162 : vector<1x256xf32> to vector<14x256xf32>
      %164 = arith.mulf %160, %163 : vector<14x256xf32>
      %165 = arith.addf %156, %164 : vector<14x256xf32>
      %c2_i32 = arith.constant 2 : i32
      %166 = arith.addi %arg9, %c2_i32 : i32
      %c0_150 = arith.constant 0 : index
      %167 = arith.index_cast %166 : i32 to index
      %c0_151 = arith.constant 0 : index
      %c0_152 = arith.constant 0 : index
      %168 = vector.load %arg8[%c0_150, %167, %c0_151, %c0_152] : memref<7x20x14x256xf32, #tpu.memory_space<vmem>>, vector<1x1x14x256xf32>
      %169 = vector.shape_cast %168 : vector<1x1x14x256xf32> to vector<14x256xf32>
      %c14 = arith.constant 14 : index
      %c0_153 = arith.constant 0 : index
      %c0_154 = arith.constant 0 : index
      %170 = vector.load %arg4[%c14, %c0_153, %c0_154] : memref<49x1x256xf32, #tpu.memory_space<vmem>>, vector<1x1x256xf32>
      %171 = vector.shape_cast %170 : vector<1x1x256xf32> to vector<1x256xf32>
      %172 = vector.broadcast %171 : vector<1x256xf32> to vector<14x256xf32>
      %173 = arith.mulf %169, %172 : vector<14x256xf32>
      %174 = arith.addf %165, %173 : vector<14x256xf32>
      %c2_i32_155 = arith.constant 2 : i32
      %175 = arith.addi %arg9, %c2_i32_155 : i32
      %c1_156 = arith.constant 1 : index
      %176 = arith.index_cast %175 : i32 to index
      %c0_157 = arith.constant 0 : index
      %c0_158 = arith.constant 0 : index
      %177 = vector.load %arg8[%c1_156, %176, %c0_157, %c0_158] : memref<7x20x14x256xf32, #tpu.memory_space<vmem>>, vector<1x1x14x256xf32>
      %178 = vector.shape_cast %177 : vector<1x1x14x256xf32> to vector<14x256xf32>
      %c15 = arith.constant 15 : index
      %c0_159 = arith.constant 0 : index
      %c0_160 = arith.constant 0 : index
      %179 = vector.load %arg4[%c15, %c0_159, %c0_160] : memref<49x1x256xf32, #tpu.memory_space<vmem>>, vector<1x1x256xf32>
      %180 = vector.shape_cast %179 : vector<1x1x256xf32> to vector<1x256xf32>
      %181 = vector.broadcast %180 : vector<1x256xf32> to vector<14x256xf32>
      %182 = arith.mulf %178, %181 : vector<14x256xf32>
      %183 = arith.addf %174, %182 : vector<14x256xf32>
      %c2_i32_161 = arith.constant 2 : i32
      %184 = arith.addi %arg9, %c2_i32_161 : i32
      %c2_162 = arith.constant 2 : index
      %185 = arith.index_cast %184 : i32 to index
      %c0_163 = arith.constant 0 : index
      %c0_164 = arith.constant 0 : index
      %186 = vector.load %arg8[%c2_162, %185, %c0_163, %c0_164] : memref<7x20x14x256xf32, #tpu.memory_space<vmem>>, vector<1x1x14x256xf32>
      %187 = vector.shape_cast %186 : vector<1x1x14x256xf32> to vector<14x256xf32>
      %c16 = arith.constant 16 : index
      %c0_165 = arith.constant 0 : index
      %c0_166 = arith.constant 0 : index
      %188 = vector.load %arg4[%c16, %c0_165, %c0_166] : memref<49x1x256xf32, #tpu.memory_space<vmem>>, vector<1x1x256xf32>
      %189 = vector.shape_cast %188 : vector<1x1x256xf32> to vector<1x256xf32>
      %190 = vector.broadcast %189 : vector<1x256xf32> to vector<14x256xf32>
      %191 = arith.mulf %187, %190 : vector<14x256xf32>
      %192 = arith.addf %183, %191 : vector<14x256xf32>
      %c2_i32_167 = arith.constant 2 : i32
      %193 = arith.addi %arg9, %c2_i32_167 : i32
      %c3_168 = arith.constant 3 : index
      %194 = arith.index_cast %193 : i32 to index
      %c0_169 = arith.constant 0 : index
      %c0_170 = arith.constant 0 : index
      %195 = vector.load %arg8[%c3_168, %194, %c0_169, %c0_170] : memref<7x20x14x256xf32, #tpu.memory_space<vmem>>, vector<1x1x14x256xf32>
      %196 = vector.shape_cast %195 : vector<1x1x14x256xf32> to vector<14x256xf32>
      %c17 = arith.constant 17 : index
      %c0_171 = arith.constant 0 : index
      %c0_172 = arith.constant 0 : index
      %197 = vector.load %arg4[%c17, %c0_171, %c0_172] : memref<49x1x256xf32, #tpu.memory_space<vmem>>, vector<1x1x256xf32>
      %198 = vector.shape_cast %197 : vector<1x1x256xf32> to vector<1x256xf32>
      %199 = vector.broadcast %198 : vector<1x256xf32> to vector<14x256xf32>
      %200 = arith.mulf %196, %199 : vector<14x256xf32>
      %201 = arith.addf %192, %200 : vector<14x256xf32>
      %c2_i32_173 = arith.constant 2 : i32
      %202 = arith.addi %arg9, %c2_i32_173 : i32
      %c4_174 = arith.constant 4 : index
      %203 = arith.index_cast %202 : i32 to index
      %c0_175 = arith.constant 0 : index
      %c0_176 = arith.constant 0 : index
      %204 = vector.load %arg8[%c4_174, %203, %c0_175, %c0_176] : memref<7x20x14x256xf32, #tpu.memory_space<vmem>>, vector<1x1x14x256xf32>
      %205 = vector.shape_cast %204 : vector<1x1x14x256xf32> to vector<14x256xf32>
      %c18 = arith.constant 18 : index
      %c0_177 = arith.constant 0 : index
      %c0_178 = arith.constant 0 : index
      %206 = vector.load %arg4[%c18, %c0_177, %c0_178] : memref<49x1x256xf32, #tpu.memory_space<vmem>>, vector<1x1x256xf32>
      %207 = vector.shape_cast %206 : vector<1x1x256xf32> to vector<1x256xf32>
      %208 = vector.broadcast %207 : vector<1x256xf32> to vector<14x256xf32>
      %209 = arith.mulf %205, %208 : vector<14x256xf32>
      %210 = arith.addf %201, %209 : vector<14x256xf32>
      %c2_i32_179 = arith.constant 2 : i32
      %211 = arith.addi %arg9, %c2_i32_179 : i32
      %c5_180 = arith.constant 5 : index
      %212 = arith.index_cast %211 : i32 to index
      %c0_181 = arith.constant 0 : index
      %c0_182 = arith.constant 0 : index
      %213 = vector.load %arg8[%c5_180, %212, %c0_181, %c0_182] : memref<7x20x14x256xf32, #tpu.memory_space<vmem>>, vector<1x1x14x256xf32>
      %214 = vector.shape_cast %213 : vector<1x1x14x256xf32> to vector<14x256xf32>
      %c19 = arith.constant 19 : index
      %c0_183 = arith.constant 0 : index
      %c0_184 = arith.constant 0 : index
      %215 = vector.load %arg4[%c19, %c0_183, %c0_184] : memref<49x1x256xf32, #tpu.memory_space<vmem>>, vector<1x1x256xf32>
      %216 = vector.shape_cast %215 : vector<1x1x256xf32> to vector<1x256xf32>
      %217 = vector.broadcast %216 : vector<1x256xf32> to vector<14x256xf32>
      %218 = arith.mulf %214, %217 : vector<14x256xf32>
      %219 = arith.addf %210, %218 : vector<14x256xf32>
      %c2_i32_185 = arith.constant 2 : i32
      %220 = arith.addi %arg9, %c2_i32_185 : i32
      %c6_186 = arith.constant 6 : index
      %221 = arith.index_cast %220 : i32 to index
      %c0_187 = arith.constant 0 : index
      %c0_188 = arith.constant 0 : index
      %222 = vector.load %arg8[%c6_186, %221, %c0_187, %c0_188] : memref<7x20x14x256xf32, #tpu.memory_space<vmem>>, vector<1x1x14x256xf32>
      %223 = vector.shape_cast %222 : vector<1x1x14x256xf32> to vector<14x256xf32>
      %c20 = arith.constant 20 : index
      %c0_189 = arith.constant 0 : index
      %c0_190 = arith.constant 0 : index
      %224 = vector.load %arg4[%c20, %c0_189, %c0_190] : memref<49x1x256xf32, #tpu.memory_space<vmem>>, vector<1x1x256xf32>
      %225 = vector.shape_cast %224 : vector<1x1x256xf32> to vector<1x256xf32>
      %226 = vector.broadcast %225 : vector<1x256xf32> to vector<14x256xf32>
      %227 = arith.mulf %223, %226 : vector<14x256xf32>
      %228 = arith.addf %219, %227 : vector<14x256xf32>
      %c3_i32 = arith.constant 3 : i32
      %229 = arith.addi %arg9, %c3_i32 : i32
      %c0_191 = arith.constant 0 : index
      %230 = arith.index_cast %229 : i32 to index
      %c0_192 = arith.constant 0 : index
      %c0_193 = arith.constant 0 : index
      %231 = vector.load %arg8[%c0_191, %230, %c0_192, %c0_193] : memref<7x20x14x256xf32, #tpu.memory_space<vmem>>, vector<1x1x14x256xf32>
      %232 = vector.shape_cast %231 : vector<1x1x14x256xf32> to vector<14x256xf32>
      %c21 = arith.constant 21 : index
      %c0_194 = arith.constant 0 : index
      %c0_195 = arith.constant 0 : index
      %233 = vector.load %arg4[%c21, %c0_194, %c0_195] : memref<49x1x256xf32, #tpu.memory_space<vmem>>, vector<1x1x256xf32>
      %234 = vector.shape_cast %233 : vector<1x1x256xf32> to vector<1x256xf32>
      %235 = vector.broadcast %234 : vector<1x256xf32> to vector<14x256xf32>
      %236 = arith.mulf %232, %235 : vector<14x256xf32>
      %237 = arith.addf %228, %236 : vector<14x256xf32>
      %c3_i32_196 = arith.constant 3 : i32
      %238 = arith.addi %arg9, %c3_i32_196 : i32
      %c1_197 = arith.constant 1 : index
      %239 = arith.index_cast %238 : i32 to index
      %c0_198 = arith.constant 0 : index
      %c0_199 = arith.constant 0 : index
      %240 = vector.load %arg8[%c1_197, %239, %c0_198, %c0_199] : memref<7x20x14x256xf32, #tpu.memory_space<vmem>>, vector<1x1x14x256xf32>
      %241 = vector.shape_cast %240 : vector<1x1x14x256xf32> to vector<14x256xf32>
      %c22 = arith.constant 22 : index
      %c0_200 = arith.constant 0 : index
      %c0_201 = arith.constant 0 : index
      %242 = vector.load %arg4[%c22, %c0_200, %c0_201] : memref<49x1x256xf32, #tpu.memory_space<vmem>>, vector<1x1x256xf32>
      %243 = vector.shape_cast %242 : vector<1x1x256xf32> to vector<1x256xf32>
      %244 = vector.broadcast %243 : vector<1x256xf32> to vector<14x256xf32>
      %245 = arith.mulf %241, %244 : vector<14x256xf32>
      %246 = arith.addf %237, %245 : vector<14x256xf32>
      %c3_i32_202 = arith.constant 3 : i32
      %247 = arith.addi %arg9, %c3_i32_202 : i32
      %c2_203 = arith.constant 2 : index
      %248 = arith.index_cast %247 : i32 to index
      %c0_204 = arith.constant 0 : index
      %c0_205 = arith.constant 0 : index
      %249 = vector.load %arg8[%c2_203, %248, %c0_204, %c0_205] : memref<7x20x14x256xf32, #tpu.memory_space<vmem>>, vector<1x1x14x256xf32>
      %250 = vector.shape_cast %249 : vector<1x1x14x256xf32> to vector<14x256xf32>
      %c23 = arith.constant 23 : index
      %c0_206 = arith.constant 0 : index
      %c0_207 = arith.constant 0 : index
      %251 = vector.load %arg4[%c23, %c0_206, %c0_207] : memref<49x1x256xf32, #tpu.memory_space<vmem>>, vector<1x1x256xf32>
      %252 = vector.shape_cast %251 : vector<1x1x256xf32> to vector<1x256xf32>
      %253 = vector.broadcast %252 : vector<1x256xf32> to vector<14x256xf32>
      %254 = arith.mulf %250, %253 : vector<14x256xf32>
      %255 = arith.addf %246, %254 : vector<14x256xf32>
      %c3_i32_208 = arith.constant 3 : i32
      %256 = arith.addi %arg9, %c3_i32_208 : i32
      %c3_209 = arith.constant 3 : index
      %257 = arith.index_cast %256 : i32 to index
      %c0_210 = arith.constant 0 : index
      %c0_211 = arith.constant 0 : index
      %258 = vector.load %arg8[%c3_209, %257, %c0_210, %c0_211] : memref<7x20x14x256xf32, #tpu.memory_space<vmem>>, vector<1x1x14x256xf32>
      %259 = vector.shape_cast %258 : vector<1x1x14x256xf32> to vector<14x256xf32>
      %c24 = arith.constant 24 : index
      %c0_212 = arith.constant 0 : index
      %c0_213 = arith.constant 0 : index
      %260 = vector.load %arg4[%c24, %c0_212, %c0_213] : memref<49x1x256xf32, #tpu.memory_space<vmem>>, vector<1x1x256xf32>
      %261 = vector.shape_cast %260 : vector<1x1x256xf32> to vector<1x256xf32>
      %262 = vector.broadcast %261 : vector<1x256xf32> to vector<14x256xf32>
      %263 = arith.mulf %259, %262 : vector<14x256xf32>
      %264 = arith.addf %255, %263 : vector<14x256xf32>
      %c3_i32_214 = arith.constant 3 : i32
      %265 = arith.addi %arg9, %c3_i32_214 : i32
      %c4_215 = arith.constant 4 : index
      %266 = arith.index_cast %265 : i32 to index
      %c0_216 = arith.constant 0 : index
      %c0_217 = arith.constant 0 : index
      %267 = vector.load %arg8[%c4_215, %266, %c0_216, %c0_217] : memref<7x20x14x256xf32, #tpu.memory_space<vmem>>, vector<1x1x14x256xf32>
      %268 = vector.shape_cast %267 : vector<1x1x14x256xf32> to vector<14x256xf32>
      %c25 = arith.constant 25 : index
      %c0_218 = arith.constant 0 : index
      %c0_219 = arith.constant 0 : index
      %269 = vector.load %arg4[%c25, %c0_218, %c0_219] : memref<49x1x256xf32, #tpu.memory_space<vmem>>, vector<1x1x256xf32>
      %270 = vector.shape_cast %269 : vector<1x1x256xf32> to vector<1x256xf32>
      %271 = vector.broadcast %270 : vector<1x256xf32> to vector<14x256xf32>
      %272 = arith.mulf %268, %271 : vector<14x256xf32>
      %273 = arith.addf %264, %272 : vector<14x256xf32>
      %c3_i32_220 = arith.constant 3 : i32
      %274 = arith.addi %arg9, %c3_i32_220 : i32
      %c5_221 = arith.constant 5 : index
      %275 = arith.index_cast %274 : i32 to index
      %c0_222 = arith.constant 0 : index
      %c0_223 = arith.constant 0 : index
      %276 = vector.load %arg8[%c5_221, %275, %c0_222, %c0_223] : memref<7x20x14x256xf32, #tpu.memory_space<vmem>>, vector<1x1x14x256xf32>
      %277 = vector.shape_cast %276 : vector<1x1x14x256xf32> to vector<14x256xf32>
      %c26 = arith.constant 26 : index
      %c0_224 = arith.constant 0 : index
      %c0_225 = arith.constant 0 : index
      %278 = vector.load %arg4[%c26, %c0_224, %c0_225] : memref<49x1x256xf32, #tpu.memory_space<vmem>>, vector<1x1x256xf32>
      %279 = vector.shape_cast %278 : vector<1x1x256xf32> to vector<1x256xf32>
      %280 = vector.broadcast %279 : vector<1x256xf32> to vector<14x256xf32>
      %281 = arith.mulf %277, %280 : vector<14x256xf32>
      %282 = arith.addf %273, %281 : vector<14x256xf32>
      %c3_i32_226 = arith.constant 3 : i32
      %283 = arith.addi %arg9, %c3_i32_226 : i32
      %c6_227 = arith.constant 6 : index
      %284 = arith.index_cast %283 : i32 to index
      %c0_228 = arith.constant 0 : index
      %c0_229 = arith.constant 0 : index
      %285 = vector.load %arg8[%c6_227, %284, %c0_228, %c0_229] : memref<7x20x14x256xf32, #tpu.memory_space<vmem>>, vector<1x1x14x256xf32>
      %286 = vector.shape_cast %285 : vector<1x1x14x256xf32> to vector<14x256xf32>
      %c27 = arith.constant 27 : index
      %c0_230 = arith.constant 0 : index
      %c0_231 = arith.constant 0 : index
      %287 = vector.load %arg4[%c27, %c0_230, %c0_231] : memref<49x1x256xf32, #tpu.memory_space<vmem>>, vector<1x1x256xf32>
      %288 = vector.shape_cast %287 : vector<1x1x256xf32> to vector<1x256xf32>
      %289 = vector.broadcast %288 : vector<1x256xf32> to vector<14x256xf32>
      %290 = arith.mulf %286, %289 : vector<14x256xf32>
      %291 = arith.addf %282, %290 : vector<14x256xf32>
      %c4_i32 = arith.constant 4 : i32
      %292 = arith.addi %arg9, %c4_i32 : i32
      %c0_232 = arith.constant 0 : index
      %293 = arith.index_cast %292 : i32 to index
      %c0_233 = arith.constant 0 : index
      %c0_234 = arith.constant 0 : index
      %294 = vector.load %arg8[%c0_232, %293, %c0_233, %c0_234] : memref<7x20x14x256xf32, #tpu.memory_space<vmem>>, vector<1x1x14x256xf32>
      %295 = vector.shape_cast %294 : vector<1x1x14x256xf32> to vector<14x256xf32>
      %c28 = arith.constant 28 : index
      %c0_235 = arith.constant 0 : index
      %c0_236 = arith.constant 0 : index
      %296 = vector.load %arg4[%c28, %c0_235, %c0_236] : memref<49x1x256xf32, #tpu.memory_space<vmem>>, vector<1x1x256xf32>
      %297 = vector.shape_cast %296 : vector<1x1x256xf32> to vector<1x256xf32>
      %298 = vector.broadcast %297 : vector<1x256xf32> to vector<14x256xf32>
      %299 = arith.mulf %295, %298 : vector<14x256xf32>
      %300 = arith.addf %291, %299 : vector<14x256xf32>
      %c4_i32_237 = arith.constant 4 : i32
      %301 = arith.addi %arg9, %c4_i32_237 : i32
      %c1_238 = arith.constant 1 : index
      %302 = arith.index_cast %301 : i32 to index
      %c0_239 = arith.constant 0 : index
      %c0_240 = arith.constant 0 : index
      %303 = vector.load %arg8[%c1_238, %302, %c0_239, %c0_240] : memref<7x20x14x256xf32, #tpu.memory_space<vmem>>, vector<1x1x14x256xf32>
      %304 = vector.shape_cast %303 : vector<1x1x14x256xf32> to vector<14x256xf32>
      %c29 = arith.constant 29 : index
      %c0_241 = arith.constant 0 : index
      %c0_242 = arith.constant 0 : index
      %305 = vector.load %arg4[%c29, %c0_241, %c0_242] : memref<49x1x256xf32, #tpu.memory_space<vmem>>, vector<1x1x256xf32>
      %306 = vector.shape_cast %305 : vector<1x1x256xf32> to vector<1x256xf32>
      %307 = vector.broadcast %306 : vector<1x256xf32> to vector<14x256xf32>
      %308 = arith.mulf %304, %307 : vector<14x256xf32>
      %309 = arith.addf %300, %308 : vector<14x256xf32>
      %c4_i32_243 = arith.constant 4 : i32
      %310 = arith.addi %arg9, %c4_i32_243 : i32
      %c2_244 = arith.constant 2 : index
      %311 = arith.index_cast %310 : i32 to index
      %c0_245 = arith.constant 0 : index
      %c0_246 = arith.constant 0 : index
      %312 = vector.load %arg8[%c2_244, %311, %c0_245, %c0_246] : memref<7x20x14x256xf32, #tpu.memory_space<vmem>>, vector<1x1x14x256xf32>
      %313 = vector.shape_cast %312 : vector<1x1x14x256xf32> to vector<14x256xf32>
      %c30 = arith.constant 30 : index
      %c0_247 = arith.constant 0 : index
      %c0_248 = arith.constant 0 : index
      %314 = vector.load %arg4[%c30, %c0_247, %c0_248] : memref<49x1x256xf32, #tpu.memory_space<vmem>>, vector<1x1x256xf32>
      %315 = vector.shape_cast %314 : vector<1x1x256xf32> to vector<1x256xf32>
      %316 = vector.broadcast %315 : vector<1x256xf32> to vector<14x256xf32>
      %317 = arith.mulf %313, %316 : vector<14x256xf32>
      %318 = arith.addf %309, %317 : vector<14x256xf32>
      %c4_i32_249 = arith.constant 4 : i32
      %319 = arith.addi %arg9, %c4_i32_249 : i32
      %c3_250 = arith.constant 3 : index
      %320 = arith.index_cast %319 : i32 to index
      %c0_251 = arith.constant 0 : index
      %c0_252 = arith.constant 0 : index
      %321 = vector.load %arg8[%c3_250, %320, %c0_251, %c0_252] : memref<7x20x14x256xf32, #tpu.memory_space<vmem>>, vector<1x1x14x256xf32>
      %322 = vector.shape_cast %321 : vector<1x1x14x256xf32> to vector<14x256xf32>
      %c31 = arith.constant 31 : index
      %c0_253 = arith.constant 0 : index
      %c0_254 = arith.constant 0 : index
      %323 = vector.load %arg4[%c31, %c0_253, %c0_254] : memref<49x1x256xf32, #tpu.memory_space<vmem>>, vector<1x1x256xf32>
      %324 = vector.shape_cast %323 : vector<1x1x256xf32> to vector<1x256xf32>
      %325 = vector.broadcast %324 : vector<1x256xf32> to vector<14x256xf32>
      %326 = arith.mulf %322, %325 : vector<14x256xf32>
      %327 = arith.addf %318, %326 : vector<14x256xf32>
      %c4_i32_255 = arith.constant 4 : i32
      %328 = arith.addi %arg9, %c4_i32_255 : i32
      %c4_256 = arith.constant 4 : index
      %329 = arith.index_cast %328 : i32 to index
      %c0_257 = arith.constant 0 : index
      %c0_258 = arith.constant 0 : index
      %330 = vector.load %arg8[%c4_256, %329, %c0_257, %c0_258] : memref<7x20x14x256xf32, #tpu.memory_space<vmem>>, vector<1x1x14x256xf32>
      %331 = vector.shape_cast %330 : vector<1x1x14x256xf32> to vector<14x256xf32>
      %c32 = arith.constant 32 : index
      %c0_259 = arith.constant 0 : index
      %c0_260 = arith.constant 0 : index
      %332 = vector.load %arg4[%c32, %c0_259, %c0_260] : memref<49x1x256xf32, #tpu.memory_space<vmem>>, vector<1x1x256xf32>
      %333 = vector.shape_cast %332 : vector<1x1x256xf32> to vector<1x256xf32>
      %334 = vector.broadcast %333 : vector<1x256xf32> to vector<14x256xf32>
      %335 = arith.mulf %331, %334 : vector<14x256xf32>
      %336 = arith.addf %327, %335 : vector<14x256xf32>
      %c4_i32_261 = arith.constant 4 : i32
      %337 = arith.addi %arg9, %c4_i32_261 : i32
      %c5_262 = arith.constant 5 : index
      %338 = arith.index_cast %337 : i32 to index
      %c0_263 = arith.constant 0 : index
      %c0_264 = arith.constant 0 : index
      %339 = vector.load %arg8[%c5_262, %338, %c0_263, %c0_264] : memref<7x20x14x256xf32, #tpu.memory_space<vmem>>, vector<1x1x14x256xf32>
      %340 = vector.shape_cast %339 : vector<1x1x14x256xf32> to vector<14x256xf32>
      %c33 = arith.constant 33 : index
      %c0_265 = arith.constant 0 : index
      %c0_266 = arith.constant 0 : index
      %341 = vector.load %arg4[%c33, %c0_265, %c0_266] : memref<49x1x256xf32, #tpu.memory_space<vmem>>, vector<1x1x256xf32>
      %342 = vector.shape_cast %341 : vector<1x1x256xf32> to vector<1x256xf32>
      %343 = vector.broadcast %342 : vector<1x256xf32> to vector<14x256xf32>
      %344 = arith.mulf %340, %343 : vector<14x256xf32>
      %345 = arith.addf %336, %344 : vector<14x256xf32>
      %c4_i32_267 = arith.constant 4 : i32
      %346 = arith.addi %arg9, %c4_i32_267 : i32
      %c6_268 = arith.constant 6 : index
      %347 = arith.index_cast %346 : i32 to index
      %c0_269 = arith.constant 0 : index
      %c0_270 = arith.constant 0 : index
      %348 = vector.load %arg8[%c6_268, %347, %c0_269, %c0_270] : memref<7x20x14x256xf32, #tpu.memory_space<vmem>>, vector<1x1x14x256xf32>
      %349 = vector.shape_cast %348 : vector<1x1x14x256xf32> to vector<14x256xf32>
      %c34 = arith.constant 34 : index
      %c0_271 = arith.constant 0 : index
      %c0_272 = arith.constant 0 : index
      %350 = vector.load %arg4[%c34, %c0_271, %c0_272] : memref<49x1x256xf32, #tpu.memory_space<vmem>>, vector<1x1x256xf32>
      %351 = vector.shape_cast %350 : vector<1x1x256xf32> to vector<1x256xf32>
      %352 = vector.broadcast %351 : vector<1x256xf32> to vector<14x256xf32>
      %353 = arith.mulf %349, %352 : vector<14x256xf32>
      %354 = arith.addf %345, %353 : vector<14x256xf32>
      %c5_i32 = arith.constant 5 : i32
      %355 = arith.addi %arg9, %c5_i32 : i32
      %c0_273 = arith.constant 0 : index
      %356 = arith.index_cast %355 : i32 to index
      %c0_274 = arith.constant 0 : index
      %c0_275 = arith.constant 0 : index
      %357 = vector.load %arg8[%c0_273, %356, %c0_274, %c0_275] : memref<7x20x14x256xf32, #tpu.memory_space<vmem>>, vector<1x1x14x256xf32>
      %358 = vector.shape_cast %357 : vector<1x1x14x256xf32> to vector<14x256xf32>
      %c35 = arith.constant 35 : index
      %c0_276 = arith.constant 0 : index
      %c0_277 = arith.constant 0 : index
      %359 = vector.load %arg4[%c35, %c0_276, %c0_277] : memref<49x1x256xf32, #tpu.memory_space<vmem>>, vector<1x1x256xf32>
      %360 = vector.shape_cast %359 : vector<1x1x256xf32> to vector<1x256xf32>
      %361 = vector.broadcast %360 : vector<1x256xf32> to vector<14x256xf32>
      %362 = arith.mulf %358, %361 : vector<14x256xf32>
      %363 = arith.addf %354, %362 : vector<14x256xf32>
      %c5_i32_278 = arith.constant 5 : i32
      %364 = arith.addi %arg9, %c5_i32_278 : i32
      %c1_279 = arith.constant 1 : index
      %365 = arith.index_cast %364 : i32 to index
      %c0_280 = arith.constant 0 : index
      %c0_281 = arith.constant 0 : index
      %366 = vector.load %arg8[%c1_279, %365, %c0_280, %c0_281] : memref<7x20x14x256xf32, #tpu.memory_space<vmem>>, vector<1x1x14x256xf32>
      %367 = vector.shape_cast %366 : vector<1x1x14x256xf32> to vector<14x256xf32>
      %c36 = arith.constant 36 : index
      %c0_282 = arith.constant 0 : index
      %c0_283 = arith.constant 0 : index
      %368 = vector.load %arg4[%c36, %c0_282, %c0_283] : memref<49x1x256xf32, #tpu.memory_space<vmem>>, vector<1x1x256xf32>
      %369 = vector.shape_cast %368 : vector<1x1x256xf32> to vector<1x256xf32>
      %370 = vector.broadcast %369 : vector<1x256xf32> to vector<14x256xf32>
      %371 = arith.mulf %367, %370 : vector<14x256xf32>
      %372 = arith.addf %363, %371 : vector<14x256xf32>
      %c5_i32_284 = arith.constant 5 : i32
      %373 = arith.addi %arg9, %c5_i32_284 : i32
      %c2_285 = arith.constant 2 : index
      %374 = arith.index_cast %373 : i32 to index
      %c0_286 = arith.constant 0 : index
      %c0_287 = arith.constant 0 : index
      %375 = vector.load %arg8[%c2_285, %374, %c0_286, %c0_287] : memref<7x20x14x256xf32, #tpu.memory_space<vmem>>, vector<1x1x14x256xf32>
      %376 = vector.shape_cast %375 : vector<1x1x14x256xf32> to vector<14x256xf32>
      %c37 = arith.constant 37 : index
      %c0_288 = arith.constant 0 : index
      %c0_289 = arith.constant 0 : index
      %377 = vector.load %arg4[%c37, %c0_288, %c0_289] : memref<49x1x256xf32, #tpu.memory_space<vmem>>, vector<1x1x256xf32>
      %378 = vector.shape_cast %377 : vector<1x1x256xf32> to vector<1x256xf32>
      %379 = vector.broadcast %378 : vector<1x256xf32> to vector<14x256xf32>
      %380 = arith.mulf %376, %379 : vector<14x256xf32>
      %381 = arith.addf %372, %380 : vector<14x256xf32>
      %c5_i32_290 = arith.constant 5 : i32
      %382 = arith.addi %arg9, %c5_i32_290 : i32
      %c3_291 = arith.constant 3 : index
      %383 = arith.index_cast %382 : i32 to index
      %c0_292 = arith.constant 0 : index
      %c0_293 = arith.constant 0 : index
      %384 = vector.load %arg8[%c3_291, %383, %c0_292, %c0_293] : memref<7x20x14x256xf32, #tpu.memory_space<vmem>>, vector<1x1x14x256xf32>
      %385 = vector.shape_cast %384 : vector<1x1x14x256xf32> to vector<14x256xf32>
      %c38 = arith.constant 38 : index
      %c0_294 = arith.constant 0 : index
      %c0_295 = arith.constant 0 : index
      %386 = vector.load %arg4[%c38, %c0_294, %c0_295] : memref<49x1x256xf32, #tpu.memory_space<vmem>>, vector<1x1x256xf32>
      %387 = vector.shape_cast %386 : vector<1x1x256xf32> to vector<1x256xf32>
      %388 = vector.broadcast %387 : vector<1x256xf32> to vector<14x256xf32>
      %389 = arith.mulf %385, %388 : vector<14x256xf32>
      %390 = arith.addf %381, %389 : vector<14x256xf32>
      %c5_i32_296 = arith.constant 5 : i32
      %391 = arith.addi %arg9, %c5_i32_296 : i32
      %c4_297 = arith.constant 4 : index
      %392 = arith.index_cast %391 : i32 to index
      %c0_298 = arith.constant 0 : index
      %c0_299 = arith.constant 0 : index
      %393 = vector.load %arg8[%c4_297, %392, %c0_298, %c0_299] : memref<7x20x14x256xf32, #tpu.memory_space<vmem>>, vector<1x1x14x256xf32>
      %394 = vector.shape_cast %393 : vector<1x1x14x256xf32> to vector<14x256xf32>
      %c39 = arith.constant 39 : index
      %c0_300 = arith.constant 0 : index
      %c0_301 = arith.constant 0 : index
      %395 = vector.load %arg4[%c39, %c0_300, %c0_301] : memref<49x1x256xf32, #tpu.memory_space<vmem>>, vector<1x1x256xf32>
      %396 = vector.shape_cast %395 : vector<1x1x256xf32> to vector<1x256xf32>
      %397 = vector.broadcast %396 : vector<1x256xf32> to vector<14x256xf32>
      %398 = arith.mulf %394, %397 : vector<14x256xf32>
      %399 = arith.addf %390, %398 : vector<14x256xf32>
      %c5_i32_302 = arith.constant 5 : i32
      %400 = arith.addi %arg9, %c5_i32_302 : i32
      %c5_303 = arith.constant 5 : index
      %401 = arith.index_cast %400 : i32 to index
      %c0_304 = arith.constant 0 : index
      %c0_305 = arith.constant 0 : index
      %402 = vector.load %arg8[%c5_303, %401, %c0_304, %c0_305] : memref<7x20x14x256xf32, #tpu.memory_space<vmem>>, vector<1x1x14x256xf32>
      %403 = vector.shape_cast %402 : vector<1x1x14x256xf32> to vector<14x256xf32>
      %c40 = arith.constant 40 : index
      %c0_306 = arith.constant 0 : index
      %c0_307 = arith.constant 0 : index
      %404 = vector.load %arg4[%c40, %c0_306, %c0_307] : memref<49x1x256xf32, #tpu.memory_space<vmem>>, vector<1x1x256xf32>
      %405 = vector.shape_cast %404 : vector<1x1x256xf32> to vector<1x256xf32>
      %406 = vector.broadcast %405 : vector<1x256xf32> to vector<14x256xf32>
      %407 = arith.mulf %403, %406 : vector<14x256xf32>
      %408 = arith.addf %399, %407 : vector<14x256xf32>
      %c5_i32_308 = arith.constant 5 : i32
      %409 = arith.addi %arg9, %c5_i32_308 : i32
      %c6_309 = arith.constant 6 : index
      %410 = arith.index_cast %409 : i32 to index
      %c0_310 = arith.constant 0 : index
      %c0_311 = arith.constant 0 : index
      %411 = vector.load %arg8[%c6_309, %410, %c0_310, %c0_311] : memref<7x20x14x256xf32, #tpu.memory_space<vmem>>, vector<1x1x14x256xf32>
      %412 = vector.shape_cast %411 : vector<1x1x14x256xf32> to vector<14x256xf32>
      %c41 = arith.constant 41 : index
      %c0_312 = arith.constant 0 : index
      %c0_313 = arith.constant 0 : index
      %413 = vector.load %arg4[%c41, %c0_312, %c0_313] : memref<49x1x256xf32, #tpu.memory_space<vmem>>, vector<1x1x256xf32>
      %414 = vector.shape_cast %413 : vector<1x1x256xf32> to vector<1x256xf32>
      %415 = vector.broadcast %414 : vector<1x256xf32> to vector<14x256xf32>
      %416 = arith.mulf %412, %415 : vector<14x256xf32>
      %417 = arith.addf %408, %416 : vector<14x256xf32>
      %c6_i32 = arith.constant 6 : i32
      %418 = arith.addi %arg9, %c6_i32 : i32
      %c0_314 = arith.constant 0 : index
      %419 = arith.index_cast %418 : i32 to index
      %c0_315 = arith.constant 0 : index
      %c0_316 = arith.constant 0 : index
      %420 = vector.load %arg8[%c0_314, %419, %c0_315, %c0_316] : memref<7x20x14x256xf32, #tpu.memory_space<vmem>>, vector<1x1x14x256xf32>
      %421 = vector.shape_cast %420 : vector<1x1x14x256xf32> to vector<14x256xf32>
      %c42 = arith.constant 42 : index
      %c0_317 = arith.constant 0 : index
      %c0_318 = arith.constant 0 : index
      %422 = vector.load %arg4[%c42, %c0_317, %c0_318] : memref<49x1x256xf32, #tpu.memory_space<vmem>>, vector<1x1x256xf32>
      %423 = vector.shape_cast %422 : vector<1x1x256xf32> to vector<1x256xf32>
      %424 = vector.broadcast %423 : vector<1x256xf32> to vector<14x256xf32>
      %425 = arith.mulf %421, %424 : vector<14x256xf32>
      %426 = arith.addf %417, %425 : vector<14x256xf32>
      %c6_i32_319 = arith.constant 6 : i32
      %427 = arith.addi %arg9, %c6_i32_319 : i32
      %c1_320 = arith.constant 1 : index
      %428 = arith.index_cast %427 : i32 to index
      %c0_321 = arith.constant 0 : index
      %c0_322 = arith.constant 0 : index
      %429 = vector.load %arg8[%c1_320, %428, %c0_321, %c0_322] : memref<7x20x14x256xf32, #tpu.memory_space<vmem>>, vector<1x1x14x256xf32>
      %430 = vector.shape_cast %429 : vector<1x1x14x256xf32> to vector<14x256xf32>
      %c43 = arith.constant 43 : index
      %c0_323 = arith.constant 0 : index
      %c0_324 = arith.constant 0 : index
      %431 = vector.load %arg4[%c43, %c0_323, %c0_324] : memref<49x1x256xf32, #tpu.memory_space<vmem>>, vector<1x1x256xf32>
      %432 = vector.shape_cast %431 : vector<1x1x256xf32> to vector<1x256xf32>
      %433 = vector.broadcast %432 : vector<1x256xf32> to vector<14x256xf32>
      %434 = arith.mulf %430, %433 : vector<14x256xf32>
      %435 = arith.addf %426, %434 : vector<14x256xf32>
      %c6_i32_325 = arith.constant 6 : i32
      %436 = arith.addi %arg9, %c6_i32_325 : i32
      %c2_326 = arith.constant 2 : index
      %437 = arith.index_cast %436 : i32 to index
      %c0_327 = arith.constant 0 : index
      %c0_328 = arith.constant 0 : index
      %438 = vector.load %arg8[%c2_326, %437, %c0_327, %c0_328] : memref<7x20x14x256xf32, #tpu.memory_space<vmem>>, vector<1x1x14x256xf32>
      %439 = vector.shape_cast %438 : vector<1x1x14x256xf32> to vector<14x256xf32>
      %c44 = arith.constant 44 : index
      %c0_329 = arith.constant 0 : index
      %c0_330 = arith.constant 0 : index
      %440 = vector.load %arg4[%c44, %c0_329, %c0_330] : memref<49x1x256xf32, #tpu.memory_space<vmem>>, vector<1x1x256xf32>
      %441 = vector.shape_cast %440 : vector<1x1x256xf32> to vector<1x256xf32>
      %442 = vector.broadcast %441 : vector<1x256xf32> to vector<14x256xf32>
      %443 = arith.mulf %439, %442 : vector<14x256xf32>
      %444 = arith.addf %435, %443 : vector<14x256xf32>
      %c6_i32_331 = arith.constant 6 : i32
      %445 = arith.addi %arg9, %c6_i32_331 : i32
      %c3_332 = arith.constant 3 : index
      %446 = arith.index_cast %445 : i32 to index
      %c0_333 = arith.constant 0 : index
      %c0_334 = arith.constant 0 : index
      %447 = vector.load %arg8[%c3_332, %446, %c0_333, %c0_334] : memref<7x20x14x256xf32, #tpu.memory_space<vmem>>, vector<1x1x14x256xf32>
      %448 = vector.shape_cast %447 : vector<1x1x14x256xf32> to vector<14x256xf32>
      %c45 = arith.constant 45 : index
      %c0_335 = arith.constant 0 : index
      %c0_336 = arith.constant 0 : index
      %449 = vector.load %arg4[%c45, %c0_335, %c0_336] : memref<49x1x256xf32, #tpu.memory_space<vmem>>, vector<1x1x256xf32>
      %450 = vector.shape_cast %449 : vector<1x1x256xf32> to vector<1x256xf32>
      %451 = vector.broadcast %450 : vector<1x256xf32> to vector<14x256xf32>
      %452 = arith.mulf %448, %451 : vector<14x256xf32>
      %453 = arith.addf %444, %452 : vector<14x256xf32>
      %c6_i32_337 = arith.constant 6 : i32
      %454 = arith.addi %arg9, %c6_i32_337 : i32
      %c4_338 = arith.constant 4 : index
      %455 = arith.index_cast %454 : i32 to index
      %c0_339 = arith.constant 0 : index
      %c0_340 = arith.constant 0 : index
      %456 = vector.load %arg8[%c4_338, %455, %c0_339, %c0_340] : memref<7x20x14x256xf32, #tpu.memory_space<vmem>>, vector<1x1x14x256xf32>
      %457 = vector.shape_cast %456 : vector<1x1x14x256xf32> to vector<14x256xf32>
      %c46 = arith.constant 46 : index
      %c0_341 = arith.constant 0 : index
      %c0_342 = arith.constant 0 : index
      %458 = vector.load %arg4[%c46, %c0_341, %c0_342] : memref<49x1x256xf32, #tpu.memory_space<vmem>>, vector<1x1x256xf32>
      %459 = vector.shape_cast %458 : vector<1x1x256xf32> to vector<1x256xf32>
      %460 = vector.broadcast %459 : vector<1x256xf32> to vector<14x256xf32>
      %461 = arith.mulf %457, %460 : vector<14x256xf32>
      %462 = arith.addf %453, %461 : vector<14x256xf32>
      %c6_i32_343 = arith.constant 6 : i32
      %463 = arith.addi %arg9, %c6_i32_343 : i32
      %c5_344 = arith.constant 5 : index
      %464 = arith.index_cast %463 : i32 to index
      %c0_345 = arith.constant 0 : index
      %c0_346 = arith.constant 0 : index
      %465 = vector.load %arg8[%c5_344, %464, %c0_345, %c0_346] : memref<7x20x14x256xf32, #tpu.memory_space<vmem>>, vector<1x1x14x256xf32>
      %466 = vector.shape_cast %465 : vector<1x1x14x256xf32> to vector<14x256xf32>
      %c47 = arith.constant 47 : index
      %c0_347 = arith.constant 0 : index
      %c0_348 = arith.constant 0 : index
      %467 = vector.load %arg4[%c47, %c0_347, %c0_348] : memref<49x1x256xf32, #tpu.memory_space<vmem>>, vector<1x1x256xf32>
      %468 = vector.shape_cast %467 : vector<1x1x256xf32> to vector<1x256xf32>
      %469 = vector.broadcast %468 : vector<1x256xf32> to vector<14x256xf32>
      %470 = arith.mulf %466, %469 : vector<14x256xf32>
      %471 = arith.addf %462, %470 : vector<14x256xf32>
      %c6_i32_349 = arith.constant 6 : i32
      %472 = arith.addi %arg9, %c6_i32_349 : i32
      %c6_350 = arith.constant 6 : index
      %473 = arith.index_cast %472 : i32 to index
      %c0_351 = arith.constant 0 : index
      %c0_352 = arith.constant 0 : index
      %474 = vector.load %arg8[%c6_350, %473, %c0_351, %c0_352] : memref<7x20x14x256xf32, #tpu.memory_space<vmem>>, vector<1x1x14x256xf32>
      %475 = vector.shape_cast %474 : vector<1x1x14x256xf32> to vector<14x256xf32>
      %c48 = arith.constant 48 : index
      %c0_353 = arith.constant 0 : index
      %c0_354 = arith.constant 0 : index
      %476 = vector.load %arg4[%c48, %c0_353, %c0_354] : memref<49x1x256xf32, #tpu.memory_space<vmem>>, vector<1x1x256xf32>
      %477 = vector.shape_cast %476 : vector<1x1x256xf32> to vector<1x256xf32>
      %478 = vector.broadcast %477 : vector<1x256xf32> to vector<14x256xf32>
      %479 = arith.mulf %475, %478 : vector<14x256xf32>
      %480 = arith.addf %471, %479 : vector<14x256xf32>
      %c0_355 = arith.constant 0 : index
      %481 = arith.index_cast %arg9 : i32 to index
      %c0_356 = arith.constant 0 : index
      %c0_357 = arith.constant 0 : index
      %482 = vector.load %arg6[%c0_355, %481, %c0_356, %c0_357] : memref<1x14x14x256xf32, #tpu.memory_space<vmem>>, vector<1x1x14x256xf32>
      %483 = vector.shape_cast %482 : vector<1x1x14x256xf32> to vector<14x256xf32>
      %484 = vector.shape_cast %480 : vector<14x256xf32> to vector<1x1x14x256xf32>
      tpu.vector_store %arg6[%c0_355, %481, %c0_356, %c0_357], %484 {strides = array<i32>} : memref<1x14x14x256xf32, #tpu.memory_space<vmem>>, vector<1x1x14x256xf32>,
    }
    %c14_i32_58 = arith.constant 14 : i32
    return
  }
  func.func @transform_0(%arg0: i32, %arg1: i32) -> (i32, i32, i32, i32) {
    %c0_i32 = arith.constant 0 : i32
    %c0_i32_0 = arith.constant 0 : i32
    %c0_i32_1 = arith.constant 0 : i32
    return %arg0, %c0_i32, %c0_i32_0, %arg1 : i32, i32, i32, i32
  }
  func.func @transform_1(%arg0: i32, %arg1: i32) -> (i32, i32, i32, i32) {
    %c0_i32 = arith.constant 0 : i32
    %c0_i32_0 = arith.constant 0 : i32
    %c0_i32_1 = arith.constant 0 : i32
    return %arg0, %c0_i32, %c0_i32_0, %arg1 : i32, i32, i32, i32
  }
  func.func @transform_2(%arg0: i32, %arg1: i32) -> (i32, i32, i32) {
    %c0_i32 = arith.constant 0 : i32
    %c0_i32_0 = arith.constant 0 : i32
    %c0_i32_1 = arith.constant 0 : i32
    return %c0_i32, %c0_i32_0, %arg1 : i32, i32, i32
  }
  func.func @transform_3(%arg0: i32, %arg1: i32) -> (i32, i32) {
    %c0_i32 = arith.constant 0 : i32
    %c0_i32_0 = arith.constant 0 : i32
    return %c0_i32, %arg1 : i32, i32
  }
  func.func @transform_4(%arg0: i32, %arg1: i32) -> (i32, i32, i32, i32) {
    %c0_i32 = arith.constant 0 : i32
    %c0_i32_0 = arith.constant 0 : i32
    %c0_i32_1 = arith.constant 0 : i32
    return %arg0, %c0_i32, %c0_i32_0, %arg1 : i32, i32, i32, i32
  }
}

</mosaic_0001>

<bundles_post_ra>
// kernel: tpu_custom_call.1
= control target key start
LH: loop header
LB: loop body
LE: loop exit
PB: predicated region body
PF: predicated region fallthrough
CT: control target
= control target key end

     0   :  { %s7201_s15 = smov 0   ;;  %s7203_s16 = smov 0   ;;  %s9670_s0 = inlined_call_operand.vmem [shape: f32[1,14,14,512], index: 0, kind: input, shape index: {}]   ;;  %s9671_s1 = inlined_call_operand.vmem [shape: f32[1,14,14,512], index: 1, kind: input, shape index: {}]   ;;  %s9672_s2 = inlined_call_operand.vmem [shape: f32[49,1,512], index: 2, kind: input, shape index: {}]   ;;  %s9673_s3 = inlined_call_operand.vmem [shape: f32[1,512], index: 3, kind: input, shape index: {}]   ;;  %s9674_s4 = inlined_call_operand.vmem [shape: f32[1,14,14,512], index: 4, kind: output, shape index: {}]  }
   0x1   :  { %s7205_s17 = smov 0   ;;  %s7207_s18 = smov 0  }
   0x2   :  { %s7209_s19 = smov 0  }
   0x3 LB: > { %s23_s20 = sadd.s32 1, %s7165_s18  ;;  %s6675_s21 = sadd.s32 4294967295, %s7169_s19   ;;  %s7169_s19 = sphi %s7209_s19, %s14_s19   ;;  %s7165_s18 = sphi %s7207_s18, %s9898_s18   ;;  %s7161_s17 = sphi %s7205_s17, %s9897_s17   ;;  %s7157_s16 = sphi %s7203_s16, %s9896_s16   ;;  %s7153_s15 = sphi %s7201_s15, %s9895_s15  }
   0x4   : > { %p24_p0 = scmp.ge.s32.totalorder %s23_s20, 2  ;;  %p42_p1 = scmp.ne.s32.totalorder %s7157_s16, %s7153_s15 }
   0x5   : > { %p43_p2 = scmp.eq.s32.totalorder %s7169_s19, 0  ;;  %p154_p4 = scmp.eq.s32.totalorder %s6675_s21, 1 }
   0x6   : > { %s9900_s20 = smov (%p24_p0, %s23_s20), 0  ;;  %s35_s24 = sadd.s32 1, %s7157_s16 }
   0x7   : > { %p7233_p3 = por %p43_p2, %p42_p1  ;;  %s31_s23 = ssub.s32 %s7165_s18, %s9900_s20 }
   0x8   : > { %p33_p5 = scmp.eq.s32.totalorder %s31_s23, 0  ;;  %p7240_p6 = por %p154_p4, %p42_p1 }
   0x9   : > { %p6678_p7 = scmp.ge.s32.totalorder %s7169_s19, 2 }
   0xa   : > { %s7245_s26 = scalar_select %p33_p5, %s7157_s16, %s35_s24  }
   0xb   : > { %176 = sbr.rel (%p6678_p7) target bundleno = 117 (0x75), region = 16 }
  0x10   : > { %179 = sbr.rel (!%p7233_p3) target bundleno = 48 (0x30), region = 20  ;;  %s181_s27 = sand.u32 (%p7233_p3), 1, %s7157_s16  }
  0x11   : > { %s7023_s28 = sshll.u32 (%p7233_p3), %s7165_s18, 4  ;;  %s7070_s29 = smul.u32 (%p7233_p3), 448, %s181_s27 }
  0x12   : > { %s7255_s6 = scalar_lea.vmem (%p7233_p3), %s9670_s0, %s7023_s28 }
  0x13   : > { %v201_v0 = vld [vmem:[%s7255_s6] sm:$0xff] (%p7233_p3)  ;;  %v203_v1 = vld [vmem:[%s7255_s6 + $0x8] sm:$0xff] (%p7233_p3)  ;;  %s7263_s7 = scalar_lea.vmem (%p7233_p3), [#allocation4], %s7070_s29 }
  0x14   : > { %v205_v2 = vld [vmem:[%s7255_s6 + $0x20] sm:$0xff] (%p7233_p3)  ;;  %v207_v3 = vld [vmem:[%s7255_s6 + $0x28] sm:$0xff] (%p7233_p3)  ;;  %202 = vst [vmem:[%s7263_s7] sm:$0xff] (%p7233_p3), %v201_v0  ;;  %204 = vst [vmem:[%s7263_s7 + $0x8] sm:$0xff] (%p7233_p3), %v203_v1 }
  0x15   : > { %v209_v4 = vld [vmem:[%s7255_s6 + $0x40] sm:$0xff]  ;;  %v211_v5 = vld [vmem:[%s7255_s6 + $0x48] sm:$0xff]  ;;  %206 = vst [vmem:[%s7263_s7 + $0x10] sm:$0xff] %v205_v2  ;;  %208 = vst [vmem:[%s7263_s7 + $0x18] sm:$0xff] %v207_v3 }
  0x16   : > { %210 = vst [vmem:[%s7263_s7 + $0x20] sm:$0xff] %v209_v4  ;;  %212 = vst [vmem:[%s7263_s7 + $0x28] sm:$0xff] %v211_v5  ;;  %v213_v6 = vld [vmem:[%s7255_s6 + $0x60] sm:$0xff]  ;;  %v215_v7 = vld [vmem:[%s7255_s6 + $0x68] sm:$0xff] }
  0x17   : > { %v217_v8 = vld [vmem:[%s7255_s6 + $0x80] sm:$0xff]  ;;  %214 = vst [vmem:[%s7263_s7 + $0x30] sm:$0xff] %v213_v6  ;;  %216 = vst [vmem:[%s7263_s7 + $0x38] sm:$0xff] %v215_v7  ;;  %v219_v9 = vld [vmem:[%s7255_s6 + $0x88] sm:$0xff] }
  0x18   : > { %218 = vst [vmem:[%s7263_s7 + $0x40] sm:$0xff] %v217_v8  ;;  %v221_v10 = vld [vmem:[%s7255_s6 + $0xa0] sm:$0xff]  ;;  %v223_v11 = vld [vmem:[%s7255_s6 + $0xa8] sm:$0xff]  ;;  %220 = vst [vmem:[%s7263_s7 + $0x48] sm:$0xff] %v219_v9 }
  0x19   : > { %222 = vst [vmem:[%s7263_s7 + $0x50] sm:$0xff] %v221_v10  ;;  %224 = vst [vmem:[%s7263_s7 + $0x58] sm:$0xff] %v223_v11  ;;  %v225_v12 = vld [vmem:[%s7255_s6 + $0xc0] sm:$0xff]  ;;  %v227_v13 = vld [vmem:[%s7255_s6 + $0xc8] sm:$0xff] }
  0x1a   : > { %v229_v14 = vld [vmem:[%s7255_s6 + $0xe0] sm:$0xff]  ;;  %226 = vst [vmem:[%s7263_s7 + $0x60] sm:$0xff] %v225_v12  ;;  %228 = vst [vmem:[%s7263_s7 + $0x68] sm:$0xff] %v227_v13  ;;  %v231_v15 = vld [vmem:[%s7255_s6 + $0xe8] sm:$0xff] }
  0x1b   : > { %230 = vst [vmem:[%s7263_s7 + $0x70] sm:$0xff] %v229_v14  ;;  %v233_v16 = vld [vmem:[%s7255_s6 + $0x100] sm:$0xff]  ;;  %v235_v17 = vld [vmem:[%s7255_s6 + $0x108] sm:$0xff]  ;;  %232 = vst [vmem:[%s7263_s7 + $0x78] sm:$0xff] %v231_v15 }
  0x1c   : > { %234 = vst [vmem:[%s7263_s7 + $0x80] sm:$0xff] %v233_v16  ;;  %236 = vst [vmem:[%s7263_s7 + $0x88] sm:$0xff] %v235_v17  ;;  %v237_v18 = vld [vmem:[%s7255_s6 + $0x120] sm:$0xff]  ;;  %v239_v19 = vld [vmem:[%s7255_s6 + $0x128] sm:$0xff] }
  0x1d   : > { %v241_v20 = vld [vmem:[%s7255_s6 + $0x140] sm:$0xff]  ;;  %238 = vst [vmem:[%s7263_s7 + $0x90] sm:$0xff] %v237_v18  ;;  %240 = vst [vmem:[%s7263_s7 + $0x98] sm:$0xff] %v239_v19  ;;  %v243_v21 = vld [vmem:[%s7255_s6 + $0x148] sm:$0xff] }
  0x1e   : > { %242 = vst [vmem:[%s7263_s7 + $0xa0] sm:$0xff] %v241_v20  ;;  %v245_v22 = vld [vmem:[%s7255_s6 + $0x160] sm:$0xff]  ;;  %v247_v23 = vld [vmem:[%s7255_s6 + $0x168] sm:$0xff]  ;;  %244 = vst [vmem:[%s7263_s7 + $0xa8] sm:$0xff] %v243_v21 }
  0x1f   : > { %246 = vst [vmem:[%s7263_s7 + $0xb0] sm:$0xff] %v245_v22  ;;  %248 = vst [vmem:[%s7263_s7 + $0xb8] sm:$0xff] %v247_v23  ;;  %v249_v24 = vld [vmem:[%s7255_s6 + $0x180] sm:$0xff]  ;;  %v251_v25 = vld [vmem:[%s7255_s6 + $0x188] sm:$0xff] }
  0x20   : > { %v253_v26 = vld [vmem:[%s7255_s6 + $0x1a0] sm:$0xff]  ;;  %250 = vst [vmem:[%s7263_s7 + $0xc0] sm:$0xff] %v249_v24  ;;  %252 = vst [vmem:[%s7263_s7 + $0xc8] sm:$0xff] %v251_v25  ;;  %v255_v27 = vld [vmem:[%s7255_s6 + $0x1a8] sm:$0xff] }
  0x21   : > { %254 = vst [vmem:[%s7263_s7 + $0xd0] sm:$0xff] %v253_v26  ;;  %v257_v28 = vld [vmem:[%s7255_s6 + $0x1c0] sm:$0xff]  ;;  %v259_v29 = vld [vmem:[%s7255_s6 + $0x1c8] sm:$0xff]  ;;  %256 = vst [vmem:[%s7263_s7 + $0xd8] sm:$0xff] %v255_v27 }
  0x22   : > { %258 = vst [vmem:[%s7263_s7 + $0xe0] sm:$0xff] %v257_v28  ;;  %260 = vst [vmem:[%s7263_s7 + $0xe8] sm:$0xff] %v259_v29  ;;  %v261_v30 = vld [vmem:[%s7255_s6 + $0x1e0] sm:$0xff]  ;;  %v263_v31 = vld [vmem:[%s7255_s6 + $0x1e8] sm:$0xff] }
  0x23   : > { %v265_v32 = vld [vmem:[%s7255_s6 + $0x200] sm:$0xff]  ;;  %262 = vst [vmem:[%s7263_s7 + $0xf0] sm:$0xff] %v261_v30  ;;  %264 = vst [vmem:[%s7263_s7 + $0xf8] sm:$0xff] %v263_v31  ;;  %v267_v33 = vld [vmem:[%s7255_s6 + $0x208] sm:$0xff] }
  0x24   : > { %266 = vst [vmem:[%s7263_s7 + $0x100] sm:$0xff] %v265_v32  ;;  %v269_v34 = vld [vmem:[%s7255_s6 + $0x220] sm:$0xff]  ;;  %v271_v35 = vld [vmem:[%s7255_s6 + $0x228] sm:$0xff]  ;;  %268 = vst [vmem:[%s7263_s7 + $0x108] sm:$0xff] %v267_v33 }
  0x25   : > { %270 = vst [vmem:[%s7263_s7 + $0x110] sm:$0xff] %v269_v34  ;;  %272 = vst [vmem:[%s7263_s7 + $0x118] sm:$0xff] %v271_v35  ;;  %v273_v36 = vld [vmem:[%s7255_s6 + $0x240] sm:$0xff]  ;;  %v275_v37 = vld [vmem:[%s7255_s6 + $0x248] sm:$0xff] }
  0x26   : > { %v277_v38 = vld [vmem:[%s7255_s6 + $0x260] sm:$0xff]  ;;  %274 = vst [vmem:[%s7263_s7 + $0x120] sm:$0xff] %v273_v36  ;;  %276 = vst [vmem:[%s7263_s7 + $0x128] sm:$0xff] %v275_v37  ;;  %v279_v39 = vld [vmem:[%s7255_s6 + $0x268] sm:$0xff] }
  0x27   : > { %278 = vst [vmem:[%s7263_s7 + $0x130] sm:$0xff] %v277_v38  ;;  %v281_v40 = vld [vmem:[%s7255_s6 + $0x280] sm:$0xff]  ;;  %v283_v41 = vld [vmem:[%s7255_s6 + $0x288] sm:$0xff]  ;;  %280 = vst [vmem:[%s7263_s7 + $0x138] sm:$0xff] %v279_v39 }
  0x28   : > { %282 = vst [vmem:[%s7263_s7 + $0x140] sm:$0xff] %v281_v40  ;;  %284 = vst [vmem:[%s7263_s7 + $0x148] sm:$0xff] %v283_v41  ;;  %v285_v42 = vld [vmem:[%s7255_s6 + $0x2a0] sm:$0xff]  ;;  %v287_v43 = vld [vmem:[%s7255_s6 + $0x2a8] sm:$0xff] }
  0x29   : > { %v289_v44 = vld [vmem:[%s7255_s6 + $0x2c0] sm:$0xff]  ;;  %286 = vst [vmem:[%s7263_s7 + $0x150] sm:$0xff] %v285_v42  ;;  %288 = vst [vmem:[%s7263_s7 + $0x158] sm:$0xff] %v287_v43  ;;  %v291_v45 = vld [vmem:[%s7255_s6 + $0x2c8] sm:$0xff] }
  0x2a   : > { %290 = vst [vmem:[%s7263_s7 + $0x160] sm:$0xff] %v289_v44  ;;  %v293_v46 = vld [vmem:[%s7255_s6 + $0x2e0] sm:$0xff]  ;;  %v295_v47 = vld [vmem:[%s7255_s6 + $0x2e8] sm:$0xff]  ;;  %292 = vst [vmem:[%s7263_s7 + $0x168] sm:$0xff] %v291_v45 }
  0x2b   : > { %294 = vst [vmem:[%s7263_s7 + $0x170] sm:$0xff] %v293_v46  ;;  %296 = vst [vmem:[%s7263_s7 + $0x178] sm:$0xff] %v295_v47  ;;  %v297_v48 = vld [vmem:[%s7255_s6 + $0x300] sm:$0xff]  ;;  %v299_v49 = vld [vmem:[%s7255_s6 + $0x308] sm:$0xff] }
  0x2c   : > { %v301_v50 = vld [vmem:[%s7255_s6 + $0x320] sm:$0xff]  ;;  %298 = vst [vmem:[%s7263_s7 + $0x180] sm:$0xff] %v297_v48  ;;  %300 = vst [vmem:[%s7263_s7 + $0x188] sm:$0xff] %v299_v49  ;;  %v303_v51 = vld [vmem:[%s7255_s6 + $0x328] sm:$0xff] }
  0x2d   : > { %302 = vst [vmem:[%s7263_s7 + $0x190] sm:$0xff] %v301_v50  ;;  %v305_v52 = vld [vmem:[%s7255_s6 + $0x340] sm:$0xff]  ;;  %v307_v53 = vld [vmem:[%s7255_s6 + $0x348] sm:$0xff]  ;;  %304 = vst [vmem:[%s7263_s7 + $0x198] sm:$0xff] %v303_v51 }
  0x2e   : > { %306 = vst [vmem:[%s7263_s7 + $0x1a0] sm:$0xff] %v305_v52  ;;  %308 = vst [vmem:[%s7263_s7 + $0x1a8] sm:$0xff] %v307_v53  ;;  %v309_v54 = vld [vmem:[%s7255_s6 + $0x360] sm:$0xff]  ;;  %v311_v55 = vld [vmem:[%s7255_s6 + $0x368] sm:$0xff] }
  0x2f   : > { %310 = vst [vmem:[%s7263_s7 + $0x1b0] sm:$0xff] %v309_v54  ;;  %312 = vst [vmem:[%s7263_s7 + $0x1b8] sm:$0xff] %v311_v55 }
  0x30 PF: > { %318 = sbr.rel (!%p7233_p3) target bundleno = 80 (0x50), region = 43  ;;  %s320_s8 = sand.u32 (%p7233_p3), 1, %s7157_s16  }
  0x31   : > { %s7024_s9 = sshll.u32 (%p7233_p3), %s7165_s18, 4  ;;  %s7071_s10 = smul.u32 (%p7233_p3), 448, %s320_s8 }
  0x32   : > { %s7378_s13 = scalar_lea.vmem (%p7233_p3), %s9671_s1, %s7024_s9 }
  0x33   : > { %v340_v56 = vld [vmem:[%s7378_s13] sm:$0xff] (%p7233_p3)  ;;  %v342_v57 = vld [vmem:[%s7378_s13 + $0x8] sm:$0xff] (%p7233_p3)  ;;  %s7386_s14 = scalar_lea.vmem (%p7233_p3), [#allocation5], %s7071_s10 }
  0x34   : > { %v344_v58 = vld [vmem:[%s7378_s13 + $0x20] sm:$0xff] (%p7233_p3)  ;;  %v346_v59 = vld [vmem:[%s7378_s13 + $0x28] sm:$0xff] (%p7233_p3)  ;;  %341 = vst [vmem:[%s7386_s14] sm:$0xff] (%p7233_p3), %v340_v56  ;;  %343 = vst [vmem:[%s7386_s14 + $0x8] sm:$0xff] (%p7233_p3), %v342_v57 }
  0x35   : > { %v348_v60 = vld [vmem:[%s7378_s13 + $0x40] sm:$0xff]  ;;  %v350_v61 = vld [vmem:[%s7378_s13 + $0x48] sm:$0xff]  ;;  %345 = vst [vmem:[%s7386_s14 + $0x10] sm:$0xff] %v344_v58  ;;  %347 = vst [vmem:[%s7386_s14 + $0x18] sm:$0xff] %v346_v59 }
  0x36   : > { %349 = vst [vmem:[%s7386_s14 + $0x20] sm:$0xff] %v348_v60  ;;  %351 = vst [vmem:[%s7386_s14 + $0x28] sm:$0xff] %v350_v61  ;;  %v352_v62 = vld [vmem:[%s7378_s13 + $0x60] sm:$0xff]  ;;  %v354_v63 = vld [vmem:[%s7378_s13 + $0x68] sm:$0xff] }
  0x37   : > { %v356_v0 = vld [vmem:[%s7378_s13 + $0x80] sm:$0xff]  ;;  %353 = vst [vmem:[%s7386_s14 + $0x30] sm:$0xff] %v352_v62  ;;  %355 = vst [vmem:[%s7386_s14 + $0x38] sm:$0xff] %v354_v63  ;;  %v358_v1 = vld [vmem:[%s7378_s13 + $0x88] sm:$0xff] }
  0x38   : > { %357 = vst [vmem:[%s7386_s14 + $0x40] sm:$0xff] %v356_v0  ;;  %v360_v2 = vld [vmem:[%s7378_s13 + $0xa0] sm:$0xff]  ;;  %v362_v3 = vld [vmem:[%s7378_s13 + $0xa8] sm:$0xff]  ;;  %359 = vst [vmem:[%s7386_s14 + $0x48] sm:$0xff] %v358_v1 }
  0x39   : > { %361 = vst [vmem:[%s7386_s14 + $0x50] sm:$0xff] %v360_v2  ;;  %363 = vst [vmem:[%s7386_s14 + $0x58] sm:$0xff] %v362_v3  ;;  %v364_v4 = vld [vmem:[%s7378_s13 + $0xc0] sm:$0xff]  ;;  %v366_v5 = vld [vmem:[%s7378_s13 + $0xc8] sm:$0xff] }
  0x3a   : > { %v368_v6 = vld [vmem:[%s7378_s13 + $0xe0] sm:$0xff]  ;;  %365 = vst [vmem:[%s7386_s14 + $0x60] sm:$0xff] %v364_v4  ;;  %367 = vst [vmem:[%s7386_s14 + $0x68] sm:$0xff] %v366_v5  ;;  %v370_v7 = vld [vmem:[%s7378_s13 + $0xe8] sm:$0xff] }
  0x3b   : > { %369 = vst [vmem:[%s7386_s14 + $0x70] sm:$0xff] %v368_v6  ;;  %v372_v8 = vld [vmem:[%s7378_s13 + $0x100] sm:$0xff]  ;;  %v374_v9 = vld [vmem:[%s7378_s13 + $0x108] sm:$0xff]  ;;  %371 = vst [vmem:[%s7386_s14 + $0x78] sm:$0xff] %v370_v7 }
  0x3c   : > { %373 = vst [vmem:[%s7386_s14 + $0x80] sm:$0xff] %v372_v8  ;;  %375 = vst [vmem:[%s7386_s14 + $0x88] sm:$0xff] %v374_v9  ;;  %v376_v10 = vld [vmem:[%s7378_s13 + $0x120] sm:$0xff]  ;;  %v378_v11 = vld [vmem:[%s7378_s13 + $0x128] sm:$0xff] }
  0x3d   : > { %v380_v12 = vld [vmem:[%s7378_s13 + $0x140] sm:$0xff]  ;;  %377 = vst [vmem:[%s7386_s14 + $0x90] sm:$0xff] %v376_v10  ;;  %379 = vst [vmem:[%s7386_s14 + $0x98] sm:$0xff] %v378_v11  ;;  %v382_v13 = vld [vmem:[%s7378_s13 + $0x148] sm:$0xff] }
  0x3e   : > { %381 = vst [vmem:[%s7386_s14 + $0xa0] sm:$0xff] %v380_v12  ;;  %v384_v14 = vld [vmem:[%s7378_s13 + $0x160] sm:$0xff]  ;;  %v386_v15 = vld [vmem:[%s7378_s13 + $0x168] sm:$0xff]  ;;  %383 = vst [vmem:[%s7386_s14 + $0xa8] sm:$0xff] %v382_v13 }
  0x3f   : > { %385 = vst [vmem:[%s7386_s14 + $0xb0] sm:$0xff] %v384_v14  ;;  %387 = vst [vmem:[%s7386_s14 + $0xb8] sm:$0xff] %v386_v15  ;;  %v388_v16 = vld [vmem:[%s7378_s13 + $0x180] sm:$0xff]  ;;  %v390_v17 = vld [vmem:[%s7378_s13 + $0x188] sm:$0xff] }
  0x40   : > { %v392_v18 = vld [vmem:[%s7378_s13 + $0x1a0] sm:$0xff]  ;;  %389 = vst [vmem:[%s7386_s14 + $0xc0] sm:$0xff] %v388_v16  ;;  %391 = vst [vmem:[%s7386_s14 + $0xc8] sm:$0xff] %v390_v17  ;;  %v394_v19 = vld [vmem:[%s7378_s13 + $0x1a8] sm:$0xff] }
  0x41   : > { %393 = vst [vmem:[%s7386_s14 + $0xd0] sm:$0xff] %v392_v18  ;;  %v396_v20 = vld [vmem:[%s7378_s13 + $0x1c0] sm:$0xff]  ;;  %v398_v21 = vld [vmem:[%s7378_s13 + $0x1c8] sm:$0xff]  ;;  %395 = vst [vmem:[%s7386_s14 + $0xd8] sm:$0xff] %v394_v19 }
  0x42   : > { %397 = vst [vmem:[%s7386_s14 + $0xe0] sm:$0xff] %v396_v20  ;;  %399 = vst [vmem:[%s7386_s14 + $0xe8] sm:$0xff] %v398_v21  ;;  %v400_v22 = vld [vmem:[%s7378_s13 + $0x1e0] sm:$0xff]  ;;  %v402_v23 = vld [vmem:[%s7378_s13 + $0x1e8] sm:$0xff] }
  0x43   : > { %v404_v24 = vld [vmem:[%s7378_s13 + $0x200] sm:$0xff]  ;;  %401 = vst [vmem:[%s7386_s14 + $0xf0] sm:$0xff] %v400_v22  ;;  %403 = vst [vmem:[%s7386_s14 + $0xf8] sm:$0xff] %v402_v23  ;;  %v406_v25 = vld [vmem:[%s7378_s13 + $0x208] sm:$0xff] }
  0x44   : > { %405 = vst [vmem:[%s7386_s14 + $0x100] sm:$0xff] %v404_v24  ;;  %v408_v26 = vld [vmem:[%s7378_s13 + $0x220] sm:$0xff]  ;;  %v410_v27 = vld [vmem:[%s7378_s13 + $0x228] sm:$0xff]  ;;  %407 = vst [vmem:[%s7386_s14 + $0x108] sm:$0xff] %v406_v25 }
  0x45   : > { %409 = vst [vmem:[%s7386_s14 + $0x110] sm:$0xff] %v408_v26  ;;  %411 = vst [vmem:[%s7386_s14 + $0x118] sm:$0xff] %v410_v27  ;;  %v412_v28 = vld [vmem:[%s7378_s13 + $0x240] sm:$0xff]  ;;  %v414_v29 = vld [vmem:[%s7378_s13 + $0x248] sm:$0xff] }
  0x46   : > { %v416_v30 = vld [vmem:[%s7378_s13 + $0x260] sm:$0xff]  ;;  %413 = vst [vmem:[%s7386_s14 + $0x120] sm:$0xff] %v412_v28  ;;  %415 = vst [vmem:[%s7386_s14 + $0x128] sm:$0xff] %v414_v29  ;;  %v418_v31 = vld [vmem:[%s7378_s13 + $0x268] sm:$0xff] }
  0x47   : > { %417 = vst [vmem:[%s7386_s14 + $0x130] sm:$0xff] %v416_v30  ;;  %v420_v32 = vld [vmem:[%s7378_s13 + $0x280] sm:$0xff]  ;;  %v422_v33 = vld [vmem:[%s7378_s13 + $0x288] sm:$0xff]  ;;  %419 = vst [vmem:[%s7386_s14 + $0x138] sm:$0xff] %v418_v31 }
  0x48   : > { %421 = vst [vmem:[%s7386_s14 + $0x140] sm:$0xff] %v420_v32  ;;  %423 = vst [vmem:[%s7386_s14 + $0x148] sm:$0xff] %v422_v33  ;;  %v424_v34 = vld [vmem:[%s7378_s13 + $0x2a0] sm:$0xff]  ;;  %v426_v35 = vld [vmem:[%s7378_s13 + $0x2a8] sm:$0xff] }
  0x49   : > { %v428_v36 = vld [vmem:[%s7378_s13 + $0x2c0] sm:$0xff]  ;;  %425 = vst [vmem:[%s7386_s14 + $0x150] sm:$0xff] %v424_v34  ;;  %427 = vst [vmem:[%s7386_s14 + $0x158] sm:$0xff] %v426_v35  ;;  %v430_v37 = vld [vmem:[%s7378_s13 + $0x2c8] sm:$0xff] }
  0x4a   : > { %429 = vst [vmem:[%s7386_s14 + $0x160] sm:$0xff] %v428_v36  ;;  %v432_v38 = vld [vmem:[%s7378_s13 + $0x2e0] sm:$0xff]  ;;  %v434_v39 = vld [vmem:[%s7378_s13 + $0x2e8] sm:$0xff]  ;;  %431 = vst [vmem:[%s7386_s14 + $0x168] sm:$0xff] %v430_v37 }
  0x4b   : > { %433 = vst [vmem:[%s7386_s14 + $0x170] sm:$0xff] %v432_v38  ;;  %435 = vst [vmem:[%s7386_s14 + $0x178] sm:$0xff] %v434_v39  ;;  %v436_v40 = vld [vmem:[%s7378_s13 + $0x300] sm:$0xff]  ;;  %v438_v41 = vld [vmem:[%s7378_s13 + $0x308] sm:$0xff] }
  0x4c   : > { %v440_v42 = vld [vmem:[%s7378_s13 + $0x320] sm:$0xff]  ;;  %437 = vst [vmem:[%s7386_s14 + $0x180] sm:$0xff] %v436_v40  ;;  %439 = vst [vmem:[%s7386_s14 + $0x188] sm:$0xff] %v438_v41  ;;  %v442_v43 = vld [vmem:[%s7378_s13 + $0x328] sm:$0xff] }
  0x4d   : > { %441 = vst [vmem:[%s7386_s14 + $0x190] sm:$0xff] %v440_v42  ;;  %v444_v44 = vld [vmem:[%s7378_s13 + $0x340] sm:$0xff]  ;;  %v446_v45 = vld [vmem:[%s7378_s13 + $0x348] sm:$0xff]  ;;  %443 = vst [vmem:[%s7386_s14 + $0x198] sm:$0xff] %v442_v43 }
  0x4e   : > { %445 = vst [vmem:[%s7386_s14 + $0x1a0] sm:$0xff] %v444_v44  ;;  %447 = vst [vmem:[%s7386_s14 + $0x1a8] sm:$0xff] %v446_v45  ;;  %v448_v46 = vld [vmem:[%s7378_s13 + $0x360] sm:$0xff]  ;;  %v450_v47 = vld [vmem:[%s7378_s13 + $0x368] sm:$0xff] }
  0x4f   : > { %449 = vst [vmem:[%s7386_s14 + $0x1b0] sm:$0xff] %v448_v46  ;;  %451 = vst [vmem:[%s7386_s14 + $0x1b8] sm:$0xff] %v450_v47 }
  0x50 PF: > { %457 = sbr.rel (!%p7233_p3) target bundleno = 117 (0x75), region = 66  ;;  %s459_s21 = sand.u32 (%p7233_p3), 1, %s7157_s16  }
  0x51   : > { %s6683_s23 = sshll.u32 (%p7233_p3), %s7165_s18, 1  ;;  %s7072_s24 = smul.u32 (%p7233_p3), 98, %s459_s21 }
  0x52   : > { %s7501_s29 = scalar_lea.vmem (%p7233_p3), %s9672_s2, %s6683_s23 }
  0x53   : > { %v480_v48 = vld [vmem:[%s7501_s29] sm:$0x3] (%p7233_p3)  ;;  %v482_v49 = vld [vmem:[%s7501_s29 + $0x4] sm:$0x3] (%p7233_p3)  ;;  %v484_v50 = vld [vmem:[%s7501_s29 + $0x8] sm:$0x3] (%p7233_p3) }
  0x54   : > { %v486_v51 = vld [vmem:[%s7501_s29 + $0xc] sm:$0x3] (%p7233_p3)  ;;  %v488_v52 = vld [vmem:[%s7501_s29 + $0x10] sm:$0x3] (%p7233_p3)  ;;  %s7508_s22 = scalar_lea.vmem (%p7233_p3), [#allocation6], %s7072_s24 }
  0x55   : > { %481 = vst [vmem:[%s7508_s22] sm:$0x3] %v480_v48  ;;  %483 = vst [vmem:[%s7508_s22 + $0x2] sm:$0x3] %v482_v49  ;;  %v490_v53 = vld [vmem:[%s7501_s29 + $0x14] sm:$0x3] }
  0x56   : > { %485 = vst [vmem:[%s7508_s22 + $0x4] sm:$0x3] %v484_v50  ;;  %487 = vst [vmem:[%s7508_s22 + $0x6] sm:$0x3] %v486_v51  ;;  %v492_v54 = vld [vmem:[%s7501_s29 + $0x18] sm:$0x3] }
  0x57   : > { %489 = vst [vmem:[%s7508_s22 + $0x8] sm:$0x3] %v488_v52  ;;  %v494_v55 = vld [vmem:[%s7501_s29 + $0x1c] sm:$0x3]  ;;  %491 = vst [vmem:[%s7508_s22 + $0xa] sm:$0x3] %v490_v53 }
  0x58   : > { %493 = vst [vmem:[%s7508_s22 + $0xc] sm:$0x3] %v492_v54  ;;  %495 = vst [vmem:[%s7508_s22 + $0xe] sm:$0x3] %v494_v55  ;;  %v496_v56 = vld [vmem:[%s7501_s29 + $0x20] sm:$0x3] }
  0x59   : > { %v498_v57 = vld [vmem:[%s7501_s29 + $0x24] sm:$0x3]  ;;  %v500_v58 = vld [vmem:[%s7501_s29 + $0x28] sm:$0x3]  ;;  %497 = vst [vmem:[%s7508_s22 + $0x10] sm:$0x3] %v496_v56 }
  0x5a   : > { %499 = vst [vmem:[%s7508_s22 + $0x12] sm:$0x3] %v498_v57  ;;  %501 = vst [vmem:[%s7508_s22 + $0x14] sm:$0x3] %v500_v58  ;;  %v502_v59 = vld [vmem:[%s7501_s29 + $0x2c] sm:$0x3] }
  0x5b   : > { %v504_v60 = vld [vmem:[%s7501_s29 + $0x30] sm:$0x3]  ;;  %v506_v61 = vld [vmem:[%s7501_s29 + $0x34] sm:$0x3]  ;;  %503 = vst [vmem:[%s7508_s22 + $0x16] sm:$0x3] %v502_v59 }
  0x5c   : > { %505 = vst [vmem:[%s7508_s22 + $0x18] sm:$0x3] %v504_v60  ;;  %507 = vst [vmem:[%s7508_s22 + $0x1a] sm:$0x3] %v506_v61  ;;  %v508_v62 = vld [vmem:[%s7501_s29 + $0x38] sm:$0x3] }
  0x5d   : > { %v510_v63 = vld [vmem:[%s7501_s29 + $0x3c] sm:$0x3]  ;;  %v512_v0 = vld [vmem:[%s7501_s29 + $0x40] sm:$0x3]  ;;  %509 = vst [vmem:[%s7508_s22 + $0x1c] sm:$0x3] %v508_v62 }
  0x5e   : > { %511 = vst [vmem:[%s7508_s22 + $0x1e] sm:$0x3] %v510_v63  ;;  %513 = vst [vmem:[%s7508_s22 + $0x20] sm:$0x3] %v512_v0  ;;  %v514_v1 = vld [vmem:[%s7501_s29 + $0x44] sm:$0x3] }
  0x5f   : > { %v516_v2 = vld [vmem:[%s7501_s29 + $0x48] sm:$0x3]  ;;  %v518_v3 = vld [vmem:[%s7501_s29 + $0x4c] sm:$0x3]  ;;  %515 = vst [vmem:[%s7508_s22 + $0x22] sm:$0x3] %v514_v1 }
  0x60   : > { %517 = vst [vmem:[%s7508_s22 + $0x24] sm:$0x3] %v516_v2  ;;  %519 = vst [vmem:[%s7508_s22 + $0x26] sm:$0x3] %v518_v3  ;;  %v520_v4 = vld [vmem:[%s7501_s29 + $0x50] sm:$0x3] }
  0x61   : > { %v522_v5 = vld [vmem:[%s7501_s29 + $0x54] sm:$0x3]  ;;  %v524_v6 = vld [vmem:[%s7501_s29 + $0x58] sm:$0x3]  ;;  %521 = vst [vmem:[%s7508_s22 + $0x28] sm:$0x3] %v520_v4 }
  0x62   : > { %523 = vst [vmem:[%s7508_s22 + $0x2a] sm:$0x3] %v522_v5  ;;  %525 = vst [vmem:[%s7508_s22 + $0x2c] sm:$0x3] %v524_v6  ;;  %v526_v7 = vld [vmem:[%s7501_s29 + $0x5c] sm:$0x3] }
  0x63   : > { %v528_v8 = vld [vmem:[%s7501_s29 + $0x60] sm:$0x3]  ;;  %v530_v9 = vld [vmem:[%s7501_s29 + $0x64] sm:$0x3]  ;;  %527 = vst [vmem:[%s7508_s22 + $0x2e] sm:$0x3] %v526_v7 }
  0x64   : > { %529 = vst [vmem:[%s7508_s22 + $0x30] sm:$0x3] %v528_v8  ;;  %531 = vst [vmem:[%s7508_s22 + $0x32] sm:$0x3] %v530_v9  ;;  %v532_v10 = vld [vmem:[%s7501_s29 + $0x68] sm:$0x3] }
  0x65   : > { %v534_v11 = vld [vmem:[%s7501_s29 + $0x6c] sm:$0x3]  ;;  %v536_v12 = vld [vmem:[%s7501_s29 + $0x70] sm:$0x3]  ;;  %533 = vst [vmem:[%s7508_s22 + $0x34] sm:$0x3] %v532_v10 }
  0x66   : > { %535 = vst [vmem:[%s7508_s22 + $0x36] sm:$0x3] %v534_v11  ;;  %537 = vst [vmem:[%s7508_s22 + $0x38] sm:$0x3] %v536_v12  ;;  %v538_v13 = vld [vmem:[%s7501_s29 + $0x74] sm:$0x3] }
  0x67   : > { %v540_v14 = vld [vmem:[%s7501_s29 + $0x78] sm:$0x3]  ;;  %v542_v15 = vld [vmem:[%s7501_s29 + $0x7c] sm:$0x3]  ;;  %539 = vst [vmem:[%s7508_s22 + $0x3a] sm:$0x3] %v538_v13 }
  0x68   : > { %541 = vst [vmem:[%s7508_s22 + $0x3c] sm:$0x3] %v540_v14  ;;  %543 = vst [vmem:[%s7508_s22 + $0x3e] sm:$0x3] %v542_v15  ;;  %v544_v16 = vld [vmem:[%s7501_s29 + $0x80] sm:$0x3] }
  0x69   : > { %v546_v17 = vld [vmem:[%s7501_s29 + $0x84] sm:$0x3]  ;;  %v548_v18 = vld [vmem:[%s7501_s29 + $0x88] sm:$0x3]  ;;  %545 = vst [vmem:[%s7508_s22 + $0x40] sm:$0x3] %v544_v16 }
  0x6a   : > { %547 = vst [vmem:[%s7508_s22 + $0x42] sm:$0x3] %v546_v17  ;;  %549 = vst [vmem:[%s7508_s22 + $0x44] sm:$0x3] %v548_v18  ;;  %v550_v19 = vld [vmem:[%s7501_s29 + $0x8c] sm:$0x3] }
  0x6b   : > { %v552_v20 = vld [vmem:[%s7501_s29 + $0x90] sm:$0x3]  ;;  %v554_v21 = vld [vmem:[%s7501_s29 + $0x94] sm:$0x3]  ;;  %551 = vst [vmem:[%s7508_s22 + $0x46] sm:$0x3] %v550_v19 }
  0x6c   : > { %553 = vst [vmem:[%s7508_s22 + $0x48] sm:$0x3] %v552_v20  ;;  %555 = vst [vmem:[%s7508_s22 + $0x4a] sm:$0x3] %v554_v21  ;;  %v556_v22 = vld [vmem:[%s7501_s29 + $0x98] sm:$0x3] }
  0x6d   : > { %v558_v23 = vld [vmem:[%s7501_s29 + $0x9c] sm:$0x3]  ;;  %v560_v24 = vld [vmem:[%s7501_s29 + $0xa0] sm:$0x3]  ;;  %557 = vst [vmem:[%s7508_s22 + $0x4c] sm:$0x3] %v556_v22 }
  0x6e   : > { %559 = vst [vmem:[%s7508_s22 + $0x4e] sm:$0x3] %v558_v23  ;;  %561 = vst [vmem:[%s7508_s22 + $0x50] sm:$0x3] %v560_v24  ;;  %v562_v25 = vld [vmem:[%s7501_s29 + $0xa4] sm:$0x3] }
  0x6f   : > { %v564_v26 = vld [vmem:[%s7501_s29 + $0xa8] sm:$0x3]  ;;  %v566_v27 = vld [vmem:[%s7501_s29 + $0xac] sm:$0x3]  ;;  %563 = vst [vmem:[%s7508_s22 + $0x52] sm:$0x3] %v562_v25 }
  0x70   : > { %565 = vst [vmem:[%s7508_s22 + $0x54] sm:$0x3] %v564_v26  ;;  %567 = vst [vmem:[%s7508_s22 + $0x56] sm:$0x3] %v566_v27  ;;  %v568_v28 = vld [vmem:[%s7501_s29 + $0xb0] sm:$0x3] }
  0x71   : > { %v570_v29 = vld [vmem:[%s7501_s29 + $0xb4] sm:$0x3]  ;;  %v572_v30 = vld [vmem:[%s7501_s29 + $0xb8] sm:$0x3]  ;;  %569 = vst [vmem:[%s7508_s22 + $0x58] sm:$0x3] %v568_v28 }
  0x72   : > { %571 = vst [vmem:[%s7508_s22 + $0x5a] sm:$0x3] %v570_v29  ;;  %573 = vst [vmem:[%s7508_s22 + $0x5c] sm:$0x3] %v572_v30  ;;  %v574_v31 = vld [vmem:[%s7501_s29 + $0xbc] sm:$0x3] }
  0x73   : > { %v576_v32 = vld [vmem:[%s7501_s29 + $0xc0] sm:$0x3]  ;;  %575 = vst [vmem:[%s7508_s22 + $0x5e] sm:$0x3] %v574_v31 }
  0x74   : > { %577 = vst [vmem:[%s7508_s22 + $0x60] sm:$0x3] %v576_v32 }
  0x75 PF: > { %p6684_p8 = scmp.ge.s32.totalorder %s7169_s19, 1  ;;  %p706_p9 = scmp.lt.s32.totalorder %s7169_s19, 3 }
  0x77   : > { %p707_p10 = pnand %p6684_p8, %p706_p9 }
  0x79   : > { %710 = sbr.rel (%p707_p10) target bundleno = 831 (0x33f), region = 111 }
  0x7e   : > { %s713_s30 = sand.u32 1, %s7153_s15   ;;  %v7175_v33 = vmov 0.0   ;;  %vm1116_vm0 = vcmask 1042432   ;;  %s6685_s8 = sshll.u32 %s7161_s17, 1  ;;  %vm1690_vm1 = vcmask 1046528   ;;  %vm2132_vm2 = vcmask 1045504  }
  0x7f   : > { %790 = vst [vmem:[#allocation2 + $0x338] sm:$0xff] %v7175_v33  ;;  %772 = vst [vmem:[#allocation2 + $0x2b0] sm:$0xff] %v7175_v33  ;;  %s7700_s5 = smul.u32 448, %s713_s30  ;;  %v7715_v34 = vrot.slane %v7175_v33, 2  ;;  %v7752_v52 = vrot.slane %v7175_v33, 3  ;;  %p7833_p11 = scmp.lt.s32.totalorder %s6685_s8, 3 }
  0x80   : > { %773 = vst [vmem:[#allocation2 + $0x3b0] sm:$0xff] %v7175_v33  ;;  %774 = vst [vmem:[#allocation2 + $0xd8] sm:$0xff] %v7175_v33  ;;  %s7719_s6 = smul.u32 98, %s713_s30  ;;  %vm2654_vm3 = vcmask 1044480   ;;  %vm3256_vm4 = vcmask 1043456   ;;  %vm4459_vm5 = vcmask 1041408  }
  0x81   : > { %775 = vst [vmem:[#allocation2 + $0x18] sm:$0xff] %v7175_v33  ;;  %776 = vst [vmem:[#allocation2 + $0x50] sm:$0xf] %v7175_v33  ;;  %s7734_s15 = scalar_lea.vmem [#allocation4], %s7700_s5  ;;  %s7738_s7 = scalar_lea.vmem [#allocation5], %s7700_s5 }
  0x82   : > { %777 = vst [vmem:[#allocation2 + $0x368] sm:$0xf] %v7175_v33  ;;  %778 = vst [vmem:[#allocation2 + $0x330] sm:$0xff] %v7175_v33  ;;  %v892_v35 = vld [vmem:[%s7734_s15] sm:$0xff]  ;;  %v893_v37 = vld [vmem:[%s7734_s15 + $0x8] sm:$0xff]  ;;  %s9902_s8 = smov (!%p7833_p11, %s6685_s8), 3 }
  0x83   : > { %779 = vst [vmem:[#allocation2 + $0x48] sm:$0xff] %v7175_v33  ;;  %780 = vst [vmem:[#allocation2 + $0x380] sm:$0xff] %v7175_v33  ;;  %v948_v36 = vld [vmem:[%s7738_s7] sm:$0xff]  ;;  %v949_v39 = vld [vmem:[%s7738_s7 + $0x8] sm:$0xff]  ;;  %s769_s12 = scalar_lea.vmem %s9673_s3, %s9902_s8  ;;  %s9163_s13 = scalar_lea.vmem [#allocation6], %s7719_s6 }
  0x84   : > { %781 = vst [vmem:[#allocation2 + $0x110] sm:$0xff] %v7175_v33  ;;  %782 = vst [vmem:[#allocation2 + $0x118] sm:$0xf] %v7175_v33  ;;  %v1004_v38 = vadd.f32 %v948_v36, %v892_v35  ;;  %v894_v40 = vld [vmem:[%s7734_s15 + $0x10] sm:$0x3f]  ;;  %v1005_v42 = vadd.f32 %v949_v39, %v893_v37  ;;  %v896_v46 = vld [vmem:[%s7734_s15 + $0x20] sm:$0xff] }
  0x85   : > { %783 = vst [vmem:[#allocation2 + $0x98] sm:$0xf] %v7175_v33  ;;  %784 = vst [vmem:[#allocation2 + $0x320] sm:$0xff] %v7175_v33  ;;  %v950_v41 = vld [vmem:[%s7738_s7 + $0x10] sm:$0x3f]  ;;  %v952_v49 = vld [vmem:[%s7738_s7 + $0x20] sm:$0xff] }
  0x86   : > { %785 = vst [vmem:[#allocation2 + $0x150] sm:$0xff] %v7175_v33  ;;  %786 = vst [vmem:[#allocation2 + $0x108] sm:$0xff] %v7175_v33  ;;  %v1006_v43 = vadd.f32 %v950_v41, %v894_v40  ;;  %v895_v44 = vld [vmem:[%s7734_s15 + $0x18] sm:$0x3f]  ;;  %v1117_v47 = vrot.slane %v1004_v38, 5  ;;  %v897_v50 = vld [vmem:[%s7734_s15 + $0x28] sm:$0xff]  ;;  %v1008_v55 = vadd.f32 %v952_v49, %v896_v46 }
  0x87   : > { %787 = vst [vmem:[#allocation2 + $0x60] sm:$0xff] %v7175_v33  ;;  %788 = vst [vmem:[#allocation2 + $0x2e0] sm:$0xf] %v7175_v33  ;;  %v951_v45 = vld [vmem:[%s7738_s7 + $0x18] sm:$0x3f]  ;;  %v953_v51 = vld [vmem:[%s7738_s7 + $0x28] sm:$0xff] }
  0x88   : > { %789 = vst [vmem:[#allocation2 + $0x388] sm:$0xf] %v7175_v33  ;;  %791 = vst [vmem:[#allocation2 + $0x340] sm:$0xff] %v7175_v33  ;;  %v1007_v48 = vadd.f32 %v951_v45, %v895_v44  ;;  %v1118_v53 = vrot.slane %v1005_v42, 5  ;;  %v1119_v54 = vrot.slane %v1006_v43, 5  ;;  %v1009_v56 = vadd.f32 %v953_v51, %v897_v50  ;;  %v900_v63 = vld [vmem:[%s7734_s15 + $0x40] sm:$0xff] }
  0x89   : > { %794 = vst [vmem:[#allocation2 + $0x1b8] sm:$0xf] %v7175_v33  ;;  %795 = vst [vmem:[#allocation2 + $0x168] sm:$0xf] %v7175_v33  ;;  %v898_v57 = vld [vmem:[%s7734_s15 + $0x30] sm:$0x3f] }
  0x8a   : > { %796 = vst [vmem:[#allocation2 + $0x2f0] sm:$0xff] %v7175_v33  ;;  %797 = vst [vmem:[#allocation2 + $0x288] sm:$0xff] %v7175_v33  ;;  %v954_v58 = vld [vmem:[%s7738_s7 + $0x30] sm:$0x3f]  ;;  %v1121_v59 = vrot.slane %v1007_v48, 5  ;;  %v1123_v0 = vrot.slane %v1008_v55, 5  ;;  %v7764_v6 = vsel %vm1116_vm0, %v1117_v47, %v1119_v54 }
  0x8b   : > { %800 = vst [vmem:[#allocation2 + $0x1b0] sm:$0xf] %v7175_v33  ;;  %801 = vst [vmem:[#allocation2 + $0x270] sm:$0xf] %v7175_v33  ;;  %v1010_v60 = vadd.f32 %v954_v58, %v898_v57  ;;  %v899_v61 = vld [vmem:[%s7734_s15 + $0x38] sm:$0x3f] }
  0x8c   : > { %802 = vst [vmem:[#allocation2 + $0xf0] sm:$0xff] %v7175_v33  ;;  %803 = vst [vmem:[#allocation2 + $0x8] sm:$0xff] %v7175_v33  ;;  %v955_v62 = vld [vmem:[%s7738_s7 + $0x38] sm:$0x3f]  ;;  %v1124_v1 = vrot.slane %v1009_v56, 5  ;;  %v956_v3 = vld [vmem:[%s7738_s7 + $0x40] sm:$0xff]  ;;  %v7771_v13 = vsel %vm1116_vm0, %v1118_v53, %v1121_v59 }
  0x8d   : > { %806 = vst [vmem:[#allocation2 + $0x390] sm:$0xf] %v7175_v33  ;;  %807 = vst [vmem:[#allocation2 + $0x278] sm:$0xf] %v7175_v33  ;;  %v1011_v2 = vadd.f32 %v955_v62, %v899_v61  ;;  %v901_v4 = vld [vmem:[%s7734_s15 + $0x48] sm:$0xff]  ;;  %v1125_v7 = vrot.slane %v1010_v60, 5  ;;  %v1012_v8 = vadd.f32 %v956_v3, %v900_v63 }
  0x8e   : > { %808 = vst [vmem:[#allocation2] sm:$0xff] %v7175_v33  ;;  %809 = vst [vmem:[#allocation2 + $0x290] sm:$0xff] %v7175_v33  ;;  %v957_v5 = vld [vmem:[%s7738_s7 + $0x48] sm:$0xff]  ;;  %v902_v10 = vld [vmem:[%s7734_s15 + $0x50] sm:$0x3f]  ;;  %v9701_v61 = vrot.slane %v7764_v6, 2 }
  0x8f   : > { %812 = vst [vmem:[#allocation2 + $0x1c0] sm:$0xf] %v7175_v33  ;;  %813 = vst [vmem:[#allocation2 + $0x90] sm:$0xf] %v7175_v33  ;;  %v1013_v9 = vadd.f32 %v957_v5, %v901_v4  ;;  %v958_v11 = vld [vmem:[%s7738_s7 + $0x50] sm:$0x3f]  ;;  %v7786_v31 = vsel %vm1116_vm0, %v1123_v0, %v1125_v7 }
  0x90   : > { %814 = vst [vmem:[#allocation2 + $0x70] sm:$0xff] %v7175_v33  ;;  %815 = vst [vmem:[#allocation2 + $0x210] sm:$0xff] %v7175_v33  ;;  %v904_v12 = vld [vmem:[%s7734_s15 + $0x60] sm:$0xff]  ;;  %v1127_v14 = vrot.slane %v1011_v2, 5  ;;  %v1014_v15 = vadd.f32 %v958_v11, %v902_v10  ;;  %v903_v16 = vld [vmem:[%s7734_s15 + $0x58] sm:$0x3f] }
  0x91   : > { %818 = vst [vmem:[#allocation2 + $0x1d8] sm:$0xf] %v7175_v33  ;;  %819 = vst [vmem:[#allocation2 + $0x260] sm:$0xf] %v7175_v33  ;;  %v959_v17 = vld [vmem:[%s7738_s7 + $0x58] sm:$0x3f] }
  0x92   : > { %820 = vst [vmem:[#allocation2 + $0x358] sm:$0xff] %v7175_v33  ;;  %821 = vst [vmem:[#allocation2 + $0x2c0] sm:$0xff] %v7175_v33  ;;  %v960_v18 = vld [vmem:[%s7738_s7 + $0x60] sm:$0xff]  ;;  %v1129_v19 = vrot.slane %v1012_v8, 5  ;;  %v1130_v20 = vrot.slane %v1013_v9, 5  ;;  %v1015_v21 = vadd.f32 %v959_v17, %v903_v16  ;;  %v905_v23 = vld [vmem:[%s7734_s15 + $0x68] sm:$0xff]  ;;  %v7789_v32 = vsel %vm1116_vm0, %v1124_v1, %v1127_v14 }
  0x93   : > { %824 = vst [vmem:[#allocation2 + $0x78] sm:$0xf] %v7175_v33  ;;  %825 = vst [vmem:[#allocation2 + $0x158] sm:$0xf] %v7175_v33  ;;  %v7777_v22 = vadd.f32 %v960_v18, %v904_v12  ;;  %v961_v24 = vld [vmem:[%s7738_s7 + $0x68] sm:$0xff]  ;;  %v1131_v26 = vrot.slane %v1014_v15, 5 }
  0x94   : > { %826 = vst [vmem:[#allocation2 + $0xa8] sm:$0xff] %v7175_v33  ;;  %827 = vst [vmem:[#allocation2 + $0x300] sm:$0xff] %v7175_v33  ;;  %v906_v25 = vld [vmem:[%s7734_s15 + $0x70] sm:$0x3f]  ;;  %v1017_v27 = vadd.f32 %v961_v24, %v905_v23  ;;  %v907_v29 = vld [vmem:[%s7734_s15 + $0x78] sm:$0x3f] }
  0x95   : > { %830 = vst [vmem:[#allocation2 + $0x40] sm:$0xf] %v7175_v33  ;;  %831 = vst [vmem:[#allocation2 + $0x1d0] sm:$0xf] %v7175_v33  ;;  %v962_v28 = vld [vmem:[%s7738_s7 + $0x70] sm:$0x3f]  ;;  %v7801_v46 = vsel %vm1116_vm0, %v1129_v19, %v1131_v26 }
  0x96   : > { %832 = vst [vmem:[#allocation2 + $0x2e8] sm:$0xff] %v7175_v33  ;;  %833 = vst [vmem:[#allocation2 + $0x1f0] sm:$0xff] %v7175_v33  ;;  %v908_v30 = vld [vmem:[%s7734_s15 + $0x80] sm:$0xff]  ;;  %v1135_v35 = vrot.slane %v7777_v22, 5  ;;  %v1018_v36 = vadd.f32 %v962_v28, %v906_v25  ;;  %v963_v37 = vld [vmem:[%s7738_s7 + $0x78] sm:$0x3f] }
  0x97   : > { %836 = vst [vmem:[#allocation2 + $0x30] sm:$0xf] %v7175_v33  ;;  %837 = vst [vmem:[#allocation2 + $0xc0] sm:$0xf] %v7175_v33  ;;  %v964_v38 = vld [vmem:[%s7738_s7 + $0x80] sm:$0xff]  ;;  %v909_v39 = vld [vmem:[%s7734_s15 + $0x88] sm:$0xff]  ;;  %v1019_v41 = vadd.f32 %v963_v37, %v907_v29 }
  0x98   : > { %838 = vst [vmem:[#allocation2 + $0x228] sm:$0xff] %v7175_v33  ;;  %839 = vst [vmem:[#allocation2 + $0x170] sm:$0xff] %v7175_v33  ;;  %v1136_v40 = vrot.slane %v1017_v27, 5  ;;  %v1020_v42 = vadd.f32 %v964_v38, %v908_v30  ;;  %v965_v43 = vld [vmem:[%s7738_s7 + $0x88] sm:$0xff]  ;;  %v910_v44 = vld [vmem:[%s7734_s15 + $0x90] sm:$0x3f] }
  0x99   : > { %842 = vst [vmem:[#allocation2 + $0x348] sm:$0xf] %v7175_v33  ;;  %843 = vst [vmem:[#allocation2 + $0x3a8] sm:$0xf] %v7175_v33  ;;  %v966_v45 = vld [vmem:[%s7738_s7 + $0x90] sm:$0x3f]  ;;  %v1021_v48 = vadd.f32 %v965_v43, %v909_v39 }
  0x9a   : > { %844 = vst [vmem:[#allocation2 + $0xf8] sm:$0xff] %v7175_v33  ;;  %845 = vst [vmem:[#allocation2 + $0x250] sm:$0xff] %v7175_v33  ;;  %v1022_v49 = vadd.f32 %v966_v45, %v910_v44  ;;  %v911_v50 = vld [vmem:[%s7734_s15 + $0x98] sm:$0x3f]  ;;  %v1139_v55 = vrot.slane %v1019_v41, 5  ;;  %v1141_v56 = vrot.slane %v1020_v42, 5 }
  0x9b   : > { %848 = vst [vmem:[#allocation2 + $0x2b8] sm:$0xf] %v7175_v33  ;;  %849 = vst [vmem:[#allocation2 + $0x128] sm:$0xf] %v7175_v33  ;;  %v967_v51 = vld [vmem:[%s7738_s7 + $0x98] sm:$0x3f] }
  0x9c   : > { %850 = vst [vmem:[#allocation2 + $0xa0] sm:$0xff] %v7175_v33  ;;  %851 = vst [vmem:[#allocation2 + $0x3a0] sm:$0xff] %v7175_v33  ;;  %v1023_v57 = vadd.f32 %v967_v51, %v911_v50  ;;  %v968_v58 = vld [vmem:[%s7738_s7 + $0xa0] sm:$0xff]  ;;  %v969_v60 = vld [vmem:[%s7738_s7 + $0xa8] sm:$0xff]  ;;  %v1142_v62 = vrot.slane %v1021_v48, 5  ;;  %v1143_v63 = vrot.slane %v1022_v49, 5  ;;  %v7824_v11 = vsel %vm1116_vm0, %v1136_v40, %v1139_v55 }
  0x9d   : > { %854 = vst [vmem:[#allocation2 + $0x230] sm:$0xf] %v7175_v33  ;;  %855 = vst [vmem:[#allocation2 + $0x298] sm:$0xf] %v7175_v33  ;;  %v914_v2 = vld [vmem:[%s7734_s15 + $0xb0] sm:$0x3f] }
  0x9e   : > { %856 = vst [vmem:[#allocation2 + $0x318] sm:$0xff] %v7175_v33  ;;  %857 = vst [vmem:[#allocation2 + $0x160] sm:$0xff] %v7175_v33  ;;  %v970_v3 = vld [vmem:[%s7738_s7 + $0xb0] sm:$0x3f]  ;;  %v1145_v4 = vrot.slane %v1023_v57, 5  ;;  %v916_v9 = vld [vmem:[%s7734_s15 + $0xc0] sm:$0xff] }
  0x9f   : > { %860 = vst [vmem:[#allocation2 + $0x120] sm:$0xf] %v7175_v33  ;;  %861 = vst [vmem:[#allocation2 + $0x140] sm:$0xf] %v7175_v33  ;;  %v1026_v5 = vadd.f32 %v970_v3, %v914_v2  ;;  %v971_v8 = vld [vmem:[%s7738_s7 + $0xb8] sm:$0x3f] }
  0xa0   : > { %862 = vst [vmem:[#allocation2 + $0x68] sm:$0xff] %v7175_v33  ;;  %863 = vst [vmem:[#allocation2 + $0xd0] sm:$0xff] %v7175_v33  ;;  %v972_v16 = vld [vmem:[%s7738_s7 + $0xc0] sm:$0xff]  ;;  %v917_v17 = vld [vmem:[%s7734_s15 + $0xc8] sm:$0xff]  ;;  %s9166_s14 = scalar_lea.vmem [#allocation7], %s7700_s5  ;;  %s9168_s21 = smov 0  }
  0xa1   : > { %866 = vst [vmem:[#allocation2 + $0x258] sm:$0xf] %v7175_v33  ;;  %867 = vst [vmem:[#allocation2 + $0x220] sm:$0xf] %v7175_v33  ;;  %v973_v18 = vld [vmem:[%s7738_s7 + $0xc8] sm:$0xff]  ;;  %v920_v25 = vld [vmem:[%s7734_s15 + $0xe0] sm:$0xff] }
  0xa2   : > { %868 = vst [vmem:[#allocation2 + $0x2a0] sm:$0xff] %v7175_v33  ;;  %869 = vst [vmem:[#allocation2 + $0x1a0] sm:$0xff] %v7175_v33  ;;  %v1029_v22 = vadd.f32 %v973_v18, %v917_v17  ;;  %v918_v23 = vld [vmem:[%s7734_s15 + $0xd0] sm:$0x3f]  ;;  %v919_v29 = vld [vmem:[%s7734_s15 + $0xd8] sm:$0x3f] }
  0xa3   : > { %872 = vst [vmem:[#allocation2 + $0x1e0] sm:$0xf] %v7175_v33  ;;  %873 = vst [vmem:[#allocation2 + $0x100] sm:$0xf] %v7175_v33  ;;  %v974_v24 = vld [vmem:[%s7738_s7 + $0xd0] sm:$0x3f] }
  0xa4   : > { %874 = vst [vmem:[#allocation2 + $0x10] sm:$0xff] %v7175_v33  ;;  %875 = vst [vmem:[#allocation2 + $0x268] sm:$0xff] %v7175_v33  ;;  %v1030_v28 = vadd.f32 %v974_v24, %v918_v23  ;;  %v975_v30 = vld [vmem:[%s7738_s7 + $0xd8] sm:$0x3f]  ;;  %v921_v39 = vld [vmem:[%s7734_s15 + $0xe8] sm:$0xff] }
  0xa5   : > { %876 = vst [vmem:[#allocation2 + $0x248] sm:$0xff] %v7175_v33  ;;  %877 = vst [vmem:[#allocation2 + $0x190] sm:$0xff] %v7175_v33  ;;  %v1031_v37 = vadd.f32 %v975_v30, %v919_v29  ;;  %v922_v41 = vld [vmem:[%s7734_s15 + $0xf0] sm:$0x3f]  ;;  %v923_v45 = vld [vmem:[%s7734_s15 + $0xf8] sm:$0x3f] }
  0xa6   : > { %878 = vst [vmem:[#allocation2 + $0x1f8] sm:$0xf] %v7175_v33  ;;  %879 = vst [vmem:[#allocation2 + $0x218] sm:$0xf] %v7175_v33  ;;  %v1155_v42 = vrot.slane %v1030_v28, 5  ;;  %v925_v57 = vld [vmem:[%s7734_s15 + $0x108] sm:$0xff] }
  0xa7   : > { %880 = vst [vmem:[#allocation2 + $0x198] sm:$0xff] %v7175_v33  ;;  %881 = vst [vmem:[#allocation2 + $0x2a8] sm:$0xff] %v7175_v33  ;;  %v978_v44 = vld [vmem:[%s7738_s7 + $0xf0] sm:$0x3f]  ;;  %v1157_v50 = vrot.slane %v1031_v37, 5  ;;  %v929_v17 = vld [vmem:[%s7734_s15 + $0x128] sm:$0xff] }
  0xa8   : > { %882 = vst [vmem:[#allocation2 + $0xc8] sm:$0xff] %v7175_v33  ;;  %883 = vst [vmem:[#allocation2 + $0x3b8] sm:$0xff] %v7175_v33  ;;  %v985_v18 = vld [vmem:[%s7738_s7 + $0x128] sm:$0xff]  ;;  %v931_v30 = vld [vmem:[%s7734_s15 + $0x138] sm:$0x3f] }
  0xa9   : > { %884 = vst [vmem:[#allocation2 + $0x240] sm:$0xf] %v7175_v33  ;;  %885 = vst [vmem:[#allocation2 + $0x178] sm:$0xf] %v7175_v33  ;;  %v1041_v24 = vadd.f32 %v985_v18, %v929_v17 }
  0xaa   : > { %886 = vst [vmem:[#allocation2 + $0xb0] sm:$0xff] %v7175_v33  ;;  %887 = vst [vmem:[#allocation2 + $0x398] sm:$0xff] %v7175_v33 }
  0xab   : > { %888 = vst [vmem:[#allocation2 + $0x2d8] sm:$0xff] %v7175_v33  ;;  %889 = vst [vmem:[#allocation2 + $0x1c8] sm:$0xff] %v7175_v33 }
  0xac   : > { %890 = vst [vmem:[#allocation2 + $0x2c8] sm:$0xf] %v7175_v33  ;;  %891 = vst [vmem:[#allocation2 + $0x310] sm:$0xf] %v7175_v33 }
  0xad   : > { %1450 = vst [vmem:[#allocation3] sm:$0xff] %v7175_v33  ;;  %1451 = vst [vmem:[#allocation3 + $0x8] sm:$0xff] %v7175_v33 }
  0xae   : > { %1454 = vst [vmem:[#allocation3 + $0x20] sm:$0xff] %v7175_v33  ;;  %1455 = vst [vmem:[#allocation3 + $0x28] sm:$0xff] %v7175_v33 }
  0xaf   : > { %1458 = vst [vmem:[#allocation3 + $0x40] sm:$0xff] %v7175_v33  ;;  %1459 = vst [vmem:[#allocation3 + $0x48] sm:$0xff] %v7175_v33 }
  0xb0   : > { %1518 = vst [vmem:[#allocation3 + $0x220] sm:$0xff] %v7175_v33  ;;  %1519 = vst [vmem:[#allocation3 + $0x228] sm:$0xff] %v7175_v33 }
  0xb1   : > { %1522 = vst [vmem:[#allocation3 + $0x240] sm:$0xff] %v7175_v33  ;;  %1523 = vst [vmem:[#allocation3 + $0x248] sm:$0xff] %v7175_v33 }
  0xb2   : > { %1526 = vst [vmem:[#allocation3 + $0x260] sm:$0xff] %v7175_v33  ;;  %1527 = vst [vmem:[#allocation3 + $0x268] sm:$0xff] %v7175_v33  ;;  %v1133_v33 = vrot.slane %v1015_v21, 5  ;;  %v1028_v21 = vadd.f32 %v972_v16, %v916_v9  ;;  %v984_v16 = vld [vmem:[%s7738_s7 + $0x120] sm:$0xff] }
  0xb3   : > { %2336 = vst [vmem:[#allocation3 + $0x510] sm:$0x3f] %v7715_v34  ;;  %2337 = vst [vmem:[#allocation3 + $0x518] sm:$0x3f] %v7715_v34 }
  0xb4   : > { %2340 = vst [vmem:[#allocation3 + $0x530] sm:$0x3f] %v7715_v34  ;;  %2341 = vst [vmem:[#allocation3 + $0x538] sm:$0x3f] %v7715_v34 }
  0xb5   : > { %2344 = vst [vmem:[#allocation3 + $0x550] sm:$0x3f] %v7715_v34  ;;  %2345 = vst [vmem:[#allocation3 + $0x558] sm:$0x3f] %v7715_v34 }
  0xb6   : > { %2404 = vst [vmem:[#allocation3 + $0x730] sm:$0x3f] %v7715_v34  ;;  %2405 = vst [vmem:[#allocation3 + $0x738] sm:$0x3f] %v7715_v34 }
  0xb7   : > { %2408 = vst [vmem:[#allocation3 + $0x750] sm:$0x3f] %v7715_v34  ;;  %2409 = vst [vmem:[#allocation3 + $0x758] sm:$0x3f] %v7715_v34 }
  0xb8   : > { %2412 = vst [vmem:[#allocation3 + $0x770] sm:$0x3f] %v7715_v34  ;;  %2413 = vst [vmem:[#allocation3 + $0x778] sm:$0x3f] %v7715_v34 }
  0xb9   : > { %9766 = vst [vmem:[#allocation8_spill] sm:$0xff] %v7752_v52  ;;  %1286 = vst [vmem:[#allocation2 + $0x338] sm:$0xf8] %v1117_v47  ;;  %v1137_v47 = vrot.slane %v1018_v36, 5  ;;  %v1154_v36 = vrot.slane %v1029_v22, 5 }
  0xba   : > { %1287 = vst [vmem:[#allocation2 + $0x340] sm:$0xf8] %v1118_v53  ;;  %1290 = vst [vmem:[#allocation2 + $0x1b8] sm:$0x1] %v1119_v54  ;;  %v912_v53 = vld [vmem:[%s7734_s15 + $0xa0] sm:$0xff]  ;;  %v7808_v54 = vsel %vm1116_vm0, %v1130_v20, %v1133_v33 }
  0xbb   : > { %1291 = vst [vmem:[#allocation2 + $0x168] sm:$0x1] %v1121_v59  ;;  %1288 = vst [vmem:[#allocation2 + $0x80] sm:$0xff] %v7764_v6  ;;  %v913_v59 = vld [vmem:[%s7734_s15 + $0xa8] sm:$0xff]  ;;  %v7821_v10 = vsel %vm1116_vm0, %v1135_v35, %v1137_v47  ;;  %v7884_v9 = vsel %vm1116_vm0, %v1154_v36, %v1157_v50 }
  0xbc   : > { %1292 = vst [vmem:[#allocation2 + $0x2f0] sm:$0xf8] %v1123_v0  ;;  %1293 = vst [vmem:[#allocation2 + $0x288] sm:$0xf8] %v1124_v1  ;;  %v1024_v0 = vadd.f32 %v968_v58, %v912_v53  ;;  %v1025_v1 = vadd.f32 %v969_v60, %v913_v59  ;;  %v1034_v53 = vadd.f32 %v978_v44, %v922_v41  ;;  %v988_v41 = vld [vmem:[%s7738_s7 + $0x140] sm:$0xff] }
  0xbd   : > { %1289 = vst [vmem:[#allocation2 + $0x1a8] sm:$0xff] %v7771_v13  ;;  %1296 = vst [vmem:[#allocation2 + $0x1b0] sm:$0x1] %v1125_v7  ;;  %v915_v7 = vld [vmem:[%s7734_s15 + $0xb8] sm:$0x3f] }
  0xbe   : > { %1297 = vst [vmem:[#allocation2 + $0x270] sm:$0x1] %v1127_v14  ;;  %1298 = vst [vmem:[#allocation2 + $0xf0] sm:$0xf8] %v1129_v19  ;;  %v1147_v12 = vrot.slane %v1024_v0, 5  ;;  %v1148_v14 = vrot.slane %v1025_v1, 5  ;;  %v1027_v15 = vadd.f32 %v971_v8, %v915_v7  ;;  %v7840_v19 = vsel %vm1116_vm0, %v1141_v56, %v1143_v63 }
  0xbf   : > { %1299 = vst [vmem:[#allocation2 + $0x8] sm:$0xf8] %v1130_v20  ;;  %1294 = vst [vmem:[#allocation2 + $0x360] sm:$0xff] %v7786_v31  ;;  %v1149_v20 = vrot.slane %v1026_v5, 5  ;;  %v982_v0 = vld [vmem:[%s7738_s7 + $0x110] sm:$0x3f] }
  0xc0   : > { %1295 = vst [vmem:[#allocation2 + $0x130] sm:$0xff] %v7789_v32  ;;  %1302 = vst [vmem:[#allocation2 + $0x390] sm:$0x1] %v1131_v26  ;;  %v7847_v26 = vsel %vm1116_vm0, %v1142_v62, %v1145_v4  ;;  %v1151_v27 = vrot.slane %v1027_v15, 5  ;;  %v1161_v2 = vrot.slane %v1034_v53, 5  ;;  %v928_v8 = vld [vmem:[%s7734_s15 + $0x120] sm:$0xff] }
  0xc1   : > { %1303 = vst [vmem:[#allocation2 + $0x278] sm:$0x1] %v1133_v33  ;;  %1304 = vst [vmem:[#allocation2] sm:$0xf8] %v1135_v35  ;;  %v976_v33 = vld [vmem:[%s7738_s7 + $0xe0] sm:$0xff]  ;;  %v1153_v35 = vrot.slane %v1028_v21, 5  ;;  %v7862_v48 = vsel %vm1116_vm0, %v1147_v12, %v1149_v20  ;;  %v1040_v23 = vadd.f32 %v984_v16, %v928_v8 }
  0xc2   : > { %1300 = vst [vmem:[#allocation2 + $0x148] sm:$0xff] %v7801_v46  ;;  %9767 = vst [vmem:[#allocation9_spill] sm:$0xff] %v7808_v54  ;;  %v7853_v38 = vadd.f32 %v976_v33, %v920_v25  ;;  %v7865_v49 = vsel %vm1116_vm0, %v1148_v14, %v1151_v27  ;;  %v927_v5 = vld [vmem:[%s7734_s15 + $0x118] sm:$0x3f]  ;;  %v930_v25 = vld [vmem:[%s7734_s15 + $0x130] sm:$0x3f] }
  0xc3   : > { %1305 = vst [vmem:[#allocation2 + $0x290] sm:$0xf8] %v1136_v40  ;;  %1301 = vst [vmem:[#allocation2 + $0x200] sm:$0xff] %v7808_v54  ;;  %v977_v40 = vld [vmem:[%s7738_s7 + $0xe8] sm:$0xff]  ;;  %v7877_v1 = vsel %vm1116_vm0, %v1153_v35, %v1155_v42  ;;  %v983_v7 = vld [vmem:[%s7738_s7 + $0x118] sm:$0x3f] }
  0xc4   : > { %1308 = vst [vmem:[#allocation2 + $0x1c0] sm:$0x1] %v1137_v47  ;;  %1309 = vst [vmem:[#allocation2 + $0x90] sm:$0x1] %v1139_v55  ;;  %v1033_v43 = vadd.f32 %v977_v40, %v921_v39  ;;  %v924_v47 = vld [vmem:[%s7734_s15 + $0x100] sm:$0xff]  ;;  %v1159_v51 = vrot.slane %v7853_v38, 5  ;;  %v1039_v15 = vadd.f32 %v983_v7, %v927_v5 }
  0xc5   : > { %1310 = vst [vmem:[#allocation2 + $0x70] sm:$0xf8] %v1141_v56  ;;  %9768 = vst [vmem:[#allocation10_spill] sm:$0xff] %v7821_v10  ;;  %v979_v55 = vld [vmem:[%s7738_s7 + $0xf8] sm:$0x3f]  ;;  %v980_v56 = vld [vmem:[%s7738_s7 + $0x100] sm:$0xff] }
  0xc6   : > { %9769 = vst [vmem:[#allocation11_spill] sm:$0xff] %v7824_v11  ;;  %2348 = vst [vmem:[#allocation3 + $0x570] sm:$0x3f] %v9701_v61  ;;  %v1160_v58 = vrot.slane %v1033_v43, 5  ;;  %v1035_v59 = vadd.f32 %v979_v55, %v923_v45  ;;  %v1036_v60 = vadd.f32 %v980_v56, %v924_v47  ;;  %v1169_v28 = vrot.slane %v1039_v15, 5  ;;  %v989_v43 = vld [vmem:[%s7738_s7 + $0x148] sm:$0xff] }
  0xc7   : > { %1311 = vst [vmem:[#allocation2 + $0x210] sm:$0xf8] %v1142_v62  ;;  %1314 = vst [vmem:[#allocation2 + $0x1d8] sm:$0x1] %v1143_v63  ;;  %v981_v62 = vld [vmem:[%s7738_s7 + $0x108] sm:$0xff]  ;;  %v1171_v38 = vrot.slane %v1040_v23, 5 }
  0xc8   : > { %1306 = vst [vmem:[#allocation2 + $0x188] sm:$0xff] %v7821_v10  ;;  %1307 = vst [vmem:[#allocation2 + $0xe0] sm:$0xff] %v7824_v11  ;;  %v926_v63 = vld [vmem:[%s7734_s15 + $0x110] sm:$0x3f]  ;;  %v1037_v3 = vadd.f32 %v981_v62, %v925_v57  ;;  %v987_v33 = vld [vmem:[%s7738_s7 + $0x138] sm:$0x3f] }
  0xc9   : > { %9771 = vst [vmem:[#allocation12_spill] sm:$0xff] %v7840_v19  ;;  %1315 = vst [vmem:[#allocation2 + $0x260] sm:$0x1] %v1145_v4  ;;  %v1038_v4 = vadd.f32 %v982_v0, %v926_v63  ;;  %v1172_v39 = vrot.slane %v1041_v24, 5  ;;  %v1043_v40 = vadd.f32 %v987_v33, %v931_v30  ;;  %v990_v53 = vld [vmem:[%s7738_s7 + $0x150] sm:$0x3f] }
  0xca   : > { %1312 = vst [vmem:[#allocation2 + $0x308] sm:$0xff] %v7840_v19  ;;  %9772 = vst [vmem:[#allocation13_spill] sm:$0xff] %v7847_v26  ;;  %v1166_v21 = vrot.slane %v1037_v3, 5  ;;  %v936_v55 = vld [vmem:[%s7734_s15 + $0x160] sm:$0xff]  ;;  %v993_v5 = vld [vmem:[%s7738_s7 + $0x168] sm:$0xff] }
  0xcb   : > { %1316 = vst [vmem:[#allocation2 + $0x358] sm:$0xf8] %v1147_v12  ;;  %1317 = vst [vmem:[#allocation2 + $0x2c0] sm:$0xf8] %v1148_v14  ;;  %v1163_v12 = vrot.slane %v1035_v59, 5  ;;  %v1165_v14 = vrot.slane %v1036_v60, 5 }
  0xcc   : > { %1313 = vst [vmem:[#allocation2 + $0x370] sm:$0xff] %v7847_v26  ;;  %1320 = vst [vmem:[#allocation2 + $0x78] sm:$0x1] %v1149_v20  ;;  %v9700_v20 = vrot.slane %v7771_v13, 2  ;;  %v1167_v22 = vrot.slane %v1038_v4, 5  ;;  %v7923_v56 = vsel %vm1116_vm0, %v1166_v21, %v1169_v28  ;;  %v1175_v57 = vrot.slane %v1043_v40, 5 }
  0xcd   : > { %1321 = vst [vmem:[#allocation2 + $0x158] sm:$0x1] %v1151_v27  ;;  %9773 = vst [vmem:[#allocation14_spill] sm:$0xff] %v7862_v48  ;;  %v986_v27 = vld [vmem:[%s7738_s7 + $0x130] sm:$0x3f]  ;;  %v7900_v37 = vsel %vm1116_vm0, %v1160_v58, %v1163_v12  ;;  %v992_v62 = vld [vmem:[%s7738_s7 + $0x160] sm:$0xff] }
  0xce   : > { %9774 = vst [vmem:[#allocation15_spill] sm:$0xff] %v7865_v49  ;;  %1322 = vst [vmem:[#allocation2 + $0xa8] sm:$0xf8] %v1153_v35  ;;  %v1042_v29 = vadd.f32 %v986_v27, %v930_v25  ;;  %v932_v35 = vld [vmem:[%s7734_s15 + $0x140] sm:$0xff]  ;;  %v7916_v44 = vsel %vm1116_vm0, %v1165_v14, %v1167_v22  ;;  %v935_v59 = vld [vmem:[%s7734_s15 + $0x158] sm:$0x3f]  ;;  %v7929_v3 = vadd.f32 %v992_v62, %v936_v55 }
  0xcf   : > { %1323 = vst [vmem:[#allocation2 + $0x300] sm:$0xf8] %v1154_v36  ;;  %1318 = vst [vmem:[#allocation2 + $0x328] sm:$0xff] %v7862_v48  ;;  %v7897_v36 = vsel %vm1116_vm0, %v1159_v51, %v1161_v2  ;;  %v1044_v47 = vadd.f32 %v988_v41, %v932_v35  ;;  %v991_v60 = vld [vmem:[%s7738_s7 + $0x158] sm:$0x3f]  ;;  %v937_v4 = vld [vmem:[%s7734_s15 + $0x168] sm:$0xff]  ;;  %v7941_v18 = vsel %vm1116_vm0, %v1172_v39, %v1175_v57 }
  0xd0   : > { %1319 = vst [vmem:[#allocation2 + $0x238] sm:$0xff] %v7865_v49  ;;  %1326 = vst [vmem:[#allocation2 + $0x40] sm:$0x1] %v1155_v42  ;;  %v933_v42 = vld [vmem:[%s7734_s15 + $0x148] sm:$0xff]  ;;  %v1173_v45 = vrot.slane %v1042_v29, 5  ;;  %v940_v16 = vld [vmem:[%s7734_s15 + $0x180] sm:$0xff] }
  0xd1   : > { %9775 = vst [vmem:[#allocation16_spill] sm:$0xff] %v7877_v1  ;;  %1327 = vst [vmem:[#allocation2 + $0x1d0] sm:$0x1] %v1157_v50  ;;  %v1045_v50 = vadd.f32 %v989_v43, %v933_v42  ;;  %v1177_v63 = vrot.slane %v1044_v47, 5  ;;  %v938_v7 = vld [vmem:[%s7734_s15 + $0x170] sm:$0x3f] }
  0xd2   : > { %1328 = vst [vmem:[#allocation2 + $0x2e8] sm:$0xf8] %v1159_v51  ;;  %1324 = vst [vmem:[#allocation2 + $0xe8] sm:$0xff] %v7877_v1  ;;  %v934_v51 = vld [vmem:[%s7734_s15 + $0x150] sm:$0x3f]  ;;  %v7938_v17 = vsel %vm1116_vm0, %v1171_v38, %v1173_v45  ;;  %v996_v25 = vld [vmem:[%s7738_s7 + $0x180] sm:$0xff] }
  0xd3   : > { %9776 = vst [vmem:[#allocation17_spill] sm:$0xff] %v7884_v9  ;;  %1329 = vst [vmem:[#allocation2 + $0x1f0] sm:$0xf8] %v1160_v58  ;;  %v1046_v58 = vadd.f32 %v990_v53, %v934_v51  ;;  %v1178_v0 = vrot.slane %v1045_v50, 5  ;;  %v939_v15 = vld [vmem:[%s7734_s15 + $0x178] sm:$0x3f]  ;;  %v1052_v30 = vadd.f32 %v996_v25, %v940_v16 }
  0xd4   : > { %1325 = vst [vmem:[#allocation2 + $0x20] sm:$0xff] %v7884_v9  ;;  %1332 = vst [vmem:[#allocation2 + $0x30] sm:$0x1] %v1161_v2  ;;  %v1047_v2 = vadd.f32 %v991_v60, %v935_v59  ;;  %v995_v24 = vld [vmem:[%s7738_s7 + $0x178] sm:$0x3f]  ;;  %v941_v27 = vld [vmem:[%s7734_s15 + $0x188] sm:$0xff] }
  0xd5   : > { %1333 = vst [vmem:[#allocation2 + $0xc0] sm:$0x1] %v1163_v12  ;;  %1334 = vst [vmem:[#allocation2 + $0x228] sm:$0xf8] %v1165_v14  ;;  %v1179_v8 = vrot.slane %v1046_v58, 5  ;;  %v1049_v12 = vadd.f32 %v993_v5, %v937_v4  ;;  %v1051_v29 = vadd.f32 %v995_v24, %v939_v15  ;;  %v997_v33 = vld [vmem:[%s7738_s7 + $0x188] sm:$0xff] }
  0xd6   : > { %9777 = vst [vmem:[#allocation18_spill] sm:$0xff] %v7897_v36  ;;  %9778 = vst [vmem:[#allocation19_spill] sm:$0xff] %v7900_v37  ;;  %v994_v14 = vld [vmem:[%s7738_s7 + $0x170] sm:$0x3f]  ;;  %v1053_v41 = vadd.f32 %v997_v33, %v941_v27  ;;  %v943_v43 = vld [vmem:[%s7734_s15 + $0x198] sm:$0x3f] }
  0xd7   : > { %2349 = vst [vmem:[#allocation3 + $0x578] sm:$0x3f] %v9700_v20  ;;  %1335 = vst [vmem:[#allocation2 + $0x170] sm:$0xf8] %v1166_v21  ;;  %v1181_v21 = vrot.slane %v1047_v2, 5  ;;  %v1050_v23 = vadd.f32 %v994_v14, %v938_v7  ;;  %v944_v47 = vld [vmem:[%s7734_s15 + $0x1a0] sm:$0xff] }
  0xd8   : > { %1338 = vst [vmem:[#allocation2 + $0x348] sm:$0x1] %v1167_v22  ;;  %1330 = vst [vmem:[#allocation2 + $0x38] sm:$0xff] %v7897_v36  ;;  %v1183_v22 = vrot.slane %v7929_v3, 5  ;;  %v942_v35 = vld [vmem:[%s7734_s15 + $0x190] sm:$0x3f] }
  0xd9   : > { %1331 = vst [vmem:[#allocation2 + $0x2d0] sm:$0xff] %v7900_v37  ;;  %9779 = vst [vmem:[#allocation20_spill] sm:$0xff] %v7916_v44  ;;  %v1185_v40 = vrot.slane %v1050_v23, 5  ;;  %v7960_v50 = vsel %vm1116_vm0, %v1178_v0, %v1181_v21  ;;  %v1187_v51 = vrot.slane %v1051_v29, 5  ;;  %v1189_v53 = vrot.slane %v1052_v30, 5  ;;  %v945_v58 = vld [vmem:[%s7734_s15 + $0x1a8] sm:$0xff] }
  0xda   : > { %1339 = vst [vmem:[#allocation2 + $0x3a8] sm:$0x1] %v1169_v28  ;;  %1336 = vst [vmem:[#allocation2 + $0x280] sm:$0xff] %v7916_v44  ;;  %v1184_v28 = vrot.slane %v1049_v12, 5  ;;  %v1001_v59 = vld [vmem:[%s7738_s7 + $0x1a8] sm:$0xff]  ;;  %v9699_v60 = vrot.slane %v7786_v31, 2 }
  0xdb   : > { %9780 = vst [vmem:[#allocation21_spill] sm:$0xff] %v7923_v56  ;;  %1340 = vst [vmem:[#allocation2 + $0xf8] sm:$0xf8] %v1171_v38  ;;  %v998_v38 = vld [vmem:[%s7738_s7 + $0x190] sm:$0x3f]  ;;  %v1190_v62 = vrot.slane %v1053_v41, 5  ;;  %v7971_v2 = vadd.f32 %v1001_v59, %v945_v58  ;;  %v7978_v14 = vsel %vm1116_vm0, %v1183_v22, %v1185_v40 }
  0xdc   : > { %1341 = vst [vmem:[#allocation2 + $0x250] sm:$0xf8] %v1172_v39  ;;  %1337 = vst [vmem:[#allocation2 + $0x138] sm:$0xff] %v7923_v56  ;;  %v7953_v39 = vsel %vm1116_vm0, %v1177_v63, %v1179_v8  ;;  %v1054_v42 = vadd.f32 %v998_v38, %v942_v35  ;;  %v946_v3 = vld [vmem:[%s7734_s15 + $0x1b0] sm:$0x3f]  ;;  %v7981_v15 = vsel %vm1116_vm0, %v1184_v28, %v1187_v51  ;;  %v1382_v16 = vld [vmem:[#allocation2 + $0x338] sm:$0xff] }
  0xdd   : > { %1344 = vst [vmem:[#allocation2 + $0x2b8] sm:$0x1] %v1173_v45  ;;  %1345 = vst [vmem:[#allocation2 + $0x128] sm:$0x1] %v1175_v57  ;;  %v999_v45 = vld [vmem:[%s7738_s7 + $0x198] sm:$0x3f] }
  0xde   : > { %9781 = vst [vmem:[#allocation22_spill] sm:$0xff] %v7938_v17  ;;  %9782 = vst [vmem:[#allocation23_spill] sm:$0xff] %v7941_v18  ;;  %v1055_v55 = vadd.f32 %v999_v45, %v943_v43  ;;  %v1000_v57 = vld [vmem:[%s7738_s7 + $0x1a0] sm:$0xff]  ;;  %v1002_v4 = vld [vmem:[%s7738_s7 + $0x1b0] sm:$0x3f]  ;;  %v1196_v23 = vrot.slane %v7971_v2, 5 }
  0xdf   : > { %1346 = vst [vmem:[#allocation2 + $0xa0] sm:$0xf8] %v1177_v63  ;;  %1347 = vst [vmem:[#allocation2 + $0x3a0] sm:$0xf8] %v1178_v0  ;;  %v1191_v63 = vrot.slane %v1054_v42, 5  ;;  %v1056_v0 = vadd.f32 %v1000_v57, %v944_v47  ;;  %v1058_v7 = vadd.f32 %v1002_v4, %v946_v3  ;;  %v1383_v27 = vld [vmem:[#allocation2 + $0x340] sm:$0xff] }
  0xe0   : > { %1342 = vst [vmem:[#allocation2 + $0xb8] sm:$0xff] %v7938_v17  ;;  %1343 = vst [vmem:[#allocation2 + $0x1e8] sm:$0xff] %v7941_v18  ;;  %v1193_v5 = vrot.slane %v1055_v55, 5  ;;  %v1003_v12 = vld [vmem:[%s7738_s7 + $0x1b8] sm:$0x3f]  ;;  %v1387_v33 = vld [vmem:[#allocation2 + $0x288] sm:$0xff] }
  0xe1   : > { %1350 = vst [vmem:[#allocation2 + $0x230] sm:$0x1] %v1179_v8  ;;  %9783 = vst [vmem:[#allocation24_spill] sm:$0xff] %v7953_v39  ;;  %v947_v8 = vld [vmem:[%s7734_s15 + $0x1b8] sm:$0x3f]  ;;  %v1197_v29 = vrot.slane %v1058_v7, 5 }
  0xe2   : > { %1351 = vst [vmem:[#allocation2 + $0x298] sm:$0x1] %v1181_v21  ;;  %1352 = vst [vmem:[#allocation2 + $0x318] sm:$0xf8] %v1183_v22  ;;  %v1195_v21 = vrot.slane %v1056_v0, 5  ;;  %v1059_v24 = vadd.f32 %v1003_v12, %v947_v8  ;;  %v7991_v22 = vsel %vm1116_vm0, %v1189_v53, %v1191_v63  ;;  %v7995_v30 = vsel %vm1116_vm0, %v1190_v62, %v1193_v5  ;;  %v1390_v35 = vld [vmem:[#allocation2 + $0xf0] sm:$0xff] }
  0xe3   : > { %1348 = vst [vmem:[#allocation2 + $0x2f8] sm:$0xff] %v7953_v39  ;;  %9784 = vst [vmem:[#allocation25_spill] sm:$0xff] %v7960_v50  ;;  %v7986_v25 = vld [vmem:[%s769_s12] sm:$0x3]  ;;  %v1391_v38 = vld [vmem:[#allocation2 + $0x8] sm:$0xff]  ;;  %v9697_v41 = vrot.slane %v7801_v46, 2 }
  0xe4   : > { %1353 = vst [vmem:[#allocation2 + $0x160] sm:$0xf8] %v1184_v28  ;;  %1349 = vst [vmem:[#allocation2 + $0x350] sm:$0xff] %v7960_v50  ;;  %v1386_v28 = vld [vmem:[#allocation2 + $0x2f0] sm:$0xff]  ;;  %v1199_v42 = vrot.slane %v1059_v24, 5  ;;  %v1394_v43 = vld [vmem:[#allocation2] sm:$0xff]  ;;  %v8003_v55 = vsel %vm1116_vm0, %v1195_v21, %v1197_v29 }
  0xe5   : > { %1356 = vst [vmem:[#allocation2 + $0x120] sm:$0x1] %v1185_v40  ;;  %1357 = vst [vmem:[#allocation2 + $0x140] sm:$0x1] %v1187_v51  ;;  %v9698_v40 = vrot.slane %v7789_v32, 2  ;;  %v1395_v45 = vld [vmem:[#allocation2 + $0x290] sm:$0xff] }
  0xe6   : > { %1358 = vst [vmem:[#allocation2 + $0x68] sm:$0xf8] %v1189_v53  ;;  %9785 = vst [vmem:[#allocation26_spill] sm:$0xff] %v7978_v14  ;;  %v1398_v47 = vld [vmem:[#allocation2 + $0x70] sm:$0xff]  ;;  %v9696_v51 = vrot.slane %v7808_v54, 2  ;;  %v9695_v53 = vrot.slane %v7821_v10, 2  ;;  %v8014_v2 = vsel %vm1116_vm0, %v1196_v23, %v1199_v42 }
  0xe7   : > { %9786 = vst [vmem:[#allocation27_spill] sm:$0xff] %v7981_v15  ;;  %2352 = vst [vmem:[#allocation3 + $0x590] sm:$0x3f] %v9699_v60  ;;  %v1399_v57 = vld [vmem:[#allocation2 + $0x210] sm:$0xff]  ;;  %v1402_v58 = vld [vmem:[#allocation2 + $0x358] sm:$0xff]  ;;  %v9692_v0 = vrot.slane %v7847_v26, 2 }
  0xe8   : > { %1359 = vst [vmem:[#allocation2 + $0xd0] sm:$0xf8] %v1190_v62  ;;  %1362 = vst [vmem:[#allocation2 + $0x258] sm:$0x1] %v1191_v63  ;;  %v1403_v59 = vld [vmem:[#allocation2 + $0x2c0] sm:$0xff]  ;;  %v9694_v62 = vrot.slane %v7824_v11, 2 }
  0xe9   : > { %9787 = vst [vmem:[#allocation28_spill] sm:$0xff] %v7986_v25  ;;  %1354 = vst [vmem:[#allocation2 + $0x88] sm:$0xff] %v7978_v14  ;;  %v9693_v63 = vrot.slane %v7840_v19, 2  ;;  %v1406_v3 = vld [vmem:[#allocation2 + $0xa8] sm:$0xff]  ;;  %v1407_v4 = vld [vmem:[#allocation2 + $0x300] sm:$0xff]  ;;  %v9691_v7 = vrot.slane %v7862_v48, 2 }
  0xea   : > { %1355 = vst [vmem:[#allocation2 + $0x28] sm:$0xff] %v7981_v15  ;;  %9788 = vst [vmem:[#allocation29_spill] sm:$0xff] %v7991_v22  ;;  %v9690_v8 = vrot.slane %v7865_v49, 2  ;;  %v9689_v12 = vrot.slane %v7877_v1, 2  ;;  %v9688_v24 = vrot.slane %v7884_v9, 2 }
  0xeb   : > { %1462 = vst [vmem:[#allocation3 + $0x60] sm:$0xff] %v1382_v16  ;;  %1363 = vst [vmem:[#allocation2 + $0x220] sm:$0x1] %v1193_v5  ;;  %v1410_v5 = vld [vmem:[#allocation2 + $0x2e8] sm:$0xff]  ;;  %v1411_v16 = vld [vmem:[#allocation2 + $0x1f0] sm:$0xff] }
  0xec   : > { %1360 = vst [vmem:[#allocation2 + $0x180] sm:$0xff] %v7991_v22  ;;  %9789 = vst [vmem:[#allocation30_spill] sm:$0xff] %v7995_v30  ;;  %v8145_v60 = vld [vmem:[#allocation2 + $0x370] sm:$0x7f]  ;;  %v8147_v20 = vld [vmem:[#allocation2 + $0x328] sm:$0x7f] }
  0xed   : > { %1463 = vst [vmem:[#allocation3 + $0x68] sm:$0xff] %v1383_v27  ;;  %1466 = vst [vmem:[#allocation3 + $0x80] sm:$0xff] %v1386_v28  ;;  %v9687_v27 = vrot.slane %v7897_v36, 2  ;;  %v9686_v28 = vrot.slane %v7900_v37, 2  ;;  %v9714_v61 = vrot.slane %v8145_v60, 1 }
  0xee   : > { %1364 = vst [vmem:[#allocation2 + $0x2a0] sm:$0xf8] %v1195_v21  ;;  %1365 = vst [vmem:[#allocation2 + $0x1a0] sm:$0xf8] %v1196_v23  ;;  %v1414_v21 = vld [vmem:[#allocation2 + $0x228] sm:$0xff]  ;;  %v1415_v23 = vld [vmem:[#allocation2 + $0x170] sm:$0xff] }
  0xef   : > { %1361 = vst [vmem:[#allocation2 + $0x378] sm:$0xff] %v7995_v30  ;;  %1467 = vst [vmem:[#allocation3 + $0x88] sm:$0xff] %v1387_v33  ;;  %v1419_v33 = vld [vmem:[#allocation2 + $0x250] sm:$0xff]  ;;  %v8265_v37 = vld [vmem:[#allocation2 + $0x1c8] sm:$0x7f] }
  0xf0   : > { %1470 = vst [vmem:[#allocation3 + $0xa0] sm:$0xff] %v1390_v35  ;;  %1471 = vst [vmem:[#allocation3 + $0xa8] sm:$0xff] %v1391_v38  ;;  %v1422_v35 = vld [vmem:[#allocation2 + $0xa0] sm:$0xff]  ;;  %v9684_v38 = vrot.slane %v7916_v44, 2  ;;  %v1530_v9 = vld [vmem:[#allocation2 + $0x2b0] sm:$0xfe] }
  0xf1   : > { %1368 = vst [vmem:[#allocation2 + $0x1e0] sm:$0x1] %v1197_v29  ;;  %9790 = vst [vmem:[#allocation31_spill] sm:$0xff] %v8003_v55  ;;  %v1418_v29 = vld [vmem:[#allocation2 + $0xf8] sm:$0xff]  ;;  %v1691_v49 = vrot.slane %v1530_v9, 1 }
  0xf2   : > { %1474 = vst [vmem:[#allocation3 + $0xc0] sm:$0xff] %v1394_v43  ;;  %1475 = vst [vmem:[#allocation3 + $0xc8] sm:$0xff] %v1395_v45  ;;  %v9682_v43 = vrot.slane %v7938_v17, 2  ;;  %v1423_v45 = vld [vmem:[#allocation2 + $0x3a0] sm:$0xff]  ;;  %v1534_v48 = vld [vmem:[#allocation2 + $0x330] sm:$0xfe] }
  0xf3   : > { %1478 = vst [vmem:[#allocation3 + $0xe0] sm:$0xff] %v1398_v47  ;;  %2353 = vst [vmem:[#allocation3 + $0x598] sm:$0x3f] %v9698_v40  ;;  %v1426_v47 = vld [vmem:[#allocation2 + $0x318] sm:$0xff]  ;;  %v8268_v17 = vld [vmem:[#allocation2 + $0x80] sm:$0xff] }
  0xf4   : > { %2356 = vst [vmem:[#allocation3 + $0x5b0] sm:$0x3f] %v9697_v41  ;;  %1369 = vst [vmem:[#allocation2 + $0x100] sm:$0x1] %v1199_v42  ;;  %v9683_v42 = vrot.slane %v7923_v56, 2 }
  0xf5   : > { %1366 = vst [vmem:[#allocation2 + $0x58] sm:$0xff] %v8003_v55  ;;  %9791 = vst [vmem:[#allocation32_spill] sm:$0xff] %v8014_v2  ;;  %v8255_v56 = vld [vmem:[#allocation2 + $0x3b8] sm:$0x7f]  ;;  %v1535_v26 = vld [vmem:[#allocation2 + $0x48] sm:$0xfe] }
  0xf6   : > { %1479 = vst [vmem:[#allocation3 + $0xe8] sm:$0xff] %v1399_v57  ;;  %1482 = vst [vmem:[#allocation3 + $0x100] sm:$0xff] %v1402_v58  ;;  %v1427_v57 = vld [vmem:[#allocation2 + $0x160] sm:$0xff]  ;;  %v9681_v58 = vrot.slane %v7941_v18, 2  ;;  %v8245_v18 = vld [vmem:[#allocation2 + $0x190] sm:$0x7f] }
  0xf7   : > { %1483 = vst [vmem:[#allocation3 + $0x108] sm:$0xff] %v1403_v59  ;;  %2357 = vst [vmem:[#allocation3 + $0x5b8] sm:$0x3f] %v9696_v51  ;;  %v9676_v59 = vrot.slane %v7953_v39, 2  ;;  %v8137_v51 = vld [vmem:[#allocation2 + $0x308] sm:$0x7f] }
  0xf8   : > { %2360 = vst [vmem:[#allocation3 + $0x5d0] sm:$0x3f] %v9695_v53  ;;  %1367 = vst [vmem:[#allocation2 + $0x208] sm:$0xff] %v8014_v2  ;;  %v8135_v53 = vld [vmem:[#allocation2 + $0xe0] sm:$0x7f]  ;;  %v9712_v40 = vrot.slane %v8137_v51, 1 }
  0xf9   : > { %1486 = vst [vmem:[#allocation3 + $0x120] sm:$0xff] %v1406_v3  ;;  %1487 = vst [vmem:[#allocation3 + $0x128] sm:$0xff] %v1407_v4  ;;  %v9675_v3 = vrot.slane %v7960_v50, 2  ;;  %v1430_v4 = vld [vmem:[#allocation2 + $0x68] sm:$0xff]  ;;  %v9710_v41 = vrot.slane %v8135_v53, 1  ;;  %v1700_v19 = vrot.slane %v1535_v26, 1 }
  0xfa   : > { %1490 = vst [vmem:[#allocation3 + $0x140] sm:$0xff] %v1410_v5  ;;  %2361 = vst [vmem:[#allocation3 + $0x5d8] sm:$0x3f] %v9694_v62  ;;  %v1431_v5 = vld [vmem:[#allocation2 + $0xd0] sm:$0xff]  ;;  %v1538_v11 = vld [vmem:[#allocation2 + $0x320] sm:$0xfe] }
  0xfb   : > { %2364 = vst [vmem:[#allocation3 + $0x5f0] sm:$0x3f] %v9693_v63  ;;  %2365 = vst [vmem:[#allocation3 + $0x5f8] sm:$0x3f] %v9692_v0  ;;  %v8127_v0 = vld [vmem:[#allocation2 + $0x188] sm:$0x7f] }
  0xfc   : > { %1491 = vst [vmem:[#allocation3 + $0x148] sm:$0xff] %v1411_v16  ;;  %1494 = vst [vmem:[#allocation3 + $0x160] sm:$0xff] %v1414_v21  ;;  %v1372_v16 = vld [vmem:[#allocation2 + $0xd8] sm:$0x3f]  ;;  %v9679_v21 = vrot.slane %v7978_v14, 2  ;;  %v9708_v62 = vrot.slane %v8127_v0, 1 }
  0xfd   : > { %1495 = vst [vmem:[#allocation3 + $0x168] sm:$0xff] %v1415_v23  ;;  %2368 = vst [vmem:[#allocation3 + $0x610] sm:$0x3f] %v9691_v7  ;;  %v9677_v23 = vrot.slane %v7981_v15, 2  ;;  %v8125_v7 = vld [vmem:[#allocation2 + $0x200] sm:$0x7f] }
  0xfe   : > { %2369 = vst [vmem:[#allocation3 + $0x618] sm:$0x3f] %v9690_v8  ;;  %2372 = vst [vmem:[#allocation3 + $0x630] sm:$0x3f] %v9689_v12  ;;  %v9706_v63 = vrot.slane %v8125_v7, 1 }
  0xff   : > { %1498 = vst [vmem:[#allocation3 + $0x180] sm:$0xff] %v1418_v29  ;;  %1499 = vst [vmem:[#allocation3 + $0x188] sm:$0xff] %v1419_v33  ;;  %v1434_v29 = vld [vmem:[#allocation2 + $0x2a0] sm:$0xff]  ;;  %v8225_v15 = vld [vmem:[#allocation2 + $0x378] sm:$0x7f] }
 0x100   : > { %1502 = vst [vmem:[#allocation3 + $0x1a0] sm:$0xff] %v1422_v35  ;;  %2373 = vst [vmem:[#allocation3 + $0x638] sm:$0x3f] %v9688_v24  ;;  %v1435_v33 = vld [vmem:[#allocation2 + $0x1a0] sm:$0xff]  ;;  %v1373_v35 = vld [vmem:[#allocation2 + $0x18] sm:$0x3f] }
 0x101   : > { %2376 = vst [vmem:[#allocation3 + $0x650] sm:$0x3f] %v9687_v27  ;;  %2377 = vst [vmem:[#allocation3 + $0x658] sm:$0x3f] %v9686_v28  ;;  %v8115_v27 = vld [vmem:[#allocation2 + $0x130] sm:$0x7f] }
 0x102   : > { %1503 = vst [vmem:[#allocation3 + $0x1a8] sm:$0xff] %v1423_v45  ;;  %1506 = vst [vmem:[#allocation3 + $0x1c0] sm:$0xff] %v1426_v47  ;;  %v9678_v45 = vrot.slane %v7991_v22, 2  ;;  %v9680_v47 = vrot.slane %v7995_v30, 2  ;;  %v8117_v24 = vld [vmem:[#allocation2 + $0x148] sm:$0x7f] }
 0x103   : > { %1507 = vst [vmem:[#allocation3 + $0x1c8] sm:$0xff] %v1427_v57  ;;  %2380 = vst [vmem:[#allocation3 + $0x670] sm:$0x3f] %v9684_v38  ;;  %v1376_v57 = vld [vmem:[#allocation2 + $0x380] sm:$0x3f]  ;;  %v9702_v12 = vrot.slane %v8115_v27, 1 }
 0x104   : > { %2381 = vst [vmem:[#allocation3 + $0x678] sm:$0x3f] %v9683_v42  ;;  %2384 = vst [vmem:[#allocation3 + $0x690] sm:$0x3f] %v9682_v43  ;;  %v8105_v42 = vld [vmem:[#allocation2 + $0x1a8] sm:$0x7f] }
 0x105   : > { %1510 = vst [vmem:[#allocation3 + $0x1e0] sm:$0xff] %v1430_v4  ;;  %1511 = vst [vmem:[#allocation3 + $0x1e8] sm:$0xff] %v1431_v5  ;;  %v1377_v4 = vld [vmem:[#allocation2 + $0x110] sm:$0x3f]  ;;  %v1380_v5 = vld [vmem:[#allocation2 + $0x108] sm:$0x3f] }
 0x106   : > { %1452 = vst [vmem:[#allocation3 + $0x10] sm:$0x3f] %v1372_v16  ;;  %2385 = vst [vmem:[#allocation3 + $0x698] sm:$0x3f] %v9681_v58  ;;  %v1381_v16 = vld [vmem:[#allocation2 + $0x60] sm:$0x3f] }
 0x107   : > { %2388 = vst [vmem:[#allocation3 + $0x6b0] sm:$0x3f] %v9676_v59  ;;  %2389 = vst [vmem:[#allocation3 + $0x6b8] sm:$0x3f] %v9675_v3  ;;  %v1384_v3 = vld [vmem:[#allocation2 + $0x80] sm:$0x3f] }
 0x108   : > { %1514 = vst [vmem:[#allocation3 + $0x200] sm:$0xff] %v1434_v29  ;;  %1515 = vst [vmem:[#allocation3 + $0x208] sm:$0xff] %v1435_v33  ;;  %v1385_v59 = vld [vmem:[#allocation2 + $0x1a8] sm:$0x3f]  ;;  %v1388_v29 = vld [vmem:[#allocation2 + $0x360] sm:$0x3f] }
 0x109   : > { %1453 = vst [vmem:[#allocation3 + $0x18] sm:$0x3f] %v1373_v35  ;;  %2392 = vst [vmem:[#allocation3 + $0x6d0] sm:$0x3f] %v9679_v21  ;;  %v1389_v33 = vld [vmem:[#allocation2 + $0x130] sm:$0x3f] }
 0x10a   : > { %2393 = vst [vmem:[#allocation3 + $0x6d8] sm:$0x3f] %v9677_v23  ;;  %1456 = vst [vmem:[#allocation3 + $0x30] sm:$0x3f] %v1376_v57  ;;  %v1392_v35 = vld [vmem:[#allocation2 + $0x148] sm:$0x3f] }
 0x10b   : > { %1457 = vst [vmem:[#allocation3 + $0x38] sm:$0x3f] %v1377_v4  ;;  %1460 = vst [vmem:[#allocation3 + $0x50] sm:$0x3f] %v1380_v5  ;;  %v1393_v57 = vld [vmem:[#allocation2 + $0x200] sm:$0x3f] }
 0x10c   : > { %2396 = vst [vmem:[#allocation3 + $0x6f0] sm:$0x3f] %v9678_v45  ;;  %2397 = vst [vmem:[#allocation3 + $0x6f8] sm:$0x3f] %v9680_v47  ;;  %v1396_v4 = vld [vmem:[#allocation2 + $0x188] sm:$0x3f] }
 0x10d   : > { %1461 = vst [vmem:[#allocation3 + $0x58] sm:$0x3f] %v1381_v16  ;;  %1464 = vst [vmem:[#allocation3 + $0x70] sm:$0x3f] %v1384_v3  ;;  %v1397_v5 = vld [vmem:[#allocation2 + $0xe0] sm:$0x3f] }
 0x10e   : > { %1465 = vst [vmem:[#allocation3 + $0x78] sm:$0x3f] %v1385_v59  ;;  %1468 = vst [vmem:[#allocation3 + $0x90] sm:$0x3f] %v1388_v29  ;;  %v1400_v23 = vld [vmem:[#allocation2 + $0x308] sm:$0x3f] }
 0x10f   : > { %1469 = vst [vmem:[#allocation3 + $0x98] sm:$0x3f] %v1389_v33  ;;  %1472 = vst [vmem:[#allocation3 + $0xb0] sm:$0x3f] %v1392_v35  ;;  %v1401_v45 = vld [vmem:[#allocation2 + $0x370] sm:$0x3f] }
 0x110   : > { %1473 = vst [vmem:[#allocation3 + $0xb8] sm:$0x3f] %v1393_v57  ;;  %1476 = vst [vmem:[#allocation3 + $0xd0] sm:$0x3f] %v1396_v4  ;;  %v1404_v21 = vld [vmem:[#allocation2 + $0x328] sm:$0x3f] }
 0x111   : > { %1477 = vst [vmem:[#allocation3 + $0xd8] sm:$0x3f] %v1397_v5  ;;  %1480 = vst [vmem:[#allocation3 + $0xf0] sm:$0x3f] %v1400_v23  ;;  %v1405_v3 = vld [vmem:[#allocation2 + $0x238] sm:$0x3f] }
 0x112   : > { %1481 = vst [vmem:[#allocation3 + $0xf8] sm:$0x3f] %v1401_v45  ;;  %1484 = vst [vmem:[#allocation3 + $0x110] sm:$0x3f] %v1404_v21  ;;  %v1408_v59 = vld [vmem:[#allocation2 + $0xe8] sm:$0x3f] }
 0x113   : > { %v1409_v16 = vld [vmem:[#allocation2 + $0x20] sm:$0x3f]  ;;  %1485 = vst [vmem:[#allocation3 + $0x118] sm:$0x3f] %v1405_v3  ;;  %1488 = vst [vmem:[#allocation3 + $0x130] sm:$0x3f] %v1408_v59 }
 0x114   : > { %1489 = vst [vmem:[#allocation3 + $0x138] sm:$0x3f] %v1409_v16  ;;  %v1412_v29 = vld [vmem:[#allocation2 + $0x38] sm:$0x3f]  ;;  %v1413_v33 = vld [vmem:[#allocation2 + $0x2d0] sm:$0x3f] }
 0x115   : > { %v1416_v35 = vld [vmem:[#allocation2 + $0x280] sm:$0x3f]  ;;  %1492 = vst [vmem:[#allocation3 + $0x150] sm:$0x3f] %v1412_v29  ;;  %1493 = vst [vmem:[#allocation3 + $0x158] sm:$0x3f] %v1413_v33 }
 0x116   : > { %1496 = vst [vmem:[#allocation3 + $0x170] sm:$0x3f] %v1416_v35  ;;  %v1417_v57 = vld [vmem:[#allocation2 + $0x138] sm:$0x3f]  ;;  %v1421_v5 = vld [vmem:[#allocation2 + $0x1e8] sm:$0x3f] }
 0x117   : > { %v1420_v4 = vld [vmem:[#allocation2 + $0xb8] sm:$0x3f]  ;;  %1497 = vst [vmem:[#allocation3 + $0x178] sm:$0x3f] %v1417_v57  ;;  %1501 = vst [vmem:[#allocation3 + $0x198] sm:$0x3f] %v1421_v5 }
 0x118   : > { %1500 = vst [vmem:[#allocation3 + $0x190] sm:$0x3f] %v1420_v4  ;;  %v1424_v23 = vld [vmem:[#allocation2 + $0x2f8] sm:$0x3f]  ;;  %v1425_v21 = vld [vmem:[#allocation2 + $0x350] sm:$0x3f] }
 0x119   : > { %v1428_v45 = vld [vmem:[#allocation2 + $0x88] sm:$0x3f]  ;;  %1504 = vst [vmem:[#allocation3 + $0x1b0] sm:$0x3f] %v1424_v23  ;;  %1505 = vst [vmem:[#allocation3 + $0x1b8] sm:$0x3f] %v1425_v21 }
 0x11a   : > { %1508 = vst [vmem:[#allocation3 + $0x1d0] sm:$0x3f] %v1428_v45  ;;  %v1429_v3 = vld [vmem:[#allocation2 + $0x28] sm:$0x3f]  ;;  %v1432_v59 = vld [vmem:[#allocation2 + $0x180] sm:$0x3f] }
 0x11b   : > { %v1433_v16 = vld [vmem:[#allocation2 + $0x378] sm:$0x3f]  ;;  %1509 = vst [vmem:[#allocation3 + $0x1d8] sm:$0x3f] %v1429_v3  ;;  %1512 = vst [vmem:[#allocation3 + $0x1f0] sm:$0x3f] %v1432_v59 }
 0x11c   : > { %1513 = vst [vmem:[#allocation3 + $0x1f8] sm:$0x3f] %v1433_v16  ;;  %v1436_v29 = vld [vmem:[#allocation2 + $0x58] sm:$0x3f]  ;;  %v1437_v33 = vld [vmem:[#allocation2 + $0x208] sm:$0x3f] }
 0x11d   : > { %v1440_v35 = vld [vmem:[#allocation2 + $0x248] sm:$0x3f]  ;;  %1516 = vst [vmem:[#allocation3 + $0x210] sm:$0x3f] %v1436_v29  ;;  %1517 = vst [vmem:[#allocation3 + $0x218] sm:$0x3f] %v1437_v33 }
 0x11e   : > { %1520 = vst [vmem:[#allocation3 + $0x230] sm:$0x3f] %v1440_v35  ;;  %v1441_v57 = vld [vmem:[#allocation2 + $0x190] sm:$0x3f]  ;;  %v1444_v4 = vld [vmem:[#allocation2 + $0xc8] sm:$0x3f] }
 0x11f   : > { %v1445_v5 = vld [vmem:[#allocation2 + $0x3b8] sm:$0x3f]  ;;  %1521 = vst [vmem:[#allocation3 + $0x238] sm:$0x3f] %v1441_v57  ;;  %1524 = vst [vmem:[#allocation3 + $0x250] sm:$0x3f] %v1444_v4 }
 0x120   : > { %1525 = vst [vmem:[#allocation3 + $0x258] sm:$0x3f] %v1445_v5  ;;  %v1448_v23 = vld [vmem:[#allocation2 + $0x2d8] sm:$0x3f]  ;;  %v1449_v21 = vld [vmem:[#allocation2 + $0x1c8] sm:$0x3f] }
 0x121   : > { %v8075_v45 = vld [vmem:[#allocation2 + $0xd8] sm:$0x7f]  ;;  %1528 = vst [vmem:[#allocation3 + $0x270] sm:$0x3f] %v1448_v23  ;;  %1529 = vst [vmem:[#allocation3 + $0x278] sm:$0x3f] %v1449_v21 }
 0x122   : > { %v9719_v3 = vrot.slane %v8075_v45, 1  ;;  %v8078_v59 = vld [vmem:[#allocation2 + $0x18] sm:$0x7f]  ;;  %v8080_v16 = vld [vmem:[#allocation2 + $0x380] sm:$0x7f]  ;;  %v9685_v29 = vrot.slane %v8003_v55, 2 }
 0x123   : > { %v9717_v33 = vrot.slane %v8078_v59, 1  ;;  %v9715_v35 = vrot.slane %v8080_v16, 1  ;;  %v8085_v57 = vld [vmem:[#allocation2 + $0x110] sm:$0x7f]  ;;  %v8087_v4 = vld [vmem:[#allocation2 + $0x108] sm:$0x7f] }
 0x124   : > { %1894 = vst [vmem:[#allocation3 + $0x290] sm:$0x3f] %v9719_v3  ;;  %v9713_v5 = vrot.slane %v8085_v57, 1  ;;  %v9711_v23 = vrot.slane %v8087_v4, 1  ;;  %v8093_v21 = vld [vmem:[#allocation2 + $0x60] sm:$0x7f] }
 0x125   : > { %v8095_v47 = vld [vmem:[#allocation2 + $0x80] sm:$0x7f]  ;;  %2400 = vst [vmem:[#allocation3 + $0x710] sm:$0x3f] %v9685_v29  ;;  %1895 = vst [vmem:[#allocation3 + $0x298] sm:$0x3f] %v9717_v33 }
 0x126   : > { %1898 = vst [vmem:[#allocation3 + $0x2b0] sm:$0x3f] %v9715_v35  ;;  %v9709_v58 = vrot.slane %v8093_v21, 1  ;;  %v9707_v43 = vrot.slane %v8095_v47, 1  ;;  %v8107_v38 = vld [vmem:[#allocation2 + $0x360] sm:$0x7f] }
 0x127   : > { %1899 = vst [vmem:[#allocation3 + $0x2b8] sm:$0x3f] %v9713_v5  ;;  %1902 = vst [vmem:[#allocation3 + $0x2d0] sm:$0x3f] %v9711_v23  ;;  %v9705_v29 = vrot.slane %v8105_v42, 1  ;;  %v9703_v28 = vrot.slane %v8107_v38, 1 }
 0x128   : > { %1903 = vst [vmem:[#allocation3 + $0x2d8] sm:$0x3f] %v9709_v58  ;;  %1906 = vst [vmem:[#allocation3 + $0x2f0] sm:$0x3f] %v9707_v43  ;;  %v9704_v8 = vrot.slane %v8117_v24, 1  ;;  %v9744_v14 = vrot.slane %v8225_v15, 1 }
 0x129   : > { %1907 = vst [vmem:[#allocation3 + $0x2f8] sm:$0x3f] %v9705_v29  ;;  %1910 = vst [vmem:[#allocation3 + $0x310] sm:$0x3f] %v9703_v28  ;;  %v8155_v28 = vld [vmem:[#allocation2 + $0x238] sm:$0x7f] }
 0x12a   : > { %1911 = vst [vmem:[#allocation3 + $0x318] sm:$0x3f] %v9702_v12  ;;  %1914 = vst [vmem:[#allocation3 + $0x330] sm:$0x3f] %v9704_v8  ;;  %v9716_v12 = vrot.slane %v8147_v20, 1  ;;  %v9718_v29 = vrot.slane %v8155_v28, 1 }
 0x12b   : > { %1915 = vst [vmem:[#allocation3 + $0x338] sm:$0x3f] %v9706_v63  ;;  %1918 = vst [vmem:[#allocation3 + $0x350] sm:$0x3f] %v9708_v62  ;;  %v8157_v8 = vld [vmem:[#allocation2 + $0xe8] sm:$0x7f] }
 0x12c   : > { %1919 = vst [vmem:[#allocation3 + $0x358] sm:$0x3f] %v9710_v41  ;;  %1922 = vst [vmem:[#allocation3 + $0x370] sm:$0x3f] %v9712_v40  ;;  %v9720_v63 = vrot.slane %v8157_v8, 1 }
 0x12d   : > { %v8165_v43 = vld [vmem:[#allocation2 + $0x20] sm:$0x7f]  ;;  %v8167_v62 = vld [vmem:[#allocation2 + $0x38] sm:$0x7f]  ;;  %1923 = vst [vmem:[#allocation3 + $0x378] sm:$0x3f] %v9714_v61 }
 0x12e   : > { %1926 = vst [vmem:[#allocation3 + $0x390] sm:$0x3f] %v9716_v12  ;;  %v9721_v58 = vrot.slane %v8165_v43, 1  ;;  %v9723_v41 = vrot.slane %v8167_v62, 1  ;;  %v8175_v23 = vld [vmem:[#allocation2 + $0x2d0] sm:$0x7f] }
 0x12f   : > { %v8177_v40 = vld [vmem:[#allocation2 + $0x280] sm:$0x7f]  ;;  %1927 = vst [vmem:[#allocation3 + $0x398] sm:$0x3f] %v9718_v29  ;;  %1930 = vst [vmem:[#allocation3 + $0x3b0] sm:$0x3f] %v9720_v63 }
 0x130   : > { %v9726_v5 = vrot.slane %v8175_v23, 1  ;;  %v9728_v61 = vrot.slane %v8177_v40, 1  ;;  %v8185_v35 = vld [vmem:[#allocation2 + $0x138] sm:$0x7f]  ;;  %1931 = vst [vmem:[#allocation3 + $0x3b8] sm:$0x3f] %v9721_v58 }
 0x131   : > { %v8187_v12 = vld [vmem:[#allocation2 + $0xb8] sm:$0x7f]  ;;  %1934 = vst [vmem:[#allocation3 + $0x3d0] sm:$0x3f] %v9723_v41  ;;  %v8195_v3 = vld [vmem:[#allocation2 + $0x1e8] sm:$0x7f] }
 0x132   : > { %v8197_v63 = vld [vmem:[#allocation2 + $0x2f8] sm:$0x7f]  ;;  %1935 = vst [vmem:[#allocation3 + $0x3d8] sm:$0x3f] %v9726_v5  ;;  %1938 = vst [vmem:[#allocation3 + $0x3f0] sm:$0x3f] %v9728_v61 }
 0x133   : > { %v9732_v58 = vrot.slane %v8195_v3, 1  ;;  %v9734_v25 = vrot.slane %v8197_v63, 1  ;;  %v8205_v41 = vld [vmem:[#allocation2 + $0x350] sm:$0x7f]  ;;  %v8207_v33 = vld [vmem:[#allocation2 + $0x88] sm:$0x7f] }
 0x134   : > { %v9792_v29 = vrot.slane %v8185_v35, 1  ;;  %v9793_v52 = vrot.slane %v8187_v12, 1  ;;  %v9736_v55 = vrot.slane %v8205_v41, 1  ;;  %v9738_v5 = vrot.slane %v8207_v33, 1  ;;  %v8215_v30 = vld [vmem:[#allocation2 + $0x28] sm:$0x7f] }
 0x135   : > { %v8217_v61 = vld [vmem:[#allocation2 + $0x180] sm:$0x7f]  ;;  %1943 = vst [vmem:[#allocation3 + $0x418] sm:$0x3f] %v9732_v58  ;;  %1946 = vst [vmem:[#allocation3 + $0x430] sm:$0x3f] %v9734_v25 }
 0x136   : > { %1939 = vst [vmem:[#allocation3 + $0x3f8] sm:$0x3f] %v9792_v29  ;;  %1942 = vst [vmem:[#allocation3 + $0x410] sm:$0x3f] %v9793_v52  ;;  %v9740_v22 = vrot.slane %v8215_v30, 1  ;;  %v9742_v29 = vrot.slane %v8217_v61, 1 }
 0x137   : > { %v8227_v52 = vld [vmem:[#allocation2 + $0x58] sm:$0x7f]  ;;  %1947 = vst [vmem:[#allocation3 + $0x438] sm:$0x3f] %v9736_v55  ;;  %1950 = vst [vmem:[#allocation3 + $0x450] sm:$0x3f] %v9738_v5 }
 0x138   : > { %v9746_v58 = vrot.slane %v8227_v52, 1  ;;  %v8235_v50 = vld [vmem:[#allocation2 + $0x208] sm:$0x7f]  ;;  %1951 = vst [vmem:[#allocation3 + $0x458] sm:$0x3f] %v9740_v22  ;;  %9794 = vst [vmem:[#allocation33_spill] sm:$0xff] %v8268_v17 }
 0x139   : > { %v8237_v25 = vld [vmem:[#allocation2 + $0x248] sm:$0x7f]  ;;  %1954 = vst [vmem:[#allocation3 + $0x470] sm:$0x3f] %v9742_v29  ;;  %v9748_v39 = vrot.slane %v8235_v50, 1  ;;  %v9795_v22 = vrot.slane %v8245_v18, 1 }
 0x13a   : > { %v9750_v55 = vrot.slane %v8237_v25, 1  ;;  %v8247_v5 = vld [vmem:[#allocation2 + $0xc8] sm:$0x7f]  ;;  %1955 = vst [vmem:[#allocation3 + $0x478] sm:$0x3f] %v9744_v14  ;;  %v9797_v14 = vrot.slane %v8255_v56, 1 }
 0x13b   : > { %1958 = vst [vmem:[#allocation3 + $0x490] sm:$0x3f] %v9746_v58  ;;  %v8257_v29 = vld [vmem:[#allocation2 + $0x2d8] sm:$0x7f]  ;;  %1959 = vst [vmem:[#allocation3 + $0x498] sm:$0x3f] %v9748_v39 }
 0x13c   : > { %1962 = vst [vmem:[#allocation3 + $0x4b0] sm:$0x3f] %v9750_v55  ;;  %v9760_v58 = vrot.slane %v8014_v2, 2  ;;  %1963 = vst [vmem:[#allocation3 + $0x4b8] sm:$0x3f] %v9795_v22  ;;  %v9796_v36 = vrot.slane %v8247_v5, 1 }
 0x13d   : > { %v9762_v39 = vrot.slane %v8265_v37, 1  ;;  %v1531_v55 = vld [vmem:[#allocation2 + $0x3b0] sm:$0xfe]  ;;  %1967 = vst [vmem:[#allocation3 + $0x4d8] sm:$0x3f] %v9797_v14  ;;  %v9798_v1 = vrot.slane %v8257_v29, 1 }
 0x13e   : > { %1966 = vst [vmem:[#allocation3 + $0x4d0] sm:$0x3f] %v9796_v36  ;;  %2401 = vst [vmem:[#allocation3 + $0x718] sm:$0x3f] %v9760_v58  ;;  %v1694_v22 = vrot.slane %v1531_v55, 1  ;;  %v1697_v36 = vrot.slane %v1534_v48, 1 }
 0x13f   : > { %1970 = vst [vmem:[#allocation3 + $0x4f0] sm:$0x3f] %v9798_v1  ;;  %1971 = vst [vmem:[#allocation3 + $0x4f8] sm:$0x3f] %v9762_v39  ;;  %v1539_v44 = vld [vmem:[#allocation2 + $0x150] sm:$0xfe] }
 0x140   : > { %v9799_v17 = vrot.slane %v8075_v45, 1  ;;  %v9800_v1 = vrot.slane %v8078_v59, 1  ;;  %v1703_v58 = vrot.slane %v1538_v11, 1  ;;  %v1706_v9 = vrot.slane %v1539_v44, 1  ;;  %v1542_v55 = vld [vmem:[#allocation2 + $0x338] sm:$0xfe] }
 0x141   : > { %v1543_v10 = vld [vmem:[#allocation2 + $0x340] sm:$0xfe]  ;;  %v9801_v39 = vrot.slane %v8080_v16, 1  ;;  %v9802_v48 = vrot.slane %v8085_v57, 1  ;;  %v1709_v54 = vrot.slane %v1542_v55, 1  ;;  %v9803_v11 = vrot.slane %v8087_v4, 1 }
 0x142   : > { %v1693_v14 = vsel %vm1690_vm1, %v1691_v49, %v9799_v17  ;;  %v1696_v2 = vsel %vm1690_vm1, %v1694_v22, %v9800_v1  ;;  %v1712_v49 = vrot.slane %v1543_v10, 1  ;;  %v1546_v17 = vld [vmem:[#allocation2 + $0x2f0] sm:$0xfe]  ;;  %v1547_v59 = vld [vmem:[#allocation2 + $0x288] sm:$0xfe]  ;;  %v9805_v10 = vrot.slane %v8095_v47, 1 }
 0x143   : > { %1892 = vst [vmem:[#allocation3 + $0x280] sm:$0xff] %v1693_v14  ;;  %1893 = vst [vmem:[#allocation3 + $0x288] sm:$0xff] %v1696_v2  ;;  %v1699_v26 = vsel %vm1690_vm1, %v1697_v36, %v9801_v39  ;;  %v1702_v45 = vsel %vm1690_vm1, %v1700_v19, %v9802_v48  ;;  %v1705_v44 = vsel %vm1690_vm1, %v1703_v58, %v9803_v11  ;;  %v9804_v2 = vrot.slane %v8093_v21, 1  ;;  %v1550_v36 = vld [vmem:[#allocation2 + $0xf0] sm:$0xfe] }
 0x144   : > { %1896 = vst [vmem:[#allocation3 + $0x2a0] sm:$0xff] %v1699_v26  ;;  %1897 = vst [vmem:[#allocation3 + $0x2a8] sm:$0xff] %v1702_v45  ;;  %v1715_v22 = vrot.slane %v1546_v17, 1  ;;  %v1718_v39 = vrot.slane %v1547_v59, 1  ;;  %v1551_v57 = vld [vmem:[#allocation2 + $0x8] sm:$0xfe]  ;;  %v1711_v19 = vsel %vm1690_vm1, %v1709_v54, %v9805_v10 }
 0x145   : > { %v1708_v16 = vsel %vm1690_vm1, %v1706_v9, %v9804_v2  ;;  %1900 = vst [vmem:[#allocation3 + $0x2c0] sm:$0xff] %v1705_v44  ;;  %v9806_v14 = vrot.slane %v8105_v42, 1  ;;  %v1721_v1 = vrot.slane %v1550_v36, 1  ;;  %v1724_v58 = vrot.slane %v1551_v57, 1  ;;  %v1554_v55 = vld [vmem:[#allocation2] sm:$0xfe] }
 0x146   : > { %1901 = vst [vmem:[#allocation3 + $0x2c8] sm:$0xff] %v1708_v16  ;;  %v1555_v21 = vld [vmem:[#allocation2 + $0x290] sm:$0xfe]  ;;  %1904 = vst [vmem:[#allocation3 + $0x2e0] sm:$0xff] %v1711_v19  ;;  %v9807_v9 = vrot.slane %v8107_v38, 1  ;;  %v9808_v48 = vrot.slane %v8115_v27, 1 }
 0x147   : > { %v1714_v4 = vsel %vm1690_vm1, %v1712_v49, %v9806_v14  ;;  %v1727_v45 = vrot.slane %v1554_v55, 1  ;;  %v1730_v54 = vrot.slane %v1555_v21, 1  ;;  %v1558_v17 = vld [vmem:[#allocation2 + $0x70] sm:$0xfe]  ;;  %v9809_v49 = vrot.slane %v8117_v24, 1 }
 0x148   : > { %1905 = vst [vmem:[#allocation3 + $0x2e8] sm:$0xff] %v1714_v4  ;;  %v1717_v26 = vsel %vm1690_vm1, %v1715_v22, %v9807_v9  ;;  %v1720_v47 = vsel %vm1690_vm1, %v1718_v39, %v9808_v48  ;;  %v1559_v42 = vld [vmem:[#allocation2 + $0x210] sm:$0xfe]  ;;  %v9810_v11 = vrot.slane %v8125_v7, 1  ;;  %v1733_v44 = vrot.slane %v1558_v17, 1 }
 0x149   : > { %1908 = vst [vmem:[#allocation3 + $0x300] sm:$0xff] %v1717_v26  ;;  %1909 = vst [vmem:[#allocation3 + $0x308] sm:$0xff] %v1720_v47  ;;  %v1723_v59 = vsel %vm1690_vm1, %v1721_v1, %v9809_v49  ;;  %v1736_v2 = vrot.slane %v1559_v42, 1  ;;  %v1562_v16 = vld [vmem:[#allocation2 + $0x358] sm:$0xfe]  ;;  %v9811_v22 = vrot.slane %v8127_v0, 1 }
 0x14a   : > { %v1726_v38 = vsel %vm1690_vm1, %v1724_v58, %v9810_v11  ;;  %v1563_v27 = vld [vmem:[#allocation2 + $0x2c0] sm:$0xfe]  ;;  %1912 = vst [vmem:[#allocation3 + $0x320] sm:$0xff] %v1723_v59  ;;  %v9812_v36 = vrot.slane %v8135_v53, 1  ;;  %v1739_v57 = vrot.slane %v1562_v16, 1  ;;  %v9813_v14 = vrot.slane %v8137_v51, 1 }
 0x14b   : > { %1913 = vst [vmem:[#allocation3 + $0x328] sm:$0xff] %v1726_v38  ;;  %v1729_v39 = vsel %vm1690_vm1, %v1727_v45, %v9811_v22  ;;  %v1742_v10 = vrot.slane %v1563_v27, 1  ;;  %v1566_v19 = vld [vmem:[#allocation2 + $0xa8] sm:$0xfe]  ;;  %v1567_v7 = vld [vmem:[#allocation2 + $0x300] sm:$0xfe] }
 0x14c   : > { %v1732_v24 = vsel %vm1690_vm1, %v1730_v54, %v9812_v36  ;;  %1916 = vst [vmem:[#allocation3 + $0x340] sm:$0xff] %v1729_v39  ;;  %v1735_v4 = vsel %vm1690_vm1, %v1733_v44, %v9813_v14  ;;  %v9814_v1 = vrot.slane %v8145_v60, 1  ;;  %v1745_v58 = vrot.slane %v1566_v19, 1  ;;  %v1570_v21 = vld [vmem:[#allocation2 + $0x2e8] sm:$0xfe] }
 0x14d   : > { %1917 = vst [vmem:[#allocation3 + $0x348] sm:$0xff] %v1732_v24  ;;  %v1748_v55 = vrot.slane %v1567_v7, 1  ;;  %v1571_v53 = vld [vmem:[#allocation2 + $0x1f0] sm:$0xfe]  ;;  %1920 = vst [vmem:[#allocation3 + $0x360] sm:$0xff] %v1735_v4  ;;  %v9815_v9 = vrot.slane %v8147_v20, 1 }
 0x14e   : > { %v1738_v0 = vsel %vm1690_vm1, %v1736_v2, %v9814_v1  ;;  %v9816_v48 = vrot.slane %v8155_v28, 1  ;;  %v1751_v47 = vrot.slane %v1570_v21, 1  ;;  %v1754_v45 = vrot.slane %v1571_v53, 1  ;;  %v1574_v54 = vld [vmem:[#allocation2 + $0x228] sm:$0xfe] }
 0x14f   : > { %1921 = vst [vmem:[#allocation3 + $0x368] sm:$0xff] %v1738_v0  ;;  %v1741_v26 = vsel %vm1690_vm1, %v1739_v57, %v9815_v9  ;;  %v1575_v60 = vld [vmem:[#allocation2 + $0x170] sm:$0xfe]  ;;  %v9817_v17 = vrot.slane %v8157_v8, 1  ;;  %v9818_v49 = vrot.slane %v8165_v43, 1  ;;  %v1757_v59 = vrot.slane %v1574_v54, 1 }
 0x150   : > { %v1744_v51 = vsel %vm1690_vm1, %v1742_v10, %v9816_v48  ;;  %1924 = vst [vmem:[#allocation3 + $0x380] sm:$0xff] %v1741_v26  ;;  %v1760_v11 = vrot.slane %v1575_v60, 1  ;;  %v1578_v38 = vld [vmem:[#allocation2 + $0xf8] sm:$0xfe]  ;;  %v1579_v28 = vld [vmem:[#allocation2 + $0x250] sm:$0xfe] }
 0x151   : > { %1925 = vst [vmem:[#allocation3 + $0x388] sm:$0xff] %v1744_v51  ;;  %v1747_v42 = vsel %vm1690_vm1, %v1745_v58, %v9817_v17  ;;  %v1750_v20 = vsel %vm1690_vm1, %v1748_v55, %v9818_v49  ;;  %v9819_v44 = vrot.slane %v8167_v62, 1  ;;  %v9820_v16 = vrot.slane %v8175_v23, 1  ;;  %v1582_v43 = vld [vmem:[#allocation2 + $0xa0] sm:$0xfe] }
 0x152   : > { %1928 = vst [vmem:[#allocation3 + $0x3a0] sm:$0xff] %v1747_v42  ;;  %1929 = vst [vmem:[#allocation3 + $0x3a8] sm:$0xff] %v1750_v20  ;;  %v1763_v27 = vrot.slane %v1578_v38, 1  ;;  %v1766_v22 = vrot.slane %v1579_v28, 1  ;;  %v1583_v39 = vld [vmem:[#allocation2 + $0x3a0] sm:$0xfe] }
 0x153   : > { %v1753_v2 = vsel %vm1690_vm1, %v1751_v47, %v9819_v44  ;;  %v1756_v8 = vsel %vm1690_vm1, %v1754_v45, %v9820_v16  ;;  %v9821_v36 = vrot.slane %v8177_v40, 1  ;;  %v9822_v57 = vrot.slane %v8185_v35, 1  ;;  %v1586_v7 = vld [vmem:[#allocation2 + $0x318] sm:$0xfe]  ;;  %v1587_v23 = vld [vmem:[#allocation2 + $0x160] sm:$0xfe] }
 0x154   : > { %1932 = vst [vmem:[#allocation3 + $0x3c0] sm:$0xff] %v1753_v2  ;;  %1933 = vst [vmem:[#allocation3 + $0x3c8] sm:$0xff] %v1756_v8  ;;  %v1769_v10 = vrot.slane %v1582_v43, 1  ;;  %v1772_v19 = vrot.slane %v1583_v39, 1  ;;  %v9823_v14 = vrot.slane %v8187_v12, 1  ;;  %v9824_v1 = vrot.slane %v8195_v3, 1 }
 0x155   : > { %v1759_v24 = vsel %vm1690_vm1, %v1757_v59, %v9821_v36  ;;  %v1762_v62 = vsel %vm1690_vm1, %v1760_v11, %v9822_v57  ;;  %v1775_v0 = vrot.slane %v1586_v7, 1  ;;  %v1778_v58 = vrot.slane %v1587_v23, 1  ;;  %v1590_v55 = vld [vmem:[#allocation2 + $0x68] sm:$0xfe]  ;;  %v1591_v35 = vld [vmem:[#allocation2 + $0xd0] sm:$0xfe] }
 0x156   : > { %1936 = vst [vmem:[#allocation3 + $0x3e0] sm:$0xff] %v1759_v24  ;;  %1937 = vst [vmem:[#allocation3 + $0x3e8] sm:$0xff] %v1762_v62  ;;  %v1765_v4 = vsel %vm1690_vm1, %v1763_v27, %v9823_v14  ;;  %v1768_v40 = vsel %vm1690_vm1, %v1766_v22, %v9824_v1  ;;  %v9825_v21 = vrot.slane %v8197_v63, 1  ;;  %v9826_v9 = vrot.slane %v8205_v41, 1  ;;  %v1594_v51 = vld [vmem:[#allocation2 + $0x2a0] sm:$0xfe] }
 0x157   : > { %1940 = vst [vmem:[#allocation3 + $0x400] sm:$0xff] %v1765_v4  ;;  %1941 = vst [vmem:[#allocation3 + $0x408] sm:$0xff] %v1768_v40  ;;  %v1781_v26 = vrot.slane %v1590_v55, 1  ;;  %v1784_v48 = vrot.slane %v1591_v35, 1  ;;  %v1595_v3 = vld [vmem:[#allocation2 + $0x1a0] sm:$0xfe] }
 0x158   : > { %v1771_v53 = vsel %vm1690_vm1, %v1769_v10, %v9825_v21  ;;  %v1774_v12 = vsel %vm1690_vm1, %v1772_v19, %v9826_v9  ;;  %v9827_v47 = vrot.slane %v8207_v33, 1  ;;  %v9828_v54 = vrot.slane %v8215_v30, 1  ;;  %v1598_v42 = vld [vmem:[#allocation2 + $0x10] sm:$0xfe]  ;;  %v1599_v41 = vld [vmem:[#allocation2 + $0x268] sm:$0xfe] }
 0x159   : > { %1944 = vst [vmem:[#allocation3 + $0x420] sm:$0xff] %v1771_v53  ;;  %1945 = vst [vmem:[#allocation3 + $0x428] sm:$0xff] %v1774_v12  ;;  %v1787_v60 = vrot.slane %v1594_v51, 1  ;;  %v1790_v17 = vrot.slane %v1595_v3, 1  ;;  %v9829_v49 = vrot.slane %v8217_v61, 1  ;;  %v9830_v59 = vrot.slane %v8225_v15, 1 }
 0x15a   : > { %v1777_v45 = vsel %vm1690_vm1, %v1775_v0, %v9827_v47  ;;  %v1780_v63 = vsel %vm1690_vm1, %v1778_v58, %v9828_v54  ;;  %v1793_v11 = vrot.slane %v1598_v42, 1  ;;  %v1796_v38 = vrot.slane %v1599_v41, 1  ;;  %v1602_v28 = vld [vmem:[#allocation2 + $0x198] sm:$0xfe]  ;;  %v1603_v30 = vld [vmem:[#allocation2 + $0x2a8] sm:$0xfe] }
 0x15b   : > { %1948 = vst [vmem:[#allocation3 + $0x440] sm:$0xff] %v1777_v45  ;;  %1949 = vst [vmem:[#allocation3 + $0x448] sm:$0xff] %v1780_v63  ;;  %v1783_v20 = vsel %vm1690_vm1, %v1781_v26, %v9829_v49  ;;  %v1786_v33 = vsel %vm1690_vm1, %v1784_v48, %v9830_v59  ;;  %v9831_v44 = vrot.slane %v8227_v52, 1  ;;  %v9832_v16 = vrot.slane %v8235_v50, 1  ;;  %v1606_v22 = vld [vmem:[#allocation2 + $0xb0] sm:$0xfe] }
 0x15c   : > { %1952 = vst [vmem:[#allocation3 + $0x460] sm:$0xff] %v1783_v20  ;;  %1953 = vst [vmem:[#allocation3 + $0x468] sm:$0xff] %v1786_v33  ;;  %v1799_v8 = vrot.slane %v1602_v28, 1  ;;  %v1802_v27 = vrot.slane %v1603_v30, 1  ;;  %v1607_v15 = vld [vmem:[#allocation2 + $0x398] sm:$0xfe] }
 0x15d   : > { %v1789_v2 = vsel %vm1690_vm1, %v1787_v60, %v9831_v44  ;;  %v1792_v61 = vsel %vm1690_vm1, %v1790_v17, %v9832_v16  ;;  %v9833_v43 = vrot.slane %v8237_v25, 1  ;;  %v9834_v36 = vrot.slane %v8245_v18, 1  ;;  %v1972_v62 = vld [vmem:[#allocation2 + $0x2b0] sm:$0xfc]  ;;  %v1977_v18 = vld [vmem:[#allocation2 + $0x48] sm:$0xfc] }
 0x15e   : > { %1956 = vst [vmem:[#allocation3 + $0x480] sm:$0xff] %v1789_v2  ;;  %1957 = vst [vmem:[#allocation3 + $0x488] sm:$0xff] %v1792_v61  ;;  %v1805_v24 = vrot.slane %v1606_v22, 1  ;;  %v1808_v57 = vrot.slane %v1607_v15, 1  ;;  %v1973_v50 = vld [vmem:[#allocation2 + $0x3b0] sm:$0xfc] }
 0x15f   : > { %v1795_v39 = vsel %vm1690_vm1, %v1793_v11, %v9833_v43  ;;  %v1798_v52 = vsel %vm1690_vm1, %v1796_v38, %v9834_v36  ;;  %v9835_v10 = vrot.slane %v8247_v5, 1  ;;  %v9836_v7 = vrot.slane %v8255_v56, 1  ;;  %v1976_v4 = vld [vmem:[#allocation2 + $0x330] sm:$0xfc]  ;;  %v1980_v35 = vld [vmem:[#allocation2 + $0x320] sm:$0xfc] }
 0x160   : > { %1960 = vst [vmem:[#allocation3 + $0x4a0] sm:$0xff] %v1795_v39  ;;  %1961 = vst [vmem:[#allocation3 + $0x4a8] sm:$0xff] %v1798_v52  ;;  %v2133_v23 = vrot.slane %v1972_v62, 2  ;;  %v2136_v14 = vrot.slane %v1973_v50, 2  ;;  %v9837_v1 = vrot.slane %v8257_v29, 1  ;;  %v9838_v0 = vrot.slane %v8265_v37, 1 }
 0x161   : > { %v1801_v19 = vsel %vm1690_vm1, %v1799_v8, %v9835_v10  ;;  %v1804_v25 = vsel %vm1690_vm1, %v1802_v27, %v9836_v7  ;;  %v2139_v58 = vrot.slane %v1976_v4, 2  ;;  %v2142_v55 = vrot.slane %v1977_v18, 2  ;;  %v1981_v56 = vld [vmem:[#allocation2 + $0x150] sm:$0xfc]  ;;  %v1984_v12 = vld [vmem:[#allocation2 + $0x338] sm:$0xfc] }
 0x162   : > { %1964 = vst [vmem:[#allocation3 + $0x4c0] sm:$0xff] %v1801_v19  ;;  %1965 = vst [vmem:[#allocation3 + $0x4c8] sm:$0xff] %v1804_v25  ;;  %v1807_v40 = vsel %vm1690_vm1, %v1805_v24, %v9837_v1  ;;  %v1810_v5 = vsel %vm1690_vm1, %v1808_v57, %v9838_v0  ;;  %v2135_v21 = vsel %vm2132_vm2, %v2133_v23, %v7715_v34  ;;  %v2145_v9 = vrot.slane %v1980_v35, 2  ;;  %v1985_v26 = vld [vmem:[#allocation2 + $0x340] sm:$0xfc]  ;;  %v9844_v43 = vld [vmem:[#allocation9_spill] sm:$0xff] }
 0x163   : > { %1968 = vst [vmem:[#allocation3 + $0x4e0] sm:$0xff] %v1807_v40  ;;  %1969 = vst [vmem:[#allocation3 + $0x4e8] sm:$0xff] %v1810_v5  ;;  %v2138_v53 = vsel %vm2132_vm2, %v2136_v14, %v7715_v34  ;;  %v2148_v29 = vrot.slane %v1981_v56, 2  ;;  %v2141_v37 = vsel %vm2132_vm2, %v2139_v58, %v7715_v34  ;;  %v2144_v48 = vsel %vm2132_vm2, %v2142_v55, %v7715_v34  ;;  %v1988_v47 = vld [vmem:[#allocation2 + $0x2f0] sm:$0xfc]  ;;  %v9848_v10 = vld [vmem:[#allocation11_spill] sm:$0xff] }
 0x164   : > { %2334 = vst [vmem:[#allocation3 + $0x500] sm:$0xff] %v2135_v21  ;;  %2335 = vst [vmem:[#allocation3 + $0x508] sm:$0xff] %v2138_v53  ;;  %v2151_v51 = vrot.slane %v1984_v12, 2  ;;  %v2154_v3 = vrot.slane %v1985_v26, 2  ;;  %v1989_v45 = vld [vmem:[#allocation2 + $0x288] sm:$0xfc]  ;;  %v2147_v54 = vsel %vm2132_vm2, %v2145_v9, %v7715_v34 }
 0x165   : > { %2338 = vst [vmem:[#allocation3 + $0x520] sm:$0xff] %v2141_v37  ;;  %2339 = vst [vmem:[#allocation3 + $0x528] sm:$0xff] %v2144_v48  ;;  %v2150_v63 = vsel %vm2132_vm2, %v2148_v29, %v7715_v34  ;;  %v2157_v60 = vrot.slane %v1988_v47, 2  ;;  %v2160_v17 = vrot.slane %v1989_v45, 2  ;;  %v1992_v42 = vld [vmem:[#allocation2 + $0xf0] sm:$0xfc] }
 0x166   : > { %v1993_v41 = vld [vmem:[#allocation2 + $0x8] sm:$0xfc]  ;;  %2342 = vst [vmem:[#allocation3 + $0x540] sm:$0xff] %v2147_v54  ;;  %2343 = vst [vmem:[#allocation3 + $0x548] sm:$0xff] %v2150_v63  ;;  %v9839_v49 = vrot.slane %v7764_v6, 2  ;;  %v9840_v59 = vrot.slane %v7771_v13, 2 }
 0x167   : > { %v2163_v11 = vrot.slane %v1992_v42, 2  ;;  %v2166_v38 = vrot.slane %v1993_v41, 2  ;;  %v1996_v28 = vld [vmem:[#allocation2] sm:$0xfc]  ;;  %v1997_v30 = vld [vmem:[#allocation2 + $0x290] sm:$0xfc] }
 0x168   : > { %v2153_v20 = vsel %vm2132_vm2, %v2151_v51, %v9839_v49  ;;  %v2156_v33 = vsel %vm2132_vm2, %v2154_v3, %v9840_v59  ;;  %v9841_v44 = vrot.slane %v7786_v31, 2  ;;  %v9842_v16 = vrot.slane %v7789_v32, 2  ;;  %v2000_v27 = vld [vmem:[#allocation2 + $0x70] sm:$0xfc]  ;;  %v2004_v24 = vld [vmem:[#allocation2 + $0x358] sm:$0xfc] }
 0x169   : > { %2346 = vst [vmem:[#allocation3 + $0x560] sm:$0xff] %v2153_v20  ;;  %2347 = vst [vmem:[#allocation3 + $0x568] sm:$0xff] %v2156_v33  ;;  %v2169_v61 = vrot.slane %v1996_v28, 2  ;;  %v2172_v8 = vrot.slane %v1997_v30, 2  ;;  %v2001_v13 = vld [vmem:[#allocation2 + $0x210] sm:$0xfc] }
 0x16a   : > { %v2159_v2 = vsel %vm2132_vm2, %v2157_v60, %v9841_v44  ;;  %v2162_v6 = vsel %vm2132_vm2, %v2160_v17, %v9842_v16  ;;  %v9843_v22 = vrot.slane %v7801_v46, 2  ;;  %v9845_v39 = vrot.slane %v9844_v43, 2  ;;  %v2005_v32 = vld [vmem:[#allocation2 + $0x2c0] sm:$0xfc]  ;;  %v9846_v57 = vld [vmem:[#allocation10_spill] sm:$0xff]  ;;  %v9852_v40 = vld [vmem:[#allocation13_spill] sm:$0xff] }
 0x16b   : > { %2350 = vst [vmem:[#allocation3 + $0x580] sm:$0xff] %v2159_v2  ;;  %2351 = vst [vmem:[#allocation3 + $0x588] sm:$0xff] %v2162_v6  ;;  %v2175_v36 = vrot.slane %v2000_v27, 2  ;;  %v2178_v52 = vrot.slane %v2001_v13, 2  ;;  %v9847_v62 = vrot.slane %v9846_v57, 2  ;;  %v9849_v19 = vrot.slane %v9848_v10, 2 }
 0x16c   : > { %v2165_v15 = vsel %vm2132_vm2, %v2163_v11, %v9843_v22  ;;  %v2168_v31 = vsel %vm2132_vm2, %v2166_v38, %v9845_v39  ;;  %v2181_v7 = vrot.slane %v2004_v24, 2  ;;  %v2184_v25 = vrot.slane %v2005_v32, 2  ;;  %v2008_v23 = vld [vmem:[#allocation2 + $0xa8] sm:$0xfc]  ;;  %v2009_v14 = vld [vmem:[#allocation2 + $0x300] sm:$0xfc] }
 0x16d   : > { %2354 = vst [vmem:[#allocation3 + $0x5a0] sm:$0xff] %v2165_v15  ;;  %2355 = vst [vmem:[#allocation3 + $0x5a8] sm:$0xff] %v2168_v31  ;;  %v2171_v50 = vsel %vm2132_vm2, %v2169_v61, %v9847_v62  ;;  %v2174_v46 = vsel %vm2132_vm2, %v2172_v8, %v9849_v19  ;;  %v9850_v4 = vld [vmem:[#allocation12_spill] sm:$0xff]  ;;  %v9853_v0 = vrot.slane %v9852_v40, 2  ;;  %v2187_v58 = vrot.slane %v2008_v23, 2  ;;  %v9854_v21 = vld [vmem:[#allocation14_spill] sm:$0xff] }
 0x16e   : > { %2358 = vst [vmem:[#allocation3 + $0x5c0] sm:$0xff] %v2171_v50  ;;  %2359 = vst [vmem:[#allocation3 + $0x5c8] sm:$0xff] %v2174_v46  ;;  %v9851_v18 = vrot.slane %v9850_v4, 2  ;;  %v2190_v55 = vrot.slane %v2009_v14, 2  ;;  %v2012_v35 = vld [vmem:[#allocation2 + $0x2e8] sm:$0xfc] }
 0x16f   : > { %v2180_v5 = vsel %vm2132_vm2, %v2178_v52, %v9853_v0  ;;  %v2013_v56 = vld [vmem:[#allocation2 + $0x1f0] sm:$0xfc]  ;;  %v9855_v53 = vrot.slane %v9854_v21, 2  ;;  %v9856_v29 = vld [vmem:[#allocation15_spill] sm:$0xff]  ;;  %v2193_v37 = vrot.slane %v2012_v35, 2  ;;  %v9858_v47 = vld [vmem:[#allocation16_spill] sm:$0xff] }
 0x170   : > { %v2177_v1 = vsel %vm2132_vm2, %v2175_v36, %v9851_v18  ;;  %2363 = vst [vmem:[#allocation3 + $0x5e8] sm:$0xff] %v2180_v5  ;;  %v9857_v12 = vrot.slane %v9856_v29, 2  ;;  %v2196_v48 = vrot.slane %v2013_v56, 2  ;;  %v2016_v51 = vld [vmem:[#allocation2 + $0x228] sm:$0xfc]  ;;  %v9859_v45 = vrot.slane %v9858_v47, 2 }
 0x171   : > { %2362 = vst [vmem:[#allocation3 + $0x5e0] sm:$0xff] %v2177_v1  ;;  %v2183_v9 = vsel %vm2132_vm2, %v2181_v7, %v9855_v53  ;;  %v2017_v3 = vld [vmem:[#allocation2 + $0x170] sm:$0xfc]  ;;  %v2199_v42 = vrot.slane %v2016_v51, 2  ;;  %v2020_v49 = vld [vmem:[#allocation2 + $0xf8] sm:$0xfc] }
 0x172   : > { %v2186_v26 = vsel %vm2132_vm2, %v2184_v25, %v9857_v12  ;;  %2366 = vst [vmem:[#allocation3 + $0x600] sm:$0xff] %v2183_v9  ;;  %v2189_v54 = vsel %vm2132_vm2, %v2187_v58, %v9859_v45  ;;  %v9860_v63 = vld [vmem:[#allocation17_spill] sm:$0xff]  ;;  %v2202_v41 = vrot.slane %v2017_v3, 2  ;;  %v9862_v59 = vld [vmem:[#allocation18_spill] sm:$0xff]  ;;  %v9864_v38 = vld [vmem:[#allocation19_spill] sm:$0xff]  ;;  %v2205_v44 = vrot.slane %v2020_v49, 2 }
 0x173   : > { %2367 = vst [vmem:[#allocation3 + $0x608] sm:$0xff] %v2186_v26  ;;  %v9861_v60 = vrot.slane %v9860_v63, 2  ;;  %v2021_v20 = vld [vmem:[#allocation2 + $0x250] sm:$0xfc]  ;;  %2370 = vst [vmem:[#allocation3 + $0x620] sm:$0xff] %v2189_v54  ;;  %v9863_v33 = vrot.slane %v9862_v59, 2 }
 0x174   : > { %v9865_v28 = vrot.slane %v9864_v38, 2  ;;  %v2208_v2 = vrot.slane %v2021_v20, 2  ;;  %v2024_v16 = vld [vmem:[#allocation2 + $0xa0] sm:$0xfc]  ;;  %v9868_v13 = vld [vmem:[#allocation21_spill] sm:$0xff]  ;;  %v9870_v52 = vld [vmem:[#allocation22_spill] sm:$0xff] }
 0x175   : > { %v2192_v17 = vsel %vm2132_vm2, %v2190_v55, %v9861_v60  ;;  %v2195_v11 = vsel %vm2132_vm2, %v2193_v37, %v9863_v33  ;;  %v2025_v6 = vld [vmem:[#allocation2 + $0x3a0] sm:$0xfc]  ;;  %v9869_v22 = vrot.slane %v9868_v13, 2  ;;  %v2211_v43 = vrot.slane %v2024_v16, 2  ;;  %v2028_v31 = vld [vmem:[#allocation2 + $0x318] sm:$0xfc] }
 0x176   : > { %2371 = vst [vmem:[#allocation3 + $0x628] sm:$0xff] %v2192_v17  ;;  %v2198_v30 = vsel %vm2132_vm2, %v2196_v48, %v9865_v28  ;;  %2374 = vst [vmem:[#allocation3 + $0x640] sm:$0xff] %v2195_v11  ;;  %v9866_v61 = vld [vmem:[#allocation20_spill] sm:$0xff]  ;;  %v2214_v39 = vrot.slane %v2025_v6, 2  ;;  %v9871_v24 = vrot.slane %v9870_v52, 2  ;;  %v9872_v57 = vld [vmem:[#allocation23_spill] sm:$0xff] }
 0x177   : > { %2375 = vst [vmem:[#allocation3 + $0x648] sm:$0xff] %v2198_v30  ;;  %v9867_v8 = vrot.slane %v9866_v61, 2  ;;  %v2204_v15 = vsel %vm2132_vm2, %v2202_v41, %v9869_v22  ;;  %v2029_v36 = vld [vmem:[#allocation2 + $0x160] sm:$0xfc]  ;;  %v9873_v62 = vrot.slane %v9872_v57, 2  ;;  %v2217_v10 = vrot.slane %v2028_v31, 2 }
 0x178   : > { %2379 = vst [vmem:[#allocation3 + $0x668] sm:$0xff] %v2204_v15  ;;  %v2207_v32 = vsel %vm2132_vm2, %v2205_v44, %v9871_v24  ;;  %v2220_v19 = vrot.slane %v2029_v36, 2  ;;  %v2032_v46 = vld [vmem:[#allocation2 + $0x68] sm:$0xfc]  ;;  %v2033_v7 = vld [vmem:[#allocation2 + $0xd0] sm:$0xfc] }
 0x179   : > { %v2201_v27 = vsel %vm2132_vm2, %v2199_v42, %v9867_v8  ;;  %v2210_v50 = vsel %vm2132_vm2, %v2208_v2, %v9873_v62  ;;  %2382 = vst [vmem:[#allocation3 + $0x680] sm:$0xff] %v2207_v32  ;;  %v9874_v25 = vld [vmem:[#allocation24_spill] sm:$0xff]  ;;  %v9876_v4 = vld [vmem:[#allocation25_spill] sm:$0xff]  ;;  %v2223_v40 = vrot.slane %v2032_v46, 2  ;;  %v2226_v0 = vrot.slane %v2033_v7, 2  ;;  %v9878_v55 = vld [vmem:[#allocation26_spill] sm:$0xff] }
 0x17a   : > { %2378 = vst [vmem:[#allocation3 + $0x660] sm:$0xff] %v2201_v27  ;;  %2383 = vst [vmem:[#allocation3 + $0x688] sm:$0xff] %v2210_v50  ;;  %v9875_v23 = vrot.slane %v9874_v25, 2  ;;  %v9877_v18 = vrot.slane %v9876_v4, 2  ;;  %v2036_v5 = vld [vmem:[#allocation2 + $0x2a0] sm:$0xfc] }
 0x17b   : > { %v2037_v58 = vld [vmem:[#allocation2 + $0x1a0] sm:$0xfc]  ;;  %v9879_v35 = vrot.slane %v9878_v55, 2  ;;  %v2229_v29 = vrot.slane %v2036_v5, 2  ;;  %v2040_v26 = vld [vmem:[#allocation2 + $0x10] sm:$0xfc] }
 0x17c   : > { %v2213_v14 = vsel %vm2132_vm2, %v2211_v43, %v9875_v23  ;;  %v2216_v1 = vsel %vm2132_vm2, %v2214_v39, %v9877_v18  ;;  %v9880_v21 = vld [vmem:[#allocation27_spill] sm:$0xff]  ;;  %v2232_v12 = vrot.slane %v2037_v58, 2  ;;  %v2041_v37 = vld [vmem:[#allocation2 + $0x268] sm:$0xfc]  ;;  %v9884_v47 = vld [vmem:[#allocation30_spill] sm:$0xff]  ;;  %v2235_v63 = vrot.slane %v2040_v26, 2 }
 0x17d   : > { %2386 = vst [vmem:[#allocation3 + $0x6a0] sm:$0xff] %v2213_v14  ;;  %2387 = vst [vmem:[#allocation3 + $0x6a8] sm:$0xff] %v2216_v1  ;;  %v2219_v56 = vsel %vm2132_vm2, %v2217_v10, %v9879_v35  ;;  %v9881_v53 = vrot.slane %v9880_v21, 2  ;;  %v9882_v48 = vld [vmem:[#allocation29_spill] sm:$0xff]  ;;  %v9885_v45 = vrot.slane %v9884_v47, 2  ;;  %v2238_v60 = vrot.slane %v2041_v37, 2 }
 0x17e   : > { %2390 = vst [vmem:[#allocation3 + $0x6c0] sm:$0xff] %v2219_v56  ;;  %v9883_v51 = vrot.slane %v9882_v48, 2  ;;  %v2044_v17 = vld [vmem:[#allocation2 + $0x198] sm:$0xfc]  ;;  %v2045_v42 = vld [vmem:[#allocation2 + $0x2a8] sm:$0xfc]  ;;  %v2237_v2 = vsel %vm2132_vm2, %v2235_v63, %v7715_v34 }
 0x17f   : > { %v2222_v9 = vsel %vm2132_vm2, %v2220_v19, %v9881_v53  ;;  %v2228_v54 = vsel %vm2132_vm2, %v2226_v0, %v9885_v45  ;;  %v9886_v41 = vld [vmem:[#allocation31_spill] sm:$0xff]  ;;  %v9888_v59 = vld [vmem:[#allocation32_spill] sm:$0xff]  ;;  %v2241_v38 = vrot.slane %v2044_v17, 2  ;;  %v2244_v28 = vrot.slane %v2045_v42, 2  ;;  %v2048_v30 = vld [vmem:[#allocation2 + $0xb0] sm:$0xfc] }
 0x180   : > { %2391 = vst [vmem:[#allocation3 + $0x6c8] sm:$0xff] %v2222_v9  ;;  %v2225_v3 = vsel %vm2132_vm2, %v2223_v40, %v9883_v51  ;;  %2395 = vst [vmem:[#allocation3 + $0x6e8] sm:$0xff] %v2228_v54  ;;  %v9887_v49 = vrot.slane %v9886_v41, 2  ;;  %v9889_v33 = vrot.slane %v9888_v59, 2  ;;  %v2049_v44 = vld [vmem:[#allocation2 + $0x398] sm:$0xfc]  ;;  %v2240_v16 = vsel %vm2132_vm2, %v2238_v60, %v7715_v34 }
 0x181   : > { %2394 = vst [vmem:[#allocation3 + $0x6e0] sm:$0xff] %v2225_v3  ;;  %v2247_v6 = vrot.slane %v2048_v30, 2  ;;  %v2250_v61 = vrot.slane %v2049_v44, 2  ;;  %v2414_v8 = vld [vmem:[#allocation2 + $0x2b0] sm:$0xf8]  ;;  %2402 = vst [vmem:[#allocation3 + $0x720] sm:$0xff] %v2237_v2  ;;  %v2243_v13 = vsel %vm2132_vm2, %v2241_v38, %v7715_v34  ;;  %v2246_v22 = vsel %vm2132_vm2, %v2244_v28, %v7715_v34 }
 0x182   : > { %v2231_v20 = vsel %vm2132_vm2, %v2229_v29, %v9887_v49  ;;  %v2234_v11 = vsel %vm2132_vm2, %v2232_v12, %v9889_v33  ;;  %v2415_v27 = vld [vmem:[#allocation2 + $0x3b0] sm:$0xf8]  ;;  %2403 = vst [vmem:[#allocation3 + $0x728] sm:$0xff] %v2240_v16  ;;  %v2655_v15 = vrot.slane %v2414_v8, 3  ;;  %v2418_v39 = vld [vmem:[#allocation2 + $0x50] sm:$0x1] }
 0x183   : > { %2398 = vst [vmem:[#allocation3 + $0x700] sm:$0xff] %v2231_v20  ;;  %2399 = vst [vmem:[#allocation3 + $0x708] sm:$0xff] %v2234_v11  ;;  %v2658_v43 = vrot.slane %v2415_v27, 3  ;;  %v2419_v31 = vld [vmem:[#allocation2 + $0x368] sm:$0x1]  ;;  %v2249_v36 = vsel %vm2132_vm2, %v2247_v6, %v7715_v34  ;;  %v2252_v52 = vsel %vm2132_vm2, %v2250_v61, %v7715_v34  ;;  %v2661_v24 = vrot.slane %v2418_v39, 3 }
 0x184   : > { %2406 = vst [vmem:[#allocation3 + $0x740] sm:$0xff] %v2243_v13  ;;  %2407 = vst [vmem:[#allocation3 + $0x748] sm:$0xff] %v2246_v22  ;;  %v2663_v32 = vrot.slane %v2419_v31, 3  ;;  %v2420_v57 = vld [vmem:[#allocation2 + $0x330] sm:$0xf8]  ;;  %v9890_v50 = vld [vmem:[#allocation8_spill] sm:$0xff] }
 0x185   : > { %v2421_v62 = vld [vmem:[#allocation2 + $0x48] sm:$0xf8]  ;;  %2410 = vst [vmem:[#allocation3 + $0x760] sm:$0xff] %v2249_v36  ;;  %2411 = vst [vmem:[#allocation3 + $0x768] sm:$0xff] %v2252_v52  ;;  %v2657_v10 = vsel %vm2654_vm3, %v2655_v15, %v9890_v50  ;;  %v2660_v19 = vsel %vm2654_vm3, %v2658_v43, %v9890_v50  ;;  %v2665_v46 = vrot.slane %v2420_v57, 3  ;;  %v2662_v34 = vsel %vm2654_vm3, %v9890_v50, %v2661_v24  ;;  %v8534_v54 = vld [vmem:[#allocation2 + $0x360] sm:$0xff] }
 0x186   : > { %v2668_v7 = vrot.slane %v2421_v62, 3  ;;  %v2424_v25 = vld [vmem:[#allocation2 + $0x118] sm:$0x1]  ;;  %2936 = vst [vmem:[#allocation3 + $0x780] sm:$0xff] %v2657_v10  ;;  %2937 = vst [vmem:[#allocation3 + $0x788] sm:$0xff] %v2660_v19  ;;  %v2664_v14 = vsel %vm2654_vm3, %v9890_v50, %v2663_v32  ;;  %v8532_v3 = vld [vmem:[#allocation2 + $0x1a8] sm:$0xff] }
 0x187   : > { %v2425_v23 = vld [vmem:[#allocation2 + $0x98] sm:$0x1]  ;;  %v2671_v4 = vrot.slane %v2424_v25, 3  ;;  %v2426_v1 = vld [vmem:[#allocation2 + $0x320] sm:$0xf8]  ;;  %v2667_v0 = vsel %vm2654_vm3, %v2665_v46, %v9890_v50  ;;  %v2689_v17 = vrot.slane %v8532_v3, 3 }
 0x188   : > { %v2673_v18 = vrot.slane %v2425_v23, 3  ;;  %v2427_v40 = vld [vmem:[#allocation2 + $0x150] sm:$0xf8]  ;;  %2938 = vst [vmem:[#allocation3 + $0x790] sm:$0x3f] %v2662_v34  ;;  %v2670_v5 = vsel %vm2654_vm3, %v2668_v7, %v9890_v50  ;;  %v2675_v58 = vrot.slane %v2426_v1, 3 }
 0x189   : > { %2939 = vst [vmem:[#allocation3 + $0x798] sm:$0x3f] %v2664_v14  ;;  %v2678_v55 = vrot.slane %v2427_v40, 3  ;;  %v2430_v35 = vld [vmem:[#allocation2 + $0x2e0] sm:$0x1]  ;;  %2940 = vst [vmem:[#allocation3 + $0x7a0] sm:$0xff] %v2667_v0  ;;  %v2672_v21 = vsel %vm2654_vm3, %v9890_v50, %v2671_v4 }
 0x18a   : > { %v2431_v56 = vld [vmem:[#allocation2 + $0x388] sm:$0x1]  ;;  %2941 = vst [vmem:[#allocation3 + $0x7a8] sm:$0xff] %v2670_v5  ;;  %v2674_v53 = vsel %vm2654_vm3, %v9890_v50, %v2673_v18  ;;  %v2681_v9 = vrot.slane %v2430_v35, 3  ;;  %v2432_v12 = vld [vmem:[#allocation2 + $0x338] sm:$0xf8]  ;;  %v2677_v37 = vsel %vm2654_vm3, %v2675_v58, %v9890_v50 }
 0x18b   : > { %v2683_v29 = vrot.slane %v2431_v56, 3  ;;  %v2433_v26 = vld [vmem:[#allocation2 + $0x340] sm:$0xf8]  ;;  %2942 = vst [vmem:[#allocation3 + $0x7b0] sm:$0x3f] %v2672_v21  ;;  %v2680_v48 = vsel %vm2654_vm3, %v2678_v55, %v9890_v50  ;;  %v2685_v51 = vrot.slane %v2432_v12, 3 }
 0x18c   : > { %2943 = vst [vmem:[#allocation3 + $0x7b8] sm:$0x3f] %v2674_v53  ;;  %v2688_v47 = vrot.slane %v2433_v26, 3  ;;  %v2436_v45 = vld [vmem:[#allocation2 + $0x1b8] sm:$0x1]  ;;  %2944 = vst [vmem:[#allocation3 + $0x7c0] sm:$0xff] %v2677_v37  ;;  %v2682_v63 = vsel %vm2654_vm3, %v9890_v50, %v2681_v9 }
 0x18d   : > { %2945 = vst [vmem:[#allocation3 + $0x7c8] sm:$0xff] %v2680_v48  ;;  %v2684_v60 = vsel %vm2654_vm3, %v9890_v50, %v2683_v29  ;;  %v2691_v42 = vrot.slane %v2436_v45, 3  ;;  %v2437_v41 = vld [vmem:[#allocation2 + $0x168] sm:$0x1]  ;;  %v2438_v49 = vld [vmem:[#allocation2 + $0x2f0] sm:$0xf8] }
 0x18e   : > { %2946 = vst [vmem:[#allocation3 + $0x7d0] sm:$0x3f] %v2682_v63  ;;  %2947 = vst [vmem:[#allocation3 + $0x7d8] sm:$0x3f] %v2684_v60  ;;  %v9891_v20 = vld [vmem:[#allocation33_spill] sm:$0xff]  ;;  %v2693_v11 = vrot.slane %v2437_v41, 3  ;;  %v2690_v2 = vsel %vm2654_vm3, %v2688_v47, %v2689_v17 }
 0x18f   : > { %v9892_v59 = vrot.slane %v9891_v20, 3  ;;  %v2695_v38 = vrot.slane %v2438_v49, 3  ;;  %v2696_v28 = vrot.slane %v8534_v54, 3  ;;  %v2439_v30 = vld [vmem:[#allocation2 + $0x288] sm:$0xf8]  ;;  %v8545_v44 = vld [vmem:[#allocation2 + $0x130] sm:$0xff] }
 0x190   : > { %v2698_v61 = vrot.slane %v2439_v30, 3  ;;  %v2699_v8 = vrot.slane %v8545_v44, 3  ;;  %v2442_v27 = vld [vmem:[#allocation2 + $0x1b0] sm:$0x1]  ;;  %2949 = vst [vmem:[#allocation3 + $0x7e8] sm:$0xff] %v2690_v2  ;;  %v2694_v22 = vsel %vm2654_vm3, %v2689_v17, %v2693_v11  ;;  %v8554_v36 = vld [vmem:[#allocation2 + $0x148] sm:$0xff] }
 0x191   : > { %v2687_v33 = vsel %vm2654_vm3, %v2685_v51, %v9892_v59  ;;  %v9893_v16 = vmov %v9892_v59  ;;  %v2443_v13 = vld [vmem:[#allocation2 + $0x270] sm:$0x1]  ;;  %v2697_v15 = vsel %vm2654_vm3, %v2695_v38, %v2696_v28  ;;  %v2701_v43 = vrot.slane %v2442_v27, 3  ;;  %v2444_v31 = vld [vmem:[#allocation2 + $0xf0] sm:$0xf8]  ;;  %v8556_v52 = vld [vmem:[#allocation2 + $0x200] sm:$0xff] }
 0x192   : > { %2948 = vst [vmem:[#allocation3 + $0x7e0] sm:$0xff] %v2687_v33  ;;  %v2692_v6 = vsel %vm2654_vm3, %v9893_v16, %v2691_v42  ;;  %v2703_v39 = vrot.slane %v2443_v13, 3  ;;  %2951 = vst [vmem:[#allocation3 + $0x7f8] sm:$0x3f] %v2694_v22  ;;  %v2700_v24 = vsel %vm2654_vm3, %v2698_v61, %v2699_v8  ;;  %v2705_v32 = vrot.slane %v2444_v31, 3  ;;  %v8561_v19 = vld [vmem:[#allocation2 + $0x188] sm:$0xff] }
 0x193   : > { %2950 = vst [vmem:[#allocation3 + $0x7f0] sm:$0x3f] %v2692_v6  ;;  %2952 = vst [vmem:[#allocation3 + $0x800] sm:$0xff] %v2697_v15  ;;  %v2706_v57 = vrot.slane %v8554_v36, 3  ;;  %v2445_v62 = vld [vmem:[#allocation2 + $0x8] sm:$0xf8]  ;;  %v2702_v46 = vsel %vm2654_vm3, %v2696_v28, %v2701_v43 }
 0x194   : > { %v2709_v10 = vrot.slane %v8556_v52, 3  ;;  %2953 = vst [vmem:[#allocation3 + $0x808] sm:$0xff] %v2700_v24  ;;  %v2704_v7 = vsel %vm2654_vm3, %v2699_v8, %v2703_v39  ;;  %v2708_v25 = vrot.slane %v2445_v62, 3  ;;  %v2448_v23 = vld [vmem:[#allocation2 + $0x390] sm:$0x1]  ;;  %v2716_v14 = vrot.slane %v8561_v19, 3 }
 0x195   : > { %v2449_v34 = vld [vmem:[#allocation2 + $0x278] sm:$0x1]  ;;  %2954 = vst [vmem:[#allocation3 + $0x810] sm:$0x3f] %v2702_v46  ;;  %2955 = vst [vmem:[#allocation3 + $0x818] sm:$0x3f] %v2704_v7  ;;  %v2707_v4 = vsel %vm2654_vm3, %v2705_v32, %v2706_v57 }
 0x196   : > { %v2711_v18 = vrot.slane %v2448_v23, 3  ;;  %v2713_v1 = vrot.slane %v2449_v34, 3  ;;  %v2450_v40 = vld [vmem:[#allocation2] sm:$0xf8]  ;;  %v2451_v0 = vld [vmem:[#allocation2 + $0x290] sm:$0xf8]  ;;  %v2710_v5 = vsel %vm2654_vm3, %v2708_v25, %v2709_v10 }
 0x197   : > { %2956 = vst [vmem:[#allocation3 + $0x820] sm:$0xff] %v2707_v4  ;;  %v2715_v58 = vrot.slane %v2450_v40, 3  ;;  %v8568_v55 = vld [vmem:[#allocation2 + $0xe0] sm:$0xff]  ;;  %v2718_v35 = vrot.slane %v2451_v0, 3  ;;  %v8570_v21 = vld [vmem:[#allocation2 + $0x308] sm:$0xff]  ;;  %2957 = vst [vmem:[#allocation3 + $0x828] sm:$0xff] %v2710_v5 }
 0x198   : > { %v2454_v56 = vld [vmem:[#allocation2 + $0x1c0] sm:$0x1]  ;;  %v2712_v53 = vsel %vm2654_vm3, %v2706_v57, %v2711_v18  ;;  %v2714_v9 = vsel %vm2654_vm3, %v2709_v10, %v2713_v1  ;;  %v2719_v29 = vrot.slane %v8568_v55, 3  ;;  %v2455_v26 = vld [vmem:[#allocation2 + $0x90] sm:$0x1]  ;;  %v2726_v45 = vrot.slane %v8570_v21, 3 }
 0x199   : > { %v2721_v12 = vrot.slane %v2454_v56, 3  ;;  %v2456_v37 = vld [vmem:[#allocation2 + $0x70] sm:$0xf8]  ;;  %2958 = vst [vmem:[#allocation3 + $0x830] sm:$0x3f] %v2712_v53  ;;  %v2717_v48 = vsel %vm2654_vm3, %v2715_v58, %v2716_v14  ;;  %v2723_v51 = vrot.slane %v2455_v26, 3 }
 0x19a   : > { %2959 = vst [vmem:[#allocation3 + $0x838] sm:$0x3f] %v2714_v9  ;;  %v2725_v47 = vrot.slane %v2456_v37, 3  ;;  %v2457_v63 = vld [vmem:[#allocation2 + $0x210] sm:$0xf8]  ;;  %2960 = vst [vmem:[#allocation3 + $0x840] sm:$0xff] %v2717_v48  ;;  %v2720_v17 = vsel %vm2654_vm3, %v2718_v35, %v2719_v29 }
 0x19b   : > { %v8577_v60 = vld [vmem:[#allocation2 + $0x370] sm:$0xff]  ;;  %v2722_v42 = vsel %vm2654_vm3, %v2716_v14, %v2721_v12  ;;  %v2728_v41 = vrot.slane %v2457_v63, 3  ;;  %v2460_v20 = vld [vmem:[#allocation2 + $0x1d8] sm:$0x1]  ;;  %v2461_v59 = vld [vmem:[#allocation2 + $0x260] sm:$0x1]  ;;  %v2724_v33 = vsel %vm2654_vm3, %v2719_v29, %v2723_v51 }
 0x19c   : > { %v2729_v49 = vrot.slane %v8577_v60, 3  ;;  %2961 = vst [vmem:[#allocation3 + $0x848] sm:$0xff] %v2720_v17  ;;  %2962 = vst [vmem:[#allocation3 + $0x850] sm:$0x3f] %v2722_v42  ;;  %v2727_v11 = vsel %vm2654_vm3, %v2725_v47, %v2726_v45  ;;  %v2731_v38 = vrot.slane %v2460_v20, 3  ;;  %v2733_v28 = vrot.slane %v2461_v59, 3 }
 0x19d   : > { %v2462_v30 = vld [vmem:[#allocation2 + $0x358] sm:$0xf8]  ;;  %v8584_v2 = vld [vmem:[#allocation2 + $0x328] sm:$0xff]  ;;  %2963 = vst [vmem:[#allocation3 + $0x858] sm:$0x3f] %v2724_v33  ;;  %2964 = vst [vmem:[#allocation3 + $0x860] sm:$0xff] %v2727_v11 }
 0x19e   : > { %v8586_v16 = vld [vmem:[#allocation2 + $0x238] sm:$0xff]  ;;  %v2730_v6 = vsel %vm2654_vm3, %v2728_v41, %v2729_v49  ;;  %v2735_v61 = vrot.slane %v2462_v30, 3  ;;  %v2736_v8 = vrot.slane %v8584_v2, 3  ;;  %v2463_v27 = vld [vmem:[#allocation2 + $0x2c0] sm:$0xf8]  ;;  %v8591_v22 = vld [vmem:[#allocation2 + $0xe8] sm:$0xff]  ;;  %v2732_v15 = vsel %vm2654_vm3, %v2726_v45, %v2731_v38 }
 0x19f   : > { %v2739_v13 = vrot.slane %v8586_v16, 3  ;;  %2965 = vst [vmem:[#allocation3 + $0x868] sm:$0xff] %v2730_v6  ;;  %v2734_v43 = vsel %vm2654_vm3, %v2729_v49, %v2733_v28  ;;  %v2738_v39 = vrot.slane %v2463_v27, 3  ;;  %v2466_v31 = vld [vmem:[#allocation2 + $0x78] sm:$0x1]  ;;  %v2746_v32 = vrot.slane %v8591_v22, 3 }
 0x1a0   : > { %v2467_v24 = vld [vmem:[#allocation2 + $0x158] sm:$0x1]  ;;  %2966 = vst [vmem:[#allocation3 + $0x870] sm:$0x3f] %v2732_v15  ;;  %2967 = vst [vmem:[#allocation3 + $0x878] sm:$0x3f] %v2734_v43  ;;  %v2737_v57 = vsel %vm2654_vm3, %v2735_v61, %v2736_v8 }
 0x1a1   : > { %v2741_v62 = vrot.slane %v2466_v31, 3  ;;  %v2743_v10 = vrot.slane %v2467_v24, 3  ;;  %v2468_v46 = vld [vmem:[#allocation2 + $0xa8] sm:$0xf8]  ;;  %v2469_v7 = vld [vmem:[#allocation2 + $0x300] sm:$0xf8]  ;;  %v2740_v25 = vsel %vm2654_vm3, %v2738_v39, %v2739_v13 }
 0x1a2   : > { %2968 = vst [vmem:[#allocation3 + $0x880] sm:$0xff] %v2737_v57  ;;  %v2745_v23 = vrot.slane %v2468_v46, 3  ;;  %v8598_v34 = vld [vmem:[#allocation2 + $0x20] sm:$0xff]  ;;  %v2748_v14 = vrot.slane %v2469_v7, 3  ;;  %v8600_v18 = vld [vmem:[#allocation2 + $0x38] sm:$0xff]  ;;  %2969 = vst [vmem:[#allocation3 + $0x888] sm:$0xff] %v2740_v25 }
 0x1a3   : > { %v2472_v4 = vld [vmem:[#allocation2 + $0x40] sm:$0x1]  ;;  %v2742_v1 = vsel %vm2654_vm3, %v2736_v8, %v2741_v62  ;;  %v2744_v40 = vsel %vm2654_vm3, %v2739_v13, %v2743_v10  ;;  %v2749_v0 = vrot.slane %v8598_v34, 3  ;;  %v2473_v58 = vld [vmem:[#allocation2 + $0x1d0] sm:$0x1]  ;;  %v2756_v29 = vrot.slane %v8600_v18, 3 }
 0x1a4   : > { %v2751_v5 = vrot.slane %v2472_v4, 3  ;;  %v2474_v35 = vld [vmem:[#allocation2 + $0x2e8] sm:$0xf8]  ;;  %2970 = vst [vmem:[#allocation3 + $0x890] sm:$0x3f] %v2742_v1  ;;  %v2747_v56 = vsel %vm2654_vm3, %v2745_v23, %v2746_v32  ;;  %v2753_v53 = vrot.slane %v2473_v58, 3 }
 0x1a5   : > { %2971 = vst [vmem:[#allocation3 + $0x898] sm:$0x3f] %v2744_v40  ;;  %v2755_v9 = vrot.slane %v2474_v35, 3  ;;  %v2475_v12 = vld [vmem:[#allocation2 + $0x1f0] sm:$0xf8]  ;;  %2972 = vst [vmem:[#allocation3 + $0x8a0] sm:$0xff] %v2747_v56  ;;  %v2750_v37 = vsel %vm2654_vm3, %v2748_v14, %v2749_v0 }
 0x1a6   : > { %v8607_v26 = vld [vmem:[#allocation2 + $0x2d0] sm:$0xff]  ;;  %v2752_v48 = vsel %vm2654_vm3, %v2746_v32, %v2751_v5  ;;  %v2758_v51 = vrot.slane %v2475_v12, 3  ;;  %v2479_v63 = vld [vmem:[#allocation2 + $0xc0] sm:$0x1]  ;;  %2973 = vst [vmem:[#allocation3 + $0x8a8] sm:$0xff] %v2750_v37  ;;  %v2754_v17 = vsel %vm2654_vm3, %v2749_v0, %v2753_v53  ;;  %v8616_v33 = vld [vmem:[#allocation2 + $0x138] sm:$0xff] }
 0x1a7   : > { %v2759_v47 = vrot.slane %v8607_v26, 3  ;;  %v2478_v45 = vld [vmem:[#allocation2 + $0x30] sm:$0x1]  ;;  %2974 = vst [vmem:[#allocation3 + $0x8b0] sm:$0x3f] %v2752_v48  ;;  %v2757_v42 = vsel %vm2654_vm3, %v2755_v9, %v2756_v29  ;;  %v2763_v49 = vrot.slane %v2479_v63, 3 }
 0x1a8   : > { %v2761_v41 = vrot.slane %v2478_v45, 3  ;;  %v2480_v20 = vld [vmem:[#allocation2 + $0x228] sm:$0xf8]  ;;  %v8614_v59 = vld [vmem:[#allocation2 + $0x280] sm:$0xff]  ;;  %2975 = vst [vmem:[#allocation3 + $0x8b8] sm:$0x3f] %v2754_v17 }
 0x1a9   : > { %2976 = vst [vmem:[#allocation3 + $0x8c0] sm:$0xff] %v2757_v42  ;;  %v2760_v11 = vsel %vm2654_vm3, %v2758_v51, %v2759_v47  ;;  %v2765_v38 = vrot.slane %v2480_v20, 3  ;;  %v2766_v28 = vrot.slane %v8614_v59, 3  ;;  %v2481_v30 = vld [vmem:[#allocation2 + $0x170] sm:$0xf8]  ;;  %v2769_v6 = vrot.slane %v8616_v33, 3 }
 0x1aa   : > { %v8621_v61 = vld [vmem:[#allocation2 + $0xb8] sm:$0xff]  ;;  %2977 = vst [vmem:[#allocation3 + $0x8c8] sm:$0xff] %v2760_v11  ;;  %v2762_v8 = vsel %vm2654_vm3, %v2756_v29, %v2761_v41  ;;  %v2764_v27 = vsel %vm2654_vm3, %v2759_v47, %v2763_v49  ;;  %v2768_v13 = vrot.slane %v2481_v30, 3  ;;  %v2484_v15 = vld [vmem:[#allocation2 + $0x348] sm:$0x1]  ;;  %v8637_v12 = vld [vmem:[#allocation2 + $0x350] sm:$0xff] }
 0x1ab   : > { %v2485_v43 = vld [vmem:[#allocation2 + $0x3a8] sm:$0x1]  ;;  %v2776_v39 = vrot.slane %v8621_v61, 3  ;;  %2978 = vst [vmem:[#allocation3 + $0x8d0] sm:$0x3f] %v2762_v8  ;;  %v2767_v31 = vsel %vm2654_vm3, %v2765_v38, %v2766_v28  ;;  %v2771_v24 = vrot.slane %v2484_v15, 3 }
 0x1ac   : > { %2979 = vst [vmem:[#allocation3 + $0x8d8] sm:$0x3f] %v2764_v27  ;;  %v2773_v32 = vrot.slane %v2485_v43, 3  ;;  %v2486_v57 = vld [vmem:[#allocation2 + $0xf8] sm:$0xf8]  ;;  %2980 = vst [vmem:[#allocation3 + $0x8e0] sm:$0xff] %v2767_v31  ;;  %v2770_v10 = vsel %vm2654_vm3, %v2768_v13, %v2769_v6 }
 0x1ad   : > { %v2487_v62 = vld [vmem:[#allocation2 + $0x250] sm:$0xf8]  ;;  %v2775_v46 = vrot.slane %v2486_v57, 3  ;;  %v8628_v7 = vld [vmem:[#allocation2 + $0x1e8] sm:$0xff]  ;;  %v2490_v23 = vld [vmem:[#allocation2 + $0x2b8] sm:$0x1]  ;;  %v2772_v4 = vsel %vm2654_vm3, %v2766_v28, %v2771_v24 }
 0x1ae   : > { %v2778_v25 = vrot.slane %v2487_v62, 3  ;;  %v8630_v14 = vld [vmem:[#allocation2 + $0x2f8] sm:$0xff]  ;;  %2981 = vst [vmem:[#allocation3 + $0x8e8] sm:$0xff] %v2770_v10  ;;  %v2774_v1 = vsel %vm2654_vm3, %v2769_v6, %v2773_v32  ;;  %v2779_v40 = vrot.slane %v8628_v7, 3  ;;  %v2781_v0 = vrot.slane %v2490_v23, 3  ;;  %v8644_v11 = vld [vmem:[#allocation2 + $0x88] sm:$0xff] }
 0x1af   : > { %v2491_v5 = vld [vmem:[#allocation2 + $0x128] sm:$0x1]  ;;  %v2492_v58 = vld [vmem:[#allocation2 + $0xa0] sm:$0xf8]  ;;  %2982 = vst [vmem:[#allocation3 + $0x8f0] sm:$0x3f] %v2772_v4  ;;  %v2777_v35 = vsel %vm2654_vm3, %v2775_v46, %v2776_v39 }
 0x1b0   : > { %2983 = vst [vmem:[#allocation3 + $0x8f8] sm:$0x3f] %v2774_v1  ;;  %v2783_v56 = vrot.slane %v2491_v5, 3  ;;  %v2785_v53 = vrot.slane %v2492_v58, 3  ;;  %v2786_v9 = vrot.slane %v8630_v14, 3  ;;  %2984 = vst [vmem:[#allocation3 + $0x900] sm:$0xff] %v2777_v35  ;;  %v2780_v37 = vsel %vm2654_vm3, %v2778_v25, %v2779_v40 }
 0x1b1   : > { %v2493_v29 = vld [vmem:[#allocation2 + $0x3a0] sm:$0xf8]  ;;  %v2782_v48 = vsel %vm2654_vm3, %v2776_v39, %v2781_v0  ;;  %v2789_v47 = vrot.slane %v8637_v12, 3  ;;  %v2496_v45 = vld [vmem:[#allocation2 + $0x230] sm:$0x1]  ;;  %2985 = vst [vmem:[#allocation3 + $0x908] sm:$0xff] %v2780_v37 }
 0x1b2   : > { %v2788_v51 = vrot.slane %v2493_v29, 3  ;;  %v2497_v63 = vld [vmem:[#allocation2 + $0x298] sm:$0x1]  ;;  %2986 = vst [vmem:[#allocation3 + $0x910] sm:$0x3f] %v2782_v48  ;;  %v2784_v17 = vsel %vm2654_vm3, %v2779_v40, %v2783_v56  ;;  %v2787_v42 = vsel %vm2654_vm3, %v2785_v53, %v2786_v9  ;;  %v2791_v41 = vrot.slane %v2496_v45, 3 }
 0x1b3   : > { %v2793_v49 = vrot.slane %v2497_v63, 3  ;;  %v2498_v20 = vld [vmem:[#allocation2 + $0x318] sm:$0xf8]  ;;  %v8646_v38 = vld [vmem:[#allocation2 + $0x28] sm:$0xff]  ;;  %2987 = vst [vmem:[#allocation3 + $0x918] sm:$0x3f] %v2784_v17 }
 0x1b4   : > { %2988 = vst [vmem:[#allocation3 + $0x920] sm:$0xff] %v2787_v42  ;;  %v2790_v28 = vsel %vm2654_vm3, %v2788_v51, %v2789_v47  ;;  %v2795_v30 = vrot.slane %v2498_v20, 3  ;;  %v2796_v6 = vrot.slane %v8644_v11, 3  ;;  %v2499_v8 = vld [vmem:[#allocation2 + $0x160] sm:$0xf8]  ;;  %v2799_v27 = vrot.slane %v8646_v38, 3 }
 0x1b5   : > { %v8651_v13 = vld [vmem:[#allocation2 + $0x180] sm:$0xff]  ;;  %2989 = vst [vmem:[#allocation3 + $0x928] sm:$0xff] %v2790_v28  ;;  %v2792_v15 = vsel %vm2654_vm3, %v2786_v9, %v2791_v41  ;;  %v2794_v43 = vsel %vm2654_vm3, %v2789_v47, %v2793_v49  ;;  %v2798_v39 = vrot.slane %v2499_v8, 3  ;;  %v2504_v46 = vld [vmem:[#allocation2 + $0x68] sm:$0xf8]  ;;  %v8658_v1 = vld [vmem:[#allocation2 + $0x378] sm:$0xff] }
 0x1b6   : > { %v2502_v31 = vld [vmem:[#allocation2 + $0x120] sm:$0x1]  ;;  %v2806_v32 = vrot.slane %v8651_v13, 3  ;;  %2990 = vst [vmem:[#allocation3 + $0x930] sm:$0x3f] %v2792_v15  ;;  %v2797_v57 = vsel %vm2654_vm3, %v2795_v30, %v2796_v6  ;;  %v2805_v4 = vrot.slane %v2504_v46, 3 }
 0x1b7   : > { %v2503_v24 = vld [vmem:[#allocation2 + $0x140] sm:$0x1]  ;;  %2991 = vst [vmem:[#allocation3 + $0x938] sm:$0x3f] %v2794_v43  ;;  %v2801_v62 = vrot.slane %v2502_v31, 3  ;;  %2992 = vst [vmem:[#allocation3 + $0x940] sm:$0xff] %v2797_v57  ;;  %v2800_v23 = vsel %vm2654_vm3, %v2798_v39, %v2799_v27 }
 0x1b8   : > { %v2803_v10 = vrot.slane %v2503_v24, 3  ;;  %v2505_v25 = vld [vmem:[#allocation2 + $0xd0] sm:$0xf8]  ;;  %v2508_v0 = vld [vmem:[#allocation2 + $0x258] sm:$0x1]  ;;  %2993 = vst [vmem:[#allocation3 + $0x948] sm:$0xff] %v2800_v23  ;;  %v2807_v37 = vsel %vm2654_vm3, %v2805_v4, %v2806_v32 }
 0x1b9   : > { %v2808_v40 = vrot.slane %v2505_v25, 3  ;;  %v8660_v5 = vld [vmem:[#allocation2 + $0x58] sm:$0xff]  ;;  %v2802_v58 = vsel %vm2654_vm3, %v2796_v6, %v2801_v62  ;;  %v2809_v56 = vrot.slane %v8658_v1, 3  ;;  %v2811_v53 = vrot.slane %v2508_v0, 3  ;;  %v2509_v9 = vld [vmem:[#allocation2 + $0x220] sm:$0x1] }
 0x1ba   : > { %v2804_v35 = vsel %vm2654_vm3, %v2799_v27, %v2803_v10  ;;  %v2510_v29 = vld [vmem:[#allocation2 + $0x2a0] sm:$0xf8]  ;;  %2994 = vst [vmem:[#allocation3 + $0x950] sm:$0x3f] %v2802_v58  ;;  %v2813_v48 = vrot.slane %v2509_v9, 3  ;;  %v2816_v47 = vrot.slane %v8660_v5, 3 }
 0x1bb   : > { %2995 = vst [vmem:[#allocation3 + $0x958] sm:$0x3f] %v2804_v35  ;;  %v2815_v51 = vrot.slane %v2510_v29, 3  ;;  %v2511_v45 = vld [vmem:[#allocation2 + $0x1a0] sm:$0xf8]  ;;  %v8667_v63 = vld [vmem:[#allocation2 + $0x208] sm:$0xff]  ;;  %v2810_v17 = vsel %vm2654_vm3, %v2808_v40, %v2809_v56  ;;  %v2812_v42 = vsel %vm2654_vm3, %v2806_v32, %v2811_v53 }
 0x1bc   : > { %2996 = vst [vmem:[#allocation3 + $0x960] sm:$0xff] %v2807_v37  ;;  %v2818_v41 = vrot.slane %v2511_v45, 3  ;;  %v2819_v49 = vrot.slane %v8667_v63, 3  ;;  %v2514_v20 = vld [vmem:[#allocation2 + $0x1e0] sm:$0x1]  ;;  %2997 = vst [vmem:[#allocation3 + $0x968] sm:$0xff] %v2810_v17  ;;  %v2814_v30 = vsel %vm2654_vm3, %v2809_v56, %v2813_v48 }
 0x1bd   : > { %v2515_v28 = vld [vmem:[#allocation2 + $0x100] sm:$0x1]  ;;  %2998 = vst [vmem:[#allocation3 + $0x970] sm:$0x3f] %v2812_v42  ;;  %v2817_v6 = vsel %vm2654_vm3, %v2815_v51, %v2816_v47  ;;  %v2821_v8 = vrot.slane %v2514_v20, 3 }
 0x1be   : > { %v2823_v27 = vrot.slane %v2515_v28, 3  ;;  %v2516_v15 = vld [vmem:[#allocation2 + $0x10] sm:$0xf8]  ;;  %v2517_v43 = vld [vmem:[#allocation2 + $0x268] sm:$0xf8]  ;;  %3000 = vst [vmem:[#allocation3 + $0x980] sm:$0xff] %v2817_v6  ;;  %v2820_v39 = vsel %vm2654_vm3, %v2818_v41, %v2819_v49 }
 0x1bf   : > { %2999 = vst [vmem:[#allocation3 + $0x978] sm:$0x3f] %v2814_v30  ;;  %v2825_v31 = vrot.slane %v2516_v15, 3  ;;  %v2828_v24 = vrot.slane %v2517_v43, 3  ;;  %v2520_v32 = vld [vmem:[#allocation2 + $0x1f8] sm:$0x1]  ;;  %v2822_v62 = vsel %vm2654_vm3, %v2816_v47, %v2821_v8 }
 0x1c0   : > { %v2521_v57 = vld [vmem:[#allocation2 + $0x218] sm:$0x1]  ;;  %3001 = vst [vmem:[#allocation3 + $0x988] sm:$0xff] %v2820_v39  ;;  %v2824_v10 = vsel %vm2654_vm3, %v2819_v49, %v2823_v27  ;;  %v2831_v46 = vrot.slane %v2520_v32, 3  ;;  %v2522_v23 = vld [vmem:[#allocation2 + $0x198] sm:$0xf8] }
 0x1c1   : > { %v2833_v25 = vrot.slane %v2521_v57, 3  ;;  %v2523_v4 = vld [vmem:[#allocation2 + $0x2a8] sm:$0xf8]  ;;  %3002 = vst [vmem:[#allocation3 + $0x990] sm:$0x3f] %v2822_v62  ;;  %v2827_v40 = vsel %vm2654_vm3, %v2825_v31, %v9890_v50  ;;  %v2830_v0 = vsel %vm2654_vm3, %v2828_v24, %v9890_v50  ;;  %v2835_v58 = vrot.slane %v2522_v23, 3 }
 0x1c2   : > { %3003 = vst [vmem:[#allocation3 + $0x998] sm:$0x3f] %v2824_v10  ;;  %v2838_v35 = vrot.slane %v2523_v4, 3  ;;  %v2526_v56 = vld [vmem:[#allocation2 + $0x240] sm:$0x1]  ;;  %3004 = vst [vmem:[#allocation3 + $0x9a0] sm:$0xff] %v2827_v40  ;;  %v2832_v9 = vsel %vm2654_vm3, %v9890_v50, %v2831_v46 }
 0x1c3   : > { %v2527_v53 = vld [vmem:[#allocation2 + $0x178] sm:$0x1]  ;;  %3005 = vst [vmem:[#allocation3 + $0x9a8] sm:$0xff] %v2830_v0  ;;  %v2834_v29 = vsel %vm2654_vm3, %v9890_v50, %v2833_v25  ;;  %v2841_v37 = vrot.slane %v2526_v56, 3  ;;  %v2528_v51 = vld [vmem:[#allocation2 + $0xb0] sm:$0xf8]  ;;  %v2837_v45 = vsel %vm2654_vm3, %v2835_v58, %v9890_v50 }
 0x1c4   : > { %v2843_v48 = vrot.slane %v2527_v53, 3  ;;  %v2529_v47 = vld [vmem:[#allocation2 + $0x398] sm:$0xf8]  ;;  %3006 = vst [vmem:[#allocation3 + $0x9b0] sm:$0x3f] %v2832_v9  ;;  %v2840_v17 = vsel %vm2654_vm3, %v2838_v35, %v9890_v50  ;;  %v2845_v42 = vrot.slane %v2528_v51, 3 }
 0x1c5   : > { %3007 = vst [vmem:[#allocation3 + $0x9b8] sm:$0x3f] %v2834_v29  ;;  %v2848_v41 = vrot.slane %v2529_v47, 3  ;;  %v2532_v49 = vld [vmem:[#allocation2 + $0x2c8] sm:$0x1]  ;;  %3008 = vst [vmem:[#allocation3 + $0x9c0] sm:$0xff] %v2837_v45  ;;  %v2842_v28 = vsel %vm2654_vm3, %v9890_v50, %v2841_v37 }
 0x1c6   : > { %v2533_v20 = vld [vmem:[#allocation2 + $0x310] sm:$0x1]  ;;  %3009 = vst [vmem:[#allocation3 + $0x9c8] sm:$0xff] %v2840_v17  ;;  %v2844_v30 = vsel %vm2654_vm3, %v9890_v50, %v2843_v48  ;;  %v2851_v6 = vrot.slane %v2532_v49, 3  ;;  %v3016_v27 = vld [vmem:[#allocation2 + $0x2b0] sm:$0xf0]  ;;  %v2847_v43 = vsel %vm2654_vm3, %v2845_v42, %v9890_v50 }
 0x1c7   : > { %v2853_v8 = vrot.slane %v2533_v20, 3  ;;  %v3017_v15 = vld [vmem:[#allocation2 + $0x3b0] sm:$0xf0]  ;;  %3010 = vst [vmem:[#allocation3 + $0x9d0] sm:$0x3f] %v2842_v28  ;;  %v2850_v39 = vsel %vm2654_vm3, %v2848_v41, %v9890_v50  ;;  %v3257_v31 = vrot.slane %v3016_v27, 4 }
 0x1c8   : > { %3011 = vst [vmem:[#allocation3 + $0x9d8] sm:$0x3f] %v2844_v30  ;;  %v3020_v24 = vld [vmem:[#allocation2 + $0x50] sm:$0x3]  ;;  %v3021_v32 = vld [vmem:[#allocation2 + $0x368] sm:$0x3]  ;;  %v2852_v57 = vsel %vm2654_vm3, %v9890_v50, %v2851_v6 }
 0x1c9   : > { %3012 = vst [vmem:[#allocation3 + $0x9e0] sm:$0xff] %v2847_v43  ;;  %3013 = vst [vmem:[#allocation3 + $0x9e8] sm:$0xff] %v2850_v39  ;;  %v2854_v62 = vsel %vm2654_vm3, %v9890_v50, %v2853_v8  ;;  %v8701_v10 = vld [vmem:[#allocation2 + $0x2b0] sm:$0xff]  ;;  %v3260_v25 = vrot.slane %v3017_v15, 4  ;;  %v3023_v4 = vld [vmem:[#allocation2 + $0x48] sm:$0xf0] }
 0x1ca   : > { %v8704_v46 = vrot.slane %v8701_v10, 4  ;;  %v3022_v23 = vld [vmem:[#allocation2 + $0x330] sm:$0xf0]  ;;  %3014 = vst [vmem:[#allocation3 + $0x9f0] sm:$0x3f] %v2852_v57  ;;  %v3263_v40 = vrot.slane %v3020_v24, 4 }
 0x1cb   : > { %3015 = vst [vmem:[#allocation3 + $0x9f8] sm:$0x3f] %v2854_v62  ;;  %v3265_v0 = vrot.slane %v3021_v32, 4  ;;  %v3267_v58 = vrot.slane %v3022_v23, 4  ;;  %v3270_v35 = vrot.slane %v3023_v4, 4  ;;  %v7125_v48 = vld [vmem:[#allocation2 + $0x80] sm:$0xff] }
 0x1cc   : > { %v3026_v56 = vld [vmem:[#allocation2 + $0x118] sm:$0x3]  ;;  %v3259_v53 = vsel %vm3256_vm4, %v3257_v31, %v8704_v46  ;;  %v3262_v50 = vsel %vm3256_vm4, %v3260_v25, %v8704_v46  ;;  %v3028_v37 = vld [vmem:[#allocation2 + $0x320] sm:$0xf0]  ;;  %v3288_v51 = vrot.slane %v7125_v48, 4  ;;  %v3264_v47 = vsel %vm3256_vm4, %v8704_v46, %v3263_v40 }
 0x1cd   : > { %v3273_v9 = vrot.slane %v3026_v56, 4  ;;  %v3027_v29 = vld [vmem:[#allocation2 + $0x98] sm:$0x3]  ;;  %3538 = vst [vmem:[#allocation3 + $0xa00] sm:$0xff] %v3259_v53  ;;  %3539 = vst [vmem:[#allocation3 + $0xa08] sm:$0xff] %v3262_v50  ;;  %v3266_v45 = vsel %vm3256_vm4, %v8704_v46, %v3265_v0  ;;  %v3269_v17 = vsel %vm3256_vm4, %v3267_v58, %v8704_v46  ;;  %v3272_v42 = vsel %vm3256_vm4, %v3270_v35, %v8704_v46 }
 0x1ce   : > { %v3029_v41 = vld [vmem:[#allocation2 + $0x150] sm:$0xf0]  ;;  %v3032_v49 = vld [vmem:[#allocation2 + $0x2e0] sm:$0x3]  ;;  %v3033_v20 = vld [vmem:[#allocation2 + $0x388] sm:$0x3] }
 0x1cf   : > { %3540 = vst [vmem:[#allocation3 + $0xa10] sm:$0x3f] %v3264_v47  ;;  %3541 = vst [vmem:[#allocation3 + $0xa18] sm:$0x3f] %v3266_v45  ;;  %v3274_v28 = vsel %vm3256_vm4, %v8704_v46, %v3273_v9  ;;  %v3275_v30 = vrot.slane %v3027_v29, 4  ;;  %v3277_v6 = vrot.slane %v3028_v37, 4 }
 0x1d0   : > { %3542 = vst [vmem:[#allocation3 + $0xa20] sm:$0xff] %v3269_v17  ;;  %3543 = vst [vmem:[#allocation3 + $0xa28] sm:$0xff] %v3272_v42  ;;  %v3280_v8 = vrot.slane %v3029_v41, 4  ;;  %v3034_v27 = vld [vmem:[#allocation2 + $0x338] sm:$0xf0]  ;;  %v3283_v15 = vrot.slane %v3032_v49, 4 }
 0x1d1   : > { %3544 = vst [vmem:[#allocation3 + $0xa30] sm:$0x3f] %v3274_v28  ;;  %v3285_v43 = vrot.slane %v3033_v20, 4  ;;  %v3287_v39 = vrot.slane %v3034_v27, 4  ;;  %v3035_v31 = vld [vmem:[#allocation2 + $0x340] sm:$0xf0]  ;;  %v3276_v32 = vsel %vm3256_vm4, %v8704_v46, %v3275_v30  ;;  %v3279_v57 = vsel %vm3256_vm4, %v3277_v6, %v8704_v46 }
 0x1d2   : > { %v3291_v24 = vrot.slane %v8532_v3, 4  ;;  %v3282_v62 = vsel %vm3256_vm4, %v3280_v8, %v8704_v46  ;;  %v3290_v25 = vrot.slane %v3035_v31, 4  ;;  %v3038_v23 = vld [vmem:[#allocation2 + $0x1b8] sm:$0x3]  ;;  %v3039_v4 = vld [vmem:[#allocation2 + $0x168] sm:$0x3]  ;;  %v3284_v40 = vsel %vm3256_vm4, %v8704_v46, %v3283_v15 }
 0x1d3   : > { %3545 = vst [vmem:[#allocation3 + $0xa38] sm:$0x3f] %v3276_v32  ;;  %3546 = vst [vmem:[#allocation3 + $0xa40] sm:$0xff] %v3279_v57  ;;  %v3286_v3 = vsel %vm3256_vm4, %v8704_v46, %v3285_v43  ;;  %v3289_v0 = vsel %vm3256_vm4, %v3287_v39, %v3288_v51  ;;  %v3293_v58 = vrot.slane %v3038_v23, 4  ;;  %v3040_v35 = vld [vmem:[#allocation2 + $0x2f0] sm:$0xf0] }
 0x1d4   : > { %3547 = vst [vmem:[#allocation3 + $0xa48] sm:$0xff] %v3282_v62  ;;  %v3041_v56 = vld [vmem:[#allocation2 + $0x288] sm:$0xf0]  ;;  %3548 = vst [vmem:[#allocation3 + $0xa50] sm:$0x3f] %v3284_v40  ;;  %v3292_v53 = vsel %vm3256_vm4, %v3290_v25, %v3291_v24  ;;  %v3295_v50 = vrot.slane %v3039_v4, 4 }
 0x1d5   : > { %3549 = vst [vmem:[#allocation3 + $0xa58] sm:$0x3f] %v3286_v3  ;;  %3550 = vst [vmem:[#allocation3 + $0xa60] sm:$0xff] %v3289_v0  ;;  %v3297_v9 = vrot.slane %v3040_v35, 4  ;;  %v3298_v29 = vrot.slane %v8534_v54, 4  ;;  %v3294_v48 = vsel %vm3256_vm4, %v3288_v51, %v3293_v58  ;;  %v3300_v47 = vrot.slane %v3041_v56, 4 }
 0x1d6   : > { %v3044_v37 = vld [vmem:[#allocation2 + $0x1b0] sm:$0x3]  ;;  %3551 = vst [vmem:[#allocation3 + $0xa68] sm:$0xff] %v3292_v53  ;;  %v3301_v45 = vrot.slane %v8545_v44, 4  ;;  %3552 = vst [vmem:[#allocation3 + $0xa70] sm:$0x3f] %v3294_v48  ;;  %v3296_v41 = vsel %vm3256_vm4, %v3291_v24, %v3295_v50 }
 0x1d7   : > { %v3303_v17 = vrot.slane %v3044_v37, 4  ;;  %v3045_v42 = vld [vmem:[#allocation2 + $0x270] sm:$0x3]  ;;  %v3299_v49 = vsel %vm3256_vm4, %v3297_v9, %v3298_v29  ;;  %v3046_v28 = vld [vmem:[#allocation2 + $0xf0] sm:$0xf0]  ;;  %v3308_v30 = vrot.slane %v8554_v36, 4 }
 0x1d8   : > { %v3305_v20 = vrot.slane %v3045_v42, 4  ;;  %v3047_v6 = vld [vmem:[#allocation2 + $0x8] sm:$0xf0]  ;;  %3553 = vst [vmem:[#allocation3 + $0xa78] sm:$0x3f] %v3296_v41  ;;  %3554 = vst [vmem:[#allocation3 + $0xa80] sm:$0xff] %v3299_v49  ;;  %v3302_v54 = vsel %vm3256_vm4, %v3300_v47, %v3301_v45 }
 0x1d9   : > { %v3304_v51 = vsel %vm3256_vm4, %v3298_v29, %v3303_v17  ;;  %v3307_v8 = vrot.slane %v3046_v28, 4  ;;  %v3310_v44 = vrot.slane %v3047_v6, 4  ;;  %v3050_v27 = vld [vmem:[#allocation2 + $0x390] sm:$0x3]  ;;  %v3051_v15 = vld [vmem:[#allocation2 + $0x278] sm:$0x3] }
 0x1da   : > { %3555 = vst [vmem:[#allocation3 + $0xa88] sm:$0xff] %v3302_v54  ;;  %3556 = vst [vmem:[#allocation3 + $0xa90] sm:$0x3f] %v3304_v51  ;;  %v3306_v43 = vsel %vm3256_vm4, %v3301_v45, %v3305_v20  ;;  %v3311_v39 = vrot.slane %v8556_v52, 4  ;;  %v3313_v31 = vrot.slane %v3050_v27, 4  ;;  %v3315_v24 = vrot.slane %v3051_v15, 4 }
 0x1db   : > { %v3052_v36 = vld [vmem:[#allocation2] sm:$0xf0]  ;;  %3557 = vst [vmem:[#allocation3 + $0xa98] sm:$0x3f] %v3306_v43  ;;  %v3309_v32 = vsel %vm3256_vm4, %v3307_v8, %v3308_v30  ;;  %v3318_v62 = vrot.slane %v8561_v19, 4  ;;  %v3321_v23 = vrot.slane %v8568_v55, 4 }
 0x1dc   : > { %v3317_v57 = vrot.slane %v3052_v36, 4  ;;  %v3053_v25 = vld [vmem:[#allocation2 + $0x290] sm:$0xf0]  ;;  %3558 = vst [vmem:[#allocation3 + $0xaa0] sm:$0xff] %v3309_v32  ;;  %v3312_v4 = vsel %vm3256_vm4, %v3310_v44, %v3311_v39  ;;  %v3314_v40 = vsel %vm3256_vm4, %v3308_v30, %v3313_v31  ;;  %v3316_v3 = vsel %vm3256_vm4, %v3311_v39, %v3315_v24  ;;  %v3056_v0 = vld [vmem:[#allocation2 + $0x1c0] sm:$0x3] }
 0x1dd   : > { %v3320_v52 = vrot.slane %v3053_v25, 4  ;;  %v3057_v58 = vld [vmem:[#allocation2 + $0x90] sm:$0x3]  ;;  %3559 = vst [vmem:[#allocation3 + $0xaa8] sm:$0xff] %v3312_v4  ;;  %3560 = vst [vmem:[#allocation3 + $0xab0] sm:$0x3f] %v3314_v40 }
 0x1de   : > { %3561 = vst [vmem:[#allocation3 + $0xab8] sm:$0x3f] %v3316_v3  ;;  %v3319_v35 = vsel %vm3256_vm4, %v3317_v57, %v3318_v62  ;;  %v3323_v56 = vrot.slane %v3056_v0, 4  ;;  %v3325_v19 = vrot.slane %v3057_v58, 4  ;;  %v3058_v53 = vld [vmem:[#allocation2 + $0x70] sm:$0xf0] }
 0x1df   : > { %v3328_v55 = vrot.slane %v8570_v21, 4  ;;  %3562 = vst [vmem:[#allocation3 + $0xac0] sm:$0xff] %v3319_v35  ;;  %v3322_v50 = vsel %vm3256_vm4, %v3320_v52, %v3321_v23  ;;  %v3327_v9 = vrot.slane %v3058_v53, 4  ;;  %v3059_v29 = vld [vmem:[#allocation2 + $0x210] sm:$0xf0]  ;;  %v3331_v37 = vrot.slane %v8577_v60, 4 }
 0x1e0   : > { %v3062_v48 = vld [vmem:[#allocation2 + $0x1d8] sm:$0x3]  ;;  %3563 = vst [vmem:[#allocation3 + $0xac8] sm:$0xff] %v3322_v50  ;;  %v3324_v47 = vsel %vm3256_vm4, %v3318_v62, %v3323_v56  ;;  %v3326_v45 = vsel %vm3256_vm4, %v3321_v23, %v3325_v19  ;;  %v3330_v17 = vrot.slane %v3059_v29, 4  ;;  %v3063_v41 = vld [vmem:[#allocation2 + $0x260] sm:$0x3] }
 0x1e1   : > { %v3333_v42 = vrot.slane %v3062_v48, 4  ;;  %v3064_v49 = vld [vmem:[#allocation2 + $0x358] sm:$0xf0]  ;;  %3564 = vst [vmem:[#allocation3 + $0xad0] sm:$0x3f] %v3324_v47  ;;  %v3329_v21 = vsel %vm3256_vm4, %v3327_v9, %v3328_v55  ;;  %v3335_v20 = vrot.slane %v3063_v41, 4 }
 0x1e2   : > { %3565 = vst [vmem:[#allocation3 + $0xad8] sm:$0x3f] %v3326_v45  ;;  %v3337_v28 = vrot.slane %v3064_v49, 4  ;;  %v3338_v30 = vrot.slane %v8584_v2, 4  ;;  %v3065_v6 = vld [vmem:[#allocation2 + $0x2c0] sm:$0xf0]  ;;  %v3332_v60 = vsel %vm3256_vm4, %v3330_v17, %v3331_v37 }
 0x1e3   : > { %3566 = vst [vmem:[#allocation3 + $0xae0] sm:$0xff] %v3329_v21  ;;  %v3334_v54 = vsel %vm3256_vm4, %v3328_v55, %v3333_v42  ;;  %v3340_v51 = vrot.slane %v3065_v6, 4  ;;  %v3341_v8 = vrot.slane %v8586_v16, 4  ;;  %v3068_v44 = vld [vmem:[#allocation2 + $0x78] sm:$0x3]  ;;  %3567 = vst [vmem:[#allocation3 + $0xae8] sm:$0xff] %v3332_v60  ;;  %v3336_v15 = vsel %vm3256_vm4, %v3331_v37, %v3335_v20 }
 0x1e4   : > { %v3069_v27 = vld [vmem:[#allocation2 + $0x158] sm:$0x3]  ;;  %3568 = vst [vmem:[#allocation3 + $0xaf0] sm:$0x3f] %v3334_v54  ;;  %v3339_v43 = vsel %vm3256_vm4, %v3337_v28, %v3338_v30  ;;  %v3343_v39 = vrot.slane %v3068_v44, 4  ;;  %v3348_v57 = vrot.slane %v8591_v22, 4 }
 0x1e5   : > { %v3345_v31 = vrot.slane %v3069_v27, 4  ;;  %v3070_v2 = vld [vmem:[#allocation2 + $0xa8] sm:$0xf0]  ;;  %v3071_v24 = vld [vmem:[#allocation2 + $0x300] sm:$0xf0]  ;;  %3570 = vst [vmem:[#allocation3 + $0xb00] sm:$0xff] %v3339_v43  ;;  %v3342_v36 = vsel %vm3256_vm4, %v3340_v51, %v3341_v8 }
 0x1e6   : > { %3569 = vst [vmem:[#allocation3 + $0xaf8] sm:$0x3f] %v3336_v15  ;;  %v3347_v32 = vrot.slane %v3070_v2, 4  ;;  %v3350_v16 = vrot.slane %v3071_v24, 4  ;;  %v3074_v62 = vld [vmem:[#allocation2 + $0x40] sm:$0x3]  ;;  %v3344_v25 = vsel %vm3256_vm4, %v3338_v30, %v3343_v39 }
 0x1e7   : > { %3571 = vst [vmem:[#allocation3 + $0xb08] sm:$0xff] %v3342_v36  ;;  %v3346_v23 = vsel %vm3256_vm4, %v3341_v8, %v3345_v31  ;;  %v3351_v4 = vrot.slane %v8598_v34, 4  ;;  %v3353_v40 = vrot.slane %v3074_v62, 4  ;;  %v3075_v3 = vld [vmem:[#allocation2 + $0x1d0] sm:$0x3]  ;;  %v3358_v22 = vrot.slane %v8600_v18, 4 }
 0x1e8   : > { %v3076_v52 = vld [vmem:[#allocation2 + $0x2e8] sm:$0xf0]  ;;  %3572 = vst [vmem:[#allocation3 + $0xb10] sm:$0x3f] %v3344_v25  ;;  %3573 = vst [vmem:[#allocation3 + $0xb18] sm:$0x3f] %v3346_v23  ;;  %v3349_v0 = vsel %vm3256_vm4, %v3347_v32, %v3348_v57 }
 0x1e9   : > { %v3355_v58 = vrot.slane %v3075_v3, 4  ;;  %v3357_v35 = vrot.slane %v3076_v52, 4  ;;  %v3077_v56 = vld [vmem:[#allocation2 + $0x1f0] sm:$0xf0]  ;;  %3574 = vst [vmem:[#allocation3 + $0xb20] sm:$0xff] %v3349_v0  ;;  %v3352_v19 = vsel %vm3256_vm4, %v3350_v16, %v3351_v4  ;;  %v3354_v53 = vsel %vm3256_vm4, %v3348_v57, %v3353_v40 }
 0x1ea   : > { %v3360_v55 = vrot.slane %v3077_v56, 4  ;;  %v3361_v34 = vrot.slane %v8607_v26, 4  ;;  %v3080_v50 = vld [vmem:[#allocation2 + $0x30] sm:$0x3]  ;;  %v3081_v9 = vld [vmem:[#allocation2 + $0xc0] sm:$0x3] }
 0x1eb   : > { %3575 = vst [vmem:[#allocation3 + $0xb28] sm:$0xff] %v3352_v19  ;;  %3576 = vst [vmem:[#allocation3 + $0xb30] sm:$0x3f] %v3354_v53  ;;  %v3356_v29 = vsel %vm3256_vm4, %v3351_v4, %v3355_v58  ;;  %v3359_v37 = vsel %vm3256_vm4, %v3357_v35, %v3358_v22  ;;  %v3363_v48 = vrot.slane %v3080_v50, 4  ;;  %v3365_v47 = vrot.slane %v3081_v9, 4 }
 0x1ec   : > { %v3082_v18 = vld [vmem:[#allocation2 + $0x228] sm:$0xf0]  ;;  %v3083_v45 = vld [vmem:[#allocation2 + $0x170] sm:$0xf0]  ;;  %3577 = vst [vmem:[#allocation3 + $0xb38] sm:$0x3f] %v3356_v29  ;;  %v3362_v17 = vsel %vm3256_vm4, %v3360_v55, %v3361_v34 }
 0x1ed   : > { %3578 = vst [vmem:[#allocation3 + $0xb40] sm:$0xff] %v3359_v37  ;;  %v3367_v42 = vrot.slane %v3082_v18, 4  ;;  %v3368_v41 = vrot.slane %v8614_v59, 4  ;;  %v3370_v26 = vrot.slane %v3083_v45, 4  ;;  %v3086_v49 = vld [vmem:[#allocation2 + $0x348] sm:$0x3]  ;;  %v3364_v21 = vsel %vm3256_vm4, %v3358_v22, %v3363_v48 }
 0x1ee   : > { %3579 = vst [vmem:[#allocation3 + $0xb48] sm:$0xff] %v3362_v17  ;;  %v3366_v20 = vsel %vm3256_vm4, %v3361_v34, %v3365_v47  ;;  %v3371_v28 = vrot.slane %v8616_v33, 4  ;;  %v3373_v30 = vrot.slane %v3086_v49, 4  ;;  %v3087_v6 = vld [vmem:[#allocation2 + $0x3a8] sm:$0x3]  ;;  %v3378_v59 = vrot.slane %v8621_v61, 4 }
 0x1ef   : > { %v3088_v60 = vld [vmem:[#allocation2 + $0xf8] sm:$0xf0]  ;;  %3580 = vst [vmem:[#allocation3 + $0xb50] sm:$0x3f] %v3364_v21  ;;  %3581 = vst [vmem:[#allocation3 + $0xb58] sm:$0x3f] %v3366_v20  ;;  %v3369_v54 = vsel %vm3256_vm4, %v3367_v42, %v3368_v41 }
 0x1f0   : > { %v3375_v51 = vrot.slane %v3087_v6, 4  ;;  %v3377_v8 = vrot.slane %v3088_v60, 4  ;;  %v3089_v44 = vld [vmem:[#allocation2 + $0x250] sm:$0xf0]  ;;  %3582 = vst [vmem:[#allocation3 + $0xb60] sm:$0xff] %v3369_v54  ;;  %v3372_v27 = vsel %vm3256_vm4, %v3370_v26, %v3371_v28  ;;  %v3374_v15 = vsel %vm3256_vm4, %v3368_v41, %v3373_v30 }
 0x1f1   : > { %v3380_v43 = vrot.slane %v3089_v44, 4  ;;  %v3381_v33 = vrot.slane %v8628_v7, 4  ;;  %v3092_v39 = vld [vmem:[#allocation2 + $0x2b8] sm:$0x3]  ;;  %v3093_v31 = vld [vmem:[#allocation2 + $0x128] sm:$0x3] }
 0x1f2   : > { %3583 = vst [vmem:[#allocation3 + $0xb68] sm:$0xff] %v3372_v27  ;;  %3584 = vst [vmem:[#allocation3 + $0xb70] sm:$0x3f] %v3374_v15  ;;  %v3376_v2 = vsel %vm3256_vm4, %v3371_v28, %v3375_v51  ;;  %v3379_v24 = vsel %vm3256_vm4, %v3377_v8, %v3378_v59  ;;  %v3383_v36 = vrot.slane %v3092_v39, 4  ;;  %v3385_v32 = vrot.slane %v3093_v31, 4 }
 0x1f3   : > { %v3094_v61 = vld [vmem:[#allocation2 + $0xa0] sm:$0xf0]  ;;  %3585 = vst [vmem:[#allocation3 + $0xb78] sm:$0x3f] %v3376_v2  ;;  %3586 = vst [vmem:[#allocation3 + $0xb80] sm:$0xff] %v3379_v24  ;;  %v3382_v16 = vsel %vm3256_vm4, %v3380_v43, %v3381_v33  ;;  %v3388_v25 = vrot.slane %v8630_v14, 4 }
 0x1f4   : > { %v3095_v57 = vld [vmem:[#allocation2 + $0x3a0] sm:$0xf0]  ;;  %v3387_v62 = vrot.slane %v3094_v61, 4  ;;  %v3098_v23 = vld [vmem:[#allocation2 + $0x230] sm:$0x3]  ;;  %3587 = vst [vmem:[#allocation3 + $0xb88] sm:$0xff] %v3382_v16  ;;  %v3384_v4 = vsel %vm3256_vm4, %v3378_v59, %v3383_v36  ;;  %v3386_v40 = vsel %vm3256_vm4, %v3381_v33, %v3385_v32 }
 0x1f5   : > { %v3390_v7 = vrot.slane %v3095_v57, 4  ;;  %v3391_v3 = vrot.slane %v8637_v12, 4  ;;  %v3393_v52 = vrot.slane %v3098_v23, 4  ;;  %v3099_v0 = vld [vmem:[#allocation2 + $0x298] sm:$0x3]  ;;  %v3398_v14 = vrot.slane %v8644_v11, 4 }
 0x1f6   : > { %v3100_v58 = vld [vmem:[#allocation2 + $0x318] sm:$0xf0]  ;;  %3588 = vst [vmem:[#allocation3 + $0xb90] sm:$0x3f] %v3384_v4  ;;  %3589 = vst [vmem:[#allocation3 + $0xb98] sm:$0x3f] %v3386_v40  ;;  %v3389_v35 = vsel %vm3256_vm4, %v3387_v62, %v3388_v25 }
 0x1f7   : > { %v3395_v22 = vrot.slane %v3099_v0, 4  ;;  %v3397_v56 = vrot.slane %v3100_v58, 4  ;;  %v3101_v19 = vld [vmem:[#allocation2 + $0x160] sm:$0xf0]  ;;  %3590 = vst [vmem:[#allocation3 + $0xba0] sm:$0xff] %v3389_v35  ;;  %v3392_v53 = vsel %vm3256_vm4, %v3390_v7, %v3391_v3  ;;  %v3394_v55 = vsel %vm3256_vm4, %v3388_v25, %v3393_v52 }
 0x1f8   : > { %v3400_v34 = vrot.slane %v3101_v19, 4  ;;  %v3401_v12 = vrot.slane %v8646_v38, 4  ;;  %v3104_v50 = vld [vmem:[#allocation2 + $0x120] sm:$0x3]  ;;  %3591 = vst [vmem:[#allocation3 + $0xba8] sm:$0xff] %v3392_v53  ;;  %v3408_v42 = vrot.slane %v8651_v13, 4 }
 0x1f9   : > { %v3105_v9 = vld [vmem:[#allocation2 + $0x140] sm:$0x3]  ;;  %3592 = vst [vmem:[#allocation3 + $0xbb0] sm:$0x3f] %v3394_v55  ;;  %v3396_v29 = vsel %vm3256_vm4, %v3391_v3, %v3395_v22  ;;  %v3399_v37 = vsel %vm3256_vm4, %v3397_v56, %v3398_v14  ;;  %v3403_v48 = vrot.slane %v3104_v50, 4  ;;  %v3411_v21 = vrot.slane %v8658_v1, 4 }
 0x1fa   : > { %v3405_v47 = vrot.slane %v3105_v9, 4  ;;  %v3106_v11 = vld [vmem:[#allocation2 + $0x68] sm:$0xf0]  ;;  %v3107_v18 = vld [vmem:[#allocation2 + $0xd0] sm:$0xf0]  ;;  %3594 = vst [vmem:[#allocation3 + $0xbc0] sm:$0xff] %v3399_v37  ;;  %v3402_v45 = vsel %vm3256_vm4, %v3400_v34, %v3401_v12 }
 0x1fb   : > { %3593 = vst [vmem:[#allocation3 + $0xbb8] sm:$0x3f] %v3396_v29  ;;  %v3407_v17 = vrot.slane %v3106_v11, 4  ;;  %v3410_v38 = vrot.slane %v3107_v18, 4  ;;  %v3110_v41 = vld [vmem:[#allocation2 + $0x258] sm:$0x3]  ;;  %v3404_v26 = vsel %vm3256_vm4, %v3398_v14, %v3403_v48 }
 0x1fc   : > { %3595 = vst [vmem:[#allocation3 + $0xbc8] sm:$0xff] %v3402_v45  ;;  %v3406_v49 = vsel %vm3256_vm4, %v3401_v12, %v3405_v47  ;;  %v3413_v20 = vrot.slane %v3110_v41, 4  ;;  %v3111_v28 = vld [vmem:[#allocation2 + $0x220] sm:$0x3]  ;;  %v3112_v30 = vld [vmem:[#allocation2 + $0x2a0] sm:$0xf0] }
 0x1fd   : > { %3596 = vst [vmem:[#allocation3 + $0xbd0] sm:$0x3f] %v3404_v26  ;;  %3597 = vst [vmem:[#allocation3 + $0xbd8] sm:$0x3f] %v3406_v49  ;;  %v3409_v6 = vsel %vm3256_vm4, %v3407_v17, %v3408_v42  ;;  %v3415_v60 = vrot.slane %v3111_v28, 4  ;;  %v3417_v54 = vrot.slane %v3112_v30, 4  ;;  %v3412_v8 = vsel %vm3256_vm4, %v3410_v38, %v3411_v21 }
 0x1fe   : > { %v3418_v13 = vrot.slane %v8660_v5, 4  ;;  %v3113_v51 = vld [vmem:[#allocation2 + $0x1a0] sm:$0xf0]  ;;  %3598 = vst [vmem:[#allocation3 + $0xbe0] sm:$0xff] %v3409_v6  ;;  %v3414_v59 = vsel %vm3256_vm4, %v3408_v42, %v3413_v20  ;;  %v3421_v1 = vrot.slane %v8667_v63, 4  ;;  %3599 = vst [vmem:[#allocation3 + $0xbe8] sm:$0xff] %v3412_v8 }
 0x1ff   : > { %v3420_v44 = vrot.slane %v3113_v51, 4  ;;  %v3116_v27 = vld [vmem:[#allocation2 + $0x1e0] sm:$0x3]  ;;  %3600 = vst [vmem:[#allocation3 + $0xbf0] sm:$0x3f] %v3414_v59  ;;  %v3416_v43 = vsel %vm3256_vm4, %v3411_v21, %v3415_v60  ;;  %v8836_v26 = vrot.slane %v8701_v10, 5 }
 0x200   : > { %v3117_v15 = vld [vmem:[#allocation2 + $0x100] sm:$0x3]  ;;  %v3419_v33 = vsel %vm3256_vm4, %v3417_v54, %v3418_v13  ;;  %v3423_v39 = vrot.slane %v3116_v27, 4  ;;  %v3118_v5 = vld [vmem:[#allocation2 + $0x10] sm:$0xf0] }
 0x201   : > { %v3425_v31 = vrot.slane %v3117_v15, 4  ;;  %v3119_v2 = vld [vmem:[#allocation2 + $0x268] sm:$0xf0]  ;;  %3601 = vst [vmem:[#allocation3 + $0xbf8] sm:$0x3f] %v3416_v43  ;;  %3602 = vst [vmem:[#allocation3 + $0xc00] sm:$0xff] %v3419_v33  ;;  %v3422_v24 = vsel %vm3256_vm4, %v3420_v44, %v3421_v1 }
 0x202   : > { %v3427_v36 = vrot.slane %v3118_v5, 4  ;;  %v3430_v32 = vrot.slane %v3119_v2, 4  ;;  %v3122_v61 = vld [vmem:[#allocation2 + $0x1f8] sm:$0x3]  ;;  %3603 = vst [vmem:[#allocation3 + $0xc08] sm:$0xff] %v3422_v24  ;;  %v3424_v57 = vsel %vm3256_vm4, %v3418_v13, %v3423_v39  ;;  %v8825_v37 = vld [vmem:[#allocation2 + $0x80] sm:$0xff] }
 0x203   : > { %v3123_v63 = vld [vmem:[#allocation2 + $0x218] sm:$0x3]  ;;  %v3426_v16 = vsel %vm3256_vm4, %v3421_v1, %v3425_v31  ;;  %v3433_v62 = vrot.slane %v3122_v61, 4  ;;  %v3124_v7 = vld [vmem:[#allocation2 + $0x198] sm:$0xf0]  ;;  %v8844_v44 = vld [vmem:[#allocation2 + $0x1a8] sm:$0xff] }
 0x204   : > { %v3435_v25 = vrot.slane %v3123_v63, 4  ;;  %v3125_v23 = vld [vmem:[#allocation2 + $0x2a8] sm:$0xf0]  ;;  %3604 = vst [vmem:[#allocation3 + $0xc10] sm:$0x3f] %v3424_v57  ;;  %v3429_v4 = vsel %vm3256_vm4, %v3427_v36, %v8704_v46  ;;  %v3432_v40 = vsel %vm3256_vm4, %v3430_v32, %v8704_v46  ;;  %v3437_v3 = vrot.slane %v3124_v7, 4 }
 0x205   : > { %3605 = vst [vmem:[#allocation3 + $0xc18] sm:$0x3f] %v3426_v16  ;;  %v3440_v52 = vrot.slane %v3125_v23, 4  ;;  %v3128_v0 = vld [vmem:[#allocation2 + $0x240] sm:$0x3]  ;;  %3606 = vst [vmem:[#allocation3 + $0xc20] sm:$0xff] %v3429_v4  ;;  %v3434_v35 = vsel %vm3256_vm4, %v8704_v46, %v3433_v62 }
 0x206   : > { %v3129_v58 = vld [vmem:[#allocation2 + $0x178] sm:$0x3]  ;;  %3607 = vst [vmem:[#allocation3 + $0xc28] sm:$0xff] %v3432_v40  ;;  %v3436_v22 = vsel %vm3256_vm4, %v8704_v46, %v3435_v25  ;;  %v3443_v56 = vrot.slane %v3128_v0, 4  ;;  %v3130_v19 = vld [vmem:[#allocation2 + $0xb0] sm:$0xf0]  ;;  %v3439_v55 = vsel %vm3256_vm4, %v3437_v3, %v8704_v46 }
 0x207   : > { %v3445_v14 = vrot.slane %v3129_v58, 4  ;;  %v3131_v53 = vld [vmem:[#allocation2 + $0x398] sm:$0xf0]  ;;  %3608 = vst [vmem:[#allocation3 + $0xc30] sm:$0x3f] %v3434_v35  ;;  %v3442_v34 = vsel %vm3256_vm4, %v3440_v52, %v8704_v46  ;;  %v3447_v12 = vrot.slane %v3130_v19, 4 }
 0x208   : > { %3609 = vst [vmem:[#allocation3 + $0xc38] sm:$0x3f] %v3436_v22  ;;  %v3450_v50 = vrot.slane %v3131_v53, 4  ;;  %v3134_v9 = vld [vmem:[#allocation2 + $0x2c8] sm:$0x3]  ;;  %3610 = vst [vmem:[#allocation3 + $0xc40] sm:$0xff] %v3439_v55  ;;  %v3444_v48 = vsel %vm3256_vm4, %v8704_v46, %v3443_v56 }
 0x209   : > { %v3135_v29 = vld [vmem:[#allocation2 + $0x310] sm:$0x3]  ;;  %3611 = vst [vmem:[#allocation3 + $0xc48] sm:$0xff] %v3442_v34  ;;  %v3446_v47 = vsel %vm3256_vm4, %v8704_v46, %v3445_v14  ;;  %v3453_v11 = vrot.slane %v3134_v9, 4  ;;  %v3618_v45 = vld [vmem:[#allocation2 + $0x2b0] sm:$0xe0]  ;;  %v3449_v42 = vsel %vm3256_vm4, %v3447_v12, %v8704_v46 }
 0x20a   : > { %v3455_v18 = vrot.slane %v3135_v29, 4  ;;  %v3619_v17 = vld [vmem:[#allocation2 + $0x3b0] sm:$0xe0]  ;;  %3612 = vst [vmem:[#allocation3 + $0xc50] sm:$0x3f] %v3444_v48  ;;  %v3452_v38 = vsel %vm3256_vm4, %v3450_v50, %v8704_v46  ;;  %v3858_v41 = vrot.slane %v3618_v45, 5 }
 0x20b   : > { %3613 = vst [vmem:[#allocation3 + $0xc58] sm:$0x3f] %v3446_v47  ;;  %v3622_v49 = vld [vmem:[#allocation2 + $0x50] sm:$0x7]  ;;  %v3623_v21 = vld [vmem:[#allocation2 + $0x368] sm:$0x7]  ;;  %v3454_v20 = vsel %vm3256_vm4, %v8704_v46, %v3453_v11 }
 0x20c   : > { %3614 = vst [vmem:[#allocation3 + $0xc60] sm:$0xff] %v3449_v42  ;;  %3615 = vst [vmem:[#allocation3 + $0xc68] sm:$0xff] %v3452_v38  ;;  %v3456_v28 = vsel %vm3256_vm4, %v8704_v46, %v3455_v18  ;;  %v3861_v30 = vrot.slane %v3619_v17, 5  ;;  %v3864_v6 = vrot.slane %v3622_v49, 5  ;;  %v3624_v60 = vld [vmem:[#allocation2 + $0x330] sm:$0xe0]  ;;  %v3860_v10 = vsel %vm1116_vm0, %v3858_v41, %v8836_v26 }
 0x20d   : > { %v3625_v54 = vld [vmem:[#allocation2 + $0x48] sm:$0xe0]  ;;  %3616 = vst [vmem:[#allocation3 + $0xc70] sm:$0x3f] %v3454_v20  ;;  %3617 = vst [vmem:[#allocation3 + $0xc78] sm:$0x3f] %v3456_v28 }
 0x20e   : > { %v3866_v13 = vrot.slane %v3623_v21, 5  ;;  %v3868_v51 = vrot.slane %v3624_v60, 5  ;;  %v3871_v8 = vrot.slane %v3625_v54, 5  ;;  %v3628_v59 = vld [vmem:[#allocation2 + $0x118] sm:$0x7]  ;;  %4139 = vst [vmem:[#allocation3 + $0xc80] sm:$0xff] %v3860_v10  ;;  %v3863_v1 = vsel %vm1116_vm0, %v3861_v30, %v8836_v26 }
 0x20f   : > { %v3865_v46 = vsel %vm1116_vm0, %v8836_v26, %v3864_v6  ;;  %v3874_v27 = vrot.slane %v3628_v59, 5  ;;  %v3629_v15 = vld [vmem:[#allocation2 + $0x98] sm:$0x7]  ;;  %v3630_v43 = vld [vmem:[#allocation2 + $0x320] sm:$0xe0]  ;;  %v3889_v33 = vrot.slane %v8825_v37, 5 }
 0x210   : > { %4140 = vst [vmem:[#allocation3 + $0xc88] sm:$0xff] %v3863_v1  ;;  %4141 = vst [vmem:[#allocation3 + $0xc90] sm:$0x3f] %v3865_v46  ;;  %v3867_v39 = vsel %vm1116_vm0, %v8836_v26, %v3866_v13  ;;  %v3870_v31 = vsel %vm1116_vm0, %v3868_v51, %v8836_v26  ;;  %v3873_v5 = vsel %vm1116_vm0, %v3871_v8, %v8836_v26  ;;  %v3876_v2 = vrot.slane %v3629_v15, 5  ;;  %v3631_v24 = vld [vmem:[#allocation2 + $0x150] sm:$0xe0] }
 0x211   : > { %v3634_v36 = vld [vmem:[#allocation2 + $0x2e0] sm:$0x7]  ;;  %4142 = vst [vmem:[#allocation3 + $0xc98] sm:$0x3f] %v3867_v39  ;;  %4143 = vst [vmem:[#allocation3 + $0xca0] sm:$0xff] %v3870_v31  ;;  %v3875_v61 = vsel %vm1116_vm0, %v8836_v26, %v3874_v27  ;;  %v3878_v63 = vrot.slane %v3630_v43, 5 }
 0x212   : > { %v8857_v32 = vld [vmem:[#allocation2 + $0x360] sm:$0xff]  ;;  %4144 = vst [vmem:[#allocation3 + $0xca8] sm:$0xff] %v3873_v5  ;;  %v3881_v57 = vrot.slane %v3631_v24, 5  ;;  %v3884_v16 = vrot.slane %v3634_v36, 5  ;;  %v3635_v62 = vld [vmem:[#allocation2 + $0x388] sm:$0x7]  ;;  %v3877_v7 = vsel %vm1116_vm0, %v8836_v26, %v3876_v2 }
 0x213   : > { %v8861_v25 = vld [vmem:[#allocation2 + $0x130] sm:$0xff]  ;;  %4145 = vst [vmem:[#allocation3 + $0xcb0] sm:$0x3f] %v3875_v61  ;;  %v3886_v23 = vrot.slane %v3635_v62, 5  ;;  %v3636_v4 = vld [vmem:[#allocation2 + $0x338] sm:$0xe0]  ;;  %v3880_v52 = vsel %vm1116_vm0, %v3878_v63, %v8836_v26 }
 0x214   : > { %v3637_v40 = vld [vmem:[#allocation2 + $0x340] sm:$0xe0]  ;;  %v3892_v3 = vrot.slane %v8844_v44, 5  ;;  %4146 = vst [vmem:[#allocation3 + $0xcb8] sm:$0x3f] %v3877_v7  ;;  %v3883_v0 = vsel %vm1116_vm0, %v3881_v57, %v8836_v26  ;;  %v3885_v58 = vsel %vm1116_vm0, %v8836_v26, %v3884_v16  ;;  %v3888_v35 = vrot.slane %v3636_v4, 5 }
 0x215   : > { %v3640_v22 = vld [vmem:[#allocation2 + $0x1b8] sm:$0x7]  ;;  %v3641_v56 = vld [vmem:[#allocation2 + $0x168] sm:$0x7]  ;;  %4147 = vst [vmem:[#allocation3 + $0xcc0] sm:$0xff] %v3880_v52  ;;  %4148 = vst [vmem:[#allocation3 + $0xcc8] sm:$0xff] %v3883_v0  ;;  %v3887_v14 = vsel %vm1116_vm0, %v8836_v26, %v3886_v23 }
 0x216   : > { %4149 = vst [vmem:[#allocation3 + $0xcd0] sm:$0x3f] %v3885_v58  ;;  %v3891_v19 = vrot.slane %v3637_v40, 5  ;;  %v3894_v53 = vrot.slane %v3640_v22, 5  ;;  %v3896_v55 = vrot.slane %v3641_v56, 5  ;;  %v8874_v12 = vld [vmem:[#allocation2 + $0x148] sm:$0xff]  ;;  %v3890_v50 = vsel %vm1116_vm0, %v3888_v35, %v3889_v33 }
 0x217   : > { %v3642_v34 = vld [vmem:[#allocation2 + $0x2f0] sm:$0xe0]  ;;  %4150 = vst [vmem:[#allocation3 + $0xcd8] sm:$0x3f] %v3887_v14  ;;  %v3899_v29 = vrot.slane %v8857_v32, 5  ;;  %v3902_v47 = vrot.slane %v8861_v25, 5 }
 0x218   : > { %v3898_v9 = vrot.slane %v3642_v34, 5  ;;  %v3643_v48 = vld [vmem:[#allocation2 + $0x288] sm:$0xe0]  ;;  %v8879_v11 = vld [vmem:[#allocation2 + $0x200] sm:$0xff]  ;;  %4151 = vst [vmem:[#allocation3 + $0xce0] sm:$0xff] %v3890_v50  ;;  %v3893_v18 = vsel %vm1116_vm0, %v3891_v19, %v3892_v3  ;;  %v3895_v45 = vsel %vm1116_vm0, %v3889_v33, %v3894_v53  ;;  %v3897_v17 = vsel %vm1116_vm0, %v3892_v3, %v3896_v55  ;;  %v8896_v39 = vld [vmem:[#allocation2 + $0x370] sm:$0xff] }
 0x219   : > { %v3901_v42 = vrot.slane %v3643_v48, 5  ;;  %v3646_v38 = vld [vmem:[#allocation2 + $0x1b0] sm:$0x7]  ;;  %v8884_v49 = vld [vmem:[#allocation2 + $0x188] sm:$0xff]  ;;  %4152 = vst [vmem:[#allocation3 + $0xce8] sm:$0xff] %v3893_v18  ;;  %v3909_v6 = vrot.slane %v8874_v12, 5 }
 0x21a   : > { %v3647_v41 = vld [vmem:[#allocation2 + $0x270] sm:$0x7]  ;;  %4153 = vst [vmem:[#allocation3 + $0xcf0] sm:$0x3f] %v3895_v45  ;;  %4154 = vst [vmem:[#allocation3 + $0xcf8] sm:$0x3f] %v3897_v17  ;;  %v3900_v21 = vsel %vm1116_vm0, %v3898_v9, %v3899_v29 }
 0x21b   : > { %v3904_v20 = vrot.slane %v3646_v38, 5  ;;  %v3906_v28 = vrot.slane %v3647_v41, 5  ;;  %v3648_v30 = vld [vmem:[#allocation2 + $0xf0] sm:$0xe0]  ;;  %v8888_v60 = vld [vmem:[#allocation2 + $0xe0] sm:$0xff]  ;;  %4155 = vst [vmem:[#allocation3 + $0xd00] sm:$0xff] %v3900_v21  ;;  %v3903_v54 = vsel %vm1116_vm0, %v3901_v42, %v3902_v47 }
 0x21c   : > { %v3908_v10 = vrot.slane %v3648_v30, 5  ;;  %v3649_v13 = vld [vmem:[#allocation2 + $0x8] sm:$0xe0]  ;;  %v3912_v51 = vrot.slane %v8879_v11, 5  ;;  %v3652_v8 = vld [vmem:[#allocation2 + $0x390] sm:$0x7] }
 0x21d   : > { %v8892_v59 = vld [vmem:[#allocation2 + $0x308] sm:$0xff]  ;;  %4156 = vst [vmem:[#allocation3 + $0xd08] sm:$0xff] %v3903_v54  ;;  %v3905_v1 = vsel %vm1116_vm0, %v3899_v29, %v3904_v20  ;;  %v3907_v46 = vsel %vm1116_vm0, %v3902_v47, %v3906_v28  ;;  %v3911_v27 = vrot.slane %v3649_v13, 5  ;;  %v3914_v15 = vrot.slane %v3652_v8, 5  ;;  %v3653_v43 = vld [vmem:[#allocation2 + $0x278] sm:$0x7] }
 0x21e   : > { %v3654_v33 = vld [vmem:[#allocation2] sm:$0xe0]  ;;  %4157 = vst [vmem:[#allocation3 + $0xd10] sm:$0x3f] %v3905_v1  ;;  %4158 = vst [vmem:[#allocation3 + $0xd18] sm:$0x3f] %v3907_v46  ;;  %v3910_v31 = vsel %vm1116_vm0, %v3908_v10, %v3909_v6 }
 0x21f   : > { %v3916_v5 = vrot.slane %v3653_v43, 5  ;;  %v3918_v2 = vrot.slane %v3654_v33, 5  ;;  %v3919_v24 = vrot.slane %v8884_v49, 5  ;;  %v3655_v36 = vld [vmem:[#allocation2 + $0x290] sm:$0xe0]  ;;  %v8900_v61 = vld [vmem:[#allocation2 + $0x328] sm:$0xff]  ;;  %v3913_v63 = vsel %vm1116_vm0, %v3911_v27, %v3912_v51 }
 0x220   : > { %4159 = vst [vmem:[#allocation3 + $0xd20] sm:$0xff] %v3910_v31  ;;  %v3915_v57 = vsel %vm1116_vm0, %v3909_v6, %v3914_v15  ;;  %v3921_v16 = vrot.slane %v3655_v36, 5  ;;  %v3922_v62 = vrot.slane %v8888_v60, 5  ;;  %v3658_v7 = vld [vmem:[#allocation2 + $0x1c0] sm:$0x7]  ;;  %v8905_v4 = vld [vmem:[#allocation2 + $0x238] sm:$0xff] }
 0x221   : > { %v3659_v23 = vld [vmem:[#allocation2 + $0x90] sm:$0x7]  ;;  %4160 = vst [vmem:[#allocation3 + $0xd28] sm:$0xff] %v3913_v63  ;;  %4161 = vst [vmem:[#allocation3 + $0xd30] sm:$0x3f] %v3915_v57  ;;  %v3917_v40 = vsel %vm1116_vm0, %v3912_v51, %v3916_v5  ;;  %v3920_v3 = vsel %vm1116_vm0, %v3918_v2, %v3919_v24  ;;  %v3924_v52 = vrot.slane %v3658_v7, 5 }
 0x222   : > { %v3926_v0 = vrot.slane %v3659_v23, 5  ;;  %v3660_v58 = vld [vmem:[#allocation2 + $0x70] sm:$0xe0]  ;;  %4162 = vst [vmem:[#allocation3 + $0xd38] sm:$0x3f] %v3917_v40  ;;  %4163 = vst [vmem:[#allocation3 + $0xd40] sm:$0xff] %v3920_v3  ;;  %v3923_v22 = vsel %vm1116_vm0, %v3921_v16, %v3922_v62 }
 0x223   : > { %v3661_v35 = vld [vmem:[#allocation2 + $0x210] sm:$0xe0]  ;;  %v3928_v56 = vrot.slane %v3660_v58, 5  ;;  %v3929_v14 = vrot.slane %v8892_v59, 5  ;;  %v3664_v53 = vld [vmem:[#allocation2 + $0x1d8] sm:$0x7]  ;;  %v3925_v34 = vsel %vm1116_vm0, %v3919_v24, %v3924_v52 }
 0x224   : > { %v3931_v19 = vrot.slane %v3661_v35, 5  ;;  %v8911_v55 = vld [vmem:[#allocation2 + $0xe8] sm:$0xff]  ;;  %4164 = vst [vmem:[#allocation3 + $0xd48] sm:$0xff] %v3923_v22  ;;  %v3927_v50 = vsel %vm1116_vm0, %v3922_v62, %v3926_v0  ;;  %v3932_v9 = vrot.slane %v8896_v39, 5  ;;  %v3934_v29 = vrot.slane %v3664_v53, 5  ;;  %v8916_v18 = vld [vmem:[#allocation2 + $0x20] sm:$0xff] }
 0x225   : > { %v3665_v48 = vld [vmem:[#allocation2 + $0x260] sm:$0x7]  ;;  %v3666_v47 = vld [vmem:[#allocation2 + $0x358] sm:$0xe0]  ;;  %4165 = vst [vmem:[#allocation3 + $0xd50] sm:$0x3f] %v3925_v34  ;;  %v3930_v45 = vsel %vm1116_vm0, %v3928_v56, %v3929_v14 }
 0x226   : > { %4166 = vst [vmem:[#allocation3 + $0xd58] sm:$0x3f] %v3927_v50  ;;  %v3936_v17 = vrot.slane %v3665_v48, 5  ;;  %v3938_v42 = vrot.slane %v3666_v47, 5  ;;  %v3939_v38 = vrot.slane %v8900_v61, 5  ;;  %v8920_v21 = vld [vmem:[#allocation2 + $0x38] sm:$0xff]  ;;  %v3933_v20 = vsel %vm1116_vm0, %v3931_v19, %v3932_v9 }
 0x227   : > { %v3667_v41 = vld [vmem:[#allocation2 + $0x2c0] sm:$0xe0]  ;;  %4167 = vst [vmem:[#allocation3 + $0xd60] sm:$0xff] %v3930_v45  ;;  %v3935_v28 = vsel %vm1116_vm0, %v3929_v14, %v3934_v29  ;;  %v3942_v6 = vrot.slane %v8905_v4, 5  ;;  %v3670_v54 = vld [vmem:[#allocation2 + $0x78] sm:$0x7] }
 0x228   : > { %v3941_v30 = vrot.slane %v3667_v41, 5  ;;  %v3671_v10 = vld [vmem:[#allocation2 + $0x158] sm:$0x7]  ;;  %v8925_v13 = vld [vmem:[#allocation2 + $0x2d0] sm:$0xff]  ;;  %4168 = vst [vmem:[#allocation3 + $0xd68] sm:$0xff] %v3933_v20  ;;  %v3937_v51 = vsel %vm1116_vm0, %v3932_v9, %v3936_v17  ;;  %v3940_v8 = vsel %vm1116_vm0, %v3938_v42, %v3939_v38  ;;  %v3944_v1 = vrot.slane %v3670_v54, 5 }
 0x229   : > { %4169 = vst [vmem:[#allocation3 + $0xd70] sm:$0x3f] %v3935_v28  ;;  %v3946_v46 = vrot.slane %v3671_v10, 5  ;;  %v3672_v27 = vld [vmem:[#allocation2 + $0xa8] sm:$0xe0]  ;;  %4171 = vst [vmem:[#allocation3 + $0xd80] sm:$0xff] %v3940_v8 }
 0x22a   : > { %v3673_v15 = vld [vmem:[#allocation2 + $0x300] sm:$0xe0]  ;;  %4170 = vst [vmem:[#allocation3 + $0xd78] sm:$0x3f] %v3937_v51  ;;  %v3943_v43 = vsel %vm1116_vm0, %v3941_v30, %v3942_v6  ;;  %v3948_v33 = vrot.slane %v3672_v27, 5  ;;  %v3949_v31 = vrot.slane %v8911_v55, 5  ;;  %v3945_v36 = vsel %vm1116_vm0, %v3939_v38, %v3944_v1 }
 0x22b   : > { %v3951_v5 = vrot.slane %v3673_v15, 5  ;;  %v3676_v2 = vld [vmem:[#allocation2 + $0x40] sm:$0x7]  ;;  %4172 = vst [vmem:[#allocation3 + $0xd88] sm:$0xff] %v3943_v43  ;;  %v3947_v63 = vsel %vm1116_vm0, %v3942_v6, %v3946_v46  ;;  %v3952_v57 = vrot.slane %v8916_v18, 5  ;;  %v8936_v23 = vld [vmem:[#allocation2 + $0x138] sm:$0xff] }
 0x22c   : > { %v8931_v24 = vld [vmem:[#allocation2 + $0x280] sm:$0xff]  ;;  %v3954_v16 = vrot.slane %v3676_v2, 5  ;;  %v3677_v62 = vld [vmem:[#allocation2 + $0x1d0] sm:$0x7]  ;;  %v3678_v7 = vld [vmem:[#allocation2 + $0x2e8] sm:$0xe0]  ;;  %v3950_v40 = vsel %vm1116_vm0, %v3948_v33, %v3949_v31 }
 0x22d   : > { %4173 = vst [vmem:[#allocation3 + $0xd90] sm:$0x3f] %v3945_v36  ;;  %4174 = vst [vmem:[#allocation3 + $0xd98] sm:$0x3f] %v3947_v63  ;;  %v3956_v3 = vrot.slane %v3677_v62, 5  ;;  %v3958_v52 = vrot.slane %v3678_v7, 5  ;;  %v3953_v22 = vsel %vm1116_vm0, %v3951_v5, %v3952_v57 }
 0x22e   : > { %v3959_v0 = vrot.slane %v8920_v21, 5  ;;  %v3679_v58 = vld [vmem:[#allocation2 + $0x1f0] sm:$0xe0]  ;;  %v8940_v35 = vld [vmem:[#allocation2 + $0xb8] sm:$0xff]  ;;  %4175 = vst [vmem:[#allocation3 + $0xda0] sm:$0xff] %v3950_v40  ;;  %v3955_v56 = vsel %vm1116_vm0, %v3949_v31, %v3954_v16  ;;  %v3962_v19 = vrot.slane %v8925_v13, 5 }
 0x22f   : > { %v3961_v14 = vrot.slane %v3679_v58, 5  ;;  %v3682_v53 = vld [vmem:[#allocation2 + $0x30] sm:$0x7]  ;;  %v3683_v34 = vld [vmem:[#allocation2 + $0xc0] sm:$0x7]  ;;  %v8945_v50 = vld [vmem:[#allocation2 + $0x1e8] sm:$0xff]  ;;  %v3957_v9 = vsel %vm1116_vm0, %v3952_v57, %v3956_v3 }
 0x230   : > { %4176 = vst [vmem:[#allocation3 + $0xda8] sm:$0xff] %v3953_v22  ;;  %4177 = vst [vmem:[#allocation3 + $0xdb0] sm:$0x3f] %v3955_v56  ;;  %v3960_v29 = vsel %vm1116_vm0, %v3958_v52, %v3959_v0  ;;  %v3964_v48 = vrot.slane %v3682_v53, 5  ;;  %v3966_v47 = vrot.slane %v3683_v34, 5  ;;  %v3969_v41 = vrot.slane %v8931_v24, 5 }
 0x231   : > { %v3684_v45 = vld [vmem:[#allocation2 + $0x228] sm:$0xe0]  ;;  %v3685_v17 = vld [vmem:[#allocation2 + $0x170] sm:$0xe0]  ;;  %4178 = vst [vmem:[#allocation3 + $0xdb8] sm:$0x3f] %v3957_v9  ;;  %v3963_v42 = vsel %vm1116_vm0, %v3961_v14, %v3962_v19 }
 0x232   : > { %4179 = vst [vmem:[#allocation3 + $0xdc0] sm:$0xff] %v3960_v29  ;;  %v3968_v38 = vrot.slane %v3684_v45, 5  ;;  %v3971_v20 = vrot.slane %v3685_v17, 5  ;;  %v3688_v28 = vld [vmem:[#allocation2 + $0x348] sm:$0x7]  ;;  %v8951_v30 = vld [vmem:[#allocation2 + $0x2f8] sm:$0xff]  ;;  %v3965_v6 = vsel %vm1116_vm0, %v3959_v0, %v3964_v48  ;;  %v3967_v54 = vsel %vm1116_vm0, %v3962_v19, %v3966_v47 }
 0x233   : > { %4180 = vst [vmem:[#allocation3 + $0xdc8] sm:$0xff] %v3963_v42  ;;  %v3972_v10 = vrot.slane %v8936_v23, 5  ;;  %v3974_v51 = vrot.slane %v3688_v28, 5  ;;  %v3689_v8 = vld [vmem:[#allocation2 + $0x3a8] sm:$0x7]  ;;  %v8956_v46 = vld [vmem:[#allocation2 + $0x350] sm:$0xff] }
 0x234   : > { %v3690_v1 = vld [vmem:[#allocation2 + $0xf8] sm:$0xe0]  ;;  %4181 = vst [vmem:[#allocation3 + $0xdd0] sm:$0x3f] %v3965_v6  ;;  %4182 = vst [vmem:[#allocation3 + $0xdd8] sm:$0x3f] %v3967_v54  ;;  %v3970_v27 = vsel %vm1116_vm0, %v3968_v38, %v3969_v41 }
 0x235   : > { %v3976_v15 = vrot.slane %v3689_v8, 5  ;;  %v3978_v43 = vrot.slane %v3690_v1, 5  ;;  %v3979_v33 = vrot.slane %v8940_v35, 5  ;;  %v3691_v31 = vld [vmem:[#allocation2 + $0x250] sm:$0xe0]  ;;  %v8960_v5 = vld [vmem:[#allocation2 + $0x88] sm:$0xff]  ;;  %v3973_v2 = vsel %vm1116_vm0, %v3971_v20, %v3972_v10 }
 0x236   : > { %4183 = vst [vmem:[#allocation3 + $0xde0] sm:$0xff] %v3970_v27  ;;  %v3975_v36 = vsel %vm1116_vm0, %v3969_v41, %v3974_v51  ;;  %v3981_v63 = vrot.slane %v3691_v31, 5  ;;  %v3982_v57 = vrot.slane %v8945_v50, 5  ;;  %v3694_v16 = vld [vmem:[#allocation2 + $0x2b8] sm:$0x7]  ;;  %v8965_v7 = vld [vmem:[#allocation2 + $0x28] sm:$0xff] }
 0x237   : > { %v3695_v62 = vld [vmem:[#allocation2 + $0x128] sm:$0x7]  ;;  %4184 = vst [vmem:[#allocation3 + $0xde8] sm:$0xff] %v3973_v2  ;;  %4185 = vst [vmem:[#allocation3 + $0xdf0] sm:$0x3f] %v3975_v36  ;;  %v3977_v40 = vsel %vm1116_vm0, %v3972_v10, %v3976_v15  ;;  %v3980_v3 = vsel %vm1116_vm0, %v3978_v43, %v3979_v33  ;;  %v3984_v52 = vrot.slane %v3694_v16, 5 }
 0x238   : > { %v3986_v0 = vrot.slane %v3695_v62, 5  ;;  %v3696_v58 = vld [vmem:[#allocation2 + $0xa0] sm:$0xe0]  ;;  %4186 = vst [vmem:[#allocation3 + $0xdf8] sm:$0x3f] %v3977_v40  ;;  %4187 = vst [vmem:[#allocation3 + $0xe00] sm:$0xff] %v3980_v3  ;;  %v3983_v56 = vsel %vm1116_vm0, %v3981_v63, %v3982_v57 }
 0x239   : > { %v3697_v22 = vld [vmem:[#allocation2 + $0x3a0] sm:$0xe0]  ;;  %v3988_v14 = vrot.slane %v3696_v58, 5  ;;  %v3989_v19 = vrot.slane %v8951_v30, 5  ;;  %v3700_v34 = vld [vmem:[#allocation2 + $0x230] sm:$0x7]  ;;  %v3985_v29 = vsel %vm1116_vm0, %v3979_v33, %v3984_v52 }
 0x23a   : > { %v3991_v53 = vrot.slane %v3697_v22, 5  ;;  %v8971_v9 = vld [vmem:[#allocation2 + $0x180] sm:$0xff]  ;;  %4188 = vst [vmem:[#allocation3 + $0xe08] sm:$0xff] %v3983_v56  ;;  %v3987_v48 = vsel %vm1116_vm0, %v3982_v57, %v3986_v0  ;;  %v3992_v47 = vrot.slane %v8956_v46, 5  ;;  %v3994_v45 = vrot.slane %v3700_v34, 5  ;;  %v8976_v38 = vld [vmem:[#allocation2 + $0x378] sm:$0xff] }
 0x23b   : > { %v3701_v17 = vld [vmem:[#allocation2 + $0x298] sm:$0x7]  ;;  %v3702_v42 = vld [vmem:[#allocation2 + $0x318] sm:$0xe0]  ;;  %4189 = vst [vmem:[#allocation3 + $0xe10] sm:$0x3f] %v3985_v29  ;;  %v3990_v41 = vsel %vm1116_vm0, %v3988_v14, %v3989_v19 }
 0x23c   : > { %4190 = vst [vmem:[#allocation3 + $0xe18] sm:$0x3f] %v3987_v48  ;;  %v3996_v20 = vrot.slane %v3701_v17, 5  ;;  %v3998_v28 = vrot.slane %v3702_v42, 5  ;;  %v3999_v6 = vrot.slane %v8960_v5, 5  ;;  %v8980_v10 = vld [vmem:[#allocation2 + $0x58] sm:$0xff]  ;;  %v3993_v51 = vsel %vm1116_vm0, %v3991_v53, %v3992_v47 }
 0x23d   : > { %v3703_v54 = vld [vmem:[#allocation2 + $0x160] sm:$0xe0]  ;;  %4191 = vst [vmem:[#allocation3 + $0xe20] sm:$0xff] %v3990_v41  ;;  %v3995_v8 = vsel %vm1116_vm0, %v3989_v19, %v3994_v45  ;;  %v4002_v27 = vrot.slane %v8965_v7, 5  ;;  %v3706_v15 = vld [vmem:[#allocation2 + $0x120] sm:$0x7] }
 0x23e   : > { %v4001_v1 = vrot.slane %v3703_v54, 5  ;;  %v3707_v43 = vld [vmem:[#allocation2 + $0x140] sm:$0x7]  ;;  %4192 = vst [vmem:[#allocation3 + $0xe28] sm:$0xff] %v3993_v51  ;;  %4193 = vst [vmem:[#allocation3 + $0xe30] sm:$0x3f] %v3995_v8  ;;  %v3997_v33 = vsel %vm1116_vm0, %v3992_v47, %v3996_v20  ;;  %v4000_v31 = vsel %vm1116_vm0, %v3998_v28, %v3999_v6 }
 0x23f   : > { %v4004_v2 = vrot.slane %v3706_v15, 5  ;;  %v4006_v36 = vrot.slane %v3707_v43, 5  ;;  %v3708_v63 = vld [vmem:[#allocation2 + $0x68] sm:$0xe0]  ;;  %v3709_v57 = vld [vmem:[#allocation2 + $0xd0] sm:$0xe0] }
 0x240   : > { %4194 = vst [vmem:[#allocation3 + $0xe38] sm:$0x3f] %v3997_v33  ;;  %4195 = vst [vmem:[#allocation3 + $0xe40] sm:$0xff] %v4000_v31  ;;  %v4003_v16 = vsel %vm1116_vm0, %v4001_v1, %v4002_v27  ;;  %v4008_v62 = vrot.slane %v3708_v63, 5  ;;  %v4009_v40 = vrot.slane %v8971_v9, 5  ;;  %v4011_v3 = vrot.slane %v3709_v57, 5 }
 0x241   : > { %v3712_v52 = vld [vmem:[#allocation2 + $0x258] sm:$0x7]  ;;  %v8989_v0 = vld [vmem:[#allocation2 + $0x208] sm:$0xff]  ;;  %4196 = vst [vmem:[#allocation3 + $0xe48] sm:$0xff] %v4003_v16  ;;  %v4005_v58 = vsel %vm1116_vm0, %v3999_v6, %v4004_v2  ;;  %v4007_v22 = vsel %vm1116_vm0, %v4002_v27, %v4006_v36  ;;  %v4012_v56 = vrot.slane %v8976_v38, 5  ;;  %v4019_v47 = vrot.slane %v8980_v10, 5 }
 0x242   : > { %v4014_v14 = vrot.slane %v3712_v52, 5  ;;  %v3713_v19 = vld [vmem:[#allocation2 + $0x220] sm:$0x7]  ;;  %v3714_v53 = vld [vmem:[#allocation2 + $0x2a0] sm:$0xe0]  ;;  %v4010_v34 = vsel %vm1116_vm0, %v4008_v62, %v4009_v40  ;;  %v4022_v20 = vrot.slane %v8989_v0, 5 }
 0x243   : > { %4197 = vst [vmem:[#allocation3 + $0xe50] sm:$0x3f] %v4005_v58  ;;  %4198 = vst [vmem:[#allocation3 + $0xe58] sm:$0x3f] %v4007_v22  ;;  %v4016_v29 = vrot.slane %v3713_v19, 5  ;;  %v4018_v48 = vrot.slane %v3714_v53, 5  ;;  %v4013_v17 = vsel %vm1116_vm0, %v4011_v3, %v4012_v56 }
 0x244   : > { %v3715_v45 = vld [vmem:[#allocation2 + $0x1a0] sm:$0xe0]  ;;  %4199 = vst [vmem:[#allocation3 + $0xe60] sm:$0xff] %v4010_v34  ;;  %v4015_v42 = vsel %vm1116_vm0, %v4009_v40, %v4014_v14  ;;  %v3718_v28 = vld [vmem:[#allocation2 + $0x1e0] sm:$0x7]  ;;  %4200 = vst [vmem:[#allocation3 + $0xe68] sm:$0xff] %v4013_v17 }
 0x245   : > { %v4021_v41 = vrot.slane %v3715_v45, 5  ;;  %v3719_v6 = vld [vmem:[#allocation2 + $0x100] sm:$0x7]  ;;  %4201 = vst [vmem:[#allocation3 + $0xe70] sm:$0x3f] %v4015_v42  ;;  %v4017_v54 = vsel %vm1116_vm0, %v4012_v56, %v4016_v29  ;;  %v4020_v51 = vsel %vm1116_vm0, %v4018_v48, %v4019_v47  ;;  %v4024_v8 = vrot.slane %v3718_v28, 5 }
 0x246   : > { %v4026_v1 = vrot.slane %v3719_v6, 5  ;;  %v3720_v27 = vld [vmem:[#allocation2 + $0x10] sm:$0xe0]  ;;  %v3721_v15 = vld [vmem:[#allocation2 + $0x268] sm:$0xe0]  ;;  %4203 = vst [vmem:[#allocation3 + $0xe80] sm:$0xff] %v4020_v51 }
 0x247   : > { %4202 = vst [vmem:[#allocation3 + $0xe78] sm:$0x3f] %v4017_v54  ;;  %v4023_v43 = vsel %vm1116_vm0, %v4021_v41, %v4022_v20  ;;  %v4028_v33 = vrot.slane %v3720_v27, 5  ;;  %v4031_v31 = vrot.slane %v3721_v15, 5  ;;  %v3724_v2 = vld [vmem:[#allocation2 + $0x1f8] sm:$0x7]  ;;  %v4025_v63 = vsel %vm1116_vm0, %v4019_v47, %v4024_v8 }
 0x248   : > { %v3725_v36 = vld [vmem:[#allocation2 + $0x218] sm:$0x7]  ;;  %4204 = vst [vmem:[#allocation3 + $0xe88] sm:$0xff] %v4023_v43  ;;  %v4027_v57 = vsel %vm1116_vm0, %v4022_v20, %v4026_v1  ;;  %v4034_v16 = vrot.slane %v3724_v2, 5  ;;  %v3726_v40 = vld [vmem:[#allocation2 + $0x198] sm:$0xe0] }
 0x249   : > { %v4036_v62 = vrot.slane %v3725_v36, 5  ;;  %v3727_v3 = vld [vmem:[#allocation2 + $0x2a8] sm:$0xe0]  ;;  %4205 = vst [vmem:[#allocation3 + $0xe90] sm:$0x3f] %v4025_v63  ;;  %v4030_v52 = vsel %vm1116_vm0, %v4028_v33, %v8836_v26  ;;  %v4033_v58 = vsel %vm1116_vm0, %v4031_v31, %v8836_v26  ;;  %v4038_v22 = vrot.slane %v3726_v40, 5 }
 0x24a   : > { %4206 = vst [vmem:[#allocation3 + $0xe98] sm:$0x3f] %v4027_v57  ;;  %v4041_v56 = vrot.slane %v3727_v3, 5  ;;  %v3730_v14 = vld [vmem:[#allocation2 + $0x240] sm:$0x7]  ;;  %4207 = vst [vmem:[#allocation3 + $0xea0] sm:$0xff] %v4030_v52  ;;  %v4035_v53 = vsel %vm1116_vm0, %v8836_v26, %v4034_v16 }
 0x24b   : > { %v3731_v19 = vld [vmem:[#allocation2 + $0x178] sm:$0x7]  ;;  %4208 = vst [vmem:[#allocation3 + $0xea8] sm:$0xff] %v4033_v58  ;;  %v4037_v34 = vsel %vm1116_vm0, %v8836_v26, %v4036_v62  ;;  %v4044_v29 = vrot.slane %v3730_v14, 5  ;;  %v3732_v47 = vld [vmem:[#allocation2 + $0xb0] sm:$0xe0]  ;;  %v4040_v17 = vsel %vm1116_vm0, %v4038_v22, %v8836_v26 }
 0x24c   : > { %v4046_v48 = vrot.slane %v3731_v19, 5  ;;  %v3733_v45 = vld [vmem:[#allocation2 + $0x398] sm:$0xe0]  ;;  %4209 = vst [vmem:[#allocation3 + $0xeb0] sm:$0x3f] %v4035_v53  ;;  %v4043_v42 = vsel %vm1116_vm0, %v4041_v56, %v8836_v26  ;;  %v4048_v41 = vrot.slane %v3732_v47, 5 }
 0x24d   : > { %4210 = vst [vmem:[#allocation3 + $0xeb8] sm:$0x3f] %v4037_v34  ;;  %v4051_v20 = vrot.slane %v3733_v45, 5  ;;  %v3736_v28 = vld [vmem:[#allocation2 + $0x2c8] sm:$0x7]  ;;  %4211 = vst [vmem:[#allocation3 + $0xec0] sm:$0xff] %v4040_v17  ;;  %v4045_v54 = vsel %vm1116_vm0, %v8836_v26, %v4044_v29 }
 0x24e   : > { %v3737_v6 = vld [vmem:[#allocation2 + $0x310] sm:$0x7]  ;;  %4212 = vst [vmem:[#allocation3 + $0xec8] sm:$0xff] %v4043_v42  ;;  %v4047_v51 = vsel %vm1116_vm0, %v8836_v26, %v4046_v48  ;;  %v4054_v8 = vrot.slane %v3736_v28, 5  ;;  %v4219_v27 = vld [vmem:[#allocation2 + $0x2b0] sm:$0xc0]  ;;  %v4050_v43 = vsel %vm1116_vm0, %v4048_v41, %v8836_v26 }
 0x24f   : > { %v4056_v1 = vrot.slane %v3737_v6, 5  ;;  %v4220_v15 = vld [vmem:[#allocation2 + $0x3b0] sm:$0xc0]  ;;  %4213 = vst [vmem:[#allocation3 + $0xed0] sm:$0x3f] %v4045_v54  ;;  %v4053_v33 = vsel %vm1116_vm0, %v4051_v20, %v8836_v26  ;;  %v4460_v31 = vrot.slane %v4219_v27, 6 }
 0x250   : > { %4214 = vst [vmem:[#allocation3 + $0xed8] sm:$0x3f] %v4047_v51  ;;  %v4223_v2 = vld [vmem:[#allocation2 + $0x50] sm:$0xf]  ;;  %v4224_v36 = vld [vmem:[#allocation2 + $0x368] sm:$0xf]  ;;  %v4055_v63 = vsel %vm1116_vm0, %v8836_v26, %v4054_v8 }
 0x251   : > { %4215 = vst [vmem:[#allocation3 + $0xee0] sm:$0xff] %v4050_v43  ;;  %4216 = vst [vmem:[#allocation3 + $0xee8] sm:$0xff] %v4053_v33  ;;  %v4057_v57 = vsel %vm1116_vm0, %v8836_v26, %v4056_v1  ;;  %v7126_v16 = vld [vmem:[#allocation2 + $0x2b0] sm:$0xff]  ;;  %v4463_v40 = vrot.slane %v4220_v15, 6  ;;  %v4226_v52 = vld [vmem:[#allocation2 + $0x48] sm:$0xc0] }
 0x252   : > { %v9028_v62 = vrot.slane %v7126_v16, 6  ;;  %v4225_v3 = vld [vmem:[#allocation2 + $0x330] sm:$0xc0]  ;;  %4217 = vst [vmem:[#allocation3 + $0xef0] sm:$0x3f] %v4055_v63  ;;  %v4466_v58 = vrot.slane %v4223_v2, 6 }
 0x253   : > { %4218 = vst [vmem:[#allocation3 + $0xef8] sm:$0x3f] %v4057_v57  ;;  %v4468_v22 = vrot.slane %v4224_v36, 6  ;;  %v4470_v56 = vrot.slane %v4225_v3, 6  ;;  %v4473_v14 = vrot.slane %v4226_v52, 6  ;;  %v4491_v47 = vrot.slane %v8825_v37, 6 }
 0x254   : > { %v4229_v19 = vld [vmem:[#allocation2 + $0x118] sm:$0xf]  ;;  %v4462_v53 = vsel %vm4459_vm5, %v4460_v31, %v9028_v62  ;;  %v4465_v34 = vsel %vm4459_vm5, %v4463_v40, %v9028_v62  ;;  %v4231_v48 = vld [vmem:[#allocation2 + $0x320] sm:$0xc0]  ;;  %v4467_v45 = vsel %vm4459_vm5, %v9028_v62, %v4466_v58  ;;  %v4232_v20 = vld [vmem:[#allocation2 + $0x150] sm:$0xc0] }
 0x255   : > { %v4476_v26 = vrot.slane %v4229_v19, 6  ;;  %v4230_v29 = vld [vmem:[#allocation2 + $0x98] sm:$0xf]  ;;  %4741 = vst [vmem:[#allocation3 + $0xf00] sm:$0xff] %v4462_v53  ;;  %4742 = vst [vmem:[#allocation3 + $0xf08] sm:$0xff] %v4465_v34  ;;  %v4469_v17 = vsel %vm4459_vm5, %v9028_v62, %v4468_v22  ;;  %v4472_v42 = vsel %vm4459_vm5, %v4470_v56, %v9028_v62  ;;  %v4475_v41 = vsel %vm4459_vm5, %v4473_v14, %v9028_v62 }
 0x256   : > { %v4235_v28 = vld [vmem:[#allocation2 + $0x2e0] sm:$0xf]  ;;  %v4236_v6 = vld [vmem:[#allocation2 + $0x388] sm:$0xf]  ;;  %4743 = vst [vmem:[#allocation3 + $0xf10] sm:$0x3f] %v4467_v45 }
 0x257   : > { %4744 = vst [vmem:[#allocation3 + $0xf18] sm:$0x3f] %v4469_v17  ;;  %4745 = vst [vmem:[#allocation3 + $0xf20] sm:$0xff] %v4472_v42  ;;  %v4477_v37 = vsel %vm4459_vm5, %v9028_v62, %v4476_v26  ;;  %v4478_v54 = vrot.slane %v4230_v29, 6  ;;  %v4480_v51 = vrot.slane %v4231_v48, 6  ;;  %v4483_v8 = vrot.slane %v4232_v20, 6 }
 0x258   : > { %4746 = vst [vmem:[#allocation3 + $0xf28] sm:$0xff] %v4475_v41  ;;  %v4237_v1 = vld [vmem:[#allocation2 + $0x338] sm:$0xc0]  ;;  %4747 = vst [vmem:[#allocation3 + $0xf30] sm:$0x3f] %v4477_v37  ;;  %v4486_v27 = vrot.slane %v4235_v28, 6 }
 0x259   : > { %v4488_v15 = vrot.slane %v4236_v6, 6  ;;  %v4490_v43 = vrot.slane %v4237_v1, 6  ;;  %v4238_v33 = vld [vmem:[#allocation2 + $0x340] sm:$0xc0]  ;;  %v4494_v31 = vrot.slane %v8844_v44, 6  ;;  %v4479_v2 = vsel %vm4459_vm5, %v9028_v62, %v4478_v54 }
 0x25a   : > { %v4482_v36 = vsel %vm4459_vm5, %v4480_v51, %v9028_v62  ;;  %v4485_v63 = vsel %vm4459_vm5, %v4483_v8, %v9028_v62  ;;  %v4493_v57 = vrot.slane %v4238_v33, 6  ;;  %v4241_v16 = vld [vmem:[#allocation2 + $0x1b8] sm:$0xf]  ;;  %v4242_v40 = vld [vmem:[#allocation2 + $0x168] sm:$0xf]  ;;  %v4487_v3 = vsel %vm4459_vm5, %v9028_v62, %v4486_v27 }
 0x25b   : > { %4748 = vst [vmem:[#allocation3 + $0xf38] sm:$0x3f] %v4479_v2  ;;  %4749 = vst [vmem:[#allocation3 + $0xf40] sm:$0xff] %v4482_v36  ;;  %v4489_v44 = vsel %vm4459_vm5, %v9028_v62, %v4488_v15  ;;  %v4492_v52 = vsel %vm4459_vm5, %v4490_v43, %v4491_v47  ;;  %v4496_v58 = vrot.slane %v4241_v16, 6  ;;  %v4243_v22 = vld [vmem:[#allocation2 + $0x2f0] sm:$0xc0] }
 0x25c   : > { %4750 = vst [vmem:[#allocation3 + $0xf48] sm:$0xff] %v4485_v63  ;;  %v4244_v56 = vld [vmem:[#allocation2 + $0x288] sm:$0xc0]  ;;  %4751 = vst [vmem:[#allocation3 + $0xf50] sm:$0x3f] %v4487_v3  ;;  %v4495_v14 = vsel %vm4459_vm5, %v4493_v57, %v4494_v31  ;;  %v4498_v19 = vrot.slane %v4242_v40, 6 }
 0x25d   : > { %4752 = vst [vmem:[#allocation3 + $0xf58] sm:$0x3f] %v4489_v44  ;;  %4753 = vst [vmem:[#allocation3 + $0xf60] sm:$0xff] %v4492_v52  ;;  %v4500_v53 = vrot.slane %v4243_v22, 6  ;;  %v4501_v34 = vrot.slane %v8857_v32, 6  ;;  %v4497_v29 = vsel %vm4459_vm5, %v4491_v47, %v4496_v58  ;;  %v4503_v48 = vrot.slane %v4244_v56, 6 }
 0x25e   : > { %v4247_v26 = vld [vmem:[#allocation2 + $0x1b0] sm:$0xf]  ;;  %4754 = vst [vmem:[#allocation3 + $0xf68] sm:$0xff] %v4495_v14  ;;  %v4504_v45 = vrot.slane %v8861_v25, 6  ;;  %4755 = vst [vmem:[#allocation3 + $0xf70] sm:$0x3f] %v4497_v29  ;;  %v4499_v41 = vsel %vm4459_vm5, %v4494_v31, %v4498_v19 }
 0x25f   : > { %v4506_v17 = vrot.slane %v4247_v26, 6  ;;  %v4248_v42 = vld [vmem:[#allocation2 + $0x270] sm:$0xf]  ;;  %v4502_v20 = vsel %vm4459_vm5, %v4500_v53, %v4501_v34  ;;  %v4249_v6 = vld [vmem:[#allocation2 + $0xf0] sm:$0xc0]  ;;  %v4511_v37 = vrot.slane %v8874_v12, 6 }
 0x260   : > { %v4508_v28 = vrot.slane %v4248_v42, 6  ;;  %v4250_v54 = vld [vmem:[#allocation2 + $0x8] sm:$0xc0]  ;;  %4756 = vst [vmem:[#allocation3 + $0xf78] sm:$0x3f] %v4499_v41  ;;  %4757 = vst [vmem:[#allocation3 + $0xf80] sm:$0xff] %v4502_v20  ;;  %v4505_v32 = vsel %vm4459_vm5, %v4503_v48, %v4504_v45 }
 0x261   : > { %v4507_v47 = vsel %vm4459_vm5, %v4501_v34, %v4506_v17  ;;  %v4510_v51 = vrot.slane %v4249_v6, 6  ;;  %v4513_v25 = vrot.slane %v4250_v54, 6  ;;  %v4253_v8 = vld [vmem:[#allocation2 + $0x390] sm:$0xf]  ;;  %v4254_v1 = vld [vmem:[#allocation2 + $0x278] sm:$0xf] }
 0x262   : > { %4758 = vst [vmem:[#allocation3 + $0xf88] sm:$0xff] %v4505_v32  ;;  %4759 = vst [vmem:[#allocation3 + $0xf90] sm:$0x3f] %v4507_v47  ;;  %v4509_v27 = vsel %vm4459_vm5, %v4504_v45, %v4508_v28  ;;  %v4514_v15 = vrot.slane %v8879_v11, 6  ;;  %v4516_v43 = vrot.slane %v4253_v8, 6  ;;  %v4518_v33 = vrot.slane %v4254_v1, 6 }
 0x263   : > { %v4255_v12 = vld [vmem:[#allocation2] sm:$0xc0]  ;;  %4760 = vst [vmem:[#allocation3 + $0xf98] sm:$0x3f] %v4509_v27  ;;  %v4512_v31 = vsel %vm4459_vm5, %v4510_v51, %v4511_v37  ;;  %v4521_v36 = vrot.slane %v8884_v49, 6  ;;  %v4524_v57 = vrot.slane %v8888_v60, 6 }
 0x264   : > { %v4520_v2 = vrot.slane %v4255_v12, 6  ;;  %v4256_v63 = vld [vmem:[#allocation2 + $0x290] sm:$0xc0]  ;;  %4761 = vst [vmem:[#allocation3 + $0xfa0] sm:$0xff] %v4512_v31  ;;  %v4515_v16 = vsel %vm4459_vm5, %v4513_v25, %v4514_v15  ;;  %v4517_v40 = vsel %vm4459_vm5, %v4511_v37, %v4516_v43  ;;  %v4519_v3 = vsel %vm4459_vm5, %v4514_v15, %v4518_v33  ;;  %v4259_v44 = vld [vmem:[#allocation2 + $0x1c0] sm:$0xf] }
 0x265   : > { %v4523_v11 = vrot.slane %v4256_v63, 6  ;;  %v4260_v52 = vld [vmem:[#allocation2 + $0x90] sm:$0xf]  ;;  %4762 = vst [vmem:[#allocation3 + $0xfa8] sm:$0xff] %v4515_v16  ;;  %4763 = vst [vmem:[#allocation3 + $0xfb0] sm:$0x3f] %v4517_v40 }
 0x266   : > { %4764 = vst [vmem:[#allocation3 + $0xfb8] sm:$0x3f] %v4519_v3  ;;  %v4522_v58 = vsel %vm4459_vm5, %v4520_v2, %v4521_v36  ;;  %v4526_v22 = vrot.slane %v4259_v44, 6  ;;  %v4528_v49 = vrot.slane %v4260_v52, 6  ;;  %v4261_v56 = vld [vmem:[#allocation2 + $0x70] sm:$0xc0] }
 0x267   : > { %v4531_v60 = vrot.slane %v8892_v59, 6  ;;  %4765 = vst [vmem:[#allocation3 + $0xfc0] sm:$0xff] %v4522_v58  ;;  %v4525_v14 = vsel %vm4459_vm5, %v4523_v11, %v4524_v57  ;;  %v4530_v19 = vrot.slane %v4261_v56, 6  ;;  %v4262_v53 = vld [vmem:[#allocation2 + $0x210] sm:$0xc0]  ;;  %v4534_v34 = vrot.slane %v8896_v39, 6 }
 0x268   : > { %v4265_v26 = vld [vmem:[#allocation2 + $0x1d8] sm:$0xf]  ;;  %4766 = vst [vmem:[#allocation3 + $0xfc8] sm:$0xff] %v4525_v14  ;;  %v4527_v29 = vsel %vm4459_vm5, %v4521_v36, %v4526_v22  ;;  %v4529_v48 = vsel %vm4459_vm5, %v4524_v57, %v4528_v49  ;;  %v4533_v45 = vrot.slane %v4262_v53, 6  ;;  %v4266_v42 = vld [vmem:[#allocation2 + $0x260] sm:$0xf] }
 0x269   : > { %v4536_v17 = vrot.slane %v4265_v26, 6  ;;  %v4267_v41 = vld [vmem:[#allocation2 + $0x358] sm:$0xc0]  ;;  %4767 = vst [vmem:[#allocation3 + $0xfd0] sm:$0x3f] %v4527_v29  ;;  %v4532_v59 = vsel %vm4459_vm5, %v4530_v19, %v4531_v60  ;;  %v4538_v20 = vrot.slane %v4266_v42, 6 }
 0x26a   : > { %4768 = vst [vmem:[#allocation3 + $0xfd8] sm:$0x3f] %v4529_v48  ;;  %v4540_v28 = vrot.slane %v4267_v41, 6  ;;  %v4541_v6 = vrot.slane %v8900_v61, 6  ;;  %v4268_v37 = vld [vmem:[#allocation2 + $0x2c0] sm:$0xc0]  ;;  %v4535_v39 = vsel %vm4459_vm5, %v4533_v45, %v4534_v34 }
 0x26b   : > { %4769 = vst [vmem:[#allocation3 + $0xfe0] sm:$0xff] %v4532_v59  ;;  %v4537_v54 = vsel %vm4459_vm5, %v4531_v60, %v4536_v17  ;;  %v4543_v32 = vrot.slane %v4268_v37, 6  ;;  %v4544_v47 = vrot.slane %v8905_v4, 6  ;;  %v4271_v51 = vld [vmem:[#allocation2 + $0x78] sm:$0xf]  ;;  %4770 = vst [vmem:[#allocation3 + $0xfe8] sm:$0xff] %v4535_v39  ;;  %v4539_v8 = vsel %vm4459_vm5, %v4534_v34, %v4538_v20 }
 0x26c   : > { %v4272_v25 = vld [vmem:[#allocation2 + $0x158] sm:$0xf]  ;;  %4771 = vst [vmem:[#allocation3 + $0xff0] sm:$0x3f] %v4537_v54  ;;  %v4542_v1 = vsel %vm4459_vm5, %v4540_v28, %v4541_v6  ;;  %v4546_v27 = vrot.slane %v4271_v51, 6  ;;  %v4551_v31 = vrot.slane %v8911_v55, 6 }
 0x26d   : > { %v4548_v15 = vrot.slane %v4272_v25, 6  ;;  %v4273_v61 = vld [vmem:[#allocation2 + $0xa8] sm:$0xc0]  ;;  %v4274_v43 = vld [vmem:[#allocation2 + $0x300] sm:$0xc0]  ;;  %4773 = vst [vmem:[#allocation3 + $0x1000] sm:$0xff] %v4542_v1  ;;  %v4545_v33 = vsel %vm4459_vm5, %v4543_v32, %v4544_v47 }
 0x26e   : > { %4772 = vst [vmem:[#allocation3 + $0xff8] sm:$0x3f] %v4539_v8  ;;  %v4550_v12 = vrot.slane %v4273_v61, 6  ;;  %v4553_v4 = vrot.slane %v4274_v43, 6  ;;  %v4277_v2 = vld [vmem:[#allocation2 + $0x40] sm:$0xf]  ;;  %v4547_v36 = vsel %vm4459_vm5, %v4541_v6, %v4546_v27 }
 0x26f   : > { %4774 = vst [vmem:[#allocation3 + $0x1008] sm:$0xff] %v4545_v33  ;;  %v4549_v63 = vsel %vm4459_vm5, %v4544_v47, %v4548_v15  ;;  %v4554_v57 = vrot.slane %v8916_v18, 6  ;;  %v4556_v16 = vrot.slane %v4277_v2, 6  ;;  %v4278_v40 = vld [vmem:[#allocation2 + $0x1d0] sm:$0xf]  ;;  %v4561_v55 = vrot.slane %v8920_v21, 6 }
 0x270   : > { %v4279_v3 = vld [vmem:[#allocation2 + $0x2e8] sm:$0xc0]  ;;  %4775 = vst [vmem:[#allocation3 + $0x1010] sm:$0x3f] %v4547_v36  ;;  %4776 = vst [vmem:[#allocation3 + $0x1018] sm:$0x3f] %v4549_v63  ;;  %v4552_v11 = vsel %vm4459_vm5, %v4550_v12, %v4551_v31 }
 0x271   : > { %v4558_v44 = vrot.slane %v4278_v40, 6  ;;  %v4560_v52 = vrot.slane %v4279_v3, 6  ;;  %v4280_v58 = vld [vmem:[#allocation2 + $0x1f0] sm:$0xc0]  ;;  %4777 = vst [vmem:[#allocation3 + $0x1020] sm:$0xff] %v4552_v11  ;;  %v4555_v22 = vsel %vm4459_vm5, %v4553_v4, %v4554_v57  ;;  %v4557_v49 = vsel %vm4459_vm5, %v4551_v31, %v4556_v16 }
 0x272   : > { %v4563_v56 = vrot.slane %v4280_v58, 6  ;;  %v4564_v18 = vrot.slane %v8925_v13, 6  ;;  %v4283_v60 = vld [vmem:[#allocation2 + $0x30] sm:$0xf]  ;;  %v4284_v14 = vld [vmem:[#allocation2 + $0xc0] sm:$0xf] }
 0x273   : > { %4778 = vst [vmem:[#allocation3 + $0x1028] sm:$0xff] %v4555_v22  ;;  %4779 = vst [vmem:[#allocation3 + $0x1030] sm:$0x3f] %v4557_v49  ;;  %v4559_v19 = vsel %vm4459_vm5, %v4554_v57, %v4558_v44  ;;  %v4562_v53 = vsel %vm4459_vm5, %v4560_v52, %v4561_v55  ;;  %v4566_v34 = vrot.slane %v4283_v60, 6  ;;  %v4568_v26 = vrot.slane %v4284_v14, 6 }
 0x274   : > { %v4285_v21 = vld [vmem:[#allocation2 + $0x228] sm:$0xc0]  ;;  %v4286_v29 = vld [vmem:[#allocation2 + $0x170] sm:$0xc0]  ;;  %4780 = vst [vmem:[#allocation3 + $0x1038] sm:$0x3f] %v4559_v19  ;;  %v4565_v48 = vsel %vm4459_vm5, %v4563_v56, %v4564_v18 }
 0x275   : > { %4781 = vst [vmem:[#allocation3 + $0x1040] sm:$0xff] %v4562_v53  ;;  %v4570_v45 = vrot.slane %v4285_v21, 6  ;;  %v4571_v17 = vrot.slane %v8931_v24, 6  ;;  %v4573_v13 = vrot.slane %v4286_v29, 6  ;;  %v4289_v42 = vld [vmem:[#allocation2 + $0x348] sm:$0xf]  ;;  %v4567_v41 = vsel %vm4459_vm5, %v4561_v55, %v4566_v34 }
 0x276   : > { %4782 = vst [vmem:[#allocation3 + $0x1048] sm:$0xff] %v4565_v48  ;;  %v4569_v59 = vsel %vm4459_vm5, %v4564_v18, %v4568_v26  ;;  %v4574_v20 = vrot.slane %v8936_v23, 6  ;;  %v4576_v28 = vrot.slane %v4289_v42, 6  ;;  %v4290_v6 = vld [vmem:[#allocation2 + $0x3a8] sm:$0xf]  ;;  %v4581_v24 = vrot.slane %v8940_v35, 6 }
 0x277   : > { %v4291_v37 = vld [vmem:[#allocation2 + $0xf8] sm:$0xc0]  ;;  %4783 = vst [vmem:[#allocation3 + $0x1050] sm:$0x3f] %v4567_v41  ;;  %4784 = vst [vmem:[#allocation3 + $0x1058] sm:$0x3f] %v4569_v59  ;;  %v4572_v39 = vsel %vm4459_vm5, %v4570_v45, %v4571_v17 }
 0x278   : > { %v4578_v54 = vrot.slane %v4290_v6, 6  ;;  %v4580_v32 = vrot.slane %v4291_v37, 6  ;;  %v4292_v47 = vld [vmem:[#allocation2 + $0x250] sm:$0xc0]  ;;  %4785 = vst [vmem:[#allocation3 + $0x1060] sm:$0xff] %v4572_v39  ;;  %v4575_v51 = vsel %vm4459_vm5, %v4573_v13, %v4574_v20  ;;  %v4577_v25 = vsel %vm4459_vm5, %v4571_v17, %v4576_v28 }
 0x279   : > { %v4583_v8 = vrot.slane %v4292_v47, 6  ;;  %v4584_v23 = vrot.slane %v8945_v50, 6  ;;  %v4295_v1 = vld [vmem:[#allocation2 + $0x2b8] sm:$0xf]  ;;  %v4296_v27 = vld [vmem:[#allocation2 + $0x128] sm:$0xf] }
 0x27a   : > { %4786 = vst [vmem:[#allocation3 + $0x1068] sm:$0xff] %v4575_v51  ;;  %4787 = vst [vmem:[#allocation3 + $0x1070] sm:$0x3f] %v4577_v25  ;;  %v4579_v15 = vsel %vm4459_vm5, %v4574_v20, %v4578_v54  ;;  %v4582_v61 = vsel %vm4459_vm5, %v4580_v32, %v4581_v24  ;;  %v4586_v43 = vrot.slane %v4295_v1, 6  ;;  %v4588_v33 = vrot.slane %v4296_v27, 6 }
 0x27b   : > { %v4297_v35 = vld [vmem:[#allocation2 + $0xa0] sm:$0xc0]  ;;  %4788 = vst [vmem:[#allocation3 + $0x1078] sm:$0x3f] %v4579_v15  ;;  %4789 = vst [vmem:[#allocation3 + $0x1080] sm:$0xff] %v4582_v61  ;;  %v4585_v31 = vsel %vm4459_vm5, %v4583_v8, %v4584_v23  ;;  %v4591_v2 = vrot.slane %v8951_v30, 6 }
 0x27c   : > { %v4298_v12 = vld [vmem:[#allocation2 + $0x3a0] sm:$0xc0]  ;;  %v4590_v4 = vrot.slane %v4297_v35, 6  ;;  %v4301_v36 = vld [vmem:[#allocation2 + $0x230] sm:$0xf]  ;;  %4790 = vst [vmem:[#allocation3 + $0x1088] sm:$0xff] %v4585_v31  ;;  %v4587_v63 = vsel %vm4459_vm5, %v4581_v24, %v4586_v43  ;;  %v4589_v57 = vsel %vm4459_vm5, %v4584_v23, %v4588_v33 }
 0x27d   : > { %v4593_v50 = vrot.slane %v4298_v12, 6  ;;  %v4594_v16 = vrot.slane %v8956_v46, 6  ;;  %v4596_v40 = vrot.slane %v4301_v36, 6  ;;  %v4302_v3 = vld [vmem:[#allocation2 + $0x298] sm:$0xf]  ;;  %v4601_v30 = vrot.slane %v8960_v5, 6 }
 0x27e   : > { %v4303_v11 = vld [vmem:[#allocation2 + $0x318] sm:$0xc0]  ;;  %4791 = vst [vmem:[#allocation3 + $0x1090] sm:$0x3f] %v4587_v63  ;;  %4792 = vst [vmem:[#allocation3 + $0x1098] sm:$0x3f] %v4589_v57  ;;  %v4592_v44 = vsel %vm4459_vm5, %v4590_v4, %v4591_v2 }
 0x27f   : > { %v4598_v52 = vrot.slane %v4302_v3, 6  ;;  %v4600_v55 = vrot.slane %v4303_v11, 6  ;;  %v4304_v58 = vld [vmem:[#allocation2 + $0x160] sm:$0xc0]  ;;  %4793 = vst [vmem:[#allocation3 + $0x10a0] sm:$0xff] %v4592_v44  ;;  %v4595_v22 = vsel %vm4459_vm5, %v4593_v50, %v4594_v16  ;;  %v4597_v49 = vsel %vm4459_vm5, %v4591_v2, %v4596_v40 }
 0x280   : > { %v4603_v56 = vrot.slane %v4304_v58, 6  ;;  %v4604_v46 = vrot.slane %v8965_v7, 6  ;;  %v4307_v18 = vld [vmem:[#allocation2 + $0x120] sm:$0xf]  ;;  %4794 = vst [vmem:[#allocation3 + $0x10a8] sm:$0xff] %v4595_v22  ;;  %v4611_v48 = vrot.slane %v8971_v9, 6 }
 0x281   : > { %v4308_v60 = vld [vmem:[#allocation2 + $0x140] sm:$0xf]  ;;  %4795 = vst [vmem:[#allocation3 + $0x10b0] sm:$0x3f] %v4597_v49  ;;  %v4599_v14 = vsel %vm4459_vm5, %v4594_v16, %v4598_v52  ;;  %v4602_v19 = vsel %vm4459_vm5, %v4600_v55, %v4601_v30  ;;  %v4606_v53 = vrot.slane %v4307_v18, 6  ;;  %v4614_v42 = vrot.slane %v8976_v38, 6 }
 0x282   : > { %v4608_v34 = vrot.slane %v4308_v60, 6  ;;  %v4309_v5 = vld [vmem:[#allocation2 + $0x68] sm:$0xc0]  ;;  %v4310_v26 = vld [vmem:[#allocation2 + $0xd0] sm:$0xc0]  ;;  %4797 = vst [vmem:[#allocation3 + $0x10c0] sm:$0xff] %v4602_v19  ;;  %v4605_v21 = vsel %vm4459_vm5, %v4603_v56, %v4604_v46 }
 0x283   : > { %4796 = vst [vmem:[#allocation3 + $0x10b8] sm:$0x3f] %v4599_v14  ;;  %v4610_v29 = vrot.slane %v4309_v5, 6  ;;  %v4613_v7 = vrot.slane %v4310_v26, 6  ;;  %v4313_v45 = vld [vmem:[#allocation2 + $0x258] sm:$0xf]  ;;  %v4607_v17 = vsel %vm4459_vm5, %v4601_v30, %v4606_v53 }
 0x284   : > { %4798 = vst [vmem:[#allocation3 + $0x10c8] sm:$0xff] %v4605_v21  ;;  %v4609_v13 = vsel %vm4459_vm5, %v4604_v46, %v4608_v34  ;;  %v4616_v41 = vrot.slane %v4313_v45, 6  ;;  %v4314_v59 = vld [vmem:[#allocation2 + $0x220] sm:$0xf]  ;;  %v4315_v20 = vld [vmem:[#allocation2 + $0x2a0] sm:$0xc0] }
 0x285   : > { %4799 = vst [vmem:[#allocation3 + $0x10d0] sm:$0x3f] %v4607_v17  ;;  %4800 = vst [vmem:[#allocation3 + $0x10d8] sm:$0x3f] %v4609_v13  ;;  %v4612_v28 = vsel %vm4459_vm5, %v4610_v29, %v4611_v48  ;;  %v4618_v6 = vrot.slane %v4314_v59, 6  ;;  %v4620_v37 = vrot.slane %v4315_v20, 6  ;;  %v4615_v54 = vsel %vm4459_vm5, %v4613_v7, %v4614_v42 }
 0x286   : > { %v4621_v9 = vrot.slane %v8980_v10, 6  ;;  %v4316_v39 = vld [vmem:[#allocation2 + $0x1a0] sm:$0xc0]  ;;  %4801 = vst [vmem:[#allocation3 + $0x10e0] sm:$0xff] %v4612_v28  ;;  %v4617_v32 = vsel %vm4459_vm5, %v4611_v48, %v4616_v41  ;;  %v4624_v38 = vrot.slane %v8989_v0, 6  ;;  %4802 = vst [vmem:[#allocation3 + $0x10e8] sm:$0xff] %v4615_v54 }
 0x287   : > { %v4623_v24 = vrot.slane %v4316_v39, 6  ;;  %v4319_v47 = vld [vmem:[#allocation2 + $0x1e0] sm:$0xf]  ;;  %4803 = vst [vmem:[#allocation3 + $0x10f0] sm:$0x3f] %v4617_v32  ;;  %v4619_v25 = vsel %vm4459_vm5, %v4614_v42, %v4618_v6 }
 0x288   : > { %v4320_v51 = vld [vmem:[#allocation2 + $0x100] sm:$0xf]  ;;  %v4622_v8 = vsel %vm4459_vm5, %v4620_v37, %v4621_v9  ;;  %v4626_v23 = vrot.slane %v4319_v47, 6  ;;  %v4321_v10 = vld [vmem:[#allocation2 + $0x10] sm:$0xc0] }
 0x289   : > { %v4628_v1 = vrot.slane %v4320_v51, 6  ;;  %v4322_v27 = vld [vmem:[#allocation2 + $0x268] sm:$0xc0]  ;;  %4804 = vst [vmem:[#allocation3 + $0x10f8] sm:$0x3f] %v4619_v25  ;;  %4805 = vst [vmem:[#allocation3 + $0x1100] sm:$0xff] %v4622_v8  ;;  %v4625_v15 = vsel %vm4459_vm5, %v4623_v24, %v4624_v38 }
 0x28a   : > { %v4630_v61 = vrot.slane %v4321_v10, 6  ;;  %v4633_v43 = vrot.slane %v4322_v27, 6  ;;  %v4325_v33 = vld [vmem:[#allocation2 + $0x1f8] sm:$0xf]  ;;  %4806 = vst [vmem:[#allocation3 + $0x1108] sm:$0xff] %v4625_v15  ;;  %v4627_v35 = vsel %vm4459_vm5, %v4621_v9, %v4626_v23 }
 0x28b   : > { %v4326_v0 = vld [vmem:[#allocation2 + $0x218] sm:$0xf]  ;;  %v4629_v12 = vsel %vm4459_vm5, %v4624_v38, %v4628_v1  ;;  %v4636_v31 = vrot.slane %v4325_v33, 6  ;;  %v4327_v2 = vld [vmem:[#allocation2 + $0x198] sm:$0xc0] }
 0x28c   : > { %v4638_v4 = vrot.slane %v4326_v0, 6  ;;  %v4328_v50 = vld [vmem:[#allocation2 + $0x2a8] sm:$0xc0]  ;;  %4807 = vst [vmem:[#allocation3 + $0x1110] sm:$0x3f] %v4627_v35  ;;  %v4632_v36 = vsel %vm4459_vm5, %v4630_v61, %v9028_v62  ;;  %v4635_v63 = vsel %vm4459_vm5, %v4633_v43, %v9028_v62  ;;  %v4640_v57 = vrot.slane %v4327_v2, 6 }
 0x28d   : > { %4808 = vst [vmem:[#allocation3 + $0x1118] sm:$0x3f] %v4629_v12  ;;  %v4643_v16 = vrot.slane %v4328_v50, 6  ;;  %v4331_v40 = vld [vmem:[#allocation2 + $0x240] sm:$0xf]  ;;  %4809 = vst [vmem:[#allocation3 + $0x1120] sm:$0xff] %v4632_v36  ;;  %v4637_v11 = vsel %vm4459_vm5, %v9028_v62, %v4636_v31 }
 0x28e   : > { %v4332_v3 = vld [vmem:[#allocation2 + $0x178] sm:$0xf]  ;;  %4810 = vst [vmem:[#allocation3 + $0x1128] sm:$0xff] %v4635_v63  ;;  %v4639_v44 = vsel %vm4459_vm5, %v9028_v62, %v4638_v4  ;;  %v4646_v52 = vrot.slane %v4331_v40, 6  ;;  %v4333_v30 = vld [vmem:[#allocation2 + $0xb0] sm:$0xc0]  ;;  %v4642_v22 = vsel %vm4459_vm5, %v4640_v57, %v9028_v62 }
 0x28f   : > { %v4648_v55 = vrot.slane %v4332_v3, 6  ;;  %v4334_v58 = vld [vmem:[#allocation2 + $0x398] sm:$0xc0]  ;;  %4811 = vst [vmem:[#allocation3 + $0x1130] sm:$0x3f] %v4637_v11  ;;  %v4645_v49 = vsel %vm4459_vm5, %v4643_v16, %v9028_v62  ;;  %v4650_v56 = vrot.slane %v4333_v30, 6 }
 0x290   : > { %4812 = vst [vmem:[#allocation3 + $0x1138] sm:$0x3f] %v4639_v44  ;;  %v4653_v46 = vrot.slane %v4334_v58, 6  ;;  %v4337_v18 = vld [vmem:[#allocation2 + $0x2c8] sm:$0xf]  ;;  %4813 = vst [vmem:[#allocation3 + $0x1140] sm:$0xff] %v4642_v22  ;;  %v4647_v14 = vsel %vm4459_vm5, %v9028_v62, %v4646_v52 }
 0x291   : > { %v4338_v60 = vld [vmem:[#allocation2 + $0x310] sm:$0xf]  ;;  %4814 = vst [vmem:[#allocation3 + $0x1148] sm:$0xff] %v4645_v49  ;;  %v4649_v19 = vsel %vm4459_vm5, %v9028_v62, %v4648_v55  ;;  %v4656_v53 = vrot.slane %v4337_v18, 6  ;;  %4815 = vst [vmem:[#allocation3 + $0x1150] sm:$0x3f] %v4647_v14  ;;  %v4652_v5 = vsel %vm4459_vm5, %v4650_v56, %v9028_v62 }
 0x292   : > { %v4658_v34 = vrot.slane %v4338_v60, 6  ;;  %4816 = vst [vmem:[#allocation3 + $0x1158] sm:$0x3f] %v4649_v19  ;;  %v4655_v26 = vsel %vm4459_vm5, %v4653_v46, %v9028_v62  ;;  %4817 = vst [vmem:[#allocation3 + $0x1160] sm:$0xff] %v4652_v5 }
 0x293   : > { %4818 = vst [vmem:[#allocation3 + $0x1168] sm:$0xff] %v4655_v26  ;;  %v4657_v21 = vsel %vm4459_vm5, %v9028_v62, %v4656_v53 }
 0x294   : > { %v4659_v29 = vsel %vm4459_vm5, %v9028_v62, %v4658_v34  ;;  %4819 = vst [vmem:[#allocation3 + $0x1170] sm:$0x3f] %v4657_v21 }
 0x295   : > { %4820 = vst [vmem:[#allocation3 + $0x1178] sm:$0x3f] %v4659_v29 }
 0x296 LB: >> { %v4829_v48 = vlaneseq  ;;  %s7025_s23 = sshll.u32 %s7173_s21, 5  ;;  %v4846_v7 = vld [vmem:[%s9163_s13] sm:$0x3]  ;;  %v6694_v45 = vld [vmem:[%s9163_s13 + $0x2] sm:$0x3]  ;;  %s4827_s21 = sadd.s32 1, %s7173_s21   ;;  %s7173_s21 = sphi %s9168_s21, %s4827_s21  }
 0x297   : >> { %s9182_s24 = scalar_lea.vmem [#allocation3], %s7025_s23  ;;  %v6701_v59 = vld [vmem:[%s9163_s13 + $0x4] sm:$0x3]  ;;  %v6708_v57 = vld [vmem:[%s9163_s13 + $0x6] sm:$0x3]  ;;  %s6217_s27 = scalar_lea.vmem %s9166_s14, %s7025_s23 [#allocation7] }
 0x298   : >> { %v4830_v62 = vshrl.u32 %v4829_v48, 7  ;;  %v9894_v37 = vld [vmem:[#allocation28_spill] sm:$0xff]  ;;  %p4824_p12 = scmp.ge.s32.totalorder %s4827_s21, 14  }
 0x299   : >> { %v6715_v16 = vld [vmem:[%s9163_s13 + $0x8] sm:$0x3] }
 0x29a   : >> { %v9176_v17 = vsub.s32 0, %v4830_v62  ;;  %v9178_v13 = vsub.s32 1, %v4830_v62 }
 0x29c   : >> { %v4842_v42 = vld [vmem:[%s9182_s24] sm:$0xff]  ;;  %v4843_v41 = vld [vmem:[%s9182_s24 + $0x8] sm:$0xff]  ;;  %v4844_v20 = vld [vmem:[%s9182_s24 + $0x10] sm:$0x3f]  ;;  %v4832_v9 = vrot.slane %v9894_v37, %v9176_v17  ;;  %v4836_v39 = vrot.slane %v9894_v37, %v9178_v13  ;;  %v4851_v54 = vrot.slane %v4846_v7, %v9176_v17  ;;  %v4855_v32 = vrot.slane %v4846_v7, %v9178_v13 }
 0x29d   : >> { %v4845_v28 = vld [vmem:[%s9182_s24 + $0x18] sm:$0x3f]  ;;  %v6690_v6 = vld [vmem:[%s9182_s24 + $0x280] sm:$0xff]  ;;  %v6691_v24 = vld [vmem:[%s9182_s24 + $0x288] sm:$0xff]  ;;  %v4879_v51 = vrot.slane %v6694_v45, %v9176_v17  ;;  %v4883_v25 = vrot.slane %v6694_v45, %v9178_v13  ;;  %v4907_v23 = vrot.slane %v6701_v59, %v9176_v17  ;;  %v4911_v1 = vrot.slane %v6701_v59, %v9178_v13 }
 0x29e   : >> { %v6692_v38 = vld [vmem:[%s9182_s24 + $0x290] sm:$0x3f]  ;;  %v6693_v47 = vld [vmem:[%s9182_s24 + $0x298] sm:$0x3f]  ;;  %v6697_v8 = vld [vmem:[%s9182_s24 + $0x500] sm:$0xff]  ;;  %v4858_v10 = vmul.f32 %v4851_v54, %v4842_v42  ;;  %v4859_v27 = vmul.f32 %v4855_v32, %v4843_v41  ;;  %v4860_v15 = vmul.f32 %v4851_v54, %v4844_v20  ;;  %v4861_v61 = vmul.f32 %v4855_v32, %v4845_v28 }
 0x29f   : >> { %v6698_v43 = vld [vmem:[%s9182_s24 + $0x508] sm:$0xff]  ;;  %v6699_v33 = vld [vmem:[%s9182_s24 + $0x510] sm:$0x3f]  ;;  %v6700_v0 = vld [vmem:[%s9182_s24 + $0x518] sm:$0x3f]  ;;  %v4886_v35 = vmul.f32 %v6690_v6, %v4879_v51  ;;  %v4887_v12 = vmul.f32 %v6691_v24, %v4883_v25  ;;  %v4888_v31 = vmul.f32 %v6692_v38, %v4879_v51  ;;  %v4889_v4 = vmul.f32 %v6693_v47, %v4883_v25 }
 0x2a0   : >> { %v4862_v2 = vadd.f32 %v4858_v10, %v4832_v9  ;;  %v4863_v50 = vadd.f32 %v4859_v27, %v4836_v39  ;;  %v4864_v36 = vadd.f32 %v4860_v15, %v4832_v9  ;;  %v4865_v63 = vadd.f32 %v4861_v61, %v4836_v39  ;;  %v6704_v52 = vld [vmem:[%s9182_s24 + $0x780] sm:$0xff]  ;;  %v6705_v55 = vld [vmem:[%s9182_s24 + $0x788] sm:$0xff]  ;;  %v6706_v56 = vld [vmem:[%s9182_s24 + $0x790] sm:$0x3f] }
 0x2a1   : >> { %v4914_v40 = vmul.f32 %v6697_v8, %v4907_v23  ;;  %v4915_v3 = vmul.f32 %v6698_v43, %v4911_v1  ;;  %v4916_v11 = vmul.f32 %v6699_v33, %v4907_v23  ;;  %v4917_v44 = vmul.f32 %v6700_v0, %v4911_v1  ;;  %v6707_v46 = vld [vmem:[%s9182_s24 + $0x798] sm:$0x3f]  ;;  %v6711_v18 = vld [vmem:[%s9182_s24 + $0xa00] sm:$0xff]  ;;  %v6712_v19 = vld [vmem:[%s9182_s24 + $0xa08] sm:$0xff] }
 0x2a2   : >> { %v4890_v30 = vadd.f32 %v4886_v35, %v4862_v2  ;;  %v4891_v58 = vadd.f32 %v4887_v12, %v4863_v50  ;;  %v4892_v22 = vadd.f32 %v4888_v31, %v4864_v36  ;;  %v4893_v49 = vadd.f32 %v4889_v4, %v4865_v63  ;;  %v6713_v53 = vld [vmem:[%s9182_s24 + $0xa10] sm:$0x3f]  ;;  %v6714_v34 = vld [vmem:[%s9182_s24 + $0xa18] sm:$0x3f]  ;;  %v6722_v59 = vld [vmem:[%s9163_s13 + $0xa] sm:$0x3] }
 0x2a3   : >> { %v4935_v60 = vrot.slane %v6708_v57, %v9176_v17  ;;  %v4939_v14 = vrot.slane %v6708_v57, %v9178_v13  ;;  %v4963_v5 = vrot.slane %v6715_v16, %v9176_v17  ;;  %v4967_v26 = vrot.slane %v6715_v16, %v9178_v13  ;;  %v6729_v20 = vld [vmem:[%s9163_s13 + $0xc] sm:$0x3]  ;;  %v6718_v54 = vld [vmem:[%s9182_s24 + $0xc80] sm:$0xff]  ;;  %v6720_v25 = vld [vmem:[%s9182_s24 + $0xc90] sm:$0x3f] }
 0x2a4   : >> { %v4918_v21 = vadd.f32 %v4914_v40, %v4890_v30  ;;  %v4919_v29 = vadd.f32 %v4915_v3, %v4891_v58  ;;  %v4920_v48 = vadd.f32 %v4916_v11, %v4892_v22  ;;  %v4921_v62 = vadd.f32 %v4917_v44, %v4893_v49  ;;  %v6719_v32 = vld [vmem:[%s9182_s24 + $0xc88] sm:$0xff]  ;;  %v6721_v8 = vld [vmem:[%s9182_s24 + $0xc98] sm:$0x3f]  ;;  %v6725_v23 = vld [vmem:[%s9182_s24 + $0xf00] sm:$0xff] }
 0x2a5   : >> { %v4942_v7 = vmul.f32 %v6704_v52, %v4935_v60  ;;  %v4943_v45 = vmul.f32 %v6705_v55, %v4939_v14  ;;  %v4944_v42 = vmul.f32 %v6706_v56, %v4935_v60  ;;  %v4945_v41 = vmul.f32 %v6707_v46, %v4939_v14  ;;  %v6726_v27 = vld [vmem:[%s9182_s24 + $0xf08] sm:$0xff]  ;;  %v6727_v15 = vld [vmem:[%s9182_s24 + $0xf10] sm:$0x3f]  ;;  %v6728_v61 = vld [vmem:[%s9182_s24 + $0xf18] sm:$0x3f] }
 0x2a6   : >> { %v4970_v28 = vmul.f32 %v6711_v18, %v4963_v5  ;;  %v4971_v6 = vmul.f32 %v6712_v19, %v4967_v26  ;;  %v4972_v9 = vmul.f32 %v6713_v53, %v4963_v5  ;;  %v4973_v39 = vmul.f32 %v6714_v34, %v4967_v26  ;;  %v6735_v63 = vld [vmem:[%s9163_s13 + $0xe] sm:$0x3]  ;;  %v6742_v57 = vld [vmem:[%s9163_s13 + $0x10] sm:$0x3]  ;;  %v6731_v44 = vld [vmem:[%s9182_s24 + $0x20] sm:$0xff] }
 0x2a7   : >> { %v4946_v24 = vadd.f32 %v4942_v7, %v4918_v21  ;;  %v4947_v38 = vadd.f32 %v4943_v45, %v4919_v29  ;;  %v4948_v47 = vadd.f32 %v4944_v42, %v4920_v48  ;;  %v4949_v51 = vadd.f32 %v4945_v41, %v4921_v62  ;;  %v6732_v52 = vld [vmem:[%s9182_s24 + $0x28] sm:$0xff]  ;;  %v6733_v49 = vld [vmem:[%s9182_s24 + $0x30] sm:$0x3f]  ;;  %v6734_v56 = vld [vmem:[%s9182_s24 + $0x38] sm:$0x3f] }
 0x2a8   : >> { %v4991_v1 = vrot.slane %v6722_v59, %v9176_v17  ;;  %v4995_v10 = vrot.slane %v6722_v59, %v9178_v13  ;;  %v5019_v43 = vrot.slane %v6729_v20, %v9176_v17  ;;  %v5023_v33 = vrot.slane %v6729_v20, %v9178_v13  ;;  %v6738_v46 = vld [vmem:[%s9182_s24 + $0x2a0] sm:$0xff]  ;;  %v6739_v14 = vld [vmem:[%s9182_s24 + $0x2a8] sm:$0xff]  ;;  %v6740_v19 = vld [vmem:[%s9182_s24 + $0x2b0] sm:$0x3f] }
 0x2a9   : >> { %v4974_v0 = vadd.f32 %v4970_v28, %v4946_v24  ;;  %v4975_v35 = vadd.f32 %v4971_v6, %v4947_v38  ;;  %v4976_v12 = vadd.f32 %v4972_v9, %v4948_v47  ;;  %v4977_v31 = vadd.f32 %v4973_v39, %v4949_v51  ;;  %v6741_v53 = vld [vmem:[%s9182_s24 + $0x2b8] sm:$0x3f]  ;;  %v6749_v41 = vld [vmem:[%s9163_s13 + $0x12] sm:$0x3]  ;;  %v6756_v59 = vld [vmem:[%s9163_s13 + $0x14] sm:$0x3] }
 0x2aa   : >> { %v4998_v4 = vmul.f32 %v6718_v54, %v4991_v1  ;;  %v4999_v2 = vmul.f32 %v6719_v32, %v4995_v10  ;;  %v5000_v50 = vmul.f32 %v6720_v25, %v4991_v1  ;;  %v5001_v36 = vmul.f32 %v6721_v8, %v4995_v10  ;;  %v6745_v39 = vld [vmem:[%s9182_s24 + $0x520] sm:$0xff]  ;;  %v6746_v54 = vld [vmem:[%s9182_s24 + $0x528] sm:$0xff]  ;;  %v6747_v51 = vld [vmem:[%s9182_s24 + $0x530] sm:$0x3f] }
 0x2ab   : >> { %v5026_v16 = vmul.f32 %v6725_v23, %v5019_v43  ;;  %v5027_v40 = vmul.f32 %v6726_v27, %v5023_v33  ;;  %v5028_v3 = vmul.f32 %v6727_v15, %v5019_v43  ;;  %v5029_v11 = vmul.f32 %v6728_v61, %v5023_v33  ;;  %v6748_v25 = vld [vmem:[%s9182_s24 + $0x538] sm:$0x3f]  ;;  %v6752_v8 = vld [vmem:[%s9182_s24 + $0x7a0] sm:$0xff]  ;;  %v6753_v10 = vld [vmem:[%s9182_s24 + $0x7a8] sm:$0xff] }
 0x2ac   : >> { %v5002_v55 = vadd.f32 %v4998_v4, %v4974_v0  ;;  %v5003_v30 = vadd.f32 %v4999_v2, %v4975_v35  ;;  %v5004_v58 = vadd.f32 %v5000_v50, %v4976_v12  ;;  %v5005_v22 = vadd.f32 %v5001_v36, %v4977_v31  ;;  %v6754_v27 = vld [vmem:[%s9182_s24 + $0x7b0] sm:$0x3f]  ;;  %v6755_v15 = vld [vmem:[%s9182_s24 + $0x7b8] sm:$0x3f] }
 0x2ad   : >> { %v5048_v18 = vrot.slane %v6735_v63, %v9176_v17  ;;  %v5052_v60 = vrot.slane %v6735_v63, %v9178_v13  ;;  %v5076_v34 = vrot.slane %v6742_v57, %v9176_v17  ;;  %v5080_v5 = vrot.slane %v6742_v57, %v9178_v13  ;;  %v6763_v36 = vld [vmem:[%s9163_s13 + $0x16] sm:$0x3]  ;;  %v6770_v63 = vld [vmem:[%s9163_s13 + $0x18] sm:$0x3] }
 0x2ae   : >> { %v5030_v26 = vadd.f32 %v5026_v16, %v5002_v55  ;;  %v5031_v21 = vadd.f32 %v5027_v40, %v5003_v30  ;;  %v5032_v29 = vadd.f32 %v5028_v3, %v5004_v58  ;;  %v5033_v48 = vadd.f32 %v5029_v11, %v5005_v22  ;;  %v6759_v11 = vld [vmem:[%s9182_s24 + $0xa20] sm:$0xff]  ;;  %v6761_v22 = vld [vmem:[%s9182_s24 + $0xa30] sm:$0x3f] }
 0x2af   : >> { %v5055_v62 = vmul.f32 %v6731_v44, %v5048_v18  ;;  %v5056_v7 = vmul.f32 %v6732_v52, %v5052_v60  ;;  %v5057_v45 = vmul.f32 %v6733_v49, %v5048_v18  ;;  %v5058_v42 = vmul.f32 %v6734_v56, %v5052_v60  ;;  %v6760_v44 = vld [vmem:[%s9182_s24 + $0xa28] sm:$0xff]  ;;  %v6762_v49 = vld [vmem:[%s9182_s24 + $0xa38] sm:$0x3f]  ;;  %v6766_v56 = vld [vmem:[%s9182_s24 + $0xca0] sm:$0xff] }
 0x2b0   : >> { %v5083_v20 = vmul.f32 %v6738_v46, %v5076_v34  ;;  %v5084_v28 = vmul.f32 %v6739_v14, %v5080_v5  ;;  %v5085_v6 = vmul.f32 %v6740_v19, %v5076_v34  ;;  %v5086_v9 = vmul.f32 %v6741_v53, %v5080_v5  ;;  %v6767_v60 = vld [vmem:[%s9182_s24 + $0xca8] sm:$0xff]  ;;  %v6768_v14 = vld [vmem:[%s9182_s24 + $0xcb0] sm:$0x3f]  ;;  %v6769_v19 = vld [vmem:[%s9182_s24 + $0xcb8] sm:$0x3f] }
 0x2b1   : >> { %v5059_v32 = vadd.f32 %v5055_v62, %v5030_v26  ;;  %v5060_v24 = vadd.f32 %v5056_v7, %v5031_v21  ;;  %v5061_v38 = vadd.f32 %v5057_v45, %v5032_v29  ;;  %v5062_v47 = vadd.f32 %v5058_v42, %v5033_v48  ;;  %v6777_v42 = vld [vmem:[%s9163_s13 + $0x1a] sm:$0x3] }
 0x2b2   : >> { %v5104_v23 = vrot.slane %v6749_v41, %v9176_v17  ;;  %v5108_v1 = vrot.slane %v6749_v41, %v9178_v13  ;;  %v5132_v61 = vrot.slane %v6756_v59, %v9176_v17  ;;  %v5136_v43 = vrot.slane %v6756_v59, %v9178_v13  ;;  %v6783_v41 = vld [vmem:[%s9163_s13 + $0x1c] sm:$0x3] }
 0x2b3   : >> { %v5087_v33 = vadd.f32 %v5083_v20, %v5059_v32  ;;  %v5088_v0 = vadd.f32 %v5084_v28, %v5060_v24  ;;  %v5089_v35 = vadd.f32 %v5085_v6, %v5061_v38  ;;  %v5090_v12 = vadd.f32 %v5086_v9, %v5062_v47  ;;  %v6773_v9 = vld [vmem:[%s9182_s24 + $0xf20] sm:$0xff]  ;;  %v6775_v47 = vld [vmem:[%s9182_s24 + $0xf30] sm:$0x3f] }
 0x2b4   : >> { %v5111_v31 = vmul.f32 %v6745_v39, %v5104_v23  ;;  %v5112_v4 = vmul.f32 %v6746_v54, %v5108_v1  ;;  %v5113_v2 = vmul.f32 %v6747_v51, %v5104_v23  ;;  %v5114_v50 = vmul.f32 %v6748_v25, %v5108_v1  ;;  %v6774_v39 = vld [vmem:[%s9182_s24 + $0xf28] sm:$0xff]  ;;  %v6776_v51 = vld [vmem:[%s9182_s24 + $0xf38] sm:$0x3f]  ;;  %v6779_v25 = vld [vmem:[%s9182_s24 + $0x40] sm:$0xff] }
 0x2b5   : >> { %v5139_v57 = vmul.f32 %v6752_v8, %v5132_v61  ;;  %v5140_v16 = vmul.f32 %v6753_v10, %v5136_v43  ;;  %v5141_v40 = vmul.f32 %v6754_v27, %v5132_v61  ;;  %v5142_v3 = vmul.f32 %v6755_v15, %v5136_v43  ;;  %v6780_v1 = vld [vmem:[%s9182_s24 + $0x48] sm:$0xff]  ;;  %v6781_v10 = vld [vmem:[%s9182_s24 + $0x50] sm:$0x3f]  ;;  %v6782_v27 = vld [vmem:[%s9182_s24 + $0x58] sm:$0x3f] }
 0x2b6   : >> { %v5115_v52 = vadd.f32 %v5111_v31, %v5087_v33  ;;  %v5116_v55 = vadd.f32 %v5112_v4, %v5088_v0  ;;  %v5117_v30 = vadd.f32 %v5113_v2, %v5089_v35  ;;  %v5118_v58 = vadd.f32 %v5114_v50, %v5090_v12  ;;  %v6790_v50 = vld [vmem:[%s9163_s13 + $0x1e] sm:$0x3] }
 0x2b7   : >> { %v5160_v46 = vrot.slane %v6763_v36, %v9176_v17  ;;  %v5164_v18 = vrot.slane %v6763_v36, %v9178_v13  ;;  %v5188_v53 = vrot.slane %v6770_v63, %v9176_v17  ;;  %v5192_v34 = vrot.slane %v6770_v63, %v9178_v13  ;;  %v6797_v36 = vld [vmem:[%s9163_s13 + $0x20] sm:$0x3] }
 0x2b8   : >> { %v5143_v5 = vadd.f32 %v5139_v57, %v5115_v52  ;;  %v5144_v26 = vadd.f32 %v5140_v16, %v5116_v55  ;;  %v5145_v21 = vadd.f32 %v5141_v40, %v5117_v30  ;;  %v5146_v29 = vadd.f32 %v5142_v3, %v5118_v58  ;;  %v6786_v3 = vld [vmem:[%s9182_s24 + $0x2c0] sm:$0xff]  ;;  %v6788_v58 = vld [vmem:[%s9182_s24 + $0x2d0] sm:$0x3f] }
 0x2b9   : >> { %v5167_v48 = vmul.f32 %v6759_v11, %v5160_v46  ;;  %v5168_v62 = vmul.f32 %v6760_v44, %v5164_v18  ;;  %v5169_v7 = vmul.f32 %v6761_v22, %v5160_v46  ;;  %v5170_v45 = vmul.f32 %v6762_v49, %v5164_v18  ;;  %v6787_v11 = vld [vmem:[%s9182_s24 + $0x2c8] sm:$0xff]  ;;  %v6789_v22 = vld [vmem:[%s9182_s24 + $0x2d8] sm:$0x3f]  ;;  %v6793_v49 = vld [vmem:[%s9182_s24 + $0x540] sm:$0xff] }
 0x2ba   : >> { %v5195_v59 = vmul.f32 %v6766_v56, %v5188_v53  ;;  %v5196_v20 = vmul.f32 %v6767_v60, %v5192_v34  ;;  %v5197_v28 = vmul.f32 %v6768_v14, %v5188_v53  ;;  %v5198_v6 = vmul.f32 %v6769_v19, %v5192_v34  ;;  %v6794_v18 = vld [vmem:[%s9182_s24 + $0x548] sm:$0xff]  ;;  %v6795_v60 = vld [vmem:[%s9182_s24 + $0x550] sm:$0x3f]  ;;  %v6796_v14 = vld [vmem:[%s9182_s24 + $0x558] sm:$0x3f] }
 0x2bb   : >> { %v5171_v54 = vadd.f32 %v5167_v48, %v5143_v5  ;;  %v5172_v32 = vadd.f32 %v5168_v62, %v5144_v26  ;;  %v5173_v24 = vadd.f32 %v5169_v7, %v5145_v21  ;;  %v5174_v38 = vadd.f32 %v5170_v45, %v5146_v29  ;;  %v6804_v45 = vld [vmem:[%s9163_s13 + $0x22] sm:$0x3] }
 0x2bc   : >> { %v5216_v8 = vrot.slane %v6777_v42, %v9176_v17  ;;  %v5220_v23 = vrot.slane %v6777_v42, %v9178_v13  ;;  %v5245_v15 = vrot.slane %v6783_v41, %v9176_v17  ;;  %v5249_v61 = vrot.slane %v6783_v41, %v9178_v13  ;;  %v6811_v42 = vld [vmem:[%s9163_s13 + $0x24] sm:$0x3] }
 0x2bd   : >> { %v5199_v43 = vadd.f32 %v5195_v59, %v5171_v54  ;;  %v5200_v33 = vadd.f32 %v5196_v20, %v5172_v32  ;;  %v5201_v0 = vadd.f32 %v5197_v28, %v5173_v24  ;;  %v5202_v35 = vadd.f32 %v5198_v6, %v5174_v38  ;;  %v6800_v6 = vld [vmem:[%s9182_s24 + $0x7c0] sm:$0xff]  ;;  %v6802_v38 = vld [vmem:[%s9182_s24 + $0x7d0] sm:$0x3f] }
 0x2be   : >> { %v5223_v12 = vmul.f32 %v6773_v9, %v5216_v8  ;;  %v5224_v31 = vmul.f32 %v6774_v39, %v5220_v23  ;;  %v5225_v4 = vmul.f32 %v6775_v47, %v5216_v8  ;;  %v5226_v2 = vmul.f32 %v6776_v51, %v5220_v23  ;;  %v6801_v9 = vld [vmem:[%s9182_s24 + $0x7c8] sm:$0xff]  ;;  %v6803_v47 = vld [vmem:[%s9182_s24 + $0x7d8] sm:$0x3f]  ;;  %v6807_v51 = vld [vmem:[%s9182_s24 + $0xa40] sm:$0xff] }
 0x2bf   : >> { %v5252_v63 = vmul.f32 %v6779_v25, %v5245_v15  ;;  %v5253_v57 = vmul.f32 %v6780_v1, %v5249_v61  ;;  %v5254_v16 = vmul.f32 %v6781_v10, %v5245_v15  ;;  %v5255_v40 = vmul.f32 %v6782_v27, %v5249_v61  ;;  %v6808_v23 = vld [vmem:[%s9182_s24 + $0xa48] sm:$0xff]  ;;  %v6809_v1 = vld [vmem:[%s9182_s24 + $0xa50] sm:$0x3f]  ;;  %v6810_v10 = vld [vmem:[%s9182_s24 + $0xa58] sm:$0x3f] }
 0x2c0   : >> { %v5227_v44 = vadd.f32 %v5223_v12, %v5199_v43  ;;  %v5228_v52 = vadd.f32 %v5224_v31, %v5200_v33  ;;  %v5229_v55 = vadd.f32 %v5225_v4, %v5201_v0  ;;  %v5230_v30 = vadd.f32 %v5226_v2, %v5202_v35  ;;  %v6818_v2 = vld [vmem:[%s9163_s13 + $0x26] sm:$0x3] }
 0x2c1   : >> { %v5273_v56 = vrot.slane %v6790_v50, %v9176_v17  ;;  %v5277_v46 = vrot.slane %v6790_v50, %v9178_v13  ;;  %v5301_v19 = vrot.slane %v6797_v36, %v9176_v17  ;;  %v5305_v53 = vrot.slane %v6797_v36, %v9178_v13  ;;  %v6825_v50 = vld [vmem:[%s9163_s13 + $0x28] sm:$0x3] }
 0x2c2   : >> { %v5256_v34 = vadd.f32 %v5252_v63, %v5227_v44  ;;  %v5257_v5 = vadd.f32 %v5253_v57, %v5228_v52  ;;  %v5258_v26 = vadd.f32 %v5254_v16, %v5229_v55  ;;  %v5259_v21 = vadd.f32 %v5255_v40, %v5230_v30  ;;  %v6814_v40 = vld [vmem:[%s9182_s24 + $0xcc0] sm:$0xff]  ;;  %v6816_v30 = vld [vmem:[%s9182_s24 + $0xcd0] sm:$0x3f] }
 0x2c3   : >> { %v5280_v29 = vmul.f32 %v6786_v3, %v5273_v56  ;;  %v5281_v48 = vmul.f32 %v6787_v11, %v5277_v46  ;;  %v5282_v62 = vmul.f32 %v6788_v58, %v5273_v56  ;;  %v5283_v7 = vmul.f32 %v6789_v22, %v5277_v46  ;;  %v6815_v3 = vld [vmem:[%s9182_s24 + $0xcc8] sm:$0xff]  ;;  %v6817_v58 = vld [vmem:[%s9182_s24 + $0xcd8] sm:$0x3f]  ;;  %v6821_v22 = vld [vmem:[%s9182_s24 + $0xf40] sm:$0xff] }
 0x2c4   : >> { %v5308_v41 = vmul.f32 %v6793_v49, %v5301_v19  ;;  %v5309_v59 = vmul.f32 %v6794_v18, %v5305_v53  ;;  %v5310_v20 = vmul.f32 %v6795_v60, %v5301_v19  ;;  %v5311_v28 = vmul.f32 %v6796_v14, %v5305_v53  ;;  %v6822_v46 = vld [vmem:[%s9182_s24 + $0xf48] sm:$0xff]  ;;  %v6823_v18 = vld [vmem:[%s9182_s24 + $0xf50] sm:$0x3f]  ;;  %v6824_v60 = vld [vmem:[%s9182_s24 + $0xf58] sm:$0x3f] }
 0x2c5   : >> { %v5284_v39 = vadd.f32 %v5280_v29, %v5256_v34  ;;  %v5285_v54 = vadd.f32 %v5281_v48, %v5257_v5  ;;  %v5286_v32 = vadd.f32 %v5282_v62, %v5258_v26  ;;  %v5287_v24 = vadd.f32 %v5283_v7, %v5259_v21  ;;  %v6831_v7 = vld [vmem:[%s9163_s13 + $0x2a] sm:$0x3] }
 0x2c6   : >> { %v5329_v25 = vrot.slane %v6804_v45, %v9176_v17  ;;  %v5333_v8 = vrot.slane %v6804_v45, %v9178_v13  ;;  %v5357_v27 = vrot.slane %v6811_v42, %v9176_v17  ;;  %v5361_v15 = vrot.slane %v6811_v42, %v9178_v13  ;;  %v6838_v45 = vld [vmem:[%s9163_s13 + $0x2c] sm:$0x3] }
 0x2c7   : >> { %v5312_v61 = vadd.f32 %v5308_v41, %v5284_v39  ;;  %v5313_v43 = vadd.f32 %v5309_v59, %v5285_v54  ;;  %v5314_v33 = vadd.f32 %v5310_v20, %v5286_v32  ;;  %v5315_v0 = vadd.f32 %v5311_v28, %v5287_v24  ;;  %v6827_v28 = vld [vmem:[%s9182_s24 + $0x60] sm:$0xff]  ;;  %v6829_v24 = vld [vmem:[%s9182_s24 + $0x70] sm:$0x3f] }
 0x2c8   : >> { %v5336_v35 = vmul.f32 %v6800_v6, %v5329_v25  ;;  %v5337_v12 = vmul.f32 %v6801_v9, %v5333_v8  ;;  %v5338_v31 = vmul.f32 %v6802_v38, %v5329_v25  ;;  %v5339_v4 = vmul.f32 %v6803_v47, %v5333_v8  ;;  %v6828_v6 = vld [vmem:[%s9182_s24 + $0x68] sm:$0xff]  ;;  %v6830_v38 = vld [vmem:[%s9182_s24 + $0x78] sm:$0x3f]  ;;  %v6834_v47 = vld [vmem:[%s9182_s24 + $0x2e0] sm:$0xff] }
 0x2c9   : >> { %v5364_v36 = vmul.f32 %v6807_v51, %v5357_v27  ;;  %v5365_v63 = vmul.f32 %v6808_v23, %v5361_v15  ;;  %v5366_v57 = vmul.f32 %v6809_v1, %v5357_v27  ;;  %v5367_v16 = vmul.f32 %v6810_v10, %v5361_v15  ;;  %v6835_v8 = vld [vmem:[%s9182_s24 + $0x2e8] sm:$0xff]  ;;  %v6836_v23 = vld [vmem:[%s9182_s24 + $0x2f0] sm:$0x3f]  ;;  %v6837_v1 = vld [vmem:[%s9182_s24 + $0x2f8] sm:$0x3f] }
 0x2ca   : >> { %v5340_v11 = vadd.f32 %v5336_v35, %v5312_v61  ;;  %v5341_v44 = vadd.f32 %v5337_v12, %v5313_v43  ;;  %v5342_v52 = vadd.f32 %v5338_v31, %v5314_v33  ;;  %v5343_v55 = vadd.f32 %v5339_v4, %v5315_v0  ;;  %v6845_v4 = vld [vmem:[%s9163_s13 + $0x2e] sm:$0x3] }
 0x2cb   : >> { %v5385_v49 = vrot.slane %v6818_v2, %v9176_v17  ;;  %v5389_v56 = vrot.slane %v6818_v2, %v9178_v13  ;;  %v5413_v14 = vrot.slane %v6825_v50, %v9176_v17  ;;  %v5417_v19 = vrot.slane %v6825_v50, %v9178_v13  ;;  %v6852_v2 = vld [vmem:[%s9163_s13 + $0x30] sm:$0x3] }
 0x2cc   : >> { %v5368_v53 = vadd.f32 %v5364_v36, %v5340_v11  ;;  %v5369_v34 = vadd.f32 %v5365_v63, %v5341_v44  ;;  %v5370_v5 = vadd.f32 %v5366_v57, %v5342_v52  ;;  %v5371_v26 = vadd.f32 %v5367_v16, %v5343_v55  ;;  %v6841_v16 = vld [vmem:[%s9182_s24 + $0x560] sm:$0xff]  ;;  %v6843_v55 = vld [vmem:[%s9182_s24 + $0x570] sm:$0x3f] }
 0x2cd   : >> { %v5392_v21 = vmul.f32 %v6814_v40, %v5385_v49  ;;  %v5393_v29 = vmul.f32 %v6815_v3, %v5389_v56  ;;  %v5394_v48 = vmul.f32 %v6816_v30, %v5385_v49  ;;  %v5395_v62 = vmul.f32 %v6817_v58, %v5389_v56  ;;  %v6842_v40 = vld [vmem:[%s9182_s24 + $0x568] sm:$0xff]  ;;  %v6844_v30 = vld [vmem:[%s9182_s24 + $0x578] sm:$0x3f]  ;;  %v6848_v58 = vld [vmem:[%s9182_s24 + $0x7e0] sm:$0xff] }
 0x2ce   : >> { %v5420_v42 = vmul.f32 %v6821_v22, %v5413_v14  ;;  %v5421_v41 = vmul.f32 %v6822_v46, %v5417_v19  ;;  %v5422_v59 = vmul.f32 %v6823_v18, %v5413_v14  ;;  %v5423_v20 = vmul.f32 %v6824_v60, %v5417_v19  ;;  %v6849_v56 = vld [vmem:[%s9182_s24 + $0x7e8] sm:$0xff]  ;;  %v6850_v46 = vld [vmem:[%s9182_s24 + $0x7f0] sm:$0x3f]  ;;  %v6851_v18 = vld [vmem:[%s9182_s24 + $0x7f8] sm:$0x3f] }
 0x2cf   : >> { %v5396_v9 = vadd.f32 %v5392_v21, %v5368_v53  ;;  %v5397_v39 = vadd.f32 %v5393_v29, %v5369_v34  ;;  %v5398_v54 = vadd.f32 %v5394_v48, %v5370_v5  ;;  %v5399_v32 = vadd.f32 %v5395_v62, %v5371_v26  ;;  %v6859_v62 = vld [vmem:[%s9163_s13 + $0x32] sm:$0x3] }
 0x2d0   : >> { %v5442_v51 = vrot.slane %v6831_v7, %v9176_v17  ;;  %v5446_v25 = vrot.slane %v6831_v7, %v9178_v13  ;;  %v5470_v10 = vrot.slane %v6838_v45, %v9176_v17  ;;  %v5474_v27 = vrot.slane %v6838_v45, %v9178_v13  ;;  %v6866_v7 = vld [vmem:[%s9163_s13 + $0x34] sm:$0x3] }
 0x2d1   : >> { %v5424_v15 = vadd.f32 %v5420_v42, %v5396_v9  ;;  %v5425_v61 = vadd.f32 %v5421_v41, %v5397_v39  ;;  %v5426_v43 = vadd.f32 %v5422_v59, %v5398_v54  ;;  %v5427_v33 = vadd.f32 %v5423_v20, %v5399_v32  ;;  %v6855_v20 = vld [vmem:[%s9182_s24 + $0xa60] sm:$0xff]  ;;  %v6857_v32 = vld [vmem:[%s9182_s24 + $0xa70] sm:$0x3f] }
 0x2d2   : >> { %v5449_v0 = vmul.f32 %v6827_v28, %v5442_v51  ;;  %v5450_v35 = vmul.f32 %v6828_v6, %v5446_v25  ;;  %v5451_v12 = vmul.f32 %v6829_v24, %v5442_v51  ;;  %v5452_v31 = vmul.f32 %v6830_v38, %v5446_v25  ;;  %v6856_v28 = vld [vmem:[%s9182_s24 + $0xa68] sm:$0xff]  ;;  %v6858_v24 = vld [vmem:[%s9182_s24 + $0xa78] sm:$0x3f]  ;;  %v6862_v38 = vld [vmem:[%s9182_s24 + $0xce0] sm:$0xff] }
 0x2d3   : >> { %v5477_v50 = vmul.f32 %v6834_v47, %v5470_v10  ;;  %v5478_v36 = vmul.f32 %v6835_v8, %v5474_v27  ;;  %v5479_v63 = vmul.f32 %v6836_v23, %v5470_v10  ;;  %v5480_v57 = vmul.f32 %v6837_v1, %v5474_v27  ;;  %v6863_v25 = vld [vmem:[%s9182_s24 + $0xce8] sm:$0xff]  ;;  %v6864_v8 = vld [vmem:[%s9182_s24 + $0xcf0] sm:$0x3f]  ;;  %v6865_v23 = vld [vmem:[%s9182_s24 + $0xcf8] sm:$0x3f] }
 0x2d4   : >> { %v5453_v3 = vadd.f32 %v5449_v0, %v5424_v15  ;;  %v5454_v11 = vadd.f32 %v5450_v35, %v5425_v61  ;;  %v5455_v44 = vadd.f32 %v5451_v12, %v5426_v43  ;;  %v5456_v52 = vadd.f32 %v5452_v31, %v5427_v33  ;;  %v6873_v31 = vld [vmem:[%s9163_s13 + $0x36] sm:$0x3] }
 0x2d5   : >> { %v5498_v22 = vrot.slane %v6845_v4, %v9176_v17  ;;  %v5502_v49 = vrot.slane %v6845_v4, %v9178_v13  ;;  %v5526_v60 = vrot.slane %v6852_v2, %v9176_v17  ;;  %v5530_v14 = vrot.slane %v6852_v2, %v9178_v13  ;;  %v6879_v4 = vld [vmem:[%s9163_s13 + $0x38] sm:$0x3] }
 0x2d6   : >> { %v5481_v19 = vadd.f32 %v5477_v50, %v5453_v3  ;;  %v5482_v53 = vadd.f32 %v5478_v36, %v5454_v11  ;;  %v5483_v34 = vadd.f32 %v5479_v63, %v5455_v44  ;;  %v5484_v5 = vadd.f32 %v5480_v57, %v5456_v52  ;;  %v6869_v57 = vld [vmem:[%s9182_s24 + $0xf60] sm:$0xff]  ;;  %v6871_v52 = vld [vmem:[%s9182_s24 + $0xf70] sm:$0x3f] }
 0x2d7   : >> { %v5505_v26 = vmul.f32 %v6841_v16, %v5498_v22  ;;  %v5506_v21 = vmul.f32 %v6842_v40, %v5502_v49  ;;  %v5507_v29 = vmul.f32 %v6843_v55, %v5498_v22  ;;  %v5508_v48 = vmul.f32 %v6844_v30, %v5502_v49  ;;  %v6870_v16 = vld [vmem:[%s9182_s24 + $0xf68] sm:$0xff]  ;;  %v6872_v55 = vld [vmem:[%s9182_s24 + $0xf78] sm:$0x3f]  ;;  %v6875_v30 = vld [vmem:[%s9182_s24 + $0x80] sm:$0xff] }
 0x2d8   : >> { %v5533_v45 = vmul.f32 %v6848_v58, %v5526_v60  ;;  %v5534_v42 = vmul.f32 %v6849_v56, %v5530_v14  ;;  %v5535_v41 = vmul.f32 %v6850_v46, %v5526_v60  ;;  %v5536_v59 = vmul.f32 %v6851_v18, %v5530_v14  ;;  %v6876_v49 = vld [vmem:[%s9182_s24 + $0x88] sm:$0xff]  ;;  %v6877_v56 = vld [vmem:[%s9182_s24 + $0x90] sm:$0x3f]  ;;  %v6878_v46 = vld [vmem:[%s9182_s24 + $0x98] sm:$0x3f] }
 0x2d9   : >> { %v5509_v6 = vadd.f32 %v5505_v26, %v5481_v19  ;;  %v5510_v9 = vadd.f32 %v5506_v21, %v5482_v53  ;;  %v5511_v39 = vadd.f32 %v5507_v29, %v5483_v34  ;;  %v5512_v54 = vadd.f32 %v5508_v48, %v5484_v5  ;;  %v6886_v48 = vld [vmem:[%s9163_s13 + $0x3a] sm:$0x3] }
 0x2da   : >> { %v5554_v47 = vrot.slane %v6859_v62, %v9176_v17  ;;  %v5558_v51 = vrot.slane %v6859_v62, %v9178_v13  ;;  %v5582_v1 = vrot.slane %v6866_v7, %v9176_v17  ;;  %v5586_v10 = vrot.slane %v6866_v7, %v9178_v13  ;;  %v6893_v62 = vld [vmem:[%s9163_s13 + $0x3c] sm:$0x3] }
 0x2db   : >> { %v5537_v27 = vadd.f32 %v5533_v45, %v5509_v6  ;;  %v5538_v15 = vadd.f32 %v5534_v42, %v5510_v9  ;;  %v5539_v61 = vadd.f32 %v5535_v41, %v5511_v39  ;;  %v5540_v43 = vadd.f32 %v5536_v59, %v5512_v54  ;;  %v6882_v59 = vld [vmem:[%s9182_s24 + $0x300] sm:$0xff]  ;;  %v6884_v54 = vld [vmem:[%s9182_s24 + $0x310] sm:$0x3f] }
 0x2dc   : >> { %v5561_v33 = vmul.f32 %v6855_v20, %v5554_v47  ;;  %v5562_v0 = vmul.f32 %v6856_v28, %v5558_v51  ;;  %v5563_v35 = vmul.f32 %v6857_v32, %v5554_v47  ;;  %v5564_v12 = vmul.f32 %v6858_v24, %v5558_v51  ;;  %v6883_v20 = vld [vmem:[%s9182_s24 + $0x308] sm:$0xff]  ;;  %v6885_v32 = vld [vmem:[%s9182_s24 + $0x318] sm:$0x3f]  ;;  %v6889_v24 = vld [vmem:[%s9182_s24 + $0x580] sm:$0xff] }
 0x2dd   : >> { %v5589_v2 = vmul.f32 %v6862_v38, %v5582_v1  ;;  %v5590_v50 = vmul.f32 %v6863_v25, %v5586_v10  ;;  %v5591_v36 = vmul.f32 %v6864_v8, %v5582_v1  ;;  %v5592_v63 = vmul.f32 %v6865_v23, %v5586_v10  ;;  %v6890_v51 = vld [vmem:[%s9182_s24 + $0x588] sm:$0xff]  ;;  %v6891_v25 = vld [vmem:[%s9182_s24 + $0x590] sm:$0x3f]  ;;  %v6892_v8 = vld [vmem:[%s9182_s24 + $0x598] sm:$0x3f] }
 0x2de   : >> { %v5565_v40 = vadd.f32 %v5561_v33, %v5537_v27  ;;  %v5566_v3 = vadd.f32 %v5562_v0, %v5538_v15  ;;  %v5567_v11 = vadd.f32 %v5563_v35, %v5539_v61  ;;  %v5568_v44 = vadd.f32 %v5564_v12, %v5540_v43  ;;  %v6900_v12 = vld [vmem:[%s9163_s13 + $0x3e] sm:$0x3] }
 0x2df   : >> { %v5610_v58 = vrot.slane %v6873_v31, %v9176_v17  ;;  %v5614_v22 = vrot.slane %v6873_v31, %v9178_v13  ;;  %v5639_v18 = vrot.slane %v6879_v4, %v9176_v17  ;;  %v5643_v60 = vrot.slane %v6879_v4, %v9178_v13  ;;  %v6907_v31 = vld [vmem:[%s9163_s13 + $0x40] sm:$0x3] }
 0x2e0   : >> { %v5593_v14 = vadd.f32 %v5589_v2, %v5565_v40  ;;  %v5594_v19 = vadd.f32 %v5590_v50, %v5566_v3  ;;  %v5595_v53 = vadd.f32 %v5591_v36, %v5567_v11  ;;  %v5596_v34 = vadd.f32 %v5592_v63, %v5568_v44  ;;  %v6896_v63 = vld [vmem:[%s9182_s24 + $0x800] sm:$0xff]  ;;  %v6898_v44 = vld [vmem:[%s9182_s24 + $0x810] sm:$0x3f] }
 0x2e1   : >> { %v5617_v5 = vmul.f32 %v6869_v57, %v5610_v58  ;;  %v5618_v26 = vmul.f32 %v6870_v16, %v5614_v22  ;;  %v5619_v21 = vmul.f32 %v6871_v52, %v5610_v58  ;;  %v5620_v29 = vmul.f32 %v6872_v55, %v5614_v22  ;;  %v6897_v57 = vld [vmem:[%s9182_s24 + $0x808] sm:$0xff]  ;;  %v6899_v52 = vld [vmem:[%s9182_s24 + $0x818] sm:$0x3f]  ;;  %v6903_v55 = vld [vmem:[%s9182_s24 + $0xa80] sm:$0xff] }
 0x2e2   : >> { %v5646_v7 = vmul.f32 %v6875_v30, %v5639_v18  ;;  %v5647_v45 = vmul.f32 %v6876_v49, %v5643_v60  ;;  %v5648_v42 = vmul.f32 %v6877_v56, %v5639_v18  ;;  %v5649_v41 = vmul.f32 %v6878_v46, %v5643_v60  ;;  %v6904_v22 = vld [vmem:[%s9182_s24 + $0xa88] sm:$0xff]  ;;  %v6905_v49 = vld [vmem:[%s9182_s24 + $0xa90] sm:$0x3f]  ;;  %v6906_v56 = vld [vmem:[%s9182_s24 + $0xa98] sm:$0x3f] }
 0x2e3   : >> { %v5621_v28 = vadd.f32 %v5617_v5, %v5593_v14  ;;  %v5622_v6 = vadd.f32 %v5618_v26, %v5594_v19  ;;  %v5623_v9 = vadd.f32 %v5619_v21, %v5595_v53  ;;  %v5624_v39 = vadd.f32 %v5620_v29, %v5596_v34  ;;  %v6914_v29 = vld [vmem:[%s9163_s13 + $0x42] sm:$0x3] }
 0x2e4   : >> { %v5667_v38 = vrot.slane %v6886_v48, %v9176_v17  ;;  %v5671_v47 = vrot.slane %v6886_v48, %v9178_v13  ;;  %v5695_v23 = vrot.slane %v6893_v62, %v9176_v17  ;;  %v5699_v1 = vrot.slane %v6893_v62, %v9178_v13  ;;  %v6921_v48 = vld [vmem:[%s9163_s13 + $0x44] sm:$0x3] }
 0x2e5   : >> { %v5650_v10 = vadd.f32 %v5646_v7, %v5621_v28  ;;  %v5651_v27 = vadd.f32 %v5647_v45, %v5622_v6  ;;  %v5652_v15 = vadd.f32 %v5648_v42, %v5623_v9  ;;  %v5653_v61 = vadd.f32 %v5649_v41, %v5624_v39  ;;  %v6910_v41 = vld [vmem:[%s9182_s24 + $0xd00] sm:$0xff]  ;;  %v6912_v39 = vld [vmem:[%s9182_s24 + $0xd10] sm:$0x3f] }
 0x2e6   : >> { %v5674_v43 = vmul.f32 %v6882_v59, %v5667_v38  ;;  %v5675_v33 = vmul.f32 %v6883_v20, %v5671_v47  ;;  %v5676_v0 = vmul.f32 %v6884_v54, %v5667_v38  ;;  %v5677_v35 = vmul.f32 %v6885_v32, %v5671_v47  ;;  %v6911_v59 = vld [vmem:[%s9182_s24 + $0xd08] sm:$0xff]  ;;  %v6913_v54 = vld [vmem:[%s9182_s24 + $0xd18] sm:$0x3f]  ;;  %v6917_v32 = vld [vmem:[%s9182_s24 + $0xf80] sm:$0xff] }
 0x2e7   : >> { %v5702_v4 = vmul.f32 %v6889_v24, %v5695_v23  ;;  %v5703_v2 = vmul.f32 %v6890_v51, %v5699_v1  ;;  %v5704_v50 = vmul.f32 %v6891_v25, %v5695_v23  ;;  %v5705_v36 = vmul.f32 %v6892_v8, %v5699_v1  ;;  %v6918_v47 = vld [vmem:[%s9182_s24 + $0xf88] sm:$0xff]  ;;  %v6919_v51 = vld [vmem:[%s9182_s24 + $0xf90] sm:$0x3f]  ;;  %v6920_v25 = vld [vmem:[%s9182_s24 + $0xf98] sm:$0x3f] }
 0x2e8   : >> { %v5678_v16 = vadd.f32 %v5674_v43, %v5650_v10  ;;  %v5679_v40 = vadd.f32 %v5675_v33, %v5651_v27  ;;  %v5680_v3 = vadd.f32 %v5676_v0, %v5652_v15  ;;  %v5681_v11 = vadd.f32 %v5677_v35, %v5653_v61  ;;  %v6927_v35 = vld [vmem:[%s9163_s13 + $0x46] sm:$0x3] }
 0x2e9   : >> { %v5723_v30 = vrot.slane %v6900_v12, %v9176_v17  ;;  %v5727_v58 = vrot.slane %v6900_v12, %v9178_v13  ;;  %v5751_v46 = vrot.slane %v6907_v31, %v9176_v17  ;;  %v5755_v18 = vrot.slane %v6907_v31, %v9178_v13  ;;  %v6934_v12 = vld [vmem:[%s9163_s13 + $0x48] sm:$0x3] }
 0x2ea   : >> { %v5706_v60 = vadd.f32 %v5702_v4, %v5678_v16  ;;  %v5707_v14 = vadd.f32 %v5703_v2, %v5679_v40  ;;  %v5708_v19 = vadd.f32 %v5704_v50, %v5680_v3  ;;  %v5709_v53 = vadd.f32 %v5705_v36, %v5681_v11  ;;  %v6923_v36 = vld [vmem:[%s9182_s24 + $0xa0] sm:$0xff]  ;;  %v6925_v11 = vld [vmem:[%s9182_s24 + $0xb0] sm:$0x3f] }
 0x2eb   : >> { %v5730_v34 = vmul.f32 %v6896_v63, %v5723_v30  ;;  %v5731_v5 = vmul.f32 %v6897_v57, %v5727_v58  ;;  %v5732_v26 = vmul.f32 %v6898_v44, %v5723_v30  ;;  %v5733_v21 = vmul.f32 %v6899_v52, %v5727_v58  ;;  %v6924_v63 = vld [vmem:[%s9182_s24 + $0xa8] sm:$0xff]  ;;  %v6926_v44 = vld [vmem:[%s9182_s24 + $0xb8] sm:$0x3f]  ;;  %v6930_v52 = vld [vmem:[%s9182_s24 + $0x320] sm:$0xff] }
 0x2ec   : >> { %v5758_v62 = vmul.f32 %v6903_v55, %v5751_v46  ;;  %v5759_v7 = vmul.f32 %v6904_v22, %v5755_v18  ;;  %v5760_v45 = vmul.f32 %v6905_v49, %v5751_v46  ;;  %v5761_v42 = vmul.f32 %v6906_v56, %v5755_v18  ;;  %v6931_v58 = vld [vmem:[%s9182_s24 + $0x328] sm:$0xff]  ;;  %v6932_v22 = vld [vmem:[%s9182_s24 + $0x330] sm:$0x3f]  ;;  %v6933_v49 = vld [vmem:[%s9182_s24 + $0x338] sm:$0x3f] }
 0x2ed   : >> { %v5734_v20 = vadd.f32 %v5730_v34, %v5706_v60  ;;  %v5735_v28 = vadd.f32 %v5731_v5, %v5707_v14  ;;  %v5736_v6 = vadd.f32 %v5732_v26, %v5708_v19  ;;  %v5737_v9 = vadd.f32 %v5733_v21, %v5709_v53  ;;  %v6941_v21 = vld [vmem:[%s9163_s13 + $0x4a] sm:$0x3] }
 0x2ee   : >> { %v5779_v24 = vrot.slane %v6914_v29, %v9176_v17  ;;  %v5783_v38 = vrot.slane %v6914_v29, %v9178_v13  ;;  %v5807_v8 = vrot.slane %v6921_v48, %v9176_v17  ;;  %v5811_v23 = vrot.slane %v6921_v48, %v9178_v13  ;;  %v6948_v29 = vld [vmem:[%s9163_s13 + $0x4c] sm:$0x3] }
 0x2ef   : >> { %v5762_v1 = vadd.f32 %v5758_v62, %v5734_v20  ;;  %v5763_v10 = vadd.f32 %v5759_v7, %v5735_v28  ;;  %v5764_v27 = vadd.f32 %v5760_v45, %v5736_v6  ;;  %v5765_v15 = vadd.f32 %v5761_v42, %v5737_v9  ;;  %v6937_v42 = vld [vmem:[%s9182_s24 + $0x5a0] sm:$0xff]  ;;  %v6939_v9 = vld [vmem:[%s9182_s24 + $0x5b0] sm:$0x3f] }
 0x2f0   : >> { %v5786_v61 = vmul.f32 %v6910_v41, %v5779_v24  ;;  %v5787_v43 = vmul.f32 %v6911_v59, %v5783_v38  ;;  %v5788_v33 = vmul.f32 %v6912_v39, %v5779_v24  ;;  %v5789_v0 = vmul.f32 %v6913_v54, %v5783_v38  ;;  %v6938_v41 = vld [vmem:[%s9182_s24 + $0x5a8] sm:$0xff]  ;;  %v6940_v39 = vld [vmem:[%s9182_s24 + $0x5b8] sm:$0x3f]  ;;  %v6944_v54 = vld [vmem:[%s9182_s24 + $0x820] sm:$0xff] }
 0x2f1   : >> { %v5814_v31 = vmul.f32 %v6917_v32, %v5807_v8  ;;  %v5815_v4 = vmul.f32 %v6918_v47, %v5811_v23  ;;  %v5816_v2 = vmul.f32 %v6919_v51, %v5807_v8  ;;  %v5817_v50 = vmul.f32 %v6920_v25, %v5811_v23  ;;  %v6945_v38 = vld [vmem:[%s9182_s24 + $0x828] sm:$0xff]  ;;  %v6946_v47 = vld [vmem:[%s9182_s24 + $0x830] sm:$0x3f]  ;;  %v6947_v51 = vld [vmem:[%s9182_s24 + $0x838] sm:$0x3f] }
 0x2f2   : >> { %v5790_v57 = vadd.f32 %v5786_v61, %v5762_v1  ;;  %v5791_v16 = vadd.f32 %v5787_v43, %v5763_v10  ;;  %v5792_v40 = vadd.f32 %v5788_v33, %v5764_v27  ;;  %v5793_v3 = vadd.f32 %v5789_v0, %v5765_v15  ;;  %v6955_v0 = vld [vmem:[%s9163_s13 + $0x4e] sm:$0x3] }
 0x2f3   : >> { %v5836_v55 = vrot.slane %v6927_v35, %v9176_v17  ;;  %v5840_v30 = vrot.slane %v6927_v35, %v9178_v13  ;;  %v5864_v56 = vrot.slane %v6934_v12, %v9176_v17  ;;  %v5868_v46 = vrot.slane %v6934_v12, %v9178_v13  ;;  %v6962_v35 = vld [vmem:[%s9163_s13 + $0x50] sm:$0x3] }
 0x2f4   : >> { %v5818_v18 = vadd.f32 %v5814_v31, %v5790_v57  ;;  %v5819_v60 = vadd.f32 %v5815_v4, %v5791_v16  ;;  %v5820_v14 = vadd.f32 %v5816_v2, %v5792_v40  ;;  %v5821_v19 = vadd.f32 %v5817_v50, %v5793_v3  ;;  %v6951_v50 = vld [vmem:[%s9182_s24 + $0xaa0] sm:$0xff]  ;;  %v6953_v3 = vld [vmem:[%s9182_s24 + $0xab0] sm:$0x3f] }
 0x2f5   : >> { %v5843_v53 = vmul.f32 %v6923_v36, %v5836_v55  ;;  %v5844_v34 = vmul.f32 %v6924_v63, %v5840_v30  ;;  %v5845_v5 = vmul.f32 %v6925_v11, %v5836_v55  ;;  %v5846_v26 = vmul.f32 %v6926_v44, %v5840_v30  ;;  %v6952_v36 = vld [vmem:[%s9182_s24 + $0xaa8] sm:$0xff]  ;;  %v6954_v11 = vld [vmem:[%s9182_s24 + $0xab8] sm:$0x3f]  ;;  %v6958_v44 = vld [vmem:[%s9182_s24 + $0xd20] sm:$0xff] }
 0x2f6   : >> { %v5871_v48 = vmul.f32 %v6930_v52, %v5864_v56  ;;  %v5872_v62 = vmul.f32 %v6931_v58, %v5868_v46  ;;  %v5873_v7 = vmul.f32 %v6932_v22, %v5864_v56  ;;  %v5874_v45 = vmul.f32 %v6933_v49, %v5868_v46  ;;  %v6959_v30 = vld [vmem:[%s9182_s24 + $0xd28] sm:$0xff]  ;;  %v6960_v58 = vld [vmem:[%s9182_s24 + $0xd30] sm:$0x3f]  ;;  %v6961_v22 = vld [vmem:[%s9182_s24 + $0xd38] sm:$0x3f] }
 0x2f7   : >> { %v5847_v59 = vadd.f32 %v5843_v53, %v5818_v18  ;;  %v5848_v20 = vadd.f32 %v5844_v34, %v5819_v60  ;;  %v5849_v28 = vadd.f32 %v5845_v5, %v5820_v14  ;;  %v5850_v6 = vadd.f32 %v5846_v26, %v5821_v19  ;;  %v6969_v26 = vld [vmem:[%s9163_s13 + $0x52] sm:$0x3] }
 0x2f8   : >> { %v5892_v32 = vrot.slane %v6941_v21, %v9176_v17  ;;  %v5896_v24 = vrot.slane %v6941_v21, %v9178_v13  ;;  %v5920_v25 = vrot.slane %v6948_v29, %v9176_v17  ;;  %v5924_v8 = vrot.slane %v6948_v29, %v9178_v13  ;;  %v6975_v21 = vld [vmem:[%s9163_s13 + $0x54] sm:$0x3] }
 0x2f9   : >> { %v5875_v23 = vadd.f32 %v5871_v48, %v5847_v59  ;;  %v5876_v1 = vadd.f32 %v5872_v62, %v5848_v20  ;;  %v5877_v10 = vadd.f32 %v5873_v7, %v5849_v28  ;;  %v5878_v27 = vadd.f32 %v5874_v45, %v5850_v6  ;;  %v6965_v45 = vld [vmem:[%s9182_s24 + $0xfa0] sm:$0xff]  ;;  %v6967_v6 = vld [vmem:[%s9182_s24 + $0xfb0] sm:$0x3f] }
 0x2fa   : >> { %v5899_v15 = vmul.f32 %v6937_v42, %v5892_v32  ;;  %v5900_v61 = vmul.f32 %v6938_v41, %v5896_v24  ;;  %v5901_v43 = vmul.f32 %v6939_v9, %v5892_v32  ;;  %v5902_v33 = vmul.f32 %v6940_v39, %v5896_v24  ;;  %v6966_v42 = vld [vmem:[%s9182_s24 + $0xfa8] sm:$0xff]  ;;  %v6968_v9 = vld [vmem:[%s9182_s24 + $0xfb8] sm:$0x3f]  ;;  %v6971_v39 = vld [vmem:[%s9182_s24 + $0xc0] sm:$0xff] }
 0x2fb   : >> { %v5927_v12 = vmul.f32 %v6944_v54, %v5920_v25  ;;  %v5928_v31 = vmul.f32 %v6945_v38, %v5924_v8  ;;  %v5929_v4 = vmul.f32 %v6946_v47, %v5920_v25  ;;  %v5930_v2 = vmul.f32 %v6947_v51, %v5924_v8  ;;  %v6972_v24 = vld [vmem:[%s9182_s24 + $0xc8] sm:$0xff]  ;;  %v6973_v38 = vld [vmem:[%s9182_s24 + $0xd0] sm:$0x3f]  ;;  %v6974_v47 = vld [vmem:[%s9182_s24 + $0xd8] sm:$0x3f] }
 0x2fc   : >> { %v5903_v63 = vadd.f32 %v5899_v15, %v5875_v23  ;;  %v5904_v57 = vadd.f32 %v5900_v61, %v5876_v1  ;;  %v5905_v16 = vadd.f32 %v5901_v43, %v5877_v10  ;;  %v5906_v40 = vadd.f32 %v5902_v33, %v5878_v27  ;;  %v6982_v33 = vld [vmem:[%s9163_s13 + $0x56] sm:$0x3] }
 0x2fd   : >> { %v5948_v52 = vrot.slane %v6955_v0, %v9176_v17  ;;  %v5952_v55 = vrot.slane %v6955_v0, %v9178_v13  ;;  %v5976_v49 = vrot.slane %v6962_v35, %v9176_v17  ;;  %v5980_v56 = vrot.slane %v6962_v35, %v9178_v13  ;;  %v6989_v0 = vld [vmem:[%s9163_s13 + $0x58] sm:$0x3] }
 0x2fe   : >> { %v5931_v46 = vadd.f32 %v5927_v12, %v5903_v63  ;;  %v5932_v18 = vadd.f32 %v5928_v31, %v5904_v57  ;;  %v5933_v60 = vadd.f32 %v5929_v4, %v5905_v16  ;;  %v5934_v14 = vadd.f32 %v5930_v2, %v5906_v40  ;;  %v6978_v2 = vld [vmem:[%s9182_s24 + $0x340] sm:$0xff]  ;;  %v6980_v40 = vld [vmem:[%s9182_s24 + $0x350] sm:$0x3f] }
 0x2ff   : >> { %v5955_v19 = vmul.f32 %v6951_v50, %v5948_v52  ;;  %v5956_v53 = vmul.f32 %v6952_v36, %v5952_v55  ;;  %v5957_v34 = vmul.f32 %v6953_v3, %v5948_v52  ;;  %v5958_v5 = vmul.f32 %v6954_v11, %v5952_v55  ;;  %v6979_v50 = vld [vmem:[%s9182_s24 + $0x348] sm:$0xff]  ;;  %v6981_v3 = vld [vmem:[%s9182_s24 + $0x358] sm:$0x3f]  ;;  %v6985_v11 = vld [vmem:[%s9182_s24 + $0x5c0] sm:$0xff] }
 0x300   : >> { %v5983_v29 = vmul.f32 %v6958_v44, %v5976_v49  ;;  %v5984_v48 = vmul.f32 %v6959_v30, %v5980_v56  ;;  %v5985_v62 = vmul.f32 %v6960_v58, %v5976_v49  ;;  %v5986_v7 = vmul.f32 %v6961_v22, %v5980_v56  ;;  %v6986_v55 = vld [vmem:[%s9182_s24 + $0x5c8] sm:$0xff]  ;;  %v6987_v30 = vld [vmem:[%s9182_s24 + $0x5d0] sm:$0x3f]  ;;  %v6988_v58 = vld [vmem:[%s9182_s24 + $0x5d8] sm:$0x3f] }
 0x301   : >> { %v5959_v41 = vadd.f32 %v5955_v19, %v5931_v46  ;;  %v5960_v59 = vadd.f32 %v5956_v53, %v5932_v18  ;;  %v5961_v20 = vadd.f32 %v5957_v34, %v5933_v60  ;;  %v5962_v28 = vadd.f32 %v5958_v5, %v5934_v14  ;;  %v6996_v5 = vld [vmem:[%s9163_s13 + $0x5a] sm:$0x3] }
 0x302   : >> { %v6004_v54 = vrot.slane %v6969_v26, %v9176_v17  ;;  %v6008_v32 = vrot.slane %v6969_v26, %v9178_v13  ;;  %v6033_v51 = vrot.slane %v6975_v21, %v9176_v17  ;;  %v6037_v25 = vrot.slane %v6975_v21, %v9178_v13  ;;  %v7003_v26 = vld [vmem:[%s9163_s13 + $0x5c] sm:$0x3] }
 0x303   : >> { %v5987_v8 = vadd.f32 %v5983_v29, %v5959_v41  ;;  %v5988_v23 = vadd.f32 %v5984_v48, %v5960_v59  ;;  %v5989_v1 = vadd.f32 %v5985_v62, %v5961_v20  ;;  %v5990_v10 = vadd.f32 %v5986_v7, %v5962_v28  ;;  %v6992_v7 = vld [vmem:[%s9182_s24 + $0x840] sm:$0xff]  ;;  %v6994_v28 = vld [vmem:[%s9182_s24 + $0x850] sm:$0x3f] }
 0x304   : >> { %v6011_v27 = vmul.f32 %v6965_v45, %v6004_v54  ;;  %v6012_v15 = vmul.f32 %v6966_v42, %v6008_v32  ;;  %v6013_v61 = vmul.f32 %v6967_v6, %v6004_v54  ;;  %v6014_v43 = vmul.f32 %v6968_v9, %v6008_v32  ;;  %v6993_v45 = vld [vmem:[%s9182_s24 + $0x848] sm:$0xff]  ;;  %v6995_v6 = vld [vmem:[%s9182_s24 + $0x858] sm:$0x3f]  ;;  %v6999_v9 = vld [vmem:[%s9182_s24 + $0xac0] sm:$0xff] }
 0x305   : >> { %v6040_v35 = vmul.f32 %v6971_v39, %v6033_v51  ;;  %v6041_v12 = vmul.f32 %v6972_v24, %v6037_v25  ;;  %v6042_v31 = vmul.f32 %v6973_v38, %v6033_v51  ;;  %v6043_v4 = vmul.f32 %v6974_v47, %v6037_v25  ;;  %v7000_v32 = vld [vmem:[%s9182_s24 + $0xac8] sm:$0xff]  ;;  %v7001_v24 = vld [vmem:[%s9182_s24 + $0xad0] sm:$0x3f]  ;;  %v7002_v38 = vld [vmem:[%s9182_s24 + $0xad8] sm:$0x3f] }
 0x306   : >> { %v6015_v36 = vadd.f32 %v6011_v27, %v5987_v8  ;;  %v6016_v63 = vadd.f32 %v6012_v15, %v5988_v23  ;;  %v6017_v57 = vadd.f32 %v6013_v61, %v5989_v1  ;;  %v6018_v16 = vadd.f32 %v6014_v43, %v5990_v10  ;;  %v7010_v43 = vld [vmem:[%s9163_s13 + $0x5e] sm:$0x3] }
 0x307   : >> { %v6061_v44 = vrot.slane %v6982_v33, %v9176_v17  ;;  %v6065_v52 = vrot.slane %v6982_v33, %v9178_v13  ;;  %v6089_v22 = vrot.slane %v6989_v0, %v9176_v17  ;;  %v6093_v49 = vrot.slane %v6989_v0, %v9178_v13  ;;  %v7017_v33 = vld [vmem:[%s9163_s13 + $0x60] sm:$0x3] }
 0x308   : >> { %v6044_v56 = vadd.f32 %v6040_v35, %v6015_v36  ;;  %v6045_v46 = vadd.f32 %v6041_v12, %v6016_v63  ;;  %v6046_v18 = vadd.f32 %v6042_v31, %v6017_v57  ;;  %v6047_v60 = vadd.f32 %v6043_v4, %v6018_v16  ;;  %v7006_v4 = vld [vmem:[%s9182_s24 + $0xd40] sm:$0xff]  ;;  %v7008_v16 = vld [vmem:[%s9182_s24 + $0xd50] sm:$0x3f] }
 0x309   : >> { %v6068_v14 = vmul.f32 %v6978_v2, %v6061_v44  ;;  %v6069_v19 = vmul.f32 %v6979_v50, %v6065_v52  ;;  %v6070_v53 = vmul.f32 %v6980_v40, %v6061_v44  ;;  %v6071_v34 = vmul.f32 %v6981_v3, %v6065_v52  ;;  %v7007_v2 = vld [vmem:[%s9182_s24 + $0xd48] sm:$0xff]  ;;  %v7009_v40 = vld [vmem:[%s9182_s24 + $0xd58] sm:$0x3f]  ;;  %v7013_v3 = vld [vmem:[%s9182_s24 + $0xfc0] sm:$0xff] }
 0x30a   : >> { %v6096_v21 = vmul.f32 %v6985_v11, %v6089_v22  ;;  %v6097_v29 = vmul.f32 %v6986_v55, %v6093_v49  ;;  %v6098_v48 = vmul.f32 %v6987_v30, %v6089_v22  ;;  %v6099_v62 = vmul.f32 %v6988_v58, %v6093_v49  ;;  %v7014_v52 = vld [vmem:[%s9182_s24 + $0xfc8] sm:$0xff]  ;;  %v7015_v55 = vld [vmem:[%s9182_s24 + $0xfd0] sm:$0x3f]  ;;  %v7016_v30 = vld [vmem:[%s9182_s24 + $0xfd8] sm:$0x3f] }
 0x30b   : >> { %v6072_v42 = vadd.f32 %v6068_v14, %v6044_v56  ;;  %v6073_v41 = vadd.f32 %v6069_v19, %v6045_v46  ;;  %v6074_v59 = vadd.f32 %v6070_v53, %v6046_v18  ;;  %v6075_v20 = vadd.f32 %v6071_v34, %v6047_v60 }
 0x30c   : >> { %v6117_v39 = vrot.slane %v6996_v5, %v9176_v17  ;;  %v6121_v54 = vrot.slane %v6996_v5, %v9178_v13  ;;  %v6145_v47 = vrot.slane %v7003_v26, %v9176_v17  ;;  %v6149_v51 = vrot.slane %v7003_v26, %v9178_v13 }
 0x30d   : >> { %v6100_v25 = vadd.f32 %v6096_v21, %v6072_v42  ;;  %v6101_v8 = vadd.f32 %v6097_v29, %v6073_v41  ;;  %v6102_v23 = vadd.f32 %v6098_v48, %v6074_v59  ;;  %v6103_v1 = vadd.f32 %v6099_v62, %v6075_v20 }
 0x30e   : >> { %v6124_v10 = vmul.f32 %v6992_v7, %v6117_v39  ;;  %v6125_v27 = vmul.f32 %v6993_v45, %v6121_v54  ;;  %v6126_v15 = vmul.f32 %v6994_v28, %v6117_v39  ;;  %v6127_v61 = vmul.f32 %v6995_v6, %v6121_v54 }
 0x30f   : >> { %v6152_v0 = vmul.f32 %v6999_v9, %v6145_v47  ;;  %v6153_v35 = vmul.f32 %v7000_v32, %v6149_v51  ;;  %v6154_v12 = vmul.f32 %v7001_v24, %v6145_v47  ;;  %v6155_v31 = vmul.f32 %v7002_v38, %v6149_v51 }
 0x310   : >> { %v6128_v50 = vadd.f32 %v6124_v10, %v6100_v25  ;;  %v6129_v36 = vadd.f32 %v6125_v27, %v6101_v8  ;;  %v6130_v63 = vadd.f32 %v6126_v15, %v6102_v23  ;;  %v6131_v57 = vadd.f32 %v6127_v61, %v6103_v1 }
 0x311   : >> { %v6173_v11 = vrot.slane %v7010_v43, %v9176_v17  ;;  %v6177_v44 = vrot.slane %v7010_v43, %v9178_v13  ;;  %v6201_v58 = vrot.slane %v7017_v33, %v9176_v17  ;;  %v6205_v22 = vrot.slane %v7017_v33, %v9178_v13 }
 0x312   : >> { %v6156_v49 = vadd.f32 %v6152_v0, %v6128_v50  ;;  %v6157_v56 = vadd.f32 %v6153_v35, %v6129_v36  ;;  %v6158_v46 = vadd.f32 %v6154_v12, %v6130_v63  ;;  %v6159_v18 = vadd.f32 %v6155_v31, %v6131_v57 }
 0x313   : >> { %v6180_v60 = vmul.f32 %v7006_v4, %v6173_v11  ;;  %v6181_v14 = vmul.f32 %v7007_v2, %v6177_v44  ;;  %v6182_v19 = vmul.f32 %v7008_v16, %v6173_v11  ;;  %v6183_v53 = vmul.f32 %v7009_v40, %v6177_v44 }
 0x314   : >> { %v6208_v34 = vmul.f32 %v7013_v3, %v6201_v58  ;;  %v6209_v5 = vmul.f32 %v7014_v52, %v6205_v22  ;;  %v6210_v26 = vmul.f32 %v7015_v55, %v6201_v58  ;;  %v6211_v21 = vmul.f32 %v7016_v30, %v6205_v22 }
 0x315   : >> { %v6184_v29 = vadd.f32 %v6180_v60, %v6156_v49  ;;  %v6185_v48 = vadd.f32 %v6181_v14, %v6157_v56  ;;  %v6186_v62 = vadd.f32 %v6182_v19, %v6158_v46  ;;  %v6187_v17 = vadd.f32 %v6183_v53, %v6159_v18 }
 0x316   : > { %4826 = sbr.rel (!%p4824_p12) target bundleno = 662 (0x296), region = 312 }
 0x317   : >> { %v6212_v13 = vadd.f32 %v6208_v34, %v6184_v29  ;;  %v6213_v7 = vadd.f32 %v6209_v5, %v6185_v48  ;;  %v6214_v45 = vadd.f32 %v6210_v26, %v6186_v62  ;;  %v6215_v42 = vadd.f32 %v6211_v21, %v6187_v17 }
 0x319   : >> { %6218 = vst [vmem:[%s6217_s27] sm:$0xff] %v6212_v13  ;;  %6219 = vst [vmem:[%s6217_s27 + $0x8] sm:$0xff] %v6213_v7 }
 0x31a   : >> { %6220 = vst [vmem:[%s6217_s27 + $0x10] sm:$0x3f] %v6214_v45  ;;  %6221 = vst [vmem:[%s6217_s27 + $0x18] sm:$0x3f] %v6215_v42 }
 0x31b   : > { %6228 = sbr.rel (!%p7240_p6) target bundleno = 831 (0x33f), region = 134  ;;  %s7069_s28 = sshll.u32 (%p7240_p6), %s7161_s17, 4 }
 0x31c   : > { %s9544_s30 = scalar_lea.vmem (%p7240_p6), %s9674_s4, %s7069_s28 }
 0x321   : > { %v6246_v41 = vld [vmem:[%s9166_s14] sm:$0xff]  ;;  %v6248_v59 = vld [vmem:[%s9166_s14 + $0x8] sm:$0xff]  ;;  %v6250_v20 = vld [vmem:[%s9166_s14 + $0x10] sm:$0xff] }
 0x322   : > { %v6252_v37 = vld [vmem:[%s9166_s14 + $0x18] sm:$0xff]  ;;  %v6254_v28 = vld [vmem:[%s9166_s14 + $0x20] sm:$0xff]  ;;  %v6256_v6 = vld [vmem:[%s9166_s14 + $0x28] sm:$0xff]  ;;  %6247 = vst [vmem:[%s9544_s30] sm:$0xff] %v6246_v41 }
 0x323   : > { %6249 = vst [vmem:[%s9544_s30 + $0x8] sm:$0xff] %v6248_v59  ;;  %6251 = vst [vmem:[%s9544_s30 + $0x20] sm:$0xff] %v6250_v20  ;;  %v6258_v9 = vld [vmem:[%s9166_s14 + $0x30] sm:$0xff]  ;;  %v6260_v39 = vld [vmem:[%s9166_s14 + $0x38] sm:$0xff] }
 0x324   : > { %6253 = vst [vmem:[%s9544_s30 + $0x28] sm:$0xff] %v6252_v37  ;;  %6255 = vst [vmem:[%s9544_s30 + $0x40] sm:$0xff] %v6254_v28  ;;  %v6262_v54 = vld [vmem:[%s9166_s14 + $0x40] sm:$0xff]  ;;  %v6264_v32 = vld [vmem:[%s9166_s14 + $0x48] sm:$0xff] }
 0x325   : > { %6257 = vst [vmem:[%s9544_s30 + $0x48] sm:$0xff] %v6256_v6  ;;  %6259 = vst [vmem:[%s9544_s30 + $0x60] sm:$0xff] %v6258_v9  ;;  %v6266_v24 = vld [vmem:[%s9166_s14 + $0x50] sm:$0xff]  ;;  %v6268_v38 = vld [vmem:[%s9166_s14 + $0x58] sm:$0xff] }
 0x326   : > { %6261 = vst [vmem:[%s9544_s30 + $0x68] sm:$0xff] %v6260_v39  ;;  %6263 = vst [vmem:[%s9544_s30 + $0x80] sm:$0xff] %v6262_v54  ;;  %v6270_v47 = vld [vmem:[%s9166_s14 + $0x60] sm:$0xff]  ;;  %v6272_v51 = vld [vmem:[%s9166_s14 + $0x68] sm:$0xff] }
 0x327   : > { %6265 = vst [vmem:[%s9544_s30 + $0x88] sm:$0xff] %v6264_v32  ;;  %6267 = vst [vmem:[%s9544_s30 + $0xa0] sm:$0xff] %v6266_v24  ;;  %v6274_v25 = vld [vmem:[%s9166_s14 + $0x70] sm:$0xff]  ;;  %v6276_v8 = vld [vmem:[%s9166_s14 + $0x78] sm:$0xff] }
 0x328   : > { %6269 = vst [vmem:[%s9544_s30 + $0xa8] sm:$0xff] %v6268_v38  ;;  %6271 = vst [vmem:[%s9544_s30 + $0xc0] sm:$0xff] %v6270_v47  ;;  %v6278_v23 = vld [vmem:[%s9166_s14 + $0x80] sm:$0xff]  ;;  %v6280_v1 = vld [vmem:[%s9166_s14 + $0x88] sm:$0xff] }
 0x329   : > { %6273 = vst [vmem:[%s9544_s30 + $0xc8] sm:$0xff] %v6272_v51  ;;  %6275 = vst [vmem:[%s9544_s30 + $0xe0] sm:$0xff] %v6274_v25  ;;  %v6282_v10 = vld [vmem:[%s9166_s14 + $0x90] sm:$0xff]  ;;  %v6284_v27 = vld [vmem:[%s9166_s14 + $0x98] sm:$0xff] }
 0x32a   : > { %6277 = vst [vmem:[%s9544_s30 + $0xe8] sm:$0xff] %v6276_v8  ;;  %6279 = vst [vmem:[%s9544_s30 + $0x100] sm:$0xff] %v6278_v23  ;;  %v6286_v15 = vld [vmem:[%s9166_s14 + $0xa0] sm:$0xff]  ;;  %v6288_v61 = vld [vmem:[%s9166_s14 + $0xa8] sm:$0xff] }
 0x32b   : > { %6281 = vst [vmem:[%s9544_s30 + $0x108] sm:$0xff] %v6280_v1  ;;  %6283 = vst [vmem:[%s9544_s30 + $0x120] sm:$0xff] %v6282_v10  ;;  %v6290_v43 = vld [vmem:[%s9166_s14 + $0xb0] sm:$0xff]  ;;  %v6292_v33 = vld [vmem:[%s9166_s14 + $0xb8] sm:$0xff] }
 0x32c   : > { %6285 = vst [vmem:[%s9544_s30 + $0x128] sm:$0xff] %v6284_v27  ;;  %6287 = vst [vmem:[%s9544_s30 + $0x140] sm:$0xff] %v6286_v15  ;;  %v6294_v0 = vld [vmem:[%s9166_s14 + $0xc0] sm:$0xff]  ;;  %v6296_v35 = vld [vmem:[%s9166_s14 + $0xc8] sm:$0xff] }
 0x32d   : > { %6289 = vst [vmem:[%s9544_s30 + $0x148] sm:$0xff] %v6288_v61  ;;  %6291 = vst [vmem:[%s9544_s30 + $0x160] sm:$0xff] %v6290_v43  ;;  %v6298_v12 = vld [vmem:[%s9166_s14 + $0xd0] sm:$0xff]  ;;  %v6300_v31 = vld [vmem:[%s9166_s14 + $0xd8] sm:$0xff] }
 0x32e   : > { %6293 = vst [vmem:[%s9544_s30 + $0x168] sm:$0xff] %v6292_v33  ;;  %6295 = vst [vmem:[%s9544_s30 + $0x180] sm:$0xff] %v6294_v0  ;;  %v6302_v4 = vld [vmem:[%s9166_s14 + $0xe0] sm:$0xff]  ;;  %v6304_v2 = vld [vmem:[%s9166_s14 + $0xe8] sm:$0xff] }
 0x32f   : > { %6297 = vst [vmem:[%s9544_s30 + $0x188] sm:$0xff] %v6296_v35  ;;  %6299 = vst [vmem:[%s9544_s30 + $0x1a0] sm:$0xff] %v6298_v12  ;;  %v6306_v50 = vld [vmem:[%s9166_s14 + $0xf0] sm:$0xff]  ;;  %v6308_v36 = vld [vmem:[%s9166_s14 + $0xf8] sm:$0xff] }
 0x330   : > { %6301 = vst [vmem:[%s9544_s30 + $0x1a8] sm:$0xff] %v6300_v31  ;;  %6303 = vst [vmem:[%s9544_s30 + $0x1c0] sm:$0xff] %v6302_v4  ;;  %v6310_v63 = vld [vmem:[%s9166_s14 + $0x100] sm:$0xff]  ;;  %v6312_v57 = vld [vmem:[%s9166_s14 + $0x108] sm:$0xff] }
 0x331   : > { %6305 = vst [vmem:[%s9544_s30 + $0x1c8] sm:$0xff] %v6304_v2  ;;  %6307 = vst [vmem:[%s9544_s30 + $0x1e0] sm:$0xff] %v6306_v50  ;;  %v6314_v16 = vld [vmem:[%s9166_s14 + $0x110] sm:$0xff]  ;;  %v6316_v40 = vld [vmem:[%s9166_s14 + $0x118] sm:$0xff] }
 0x332   : > { %6309 = vst [vmem:[%s9544_s30 + $0x1e8] sm:$0xff] %v6308_v36  ;;  %6311 = vst [vmem:[%s9544_s30 + $0x200] sm:$0xff] %v6310_v63  ;;  %v6318_v3 = vld [vmem:[%s9166_s14 + $0x120] sm:$0xff]  ;;  %v6320_v11 = vld [vmem:[%s9166_s14 + $0x128] sm:$0xff] }
 0x333   : > { %6313 = vst [vmem:[%s9544_s30 + $0x208] sm:$0xff] %v6312_v57  ;;  %6315 = vst [vmem:[%s9544_s30 + $0x220] sm:$0xff] %v6314_v16  ;;  %v6322_v44 = vld [vmem:[%s9166_s14 + $0x130] sm:$0xff]  ;;  %v6324_v52 = vld [vmem:[%s9166_s14 + $0x138] sm:$0xff] }
 0x334   : > { %6317 = vst [vmem:[%s9544_s30 + $0x228] sm:$0xff] %v6316_v40  ;;  %6319 = vst [vmem:[%s9544_s30 + $0x240] sm:$0xff] %v6318_v3  ;;  %v6326_v55 = vld [vmem:[%s9166_s14 + $0x140] sm:$0xff]  ;;  %v6328_v30 = vld [vmem:[%s9166_s14 + $0x148] sm:$0xff] }
 0x335   : > { %6321 = vst [vmem:[%s9544_s30 + $0x248] sm:$0xff] %v6320_v11  ;;  %6323 = vst [vmem:[%s9544_s30 + $0x260] sm:$0xff] %v6322_v44  ;;  %v6330_v58 = vld [vmem:[%s9166_s14 + $0x150] sm:$0xff]  ;;  %v6332_v22 = vld [vmem:[%s9166_s14 + $0x158] sm:$0xff] }
 0x336   : > { %6325 = vst [vmem:[%s9544_s30 + $0x268] sm:$0xff] %v6324_v52  ;;  %6327 = vst [vmem:[%s9544_s30 + $0x280] sm:$0xff] %v6326_v55  ;;  %v6334_v49 = vld [vmem:[%s9166_s14 + $0x160] sm:$0xff]  ;;  %v6336_v56 = vld [vmem:[%s9166_s14 + $0x168] sm:$0xff] }
 0x337   : > { %6329 = vst [vmem:[%s9544_s30 + $0x288] sm:$0xff] %v6328_v30  ;;  %6331 = vst [vmem:[%s9544_s30 + $0x2a0] sm:$0xff] %v6330_v58  ;;  %v6338_v46 = vld [vmem:[%s9166_s14 + $0x170] sm:$0xff]  ;;  %v6340_v18 = vld [vmem:[%s9166_s14 + $0x178] sm:$0xff] }
 0x338   : > { %6333 = vst [vmem:[%s9544_s30 + $0x2a8] sm:$0xff] %v6332_v22  ;;  %6335 = vst [vmem:[%s9544_s30 + $0x2c0] sm:$0xff] %v6334_v49  ;;  %v6342_v60 = vld [vmem:[%s9166_s14 + $0x180] sm:$0xff]  ;;  %v6344_v14 = vld [vmem:[%s9166_s14 + $0x188] sm:$0xff] }
 0x339   : > { %6337 = vst [vmem:[%s9544_s30 + $0x2c8] sm:$0xff] %v6336_v56  ;;  %6339 = vst [vmem:[%s9544_s30 + $0x2e0] sm:$0xff] %v6338_v46  ;;  %v6346_v19 = vld [vmem:[%s9166_s14 + $0x190] sm:$0xff]  ;;  %v6348_v53 = vld [vmem:[%s9166_s14 + $0x198] sm:$0xff] }
 0x33a   : > { %6341 = vst [vmem:[%s9544_s30 + $0x2e8] sm:$0xff] %v6340_v18  ;;  %6343 = vst [vmem:[%s9544_s30 + $0x300] sm:$0xff] %v6342_v60  ;;  %v6350_v34 = vld [vmem:[%s9166_s14 + $0x1a0] sm:$0xff]  ;;  %v6352_v5 = vld [vmem:[%s9166_s14 + $0x1a8] sm:$0xff] }
 0x33b   : > { %6345 = vst [vmem:[%s9544_s30 + $0x308] sm:$0xff] %v6344_v14  ;;  %6347 = vst [vmem:[%s9544_s30 + $0x320] sm:$0xff] %v6346_v19  ;;  %v6354_v26 = vld [vmem:[%s9166_s14 + $0x1b0] sm:$0xff]  ;;  %v6356_v21 = vld [vmem:[%s9166_s14 + $0x1b8] sm:$0xff] }
 0x33c   : > { %6349 = vst [vmem:[%s9544_s30 + $0x328] sm:$0xff] %v6348_v53  ;;  %6351 = vst [vmem:[%s9544_s30 + $0x340] sm:$0xff] %v6350_v34 }
 0x33d   : > { %6353 = vst [vmem:[%s9544_s30 + $0x348] sm:$0xff] %v6352_v5  ;;  %6355 = vst [vmem:[%s9544_s30 + $0x360] sm:$0xff] %v6354_v26 }
 0x33e   : > { %6357 = vst [vmem:[%s9544_s30 + $0x368] sm:$0xff] %v6356_v21 }
 0x33f PF: > { %s14_s19 = sadd.s32 1, %s7169_s19   ;;  %s9895_s15 = smov %s7157_s16 }
 0x340   : > { %p11_p13 = scmp.ge.s32.totalorder %s14_s19, 4   ;;  %s9896_s16 = smov %s7245_s26 }
 0x341   : > { %s9897_s17 = smov %s7165_s18  ;;  %s9898_s18 = smov %s9900_s20 }
 0x342   :  { %13 = sbr.rel (!%p11_p13) target bundleno = 3 (0x3), region = 323 }

</bundles_post_ra>
